<compile_context>
chip_gen: v7x
topology: tpu7x:2x2x1
jax: 0.10.0
libtpu: 0.0.40
codegen_flags: <defaults>
</compile_context>

<pallas_src>
import functools

import jax
import jax.numpy as jnp
import numpy as np
from jax.experimental import pallas as pl
from jax.experimental.pallas import tpu as pltpu


# --------------------------------------------------------------------------
# Pallas kernels
# --------------------------------------------------------------------------
def _conv_relu_hwin_kernel(x_ref, w_ref, b_ref, o_ref, *, nb):
    """Banded conv + bias + ReLU + sliding 3-row max (row-pool numerator).

    x_ref : (1, Hin*nb, K)    bf16  nb images interleaved: row = h*nb + j
    w_ref : (3, K, WCpad)     bf16  banded conv weights, one block per dh
    b_ref : (1, WCpad)        f32   bias tiled over W positions (lane-padded)
    o_ref : (1, (Hc-2)*nb, WCpad) bf16  max over conv rows (oh, oh+1, oh+2)
    """
    rows_in = x_ref.shape[1]
    m = rows_in - 2 * nb                      # conv output rows (interleaved)
    wc = w_ref.shape[2]

    acc = jnp.zeros((m, wc), jnp.float32)
    for dh in range(3):                       # dh band slices are contiguous rows
        acc = acc + jnp.dot(x_ref[0, dh * nb:dh * nb + m, :], w_ref[dh],
                            preferred_element_type=jnp.float32)
    acc = jnp.maximum(acc + b_ref[...], 0.0)

    # sliding 3-row maximum along H (vectorized; stride-2 pick happens in the
    # same XLA fusion that does the tiny W pool / conv2 pad afterwards)
    mwin = m - 2 * nb
    win = jnp.maximum(jnp.maximum(acc[0:mwin, :], acc[nb:nb + mwin, :]),
                      acc[2 * nb:2 * nb + mwin, :])
    o_ref[0, :, :] = win.astype(o_ref.dtype)


def _tail_kernel(feat_ref, dat_ref, mask_ref, fcw_ref, fcb_ref,
                 wxi_ref, wxd_ref, whh_ref, bg_ref, cw_ref, cb_ref,
                 y_ref, h_ref):
    """pic_linear + hstack(datas) + masked LSTM-style recurrence + classifier.

    feat_ref: (T*B, 1152) bf16   flattened pool2 features, time-major rows
    dat_ref : (T*B, IN)   bf16   datas, time-major rows
    mask_ref: (T, B, 1)   f32    1.0 while t < data_lens[b]
    Gate weights fused on lanes, column order [f | i | c | o] (4H = 128).
    """
    B, H = h_ref.shape
    T = mask_ref.shape[0]

    # pic_linear: Dropout (inference => identity) + Linear + ReLU
    f = jnp.dot(feat_ref[...], fcw_ref[...], preferred_element_type=jnp.float32)
    f = jnp.maximum(f + fcb_ref[...], 0.0).astype(jnp.bfloat16)      # (TB, 16)
    d = dat_ref[...]                                                 # (TB, IN)

    # hoisted, fused input projection for all gates and all timesteps
    pre = (jnp.dot(f, wxi_ref[...], preferred_element_type=jnp.float32)
           + jnp.dot(d, wxd_ref[...], preferred_element_type=jnp.float32)
           + bg_ref[...])                                            # (TB, 4H)

    h = jnp.zeros((B, H), jnp.float32)
    c = jnp.zeros((B, H), jnp.float32)
    for t in range(T):                        # T is tiny -> fully unrolled
        g = pre[t * B:(t + 1) * B, :] + jnp.dot(
            h.astype(jnp.bfloat16), whh_ref[...],
            preferred_element_type=jnp.float32)                      # (B, 4H)
        f_t = jax.nn.sigmoid(g[:, 0:H])
        i_t = jax.nn.sigmoid(g[:, H:2 * H])
        c_hat = jnp.tanh(g[:, 2 * H:3 * H])
        o_t = jax.nn.sigmoid(g[:, 3 * H:4 * H])
        c_new = f_t * c + i_t * c_hat
        h_new = o_t * jnp.tanh(c_new)
        m = mask_ref[t]                        # (B, 1): pack_padded equivalence
        c = m * c_new + (1.0 - m) * c
        h = m * h_new + (1.0 - m) * h

    y_ref[...] = (jnp.dot(h.astype(jnp.bfloat16), cw_ref[...],
                          preferred_element_type=jnp.float32) + cb_ref[...])
    h_ref[...] = h


# --------------------------------------------------------------------------
# Pallas wrappers
# --------------------------------------------------------------------------
def conv_relu_hwin(x, wband, bias_t, *, nb):
    """x: (G, Hin*nb, K) bf16 -> (G, (Hin-4)*nb, WCpad) bf16."""
    G, rows_in, K = x.shape
    wc = wband.shape[2]
    out_rows = rows_in - 4 * nb
    kern = functools.partial(_conv_relu_hwin_kernel, nb=nb)
    return pl.pallas_call(
        kern,
        out_shape=jax.ShapeDtypeStruct((G, out_rows, wc), jnp.bfloat16),
        grid=(G,),
        in_specs=[pl.BlockSpec((1, rows_in, K), lambda n: (n, 0, 0)),
                  pl.BlockSpec(wband.shape, lambda n: (0, 0, 0)),
                  pl.BlockSpec((1, wc), lambda n: (0, 0))],
        out_specs=pl.BlockSpec((1, out_rows, wc), lambda n: (n, 0, 0)),
        compiler_params=pltpu.CompilerParams(
            dimension_semantics=("parallel",),
            vmem_limit_bytes=32 * 1024 * 1024),
    )(x, wband, bias_t)


def tail_fused(feat, dat, mask, fcw, fcb, wx_img, wx_dat, w_hh, b_g, cw, cb):
    TB, F = feat.shape
    T, B, _ = mask.shape
    IN = dat.shape[1]
    H = w_hh.shape[0]
    G4 = w_hh.shape[1]
    OUT = cw.shape[1]
    return pl.pallas_call(
        _tail_kernel,
        out_shape=(jax.ShapeDtypeStruct((B, OUT), jnp.float32),
                   jax.ShapeDtypeStruct((B, H), jnp.float32)),
        grid=(1,),
        in_specs=[pl.BlockSpec((TB, F), lambda i: (0, 0)),
                  pl.BlockSpec((TB, IN), lambda i: (0, 0)),
                  pl.BlockSpec((T, B, 1), lambda i: (0, 0, 0)),
                  pl.BlockSpec((F, 16), lambda i: (0, 0)),
                  pl.BlockSpec((1, 16), lambda i: (0, 0)),
                  pl.BlockSpec((16, G4), lambda i: (0, 0)),
                  pl.BlockSpec((IN, G4), lambda i: (0, 0)),
                  pl.BlockSpec((H, G4), lambda i: (0, 0)),
                  pl.BlockSpec((1, G4), lambda i: (0, 0)),
                  pl.BlockSpec((H, OUT), lambda i: (0, 0)),
                  pl.BlockSpec((1, OUT), lambda i: (0, 0))],
        out_specs=(pl.BlockSpec((B, OUT), lambda i: (0, 0)),
                   pl.BlockSpec((B, H), lambda i: (0, 0))),
        compiler_params=pltpu.CompilerParams(
            dimension_semantics=("arbitrary",)),
    )(feat, dat, mask, fcw, fcb, wx_img, wx_dat, w_hh, b_g, cw, cb)


# --------------------------------------------------------------------------
# Parameters (deterministic synthetic init, pre-packed for the kernels)
# --------------------------------------------------------------------------
def init_params(key, input_size, hidden_size, output_size):
    D = input_size + 16          # matches self.input_size = input_size + 16
    ks = jax.random.split(key, 16)

    def u(k, shape, fan_in):
        bound = 1.0 / np.sqrt(fan_in)
        return jax.random.uniform(k, shape, jnp.float32, -bound, bound)

    # conv weights in (kh, kw, cin, cout) layout
    w1 = u(ks[0], (11, 11, 3, 16), 3 * 11 * 11)
    b1 = u(ks[1], (16,), 3 * 11 * 11)
    w2 = u(ks[2], (3, 3, 16, 32), 16 * 3 * 3)
    b2 = u(ks[3], (32,), 16 * 3 * 3)

    # ---- conv1 -> 4x4 space-to-depth banded form, output lanes 432 -> 512 ----
    w1p = jnp.pad(w1, ((0, 1), (0, 1), (0, 0), (0, 0)))          # kernel 11 -> 12
    w1s = (w1p.reshape(3, 4, 3, 4, 3, 16).transpose(0, 2, 1, 3, 4, 5)
           .reshape(3, 3, 48, 16))                                # (dh, dw, k, co)
    ind1 = np.zeros((3, 29, 27), np.float32)
    for dw in range(3):
        for ow in range(27):
            ind1[dw, ow + dw, ow] = 1.0
    w1band = jnp.einsum('dwo,hdkx->hwkox', jnp.asarray(ind1), w1s)
    w1band = w1band.reshape(3, 29 * 48, 27 * 16)
    w1band = jnp.pad(w1band, ((0, 0), (0, 0), (0, 512 - 432))).astype(jnp.bfloat16)
    b1t = jnp.pad(jnp.tile(b1, 27), (0, 512 - 432)).reshape(1, 512)

    # ---- conv2 banded form (input W padded to 16 cols -> K=256), 416 -> 512 ----
    ind2 = np.zeros((3, 16, 13), np.float32)
    for dw in range(3):
        for ow in range(13):
            ind2[dw, ow + dw, ow] = 1.0
    w2band = jnp.einsum('dwo,hdkx->hwkox', jnp.asarray(ind2), w2)
    w2band = w2band.reshape(3, 16 * 16, 13 * 32)
    w2band = jnp.pad(w2band, ((0, 0), (0, 0), (0, 512 - 416))).astype(jnp.bfloat16)
    b2t = jnp.pad(jnp.tile(b2, 13), (0, 512 - 416)).reshape(1, 512)

    # pic_linear: Linear(32*6*6, 16); torch flattens CHW, we flatten HWC.
    fc_w_chw = u(ks[4], (32 * 6 * 6, 16), 32 * 6 * 6)
    fc_b = u(ks[5], (16,), 32 * 6 * 6)
    perm = np.arange(32 * 6 * 6).reshape(32, 6, 6).transpose(1, 2, 0).reshape(-1)
    fc_w = fc_w_chw[perm].astype(jnp.bfloat16)

    # four LSTM-style gate Linears fused on lanes, column order [f | i | c | o];
    # row layout of each gate: [img_feat(16) | datas(input_size) | hidden]
    wx_img, wx_dat, w_hh, b_g = [], [], [], []
    for g in range(4):
        wg = u(ks[6 + g], (D + hidden_size, hidden_size), D + hidden_size)
        bgv = u(ks[10 + g], (hidden_size,), D + hidden_size)
        wx_img.append(wg[:16])
        wx_dat.append(wg[16:16 + input_size])
        w_hh.append(wg[16 + input_size:])
        b_g.append(bgv)
    # TODO(synk): h_gate exists in __init__ but is unused in forward; omitted.

    return {
        'w1band': w1band, 'b1t': b1t,
        'w2band': w2band, 'b2t': b2t,
        'fc_w': fc_w, 'fc_b': fc_b.reshape(1, 16),
        'wx_img': jnp.concatenate(wx_img, axis=1).astype(jnp.bfloat16),
        'wx_dat': jnp.concatenate(wx_dat, axis=1).astype(jnp.bfloat16),
        'w_hh': jnp.concatenate(w_hh, axis=1).astype(jnp.bfloat16),
        'b_g': jnp.concatenate(b_g, axis=0).reshape(1, 4 * hidden_size),
        'cls_w': u(ks[14], (hidden_size, output_size),
                   hidden_size).astype(jnp.bfloat16),
        'cls_b': u(ks[15], (output_size,), hidden_size).reshape(1, output_size),
    }


# --------------------------------------------------------------------------
# Forward pass (isBidirectional=False branch)
# --------------------------------------------------------------------------
@jax.jit
def tomato_forward(params, datas, img, data_lens):
    B, T, Cin, Himg, Wimg = img.shape
    N = B * T
    NB = 3 if N % 3 == 0 else (2 if N % 2 == 0 else 1)   # images per grid step
    G = N // NB

    # image prep: NCHW -> NHWC, time-major, pad 115->116, 4x4 space-to-depth
    x = img.transpose(1, 0, 3, 4, 2).reshape(N, Himg, Wimg, Cin)
    x = jnp.pad(x, ((0, 0), (0, 1), (0, 1), (0, 0)))
    Hs = (Himg + 1) // 4                                             # 29
    x = x.reshape(N, Hs, 4, Hs, 4, Cin).transpose(0, 1, 3, 2, 4, 5)
    x = x.reshape(N, Hs, Hs * 16 * Cin)                              # (N,29,1392)
    # interleave NB images per grid step: row = h*NB + j
    x = x.reshape(G, NB, Hs, -1).transpose(0, 2, 1, 3).reshape(G, Hs * NB, -1)
    x = x.astype(jnp.bfloat16)                                       # (G,87,1392)

    # stage 1: Conv2d(3,16,11,4) + ReLU + MaxPool(3,2)   (H-window fused in kernel)
    o1 = conv_relu_hwin(x, params['w1band'], params['b1t'], nb=NB)   # (G,75,512)
    z1 = o1[:, :, :27 * 16].reshape(G, Hs - 4, NB, 27, 16)[:, 0:2 * 13 - 1:2]
    p1 = jnp.maximum(jnp.maximum(z1[:, :, :, 0:25:2, :], z1[:, :, :, 1:26:2, :]),
                     z1[:, :, :, 2:27:2, :])                         # (G,13,NB,13,16)
    p1 = jnp.pad(p1, ((0, 0), (1, 1), (0, 0), (1, 2), (0, 0)))       # conv2 pad + lane align
    x2 = p1.reshape(G, 15 * NB, 16 * 16)                             # (G,45,256)

    # stage 2: Conv2d(16,32,3,1,p=1) + ReLU + MaxPool(3,2)
    o2 = conv_relu_hwin(x2, params['w2band'], params['b2t'], nb=NB)  # (G,33,512)
    z2 = o2[:, :, :13 * 32].reshape(G, 11, NB, 13, 32)[:, 0:11:2]    # (G,6,NB,13,32)
    p2 = jnp.maximum(jnp.maximum(z2[..., 0:11:2, :], z2[..., 1:12:2, :]),
                     z2[..., 2:13:2, :])                             # (G,6,NB,6,32)
    feat = p2.transpose(0, 2, 1, 3, 4).reshape(N, 6 * 6 * 32)        # (N,1152) bf16

    # tail: pic_linear + hstack(datas) + masked recurrence + classifier
    # TODO(synk): nn.Dropout is identity at inference time.
    dat = datas.transpose(1, 0, 2).reshape(N, -1).astype(jnp.bfloat16)
    mask = (jnp.arange(T)[:, None] < data_lens[None, :].astype(jnp.int32)
            ).astype(jnp.float32)[:, :, None]                        # (T,B,1)
    y, hidden = tail_fused(feat, dat, mask, params['fc_w'], params['fc_b'],
                           params['wx_img'], params['wx_dat'], params['w_hh'],
                           params['b_g'], params['cls_w'], params['cls_b'])
    return y, hidden


# --------------------------------------------------------------------------
if __name__ == "__main__":
    key = jax.random.PRNGKey(0)
    B, T = 2, 3
    INPUT_SIZE, HIDDEN, OUT = 8, 32, 4
    IMG = 115   # smallest AlexNet-style size giving the required 6x6 feature map

    k_img, k_dat, k_par = jax.random.split(key, 3)
    img = jax.random.normal(k_img, (B, T, 3, IMG, IMG), jnp.float32)
    datas = jax.random.normal(k_dat, (B, T, INPUT_SIZE), jnp.float32)
    data_lens = jnp.array([3, 2], jnp.int32)

    params = init_params(k_par, INPUT_SIZE, HIDDEN, OUT)

    y, hidden = tomato_forward(params, datas, img, data_lens)
    jax.block_until_ready((y, hidden))
    assert y.shape == (B, OUT) and hidden.shape == (B, HIDDEN)
    assert bool(jnp.all(jnp.isfinite(y))) and bool(jnp.all(jnp.isfinite(hidden)))
    print("KERNEL_OK")
</pallas_src>

<mosaic_0001>
module attributes {stable_mosaic.version = 11 : i64} {
  func.func @_conv_relu_hwin_kernel(%arg0: i32, %arg1: memref<1x87x1392xbf16, #tpu.memory_space<vmem>>, %arg2: memref<3x1392x512xbf16, #tpu.memory_space<vmem>>, %arg3: memref<1x512xf32, #tpu.memory_space<vmem>>, %arg4: memref<1x75x512xbf16, #tpu.memory_space<vmem>>) attributes {dimension_semantics = [#tpu.dimension_semantics<parallel>], iteration_bounds = array<i64: 2>, scalar_prefetch = 0 : i64, scratch_operands = 0 : i64, tpu.core_type = #tpu.core_type<tc>, window_params = [{transform_indices = @transform_0, window_bounds = array<i64: 1, 87, 1392>}, {pipeline_mode = #tpu.pipeline_mode<synchronous>, transform_indices = @transform_1, window_bounds = array<i64: 3, 1392, 512>}, {pipeline_mode = #tpu.pipeline_mode<synchronous>, transform_indices = @transform_2, window_bounds = array<i64: 1, 512>}, {transform_indices = @transform_3, window_bounds = array<i64: 1, 75, 512>}]} {
    %cst = arith.constant 0.000000e+00 : f32
    %0 = vector.broadcast %cst : f32 to vector<81x512xf32>
    %c0 = arith.constant 0 : index
    %c0_0 = arith.constant 0 : index
    %c0_1 = arith.constant 0 : index
    %1 = vector.load %arg1[%c0, %c0_0, %c0_1] : memref<1x87x1392xbf16, #tpu.memory_space<vmem>>, vector<1x81x1392xbf16>
    %2 = vector.shape_cast %1 : vector<1x81x1392xbf16> to vector<81x1392xbf16>
    %c0_2 = arith.constant 0 : index
    %c0_3 = arith.constant 0 : index
    %c0_4 = arith.constant 0 : index
    %3 = vector.load %arg2[%c0_2, %c0_3, %c0_4] : memref<3x1392x512xbf16, #tpu.memory_space<vmem>>, vector<1x1392x512xbf16>
    %4 = vector.shape_cast %3 : vector<1x1392x512xbf16> to vector<1392x512xbf16>
    %cst_5 = arith.constant dense<0.000000e+00> : vector<81x512xf32>
    %5 = tpu.matmul %2, %4, %cst_5 {dimension_numbers = #tpu.dot_dimension_numbers<[1], [0], [0], [1], [0, 0, 1, 1], [], []>} : vector<81x1392xbf16>, vector<1392x512xbf16>, vector<81x512xf32> -> vector<81x512xf32>
    %6 = arith.addf %0, %5 : vector<81x512xf32>
    %c0_6 = arith.constant 0 : index
    %c3 = arith.constant 3 : index
    %c0_7 = arith.constant 0 : index
    %7 = vector.load %arg1[%c0_6, %c3, %c0_7] : memref<1x87x1392xbf16, #tpu.memory_space<vmem>>, vector<1x81x1392xbf16>
    %8 = vector.shape_cast %7 : vector<1x81x1392xbf16> to vector<81x1392xbf16>
    %c1 = arith.constant 1 : index
    %c0_8 = arith.constant 0 : index
    %c0_9 = arith.constant 0 : index
    %9 = vector.load %arg2[%c1, %c0_8, %c0_9] : memref<3x1392x512xbf16, #tpu.memory_space<vmem>>, vector<1x1392x512xbf16>
    %10 = vector.shape_cast %9 : vector<1x1392x512xbf16> to vector<1392x512xbf16>
    %cst_10 = arith.constant dense<0.000000e+00> : vector<81x512xf32>
    %11 = tpu.matmul %8, %10, %cst_10 {dimension_numbers = #tpu.dot_dimension_numbers<[1], [0], [0], [1], [0, 0, 1, 1], [], []>} : vector<81x1392xbf16>, vector<1392x512xbf16>, vector<81x512xf32> -> vector<81x512xf32>
    %12 = arith.addf %6, %11 : vector<81x512xf32>
    %c0_11 = arith.constant 0 : index
    %c6 = arith.constant 6 : index
    %c0_12 = arith.constant 0 : index
    %13 = vector.load %arg1[%c0_11, %c6, %c0_12] : memref<1x87x1392xbf16, #tpu.memory_space<vmem>>, vector<1x81x1392xbf16>
    %14 = vector.shape_cast %13 : vector<1x81x1392xbf16> to vector<81x1392xbf16>
    %c2 = arith.constant 2 : index
    %c0_13 = arith.constant 0 : index
    %c0_14 = arith.constant 0 : index
    %15 = vector.load %arg2[%c2, %c0_13, %c0_14] : memref<3x1392x512xbf16, #tpu.memory_space<vmem>>, vector<1x1392x512xbf16>
    %16 = vector.shape_cast %15 : vector<1x1392x512xbf16> to vector<1392x512xbf16>
    %cst_15 = arith.constant dense<0.000000e+00> : vector<81x512xf32>
    %17 = tpu.matmul %14, %16, %cst_15 {dimension_numbers = #tpu.dot_dimension_numbers<[1], [0], [0], [1], [0, 0, 1, 1], [], []>} : vector<81x1392xbf16>, vector<1392x512xbf16>, vector<81x512xf32> -> vector<81x512xf32>
    %18 = arith.addf %12, %17 : vector<81x512xf32>
    %c0_16 = arith.constant 0 : index
    %c0_17 = arith.constant 0 : index
    %19 = vector.load %arg3[%c0_16, %c0_17] : memref<1x512xf32, #tpu.memory_space<vmem>>, vector<1x512xf32>
    %20 = vector.broadcast %19 : vector<1x512xf32> to vector<81x512xf32>
    %21 = arith.addf %18, %20 : vector<81x512xf32>
    %cst_18 = arith.constant 0.000000e+00 : f32
    %22 = vector.broadcast %cst_18 : f32 to vector<81x512xf32>
    %23 = arith.maximumf %21, %22 : vector<81x512xf32>
    %24 = vector.extract_strided_slice %23 {offsets = [0, 0], sizes = [75, 512], strides = [1, 1]} : vector<81x512xf32> to vector<75x512xf32>
    %25 = vector.extract_strided_slice %23 {offsets = [3, 0], sizes = [75, 512], strides = [1, 1]} : vector<81x512xf32> to vector<75x512xf32>
    %26 = arith.maximumf %24, %25 : vector<75x512xf32>
    %27 = vector.extract_strided_slice %23 {offsets = [6, 0], sizes = [75, 512], strides = [1, 1]} : vector<81x512xf32> to vector<75x512xf32>
    %28 = arith.maximumf %26, %27 : vector<75x512xf32>
    %29 = arith.truncf %28 : vector<75x512xf32> to vector<75x512xbf16>
    %c0_19 = arith.constant 0 : index
    %c0_20 = arith.constant 0 : index
    %c0_21 = arith.constant 0 : index
    %30 = vector.load %arg4[%c0_19, %c0_20, %c0_21] : memref<1x75x512xbf16, #tpu.memory_space<vmem>>, vector<1x75x512xbf16>
    %31 = vector.shape_cast %30 : vector<1x75x512xbf16> to vector<75x512xbf16>
    %32 = vector.shape_cast %29 : vector<75x512xbf16> to vector<1x75x512xbf16>
    tpu.vector_store %arg4[%c0_19, %c0_20, %c0_21], %32 {strides = array<i32>} : memref<1x75x512xbf16, #tpu.memory_space<vmem>>, vector<1x75x512xbf16>,
    return
  }
  func.func @transform_0(%arg0: i32) -> (i32, i32, i32) {
    %c0_i32 = arith.constant 0 : i32
    %c0_i32_0 = arith.constant 0 : i32
    %c0_i32_1 = arith.constant 0 : i32
    return %arg0, %c0_i32, %c0_i32_0 : i32, i32, i32
  }
  func.func @transform_1(%arg0: i32) -> (i32, i32, i32) {
    %c0_i32 = arith.constant 0 : i32
    %c0_i32_0 = arith.constant 0 : i32
    %c0_i32_1 = arith.constant 0 : i32
    %c0_i32_2 = arith.constant 0 : i32
    return %c0_i32, %c0_i32_0, %c0_i32_1 : i32, i32, i32
  }
  func.func @transform_2(%arg0: i32) -> (i32, i32) {
    %c0_i32 = arith.constant 0 : i32
    %c0_i32_0 = arith.constant 0 : i32
    %c0_i32_1 = arith.constant 0 : i32
    return %c0_i32, %c0_i32_0 : i32, i32
  }
  func.func @transform_3(%arg0: i32) -> (i32, i32, i32) {
    %c0_i32 = arith.constant 0 : i32
    %c0_i32_0 = arith.constant 0 : i32
    %c0_i32_1 = arith.constant 0 : i32
    return %arg0, %c0_i32, %c0_i32_0 : i32, i32, i32
  }
}

module attributes {stable_mosaic.version = 11 : i64} {
  func.func @_conv_relu_hwin_kernel(%arg0: i32, %arg1: memref<1x45x256xbf16, #tpu.memory_space<vmem>>, %arg2: memref<3x256x512xbf16, #tpu.memory_space<vmem>>, %arg3: memref<1x512xf32, #tpu.memory_space<vmem>>, %arg4: memref<1x33x512xbf16, #tpu.memory_space<vmem>>) attributes {dimension_semantics = [#tpu.dimension_semantics<parallel>], iteration_bounds = array<i64: 2>, scalar_prefetch = 0 : i64, scratch_operands = 0 : i64, tpu.core_type = #tpu.core_type<tc>, window_params = [{transform_indices = @transform_0, window_bounds = array<i64: 1, 45, 256>}, {pipeline_mode = #tpu.pipeline_mode<synchronous>, transform_indices = @transform_1, window_bounds = array<i64: 3, 256, 512>}, {pipeline_mode = #tpu.pipeline_mode<synchronous>, transform_indices = @transform_2, window_bounds = array<i64: 1, 512>}, {transform_indices = @transform_3, window_bounds = array<i64: 1, 33, 512>}]} {
    %cst = arith.constant 0.000000e+00 : f32
    %0 = vector.broadcast %cst : f32 to vector<39x512xf32>
    %c0 = arith.constant 0 : index
    %c0_0 = arith.constant 0 : index
    %c0_1 = arith.constant 0 : index
    %1 = vector.load %arg1[%c0, %c0_0, %c0_1] : memref<1x45x256xbf16, #tpu.memory_space<vmem>>, vector<1x39x256xbf16>
    %2 = vector.shape_cast %1 : vector<1x39x256xbf16> to vector<39x256xbf16>
    %c0_2 = arith.constant 0 : index
    %c0_3 = arith.constant 0 : index
    %c0_4 = arith.constant 0 : index
    %3 = vector.load %arg2[%c0_2, %c0_3, %c0_4] : memref<3x256x512xbf16, #tpu.memory_space<vmem>>, vector<1x256x512xbf16>
    %4 = vector.shape_cast %3 : vector<1x256x512xbf16> to vector<256x512xbf16>
    %cst_5 = arith.constant dense<0.000000e+00> : vector<39x512xf32>
    %5 = tpu.matmul %2, %4, %cst_5 {dimension_numbers = #tpu.dot_dimension_numbers<[1], [0], [0], [1], [0, 0, 1, 1], [], []>} : vector<39x256xbf16>, vector<256x512xbf16>, vector<39x512xf32> -> vector<39x512xf32>
    %6 = arith.addf %0, %5 : vector<39x512xf32>
    %c0_6 = arith.constant 0 : index
    %c3 = arith.constant 3 : index
    %c0_7 = arith.constant 0 : index
    %7 = vector.load %arg1[%c0_6, %c3, %c0_7] : memref<1x45x256xbf16, #tpu.memory_space<vmem>>, vector<1x39x256xbf16>
    %8 = vector.shape_cast %7 : vector<1x39x256xbf16> to vector<39x256xbf16>
    %c1 = arith.constant 1 : index
    %c0_8 = arith.constant 0 : index
    %c0_9 = arith.constant 0 : index
    %9 = vector.load %arg2[%c1, %c0_8, %c0_9] : memref<3x256x512xbf16, #tpu.memory_space<vmem>>, vector<1x256x512xbf16>
    %10 = vector.shape_cast %9 : vector<1x256x512xbf16> to vector<256x512xbf16>
    %cst_10 = arith.constant dense<0.000000e+00> : vector<39x512xf32>
    %11 = tpu.matmul %8, %10, %cst_10 {dimension_numbers = #tpu.dot_dimension_numbers<[1], [0], [0], [1], [0, 0, 1, 1], [], []>} : vector<39x256xbf16>, vector<256x512xbf16>, vector<39x512xf32> -> vector<39x512xf32>
    %12 = arith.addf %6, %11 : vector<39x512xf32>
    %c0_11 = arith.constant 0 : index
    %c6 = arith.constant 6 : index
    %c0_12 = arith.constant 0 : index
    %13 = vector.load %arg1[%c0_11, %c6, %c0_12] : memref<1x45x256xbf16, #tpu.memory_space<vmem>>, vector<1x39x256xbf16>
    %14 = vector.shape_cast %13 : vector<1x39x256xbf16> to vector<39x256xbf16>
    %c2 = arith.constant 2 : index
    %c0_13 = arith.constant 0 : index
    %c0_14 = arith.constant 0 : index
    %15 = vector.load %arg2[%c2, %c0_13, %c0_14] : memref<3x256x512xbf16, #tpu.memory_space<vmem>>, vector<1x256x512xbf16>
    %16 = vector.shape_cast %15 : vector<1x256x512xbf16> to vector<256x512xbf16>
    %cst_15 = arith.constant dense<0.000000e+00> : vector<39x512xf32>
    %17 = tpu.matmul %14, %16, %cst_15 {dimension_numbers = #tpu.dot_dimension_numbers<[1], [0], [0], [1], [0, 0, 1, 1], [], []>} : vector<39x256xbf16>, vector<256x512xbf16>, vector<39x512xf32> -> vector<39x512xf32>
    %18 = arith.addf %12, %17 : vector<39x512xf32>
    %c0_16 = arith.constant 0 : index
    %c0_17 = arith.constant 0 : index
    %19 = vector.load %arg3[%c0_16, %c0_17] : memref<1x512xf32, #tpu.memory_space<vmem>>, vector<1x512xf32>
    %20 = vector.broadcast %19 : vector<1x512xf32> to vector<39x512xf32>
    %21 = arith.addf %18, %20 : vector<39x512xf32>
    %cst_18 = arith.constant 0.000000e+00 : f32
    %22 = vector.broadcast %cst_18 : f32 to vector<39x512xf32>
    %23 = arith.maximumf %21, %22 : vector<39x512xf32>
    %24 = vector.extract_strided_slice %23 {offsets = [0, 0], sizes = [33, 512], strides = [1, 1]} : vector<39x512xf32> to vector<33x512xf32>
    %25 = vector.extract_strided_slice %23 {offsets = [3, 0], sizes = [33, 512], strides = [1, 1]} : vector<39x512xf32> to vector<33x512xf32>
    %26 = arith.maximumf %24, %25 : vector<33x512xf32>
    %27 = vector.extract_strided_slice %23 {offsets = [6, 0], sizes = [33, 512], strides = [1, 1]} : vector<39x512xf32> to vector<33x512xf32>
    %28 = arith.maximumf %26, %27 : vector<33x512xf32>
    %29 = arith.truncf %28 : vector<33x512xf32> to vector<33x512xbf16>
    %c0_19 = arith.constant 0 : index
    %c0_20 = arith.constant 0 : index
    %c0_21 = arith.constant 0 : index
    %30 = vector.load %arg4[%c0_19, %c0_20, %c0_21] : memref<1x33x512xbf16, #tpu.memory_space<vmem>>, vector<1x33x512xbf16>
    %31 = vector.shape_cast %30 : vector<1x33x512xbf16> to vector<33x512xbf16>
    %32 = vector.shape_cast %29 : vector<33x512xbf16> to vector<1x33x512xbf16>
    tpu.vector_store %arg4[%c0_19, %c0_20, %c0_21], %32 {strides = array<i32>} : memref<1x33x512xbf16, #tpu.memory_space<vmem>>, vector<1x33x512xbf16>,
    return
  }
  func.func @transform_0(%arg0: i32) -> (i32, i32, i32) {
    %c0_i32 = arith.constant 0 : i32
    %c0_i32_0 = arith.constant 0 : i32
    %c0_i32_1 = arith.constant 0 : i32
    return %arg0, %c0_i32, %c0_i32_0 : i32, i32, i32
  }
  func.func @transform_1(%arg0: i32) -> (i32, i32, i32) {
    %c0_i32 = arith.constant 0 : i32
    %c0_i32_0 = arith.constant 0 : i32
    %c0_i32_1 = arith.constant 0 : i32
    %c0_i32_2 = arith.constant 0 : i32
    return %c0_i32, %c0_i32_0, %c0_i32_1 : i32, i32, i32
  }
  func.func @transform_2(%arg0: i32) -> (i32, i32) {
    %c0_i32 = arith.constant 0 : i32
    %c0_i32_0 = arith.constant 0 : i32
    %c0_i32_1 = arith.constant 0 : i32
    return %c0_i32, %c0_i32_0 : i32, i32
  }
  func.func @transform_3(%arg0: i32) -> (i32, i32, i32) {
    %c0_i32 = arith.constant 0 : i32
    %c0_i32_0 = arith.constant 0 : i32
    %c0_i32_1 = arith.constant 0 : i32
    return %arg0, %c0_i32, %c0_i32_0 : i32, i32, i32
  }
}

module attributes {stable_mosaic.version = 11 : i64} {
  func.func @_tail_kernel(%arg0: i32, %arg1: memref<6x1152xbf16, #tpu.memory_space<vmem>>, %arg2: memref<6x8xbf16, #tpu.memory_space<vmem>>, %arg3: memref<3x2x1xf32, #tpu.memory_space<vmem>>, %arg4: memref<1152x16xbf16, #tpu.memory_space<vmem>>, %arg5: memref<1x16xf32, #tpu.memory_space<vmem>>, %arg6: memref<16x128xbf16, #tpu.memory_space<vmem>>, %arg7: memref<8x128xbf16, #tpu.memory_space<vmem>>, %arg8: memref<32x128xbf16, #tpu.memory_space<vmem>>, %arg9: memref<1x128xf32, #tpu.memory_space<vmem>>, %arg10: memref<32x4xbf16, #tpu.memory_space<vmem>>, %arg11: memref<1x4xf32, #tpu.memory_space<vmem>>, %arg12: memref<2x4xf32, #tpu.memory_space<vmem>>, %arg13: memref<2x32xf32, #tpu.memory_space<vmem>>) attributes {dimension_semantics = [#tpu.dimension_semantics<arbitrary>], iteration_bounds = array<i64: 1>, scalar_prefetch = 0 : i64, scratch_operands = 0 : i64, tpu.core_type = #tpu.core_type<tc>, window_params = [{pipeline_mode = #tpu.pipeline_mode<synchronous>, transform_indices = @transform_0, window_bounds = array<i64: 6, 1152>}, {pipeline_mode = #tpu.pipeline_mode<synchronous>, transform_indices = @transform_1, window_bounds = array<i64: 6, 8>}, {pipeline_mode = #tpu.pipeline_mode<synchronous>, transform_indices = @transform_2, window_bounds = array<i64: 3, 2, 1>}, {pipeline_mode = #tpu.pipeline_mode<synchronous>, transform_indices = @transform_3, window_bounds = array<i64: 1152, 16>}, {pipeline_mode = #tpu.pipeline_mode<synchronous>, transform_indices = @transform_4, window_bounds = array<i64: 1, 16>}, {pipeline_mode = #tpu.pipeline_mode<synchronous>, transform_indices = @transform_5, window_bounds = array<i64: 16, 128>}, {pipeline_mode = #tpu.pipeline_mode<synchronous>, transform_indices = @transform_6, window_bounds = array<i64: 8, 128>}, {pipeline_mode = #tpu.pipeline_mode<synchronous>, transform_indices = @transform_7, window_bounds = array<i64: 32, 128>}, {pipeline_mode = #tpu.pipeline_mode<synchronous>, transform_indices = @transform_8, window_bounds = array<i64: 1, 128>}, {pipeline_mode = #tpu.pipeline_mode<synchronous>, transform_indices = @transform_9, window_bounds = array<i64: 32, 4>}, {pipeline_mode = #tpu.pipeline_mode<synchronous>, transform_indices = @transform_10, window_bounds = array<i64: 1, 4>}, {pipeline_mode = #tpu.pipeline_mode<synchronous>, transform_indices = @transform_11, window_bounds = array<i64: 2, 4>}, {pipeline_mode = #tpu.pipeline_mode<synchronous>, transform_indices = @transform_12, window_bounds = array<i64: 2, 32>}]} {
    %c0 = arith.constant 0 : index
    %c0_0 = arith.constant 0 : index
    %0 = vector.load %arg1[%c0, %c0_0] : memref<6x1152xbf16, #tpu.memory_space<vmem>>, vector<6x1152xbf16>
    %c0_1 = arith.constant 0 : index
    %c0_2 = arith.constant 0 : index
    %1 = vector.load %arg4[%c0_1, %c0_2] : memref<1152x16xbf16, #tpu.memory_space<vmem>>, vector<1152x16xbf16>
    %cst = arith.constant dense<0.000000e+00> : vector<6x16xf32>
    %2 = tpu.matmul %0, %1, %cst {dimension_numbers = #tpu.dot_dimension_numbers<[1], [0], [0], [1], [0, 0, 1, 1], [], []>} : vector<6x1152xbf16>, vector<1152x16xbf16>, vector<6x16xf32> -> vector<6x16xf32>
    %c0_3 = arith.constant 0 : index
    %c0_4 = arith.constant 0 : index
    %3 = vector.load %arg5[%c0_3, %c0_4] : memref<1x16xf32, #tpu.memory_space<vmem>>, vector<1x16xf32>
    %4 = vector.broadcast %3 : vector<1x16xf32> to vector<6x16xf32>
    %5 = arith.addf %2, %4 : vector<6x16xf32>
    %cst_5 = arith.constant 0.000000e+00 : f32
    %6 = vector.broadcast %cst_5 : f32 to vector<6x16xf32>
    %7 = arith.maximumf %5, %6 : vector<6x16xf32>
    %8 = arith.truncf %7 : vector<6x16xf32> to vector<6x16xbf16>
    %c0_6 = arith.constant 0 : index
    %c0_7 = arith.constant 0 : index
    %9 = vector.load %arg2[%c0_6, %c0_7] : memref<6x8xbf16, #tpu.memory_space<vmem>>, vector<6x8xbf16>
    %c0_8 = arith.constant 0 : index
    %c0_9 = arith.constant 0 : index
    %10 = vector.load %arg6[%c0_8, %c0_9] : memref<16x128xbf16, #tpu.memory_space<vmem>>, vector<16x128xbf16>
    %cst_10 = arith.constant dense<0.000000e+00> : vector<6x128xf32>
    %11 = tpu.matmul %8, %10, %cst_10 {dimension_numbers = #tpu.dot_dimension_numbers<[1], [0], [0], [1], [0, 0, 1, 1], [], []>} : vector<6x16xbf16>, vector<16x128xbf16>, vector<6x128xf32> -> vector<6x128xf32>
    %c0_11 = arith.constant 0 : index
    %c0_12 = arith.constant 0 : index
    %12 = vector.load %arg7[%c0_11, %c0_12] : memref<8x128xbf16, #tpu.memory_space<vmem>>, vector<8x128xbf16>
    %cst_13 = arith.constant dense<0.000000e+00> : vector<6x128xf32>
    %13 = tpu.matmul %9, %12, %cst_13 {dimension_numbers = #tpu.dot_dimension_numbers<[1], [0], [0], [1], [0, 0, 1, 1], [], []>} : vector<6x8xbf16>, vector<8x128xbf16>, vector<6x128xf32> -> vector<6x128xf32>
    %14 = arith.addf %11, %13 : vector<6x128xf32>
    %c0_14 = arith.constant 0 : index
    %c0_15 = arith.constant 0 : index
    %15 = vector.load %arg9[%c0_14, %c0_15] : memref<1x128xf32, #tpu.memory_space<vmem>>, vector<1x128xf32>
    %16 = vector.broadcast %15 : vector<1x128xf32> to vector<6x128xf32>
    %17 = arith.addf %14, %16 : vector<6x128xf32>
    %cst_16 = arith.constant 0.000000e+00 : f32
    %18 = vector.broadcast %cst_16 : f32 to vector<2x32xf32>
    %cst_17 = arith.constant 0.000000e+00 : f32
    %19 = vector.broadcast %cst_17 : f32 to vector<2x32xf32>
    %20 = vector.extract_strided_slice %17 {offsets = [0, 0], sizes = [2, 128], strides = [1, 1]} : vector<6x128xf32> to vector<2x128xf32>
    %21 = arith.truncf %18 : vector<2x32xf32> to vector<2x32xbf16>
    %c0_18 = arith.constant 0 : index
    %c0_19 = arith.constant 0 : index
    %22 = vector.load %arg8[%c0_18, %c0_19] : memref<32x128xbf16, #tpu.memory_space<vmem>>, vector<32x128xbf16>
    %cst_20 = arith.constant dense<0.000000e+00> : vector<2x128xf32>
    %23 = tpu.matmul %21, %22, %cst_20 {dimension_numbers = #tpu.dot_dimension_numbers<[1], [0], [0], [1], [0, 0, 1, 1], [], []>} : vector<2x32xbf16>, vector<32x128xbf16>, vector<2x128xf32> -> vector<2x128xf32>
    %24 = arith.addf %20, %23 : vector<2x128xf32>
    %25 = vector.extract_strided_slice %24 {offsets = [0, 0], sizes = [2, 32], strides = [1, 1]} : vector<2x128xf32> to vector<2x32xf32>
    %26 = arith.negf %25 : vector<2x32xf32>
    %27 = math.exp %26 : vector<2x32xf32>
    %cst_21 = arith.constant 1.000000e+00 : f32
    %28 = vector.broadcast %cst_21 : f32 to vector<2x32xf32>
    %29 = arith.addf %28, %27 : vector<2x32xf32>
    %30 = arith.divf %28, %29 : vector<2x32xf32>
    %31 = vector.extract_strided_slice %24 {offsets = [0, 32], sizes = [2, 32], strides = [1, 1]} : vector<2x128xf32> to vector<2x32xf32>
    %32 = arith.negf %31 : vector<2x32xf32>
    %33 = math.exp %32 : vector<2x32xf32>
    %cst_22 = arith.constant 1.000000e+00 : f32
    %34 = vector.broadcast %cst_22 : f32 to vector<2x32xf32>
    %35 = arith.addf %34, %33 : vector<2x32xf32>
    %36 = arith.divf %34, %35 : vector<2x32xf32>
    %37 = vector.extract_strided_slice %24 {offsets = [0, 64], sizes = [2, 32], strides = [1, 1]} : vector<2x128xf32> to vector<2x32xf32>
    %38 = math.tanh %37 : vector<2x32xf32>
    %39 = vector.extract_strided_slice %24 {offsets = [0, 96], sizes = [2, 32], strides = [1, 1]} : vector<2x128xf32> to vector<2x32xf32>
    %40 = arith.negf %39 : vector<2x32xf32>
    %41 = math.exp %40 : vector<2x32xf32>
    %cst_23 = arith.constant 1.000000e+00 : f32
    %42 = vector.broadcast %cst_23 : f32 to vector<2x32xf32>
    %43 = arith.addf %42, %41 : vector<2x32xf32>
    %44 = arith.divf %42, %43 : vector<2x32xf32>
    %45 = arith.mulf %30, %19 : vector<2x32xf32>
    %46 = arith.mulf %36, %38 : vector<2x32xf32>
    %47 = arith.addf %45, %46 : vector<2x32xf32>
    %48 = math.tanh %47 : vector<2x32xf32>
    %49 = arith.mulf %44, %48 : vector<2x32xf32>
    %c0_24 = arith.constant 0 : index
    %c0_25 = arith.constant 0 : index
    %c0_26 = arith.constant 0 : index
    %50 = vector.load %arg3[%c0_24, %c0_25, %c0_26] : memref<3x2x1xf32, #tpu.memory_space<vmem>>, vector<1x2x1xf32>
    %51 = vector.shape_cast %50 : vector<1x2x1xf32> to vector<2x1xf32>
    %52 = vector.broadcast %51 : vector<2x1xf32> to vector<2x32xf32>
    %53 = arith.mulf %52, %47 : vector<2x32xf32>
    %cst_27 = arith.constant 1.000000e+00 : f32
    %54 = vector.broadcast %cst_27 : f32 to vector<2x1xf32>
    %55 = arith.subf %54, %51 : vector<2x1xf32>
    %56 = vector.broadcast %55 : vector<2x1xf32> to vector<2x32xf32>
    %57 = arith.mulf %56, %19 : vector<2x32xf32>
    %58 = arith.addf %53, %57 : vector<2x32xf32>
    %59 = vector.broadcast %51 : vector<2x1xf32> to vector<2x32xf32>
    %60 = arith.mulf %59, %49 : vector<2x32xf32>
    %cst_28 = arith.constant 1.000000e+00 : f32
    %61 = vector.broadcast %cst_28 : f32 to vector<2x1xf32>
    %62 = arith.subf %61, %51 : vector<2x1xf32>
    %63 = vector.broadcast %62 : vector<2x1xf32> to vector<2x32xf32>
    %64 = arith.mulf %63, %18 : vector<2x32xf32>
    %65 = arith.addf %60, %64 : vector<2x32xf32>
    %66 = vector.extract_strided_slice %17 {offsets = [2, 0], sizes = [2, 128], strides = [1, 1]} : vector<6x128xf32> to vector<2x128xf32>
    %67 = arith.truncf %65 : vector<2x32xf32> to vector<2x32xbf16>
    %c0_29 = arith.constant 0 : index
    %c0_30 = arith.constant 0 : index
    %68 = vector.load %arg8[%c0_29, %c0_30] : memref<32x128xbf16, #tpu.memory_space<vmem>>, vector<32x128xbf16>
    %cst_31 = arith.constant dense<0.000000e+00> : vector<2x128xf32>
    %69 = tpu.matmul %67, %68, %cst_31 {dimension_numbers = #tpu.dot_dimension_numbers<[1], [0], [0], [1], [0, 0, 1, 1], [], []>} : vector<2x32xbf16>, vector<32x128xbf16>, vector<2x128xf32> -> vector<2x128xf32>
    %70 = arith.addf %66, %69 : vector<2x128xf32>
    %71 = vector.extract_strided_slice %70 {offsets = [0, 0], sizes = [2, 32], strides = [1, 1]} : vector<2x128xf32> to vector<2x32xf32>
    %72 = arith.negf %71 : vector<2x32xf32>
    %73 = math.exp %72 : vector<2x32xf32>
    %cst_32 = arith.constant 1.000000e+00 : f32
    %74 = vector.broadcast %cst_32 : f32 to vector<2x32xf32>
    %75 = arith.addf %74, %73 : vector<2x32xf32>
    %76 = arith.divf %74, %75 : vector<2x32xf32>
    %77 = vector.extract_strided_slice %70 {offsets = [0, 32], sizes = [2, 32], strides = [1, 1]} : vector<2x128xf32> to vector<2x32xf32>
    %78 = arith.negf %77 : vector<2x32xf32>
    %79 = math.exp %78 : vector<2x32xf32>
    %cst_33 = arith.constant 1.000000e+00 : f32
    %80 = vector.broadcast %cst_33 : f32 to vector<2x32xf32>
    %81 = arith.addf %80, %79 : vector<2x32xf32>
    %82 = arith.divf %80, %81 : vector<2x32xf32>
    %83 = vector.extract_strided_slice %70 {offsets = [0, 64], sizes = [2, 32], strides = [1, 1]} : vector<2x128xf32> to vector<2x32xf32>
    %84 = math.tanh %83 : vector<2x32xf32>
    %85 = vector.extract_strided_slice %70 {offsets = [0, 96], sizes = [2, 32], strides = [1, 1]} : vector<2x128xf32> to vector<2x32xf32>
    %86 = arith.negf %85 : vector<2x32xf32>
    %87 = math.exp %86 : vector<2x32xf32>
    %cst_34 = arith.constant 1.000000e+00 : f32
    %88 = vector.broadcast %cst_34 : f32 to vector<2x32xf32>
    %89 = arith.addf %88, %87 : vector<2x32xf32>
    %90 = arith.divf %88, %89 : vector<2x32xf32>
    %91 = arith.mulf %76, %58 : vector<2x32xf32>
    %92 = arith.mulf %82, %84 : vector<2x32xf32>
    %93 = arith.addf %91, %92 : vector<2x32xf32>
    %94 = math.tanh %93 : vector<2x32xf32>
    %95 = arith.mulf %90, %94 : vector<2x32xf32>
    %c1 = arith.constant 1 : index
    %c0_35 = arith.constant 0 : index
    %c0_36 = arith.constant 0 : index
    %96 = vector.load %arg3[%c1, %c0_35, %c0_36] : memref<3x2x1xf32, #tpu.memory_space<vmem>>, vector<1x2x1xf32>
    %97 = vector.shape_cast %96 : vector<1x2x1xf32> to vector<2x1xf32>
    %98 = vector.broadcast %97 : vector<2x1xf32> to vector<2x32xf32>
    %99 = arith.mulf %98, %93 : vector<2x32xf32>
    %cst_37 = arith.constant 1.000000e+00 : f32
    %100 = vector.broadcast %cst_37 : f32 to vector<2x1xf32>
    %101 = arith.subf %100, %97 : vector<2x1xf32>
    %102 = vector.broadcast %101 : vector<2x1xf32> to vector<2x32xf32>
    %103 = arith.mulf %102, %58 : vector<2x32xf32>
    %104 = arith.addf %99, %103 : vector<2x32xf32>
    %105 = vector.broadcast %97 : vector<2x1xf32> to vector<2x32xf32>
    %106 = arith.mulf %105, %95 : vector<2x32xf32>
    %cst_38 = arith.constant 1.000000e+00 : f32
    %107 = vector.broadcast %cst_38 : f32 to vector<2x1xf32>
    %108 = arith.subf %107, %97 : vector<2x1xf32>
    %109 = vector.broadcast %108 : vector<2x1xf32> to vector<2x32xf32>
    %110 = arith.mulf %109, %65 : vector<2x32xf32>
    %111 = arith.addf %106, %110 : vector<2x32xf32>
    %112 = vector.extract_strided_slice %17 {offsets = [4, 0], sizes = [2, 128], strides = [1, 1]} : vector<6x128xf32> to vector<2x128xf32>
    %113 = arith.truncf %111 : vector<2x32xf32> to vector<2x32xbf16>
    %c0_39 = arith.constant 0 : index
    %c0_40 = arith.constant 0 : index
    %114 = vector.load %arg8[%c0_39, %c0_40] : memref<32x128xbf16, #tpu.memory_space<vmem>>, vector<32x128xbf16>
    %cst_41 = arith.constant dense<0.000000e+00> : vector<2x128xf32>
    %115 = tpu.matmul %113, %114, %cst_41 {dimension_numbers = #tpu.dot_dimension_numbers<[1], [0], [0], [1], [0, 0, 1, 1], [], []>} : vector<2x32xbf16>, vector<32x128xbf16>, vector<2x128xf32> -> vector<2x128xf32>
    %116 = arith.addf %112, %115 : vector<2x128xf32>
    %117 = vector.extract_strided_slice %116 {offsets = [0, 0], sizes = [2, 32], strides = [1, 1]} : vector<2x128xf32> to vector<2x32xf32>
    %118 = arith.negf %117 : vector<2x32xf32>
    %119 = math.exp %118 : vector<2x32xf32>
    %cst_42 = arith.constant 1.000000e+00 : f32
    %120 = vector.broadcast %cst_42 : f32 to vector<2x32xf32>
    %121 = arith.addf %120, %119 : vector<2x32xf32>
    %122 = arith.divf %120, %121 : vector<2x32xf32>
    %123 = vector.extract_strided_slice %116 {offsets = [0, 32], sizes = [2, 32], strides = [1, 1]} : vector<2x128xf32> to vector<2x32xf32>
    %124 = arith.negf %123 : vector<2x32xf32>
    %125 = math.exp %124 : vector<2x32xf32>
    %cst_43 = arith.constant 1.000000e+00 : f32
    %126 = vector.broadcast %cst_43 : f32 to vector<2x32xf32>
    %127 = arith.addf %126, %125 : vector<2x32xf32>
    %128 = arith.divf %126, %127 : vector<2x32xf32>
    %129 = vector.extract_strided_slice %116 {offsets = [0, 64], sizes = [2, 32], strides = [1, 1]} : vector<2x128xf32> to vector<2x32xf32>
    %130 = math.tanh %129 : vector<2x32xf32>
    %131 = vector.extract_strided_slice %116 {offsets = [0, 96], sizes = [2, 32], strides = [1, 1]} : vector<2x128xf32> to vector<2x32xf32>
    %132 = arith.negf %131 : vector<2x32xf32>
    %133 = math.exp %132 : vector<2x32xf32>
    %cst_44 = arith.constant 1.000000e+00 : f32
    %134 = vector.broadcast %cst_44 : f32 to vector<2x32xf32>
    %135 = arith.addf %134, %133 : vector<2x32xf32>
    %136 = arith.divf %134, %135 : vector<2x32xf32>
    %137 = arith.mulf %122, %104 : vector<2x32xf32>
    %138 = arith.mulf %128, %130 : vector<2x32xf32>
    %139 = arith.addf %137, %138 : vector<2x32xf32>
    %140 = math.tanh %139 : vector<2x32xf32>
    %141 = arith.mulf %136, %140 : vector<2x32xf32>
    %c2 = arith.constant 2 : index
    %c0_45 = arith.constant 0 : index
    %c0_46 = arith.constant 0 : index
    %142 = vector.load %arg3[%c2, %c0_45, %c0_46] : memref<3x2x1xf32, #tpu.memory_space<vmem>>, vector<1x2x1xf32>
    %143 = vector.shape_cast %142 : vector<1x2x1xf32> to vector<2x1xf32>
    %144 = vector.broadcast %143 : vector<2x1xf32> to vector<2x32xf32>
    %145 = arith.mulf %144, %141 : vector<2x32xf32>
    %cst_47 = arith.constant 1.000000e+00 : f32
    %146 = vector.broadcast %cst_47 : f32 to vector<2x1xf32>
    %147 = arith.subf %146, %143 : vector<2x1xf32>
    %148 = vector.broadcast %147 : vector<2x1xf32> to vector<2x32xf32>
    %149 = arith.mulf %148, %111 : vector<2x32xf32>
    %150 = arith.addf %145, %149 : vector<2x32xf32>
    %151 = arith.truncf %150 : vector<2x32xf32> to vector<2x32xbf16>
    %c0_48 = arith.constant 0 : index
    %c0_49 = arith.constant 0 : index
    %152 = vector.load %arg10[%c0_48, %c0_49] : memref<32x4xbf16, #tpu.memory_space<vmem>>, vector<32x4xbf16>
    %cst_50 = arith.constant dense<0.000000e+00> : vector<2x4xf32>
    %153 = tpu.matmul %151, %152, %cst_50 {dimension_numbers = #tpu.dot_dimension_numbers<[1], [0], [0], [1], [0, 0, 1, 1], [], []>} : vector<2x32xbf16>, vector<32x4xbf16>, vector<2x4xf32> -> vector<2x4xf32>
    %c0_51 = arith.constant 0 : index
    %c0_52 = arith.constant 0 : index
    %154 = vector.load %arg11[%c0_51, %c0_52] : memref<1x4xf32, #tpu.memory_space<vmem>>, vector<1x4xf32>
    %155 = vector.broadcast %154 : vector<1x4xf32> to vector<2x4xf32>
    %156 = arith.addf %153, %155 : vector<2x4xf32>
    %c0_53 = arith.constant 0 : index
    %c0_54 = arith.constant 0 : index
    %157 = vector.load %arg12[%c0_53, %c0_54] : memref<2x4xf32, #tpu.memory_space<vmem>>, vector<2x4xf32>
    tpu.vector_store %arg12[%c0_53, %c0_54], %156 {strides = array<i32>} : memref<2x4xf32, #tpu.memory_space<vmem>>, vector<2x4xf32>,
    %c0_55 = arith.constant 0 : index
    %c0_56 = arith.constant 0 : index
    %158 = vector.load %arg13[%c0_55, %c0_56] : memref<2x32xf32, #tpu.memory_space<vmem>>, vector<2x32xf32>
    tpu.vector_store %arg13[%c0_55, %c0_56], %150 {strides = array<i32>} : memref<2x32xf32, #tpu.memory_space<vmem>>, vector<2x32xf32>,
    return
  }
  func.func @transform_0(%arg0: i32) -> (i32, i32) {
    %c0_i32 = arith.constant 0 : i32
    %c0_i32_0 = arith.constant 0 : i32
    %c0_i32_1 = arith.constant 0 : i32
    return %c0_i32, %c0_i32_0 : i32, i32
  }
  func.func @transform_1(%arg0: i32) -> (i32, i32) {
    %c0_i32 = arith.constant 0 : i32
    %c0_i32_0 = arith.constant 0 : i32
    %c0_i32_1 = arith.constant 0 : i32
    return %c0_i32, %c0_i32_0 : i32, i32
  }
  func.func @transform_2(%arg0: i32) -> (i32, i32, i32) {
    %c0_i32 = arith.constant 0 : i32
    %c0_i32_0 = arith.constant 0 : i32
    %c0_i32_1 = arith.constant 0 : i32
    %c0_i32_2 = arith.constant 0 : i32
    return %c0_i32, %c0_i32_0, %c0_i32_1 : i32, i32, i32
  }
  func.func @transform_3(%arg0: i32) -> (i32, i32) {
    %c0_i32 = arith.constant 0 : i32
    %c0_i32_0 = arith.constant 0 : i32
    %c0_i32_1 = arith.constant 0 : i32
    return %c0_i32, %c0_i32_0 : i32, i32
  }
  func.func @transform_4(%arg0: i32) -> (i32, i32) {
    %c0_i32 = arith.constant 0 : i32
    %c0_i32_0 = arith.constant 0 : i32
    %c0_i32_1 = arith.constant 0 : i32
    return %c0_i32, %c0_i32_0 : i32, i32
  }
  func.func @transform_5(%arg0: i32) -> (i32, i32) {
    %c0_i32 = arith.constant 0 : i32
    %c0_i32_0 = arith.constant 0 : i32
    %c0_i32_1 = arith.constant 0 : i32
    return %c0_i32, %c0_i32_0 : i32, i32
  }
  func.func @transform_6(%arg0: i32) -> (i32, i32) {
    %c0_i32 = arith.constant 0 : i32
    %c0_i32_0 = arith.constant 0 : i32
    %c0_i32_1 = arith.constant 0 : i32
    return %c0_i32, %c0_i32_0 : i32, i32
  }
  func.func @transform_7(%arg0: i32) -> (i32, i32) {
    %c0_i32 = arith.constant 0 : i32
    %c0_i32_0 = arith.constant 0 : i32
    %c0_i32_1 = arith.constant 0 : i32
    return %c0_i32, %c0_i32_0 : i32, i32
  }
  func.func @transform_8(%arg0: i32) -> (i32, i32) {
    %c0_i32 = arith.constant 0 : i32
    %c0_i32_0 = arith.constant 0 : i32
    %c0_i32_1 = arith.constant 0 : i32
    return %c0_i32, %c0_i32_0 : i32, i32
  }
  func.func @transform_9(%arg0: i32) -> (i32, i32) {
    %c0_i32 = arith.constant 0 : i32
    %c0_i32_0 = arith.constant 0 : i32
    %c0_i32_1 = arith.constant 0 : i32
    return %c0_i32, %c0_i32_0 : i32, i32
  }
  func.func @transform_10(%arg0: i32) -> (i32, i32) {
    %c0_i32 = arith.constant 0 : i32
    %c0_i32_0 = arith.constant 0 : i32
    %c0_i32_1 = arith.constant 0 : i32
    return %c0_i32, %c0_i32_0 : i32, i32
  }
  func.func @transform_11(%arg0: i32) -> (i32, i32) {
    %c0_i32 = arith.constant 0 : i32
    %c0_i32_0 = arith.constant 0 : i32
    %c0_i32_1 = arith.constant 0 : i32
    return %c0_i32, %c0_i32_0 : i32, i32
  }
  func.func @transform_12(%arg0: i32) -> (i32, i32) {
    %c0_i32 = arith.constant 0 : i32
    %c0_i32_0 = arith.constant 0 : i32
    %c0_i32_1 = arith.constant 0 : i32
    return %c0_i32, %c0_i32_0 : i32, i32
  }
}

</mosaic_0001>

<bundles_post_ra>
// kernel: tomato_forward.3
= control target key start
LH: loop header
LB: loop body
LE: loop exit
PB: predicated region body
PF: predicated region fallthrough
CT: control target
= control target key end

     0   :  { %s16283_s12 = smov 0   ;;  %s20581_s0 = inlined_call_operand.vmem [shape: bf16[2,87,1392], index: 0, kind: input, shape index: {}]   ;;  %s20582_s1 = inlined_call_operand.vmem [shape: bf16[3,1392,512], index: 1, kind: input, shape index: {}]   ;;  %s20583_s2 = inlined_call_operand.vmem [shape: f32[1,512], index: 2, kind: input, shape index: {}]   ;;  %s20584_s3 = inlined_call_operand.vmem [shape: bf16[2,75,512], index: 3, kind: output, shape index: {}]  }
   0x1 LB: > { %s11832_s13 = sadd.s32 4294967295, %s16260_s12   ;;  %p11836_p0 = scmp.ge.s32.totalorder %s16260_s12, 1  ;;  %s16260_s12 = sphi %s16283_s12, %s13_s12  }
   0x2   : > { %p137_p1 = scmp.lt.s32.totalorder %s16260_s12, 3 }
   0x4   : > { %p138_p2 = pnand %p11836_p0, %p137_p1 }
   0x6   : > { %141 = sbr.rel (%p138_p2) target bundleno = 1427 (0x593), region = 32 }
   0xd   : > { %v14458_v0 = vld [vmem:[%s20582_s1 + $0xae4] ss:$16 sps:$4 sm:$0xff]   ;;  %v14460_v1 = vld [vmem:[%s20582_s1 + $0xaec] ss:$16 sps:$4 sm:$0xff]   ;;  %v14462_v2 = vld [vmem:[%s20582_s1 + $0xae0] ss:$16 sps:$4 sm:$0xff]  }
   0xe   : > { %3603 = vmatprep.subr.bf16.mxu0 %v14458_v0  ;;  %v14463_v3 = vld [vmem:[%s20582_s1 + $0xae8] ss:$16 sps:$4 sm:$0xff]   ;;  %4149 = vmatprep.subr.bf16.mxu1 %v14460_v1  ;;  %v14464_v4 = vld [vmem:[%s20582_s1 + $0xb04] ss:$16 sps:$4 sm:$0xff]   ;;  %v14466_v5 = vld [vmem:[%s20582_s1 + $0xb0c] ss:$16 sps:$4 sm:$0xff]  }
   0xf   : > { %3604 = vmatpush1.bf16.msra.mxu0 %v14462_v2  ;;  %4150 = vmatpush1.bf16.msra.mxu1 %v14463_v3  ;;  %v14468_v6 = vld [vmem:[%s20582_s1 + $0xb00] ss:$16 sps:$4 sm:$0xff]   ;;  %v14469_v7 = vld [vmem:[%s20582_s1 + $0xb08] ss:$16 sps:$4 sm:$0xff]   ;;  %v14470_v8 = vld [vmem:[%s20582_s1 + $0xb24] ss:$16 sps:$4 sm:$0xff]  }
  0x10   : > { %3605 = vmatprep.subr.bf16.mxu0 %v14464_v4  ;;  %4151 = vmatprep.subr.bf16.mxu1 %v14466_v5  ;;  %v14472_v9 = vld [vmem:[%s20582_s1 + $0xb2c] ss:$16 sps:$4 sm:$0xff]   ;;  %v14474_v10 = vld [vmem:[%s20582_s1 + $0xb20] ss:$16 sps:$4 sm:$0xff]   ;;  %v14475_v11 = vld [vmem:[%s20582_s1 + $0xb28] ss:$16 sps:$4 sm:$0xff]  }
  0x11   : > { %v14476_v12 = vld [vmem:[%s20582_s1 + $0xb44] ss:$16 sps:$4 sm:$0xff]   ;;  %v14478_v13 = vld [vmem:[%s20582_s1 + $0xb4c] ss:$16 sps:$4 sm:$0xff]   ;;  %v14480_v14 = vld [vmem:[%s20582_s1 + $0xb40] ss:$16 sps:$4 sm:$0xff]  }
  0x12   : > { %v14481_v15 = vld [vmem:[%s20582_s1 + $0xb48] ss:$16 sps:$4 sm:$0xff]   ;;  %v14482_v16 = vld [vmem:[%s20582_s1 + $0xb64] ss:$16 sps:$4 sm:$0xff]   ;;  %v14484_v17 = vld [vmem:[%s20582_s1 + $0xb6c] ss:$16 sps:$4 sm:$0xff]  }
  0x13   : > { %3606 = vmatpush1.bf16.msra.mxu0 %v14468_v6  ;;  %4152 = vmatpush1.bf16.msra.mxu1 %v14469_v7  ;;  %v14486_v18 = vld [vmem:[%s20582_s1 + $0xb60] ss:$16 sps:$4 sm:$0xff]   ;;  %v14487_v19 = vld [vmem:[%s20582_s1 + $0xb68] ss:$16 sps:$4 sm:$0xff]   ;;  %v14488_v20 = vld [vmem:[%s20582_s1 + $0xb84] ss:$16 sps:$4 sm:$0xff]  }
  0x14   : > { %3607 = vmatprep.subr.bf16.mxu0 %v14470_v8  ;;  %4153 = vmatprep.subr.bf16.mxu1 %v14472_v9  ;;  %v14490_v21 = vld [vmem:[%s20582_s1 + $0xb8c] ss:$16 sps:$4 sm:$0xff]   ;;  %v14492_v22 = vld [vmem:[%s20582_s1 + $0xb80] ss:$16 sps:$4 sm:$0xff]   ;;  %v14493_v23 = vld [vmem:[%s20582_s1 + $0xb88] ss:$16 sps:$4 sm:$0xff]  }
  0x15   : > { %v14494_v24 = vld [vmem:[%s20582_s1 + $0xba4] ss:$16 sps:$4 sm:$0xff]   ;;  %v14496_v25 = vld [vmem:[%s20582_s1 + $0xbac] ss:$16 sps:$4 sm:$0xff]   ;;  %v14498_v26 = vld [vmem:[%s20582_s1 + $0xba0] ss:$16 sps:$4 sm:$0xff]  }
  0x16   : > { %v14499_v27 = vld [vmem:[%s20582_s1 + $0xba8] ss:$16 sps:$4 sm:$0xff]   ;;  %v14500_v28 = vld [vmem:[%s20582_s1 + $0xbc4] ss:$16 sps:$4 sm:$0xff]   ;;  %v14502_v29 = vld [vmem:[%s20582_s1 + $0xbcc] ss:$16 sps:$4 sm:$0xff]  }
  0x17   : > { %3608 = vmatpush1.bf16.msra.mxu0 %v14474_v10  ;;  %4154 = vmatpush1.bf16.msra.mxu1 %v14475_v11  ;;  %v14504_v30 = vld [vmem:[%s20582_s1 + $0xbc0] ss:$16 sps:$4 sm:$0xff]   ;;  %p161_p3 = scmp.lt.s32.totalorder %s11832_s13, 1  ;;  %v14505_v31 = vld [vmem:[%s20582_s1 + $0xbc8] ss:$16 sps:$4 sm:$0xff]   ;;  %vm3584_vm1 = vcmask 916480  }
  0x18   : > { %3609 = vmatprep.subr.bf16.mxu0 %v14476_v12  ;;  %4155 = vmatprep.subr.bf16.mxu1 %v14478_v13  ;;  %v14506_v32 = vld [vmem:[%s20582_s1 + $0xbe4] ss:$16 sps:$4 sm:$0xff]   ;;  %v14508_v33 = vld [vmem:[%s20582_s1 + $0xbec] ss:$16 sps:$4 sm:$0xff]   ;;  %v14510_v34 = vld [vmem:[%s20582_s1 + $0xbe0] ss:$16 sps:$4 sm:$0xff]  }
  0x19   : > { %v14511_v35 = vld [vmem:[%s20582_s1 + $0xbe8] ss:$16 sps:$4 sm:$0xff]   ;;  %s20596_s13 = smov (!%p161_p3, %s11832_s13), 1  ;;  %v14512_v36 = vld [vmem:[%s20582_s1 + $0xc04] ss:$16 sps:$4 sm:$0xff]   ;;  %vm8074_vm2 = vcmask 1044480  }
  0x1a   : > { %v14514_v37 = vld [vmem:[%s20582_s1 + $0xc0c] ss:$16 sps:$4 sm:$0xff]   ;;  %v14516_v38 = vld [vmem:[%s20582_s1 + $0xc00] ss:$16 sps:$4 sm:$0xff]   ;;  %s14447_s17 = smul.u32 484, %s20596_s13  ;;  %vm11461_vm3 = vcmask 1041408  }
  0x1b   : > { %3610 = vmatpush1.bf16.msra.mxu0 %v14480_v14  ;;  %4156 = vmatpush1.bf16.msra.mxu1 %v14481_v15  ;;  %v14517_v39 = vld [vmem:[%s20582_s1 + $0xc08] ss:$16 sps:$4 sm:$0xff]   ;;  %v14518_v40 = vld [vmem:[%s20582_s1 + $0xc24] ss:$16 sps:$4 sm:$0xff]   ;;  %v14520_v41 = vld [vmem:[%s20582_s1 + $0xc2c] ss:$16 sps:$4 sm:$0xff]  }
  0x1c   : > { %3611 = vmatprep.subr.bf16.mxu0 %v14482_v16  ;;  %4157 = vmatprep.subr.bf16.mxu1 %v14484_v17  ;;  %v14522_v42 = vld [vmem:[%s20582_s1 + $0xc20] ss:$16 sps:$4 sm:$0xff]   ;;  %v14523_v43 = vld [vmem:[%s20582_s1 + $0xc28] ss:$16 sps:$4 sm:$0xff]   ;;  %s16433_s30 = scalar_lea.vmem %s20581_s0, %s14447_s17  ;;  %v14524_v44 = vld [vmem:[%s20582_s1 + $0xc44] ss:$16 sps:$4 sm:$0xff]  }
  0x1d   : > { %v14526_v45 = vld [vmem:[%s20582_s1 + $0xc4c] ss:$16 sps:$4 sm:$0xff]   ;;  %v14528_v46 = vld [vmem:[%s20582_s1 + $0xc40] ss:$16 sps:$4 sm:$0xff]   ;;  %v14529_v47 = vld [vmem:[%s20582_s1 + $0xc48] ss:$16 sps:$4 sm:$0xff]  }
  0x1e   : > { %v178_v48 = vld [vmem:[%s16433_s30 + $0x2c] sm:$0xff]  ;;  %v586_v49 = vld [vmem:[%s16433_s30] sm:$0xee]  ;;  %v14555_v51 = vld [vmem:[%s16433_s30 + $0x5c] ss:$44 sps:$4 sm:$0xff]   ;;  %s14448_s15 = smul.u32 160, %s20596_s13 }
  0x1f   : > { %3612 = vmatpush1.bf16.msra.mxu0 %v14486_v18  ;;  %4158 = vmatpush1.bf16.msra.mxu1 %v14487_v19  ;;  %v12188_v50 = vcombine.high %v586_v49, %v178_v48  ;;  %v14530_v52 = vld [vmem:[%s20582_s1 + $0xc64] ss:$16 sps:$4 sm:$0xff]   ;;  %v14532_v53 = vld [vmem:[%s20582_s1 + $0xc6c] ss:$16 sps:$4 sm:$0xff]   ;;  %v1227_v56 = vshrl.u32 %v14555_v51, 16  ;;  %v1230_v57 = vshll.u32 %v14555_v51, 16  ;;  %v12187_v60 = vcombine.low %v586_v49, %v178_v48 }
  0x20   : > { %3613 = vmatprep.subr.bf16.mxu0 %v14488_v20  ;;  %4159 = vmatprep.subr.bf16.mxu1 %v14490_v21  ;;  %v14534_v58 = vld [vmem:[%s20582_s1 + $0xc60] ss:$16 sps:$4 sm:$0xff]   ;;  %v14535_v59 = vld [vmem:[%s20582_s1 + $0xc68] ss:$16 sps:$4 sm:$0xff]   ;;  %v14536_v2 = vld [vmem:[%s20582_s1 + $0xc84] ss:$16 sps:$4 sm:$0xff]   ;;  %s20176_s17 = scalar_lea.vmem %s20584_s3, %s14448_s15 }
  0x21   : > { %v1219_v54 = vshrl.u32 %v12188_v50, 16  ;;  %v1222_v55 = vshll.u32 %v12188_v50, 16  ;;  %v14564_v61 = vld [vmem:[%s16433_s30 + $0x58] ss:$44 sps:$4 sm:$0xff]   ;;  %v1229_v0 = vrot.slane %v1227_v56, 1  ;;  %v1232_v1 = vrot.slane %v1230_v57, 2 }
  0x22   : > { %v14538_v3 = vld [vmem:[%s20582_s1 + $0xc8c] ss:$16 sps:$4 sm:$0xff]   ;;  %vm1200_vm0 = vsmask.f32 6400  ;;  %v14540_v4 = vld [vmem:[%s20582_s1 + $0xc80] ss:$16 sps:$4 sm:$0xff]  }
  0x23   : > { %3614 = vmatpush1.bf16.msra.mxu0 %v14492_v22  ;;  %4160 = vmatpush1.bf16.msra.mxu1 %v14493_v23  ;;  %v1221_v62 = vrot.slane %v1219_v54, 1  ;;  %v1224_v63 = vrot.slane %v1222_v55, 2  ;;  %v16472_v6 = vor.u32 %v1232_v1, %v1229_v0  ;;  %v14541_v7 = vld [vmem:[%s20582_s1 + $0xc88] ss:$16 sps:$4 sm:$0xff]   ;;  %v14542_v8 = vld [vmem:[%s20582_s1 + $0xca4] ss:$16 sps:$4 sm:$0xff]  }
  0x24   : > { %3615 = vmatprep.subr.bf16.mxu0 %v14494_v24  ;;  %4161 = vmatprep.subr.bf16.mxu1 %v14496_v25  ;;  %v1202_v9 = vshrl.u32 %v12187_v60, 16  ;;  %v1205_v11 = vshll.u32 %v12187_v60, 16  ;;  %v1210_v12 = vshrl.u32 %v14564_v61, 16  ;;  %v1213_v13 = vshll.u32 %v14564_v61, 16  ;;  %v14544_v14 = vld [vmem:[%s20582_s1 + $0xcac] ss:$16 sps:$4 sm:$0xff]  }
  0x25   : > { %v1225_v5 = vor.u32 %v1224_v63, %v1221_v62  ;;  %v14546_v15 = vld [vmem:[%s20582_s1 + $0xca0] ss:$16 sps:$4 sm:$0xff]   ;;  %v14547_v16 = vld [vmem:[%s20582_s1 + $0xca8] ss:$16 sps:$4 sm:$0xff]   ;;  %v14548_v17 = vld [vmem:[%s20582_s1 + $0xcc4] ss:$16 sps:$4 sm:$0xff]  }
  0x26   : > { %v1204_v18 = vrot.slane %v1202_v9, 1  ;;  %v1207_v19 = vrot.slane %v1205_v11, 2  ;;  %v1212_v20 = vrot.slane %v1210_v12, 1  ;;  %v1215_v21 = vrot.slane %v1213_v13, 2  ;;  %v14550_v22 = vld [vmem:[%s20582_s1 + $0xccc] ss:$16 sps:$4 sm:$0xff]  }
  0x27   : > { %3616 = vmatpush1.bf16.msra.mxu0 %v14498_v26  ;;  %4162 = vmatpush1.bf16.msra.mxu1 %v14499_v27  ;;  %v1234_v10 = vsel %vm1200_vm0, %v1225_v5, %v16472_v6  ;;  %v14552_v23 = vld [vmem:[%s20582_s1 + $0xcc0] ss:$16 sps:$4 sm:$0xff]   ;;  %v14553_v24 = vld [vmem:[%s20582_s1 + $0xcc8] ss:$16 sps:$4 sm:$0xff]   ;;  %v14559_v25 = vld [vmem:[%s20582_s1 + $0xce4] ss:$16 sps:$4 sm:$0xff]  }
  0x28   : > { %3617 = vmatprep.subr.bf16.mxu0 %v14500_v28  ;;  %4163 = vmatprep.subr.bf16.mxu1 %v14502_v29  ;;  %v1208_v26 = vor.u32 %v1207_v19, %v1204_v18  ;;  %v1216_v27 = vor.u32 %v1215_v21, %v1212_v20  ;;  %v14562_v28 = vld [vmem:[%s20582_s1 + $0xcec] ss:$16 sps:$4 sm:$0xff]   ;;  %v14557_v29 = vld [vmem:[%s20582_s1 + $0xce0] ss:$16 sps:$4 sm:$0xff]   ;;  %v14574_v51 = vld [vmem:[%s20582_s1 + $0xd28] ss:$16 sps:$4 sm:$0xff]  }
  0x29   : > { %3635 = vmatprep.mubr.bf16.mxu0 %v1234_v10  ;;  %4181 = vmatprep.mubr.bf16.mxu1 %v1234_v10  ;;  %v14571_v50 = vld [vmem:[%s20582_s1 + $0xd20] ss:$16 sps:$4 sm:$0xff]   ;;  %v14612_v54 = vld [vmem:[%s16433_s30 + $0x108] ss:$44 sps:$4 sm:$0xff]   ;;  %v14582_v57 = vld [vmem:[%s20582_s1 + $0xd4c] ss:$16 sps:$4 sm:$0xff]  }
  0x2a   : > { %v14579_v55 = vld [vmem:[%s20582_s1 + $0xd44] ss:$16 sps:$4 sm:$0xff]   ;;  %v1488_v60 = vshrl.u32 %v14612_v54, 16  ;;  %v1491_v61 = vshll.u32 %v14612_v54, 16  ;;  %v14577_v62 = vld [vmem:[%s20582_s1 + $0xd40] ss:$16 sps:$4 sm:$0xff]  }
  0x2b   : > { %3618 = vmatpush1.bf16.msra.mxu0 %v14504_v30  ;;  %4164 = vmatpush1.bf16.msra.mxu1 %v14505_v31  ;;  %v14560_v30 = vld [vmem:[%s20582_s1 + $0xce8] ss:$16 sps:$4 sm:$0xff]   ;;  %v14595_v31 = vld [vmem:[%s16433_s30 + $0xb4] ss:$44 sps:$4 sm:$0xff]   ;;  %v14588_v5 = vld [vmem:[%s20582_s1 + $0xd6c] ss:$16 sps:$4 sm:$0xff]  }
  0x2c   : > { %3619 = vmatprep.subr.bf16.mxu0 %v14506_v32  ;;  %4165 = vmatprep.subr.bf16.mxu1 %v14508_v33  ;;  %v14597_v32 = vld [vmem:[%s16433_s30 + $0xb0] ss:$44 sps:$4 sm:$0xff]   ;;  %v1217_v33 = vsel %vm1200_vm0, %v1208_v26, %v1216_v27  ;;  %v14580_v63 = vld [vmem:[%s20582_s1 + $0xd48] ss:$16 sps:$4 sm:$0xff]   ;;  %v14627_v12 = vld [vmem:[%s16433_s30 + $0x160] ss:$44 sps:$4 sm:$0xff]  }
  0x2d   : > { %v14586_v9 = vld [vmem:[%s20582_s1 + $0xd68] ss:$16 sps:$4 sm:$0xff]   ;;  %v14625_v11 = vld [vmem:[%s16433_s30 + $0x164] ss:$44 sps:$4 sm:$0xff]   ;;  %v1587_v18 = vshrl.u32 %v14627_v12, 16  ;;  %v1590_v19 = vshll.u32 %v14627_v12, 16 }
  0x2e   : > { %v14591_v13 = vld [vmem:[%s20582_s1 + $0xd84] ss:$16 sps:$4 sm:$0xff]   ;;  %v14589_v20 = vld [vmem:[%s20582_s1 + $0xd80] ss:$16 sps:$4 sm:$0xff]   ;;  %v14592_v21 = vld [vmem:[%s20582_s1 + $0xd88] ss:$16 sps:$4 sm:$0xff]  }
  0x2f   : > { %3620 = vmatpush1.bf16.msra.mxu0 %v14510_v34  ;;  %4166 = vmatpush1.bf16.msra.mxu1 %v14511_v35  ;;  %v14567_v34 = vld [vmem:[%s20582_s1 + $0xd04] ss:$16 sps:$4 sm:$0xff]   ;;  %v14570_v35 = vld [vmem:[%s20582_s1 + $0xd0c] ss:$16 sps:$4 sm:$0xff]   ;;  %vm11765_vm4 = vsmask.f32 1280 }
  0x30   : > { %3621 = vmatprep.subr.bf16.mxu0 %v14512_v36  ;;  %4167 = vmatprep.subr.bf16.mxu1 %v14514_v37  ;;  %v1398_v36 = vshrl.u32 %v14595_v31, 16  ;;  %v1401_v37 = vshll.u32 %v14595_v31, 16  ;;  %v14600_v26 = vld [vmem:[%s20582_s1 + $0xda4] ss:$16 sps:$4 sm:$0xff]   ;;  %v592_v31 = vld [vmem:[%s16433_s30 + $0x1b8] sm:$0x33]  ;;  %vm20548_vm7 = vmand %vm11461_vm3, %vm11765_vm4 }
  0x31   : > { %v14639_v12 = vld [vmem:[%s20582_s1 + $0xe4c] ss:$16 sps:$4 sm:$0xff]   ;;  %vm11767_vm5 = vcmask 1045508   ;;  %vm11768_vm6 = vsmask.f32 5376 }
  0x32   : > { %vm20559_vm8 = vmand %vm11767_vm5, %vm11768_vm6 }
  0x33   : > { %3622 = vmatpush1.bf16.msra.mxu0 %v14516_v38  ;;  %4168 = vmatpush1.bf16.msra.mxu1 %v14517_v39  ;;  %v1389_v38 = vshrl.u32 %v14597_v32, 16  ;;  %v1392_v39 = vshll.u32 %v14597_v32, 16  ;;  %v14601_v32 = vld [vmem:[%s20582_s1 + $0xda8] ss:$16 sps:$4 sm:$0xff]   ;;  %vm11770_vm9 = vmor %vm20559_vm8, %vm20548_vm7 }
  0x34   : > { %3623 = vmatprep.subr.bf16.mxu0 %v14518_v40  ;;  %4169 = vmatprep.subr.bf16.mxu1 %v14520_v41  ;;  %v14565_v40 = vld [vmem:[%s20582_s1 + $0xd00] ss:$16 sps:$4 sm:$0xff]   ;;  %v14568_v41 = vld [vmem:[%s20582_s1 + $0xd08] ss:$16 sps:$4 sm:$0xff]  }
  0x37   : > { %3624 = vmatpush1.bf16.msra.mxu0 %v14522_v42  ;;  %4170 = vmatpush1.bf16.msra.mxu1 %v14523_v43  ;;  %v1400_v42 = vrot.slane %v1398_v36, 1  ;;  %v1403_v43 = vrot.slane %v1401_v37, 2  ;;  %v14606_v36 = vld [vmem:[%s20582_s1 + $0xdc4] ss:$16 sps:$4 sm:$0xff]  }
  0x38   : > { %3625 = vmatprep.subr.bf16.mxu0 %v14524_v44  ;;  %4171 = vmatprep.subr.bf16.mxu1 %v14526_v45  ;;  %v1391_v44 = vrot.slane %v1389_v38, 1  ;;  %v1394_v45 = vrot.slane %v1392_v39, 2  ;;  %v14609_v38 = vld [vmem:[%s20582_s1 + $0xdcc] ss:$16 sps:$4 sm:$0xff]  }
  0x39   : > { %v1404_v48 = vor.u32 %v1403_v43, %v1400_v42  ;;  %v14604_v43 = vld [vmem:[%s20582_s1 + $0xdc0] ss:$16 sps:$4 sm:$0xff]  }
  0x3a   : > { %v1395_v49 = vor.u32 %v1394_v45, %v1391_v44 }
  0x3b   : > { %3626 = vmatpush1.bf16.msra.mxu0 %v14528_v46  ;;  %4172 = vmatpush1.bf16.msra.mxu1 %v14529_v47  ;;  %v14573_v46 = vld [vmem:[%s20582_s1 + $0xd24] ss:$16 sps:$4 sm:$0xff]   ;;  %v14576_v47 = vld [vmem:[%s20582_s1 + $0xd2c] ss:$16 sps:$4 sm:$0xff]  }
  0x3c   : > { %3627 = vmatprep.subr.bf16.mxu0 %v14530_v52  ;;  %4173 = vmatprep.subr.bf16.mxu1 %v14532_v53  ;;  %v1405_v52 = vsel %vm1200_vm0, %v16472_v6, %v1404_v48  ;;  %v14610_v53 = vld [vmem:[%s16433_s30 + $0x10c] ss:$44 sps:$4 sm:$0xff]   ;;  %v1396_v56 = vsel %vm1200_vm0, %v1216_v27, %v1395_v49 }
  0x3d   : > { %v14603_v27 = vld [vmem:[%s20582_s1 + $0xdac] ss:$16 sps:$4 sm:$0xff]  }
  0x3f   : > { %3628 = vmatpush1.bf16.msra.mxu0 %v14534_v58  ;;  %4174 = vmatpush1.bf16.msra.mxu1 %v14535_v59  ;;  %v1497_v58 = vshrl.u32 %v14610_v53, 16  ;;  %v1500_v59 = vshll.u32 %v14610_v53, 16  ;;  %v14613_v53 = vld [vmem:[%s20582_s1 + $0xde0] ss:$16 sps:$4 sm:$0xff]  }
  0x40   : > { %3629 = vmatprep.subr.bf16.mxu0 %v14536_v2  ;;  %4175 = vmatprep.subr.bf16.mxu1 %v14538_v3  ;;  %v1490_v2 = vrot.slane %v1488_v60, 1  ;;  %v1493_v3 = vrot.slane %v1491_v61, 2  ;;  %v14622_v60 = vld [vmem:[%s20582_s1 + $0xe08] ss:$16 sps:$4 sm:$0xff]  }
  0x41   : > { %v1499_v0 = vrot.slane %v1497_v58, 1  ;;  %v1502_v1 = vrot.slane %v1500_v59, 2  ;;  %v14624_v58 = vld [vmem:[%s20582_s1 + $0xe0c] ss:$16 sps:$4 sm:$0xff]   ;;  %v14619_v59 = vld [vmem:[%s20582_s1 + $0xe00] ss:$16 sps:$4 sm:$0xff]  }
  0x42   : > { %v179_v61 = vld [vmem:[%s16433_s30 + $0x34] sm:$0xff] }
  0x43   : > { %3630 = vmatpush1.bf16.msra.mxu0 %v14540_v4  ;;  %4176 = vmatpush1.bf16.msra.mxu1 %v14541_v7  ;;  %v14585_v4 = vld [vmem:[%s20582_s1 + $0xd64] ss:$16 sps:$4 sm:$0xff]   ;;  %v1503_v6 = vor.u32 %v1502_v1, %v1499_v0  ;;  %v1494_v7 = vor.u32 %v1493_v3, %v1490_v2  ;;  %v14633_v1 = vld [vmem:[%s20582_s1 + $0xe2c] ss:$16 sps:$4 sm:$0xff]  }
  0x44   : > { %3631 = vmatprep.subr.bf16.mxu0 %v14542_v8  ;;  %4177 = vmatprep.subr.bf16.mxu1 %v14544_v14  ;;  %v14583_v8 = vld [vmem:[%s20582_s1 + $0xd60] ss:$16 sps:$4 sm:$0xff]  }
  0x45   : > { %v1504_v10 = vsel %vm1200_vm0, %v1404_v48, %v1503_v6  ;;  %v1495_v14 = vsel %vm1200_vm0, %v1395_v49, %v1494_v7  ;;  %v14607_v48 = vld [vmem:[%s20582_s1 + $0xdc8] ss:$16 sps:$4 sm:$0xff]   ;;  %v14615_v49 = vld [vmem:[%s20582_s1 + $0xde4] ss:$16 sps:$4 sm:$0xff]  }
  0x46   : > { %v14670_v0 = vld [vmem:[%s16433_s30 + $0x64] ss:$44 sps:$4 sm:$0xff]  }
  0x47   : > { %3632 = vmatpush1.bf16.msra.mxu0 %v14546_v15  ;;  %4178 = vmatpush1.bf16.msra.mxu1 %v14547_v16  ;;  %v14594_v15 = vld [vmem:[%s20582_s1 + $0xd8c] ss:$16 sps:$4 sm:$0xff]   ;;  %v1596_v16 = vshrl.u32 %v14625_v11, 16  ;;  %v1261_v3 = vshrl.u32 %v14670_v0, 16 }
  0x48   : > { %3633 = vmatprep.subr.bf16.mxu0 %v14548_v17  ;;  %4179 = vmatprep.subr.bf16.mxu1 %v14550_v22  ;;  %v1599_v17 = vshll.u32 %v14625_v11, 16  ;;  %v14636_v11 = vld [vmem:[%s20582_s1 + $0xe44] ss:$16 sps:$4 sm:$0xff]  }
  0x49   : > { %v1598_v22 = vrot.slane %v1596_v16, 1 }
  0x4b   : > { %3634 = vmatpush1.bf16.msra.mxu0 %v14552_v23  ;;  %4180 = vmatpush1.bf16.msra.mxu1 %v14553_v24  ;;  %v1601_v23 = vrot.slane %v1599_v17, 2  ;;  %v1589_v24 = vrot.slane %v1587_v18, 1  ;;  %v14634_v17 = vld [vmem:[%s20582_s1 + $0xe40] ss:$16 sps:$4 sm:$0xff]   ;;  %v14637_v18 = vld [vmem:[%s20582_s1 + $0xe48] ss:$16 sps:$4 sm:$0xff]  }
  0x4c   : > { %3694 = vmatprep.subr.bf16.mxu0 %v14559_v25  ;;  %4240 = vmatprep.subr.bf16.mxu1 %v14562_v28  ;;  %v1592_v25 = vrot.slane %v1590_v19, 2  ;;  %v14644_v19 = vld [vmem:[%s20582_s1 + $0xe64] ss:$16 sps:$4 sm:$0xff]  }
  0x4d   : > { %v1602_v28 = vor.u32 %v1601_v23, %v1598_v22  ;;  %v14642_v22 = vld [vmem:[%s20582_s1 + $0xe60] ss:$16 sps:$4 sm:$0xff]  }
  0x4e   : > { %3636 = vmatmul.mubr.bf16.vlgmr.msra.gmra.mrb[0].mxu0 %v1217_v33  ;;  %4182 = vmatmul.mubr.bf16.vlgmr.msra.gmra.mrb[0].mxu1 %v1217_v33  ;;  %v14668_v23 = vld [vmem:[%s16433_s30 + $0x60] ss:$44 sps:$4 sm:$0xff]  }
  0x4f   : > { %3695 = vmatpush1.bf16.msra.mxu0 %v14557_v29  ;;  %4241 = vmatpush1.bf16.msra.mxu1 %v14560_v30  ;;  %v1593_v29 = vor.u32 %v1592_v25, %v1589_v24  ;;  %v14598_v30 = vld [vmem:[%s20582_s1 + $0xda0] ss:$16 sps:$4 sm:$0xff]   ;;  %v1603_v33 = vsel %vm1200_vm0, %v1503_v6, %v1602_v28  ;;  %v14645_v24 = vld [vmem:[%s20582_s1 + $0xe68] ss:$16 sps:$4 sm:$0xff]  }
  0x50   : > { %3696 = vmatprep.subr.bf16.mxu0 %v14567_v34  ;;  %4242 = vmatprep.subr.bf16.mxu1 %v14570_v35  ;;  %v12243_v34 = vcombine.high %v592_v31, %v592_v31  ;;  %v12242_v35 = vcombine.low %v592_v31, %v592_v31  ;;  %v14683_v31 = vld [vmem:[%s16433_s30 + $0xbc] ss:$44 sps:$4 sm:$0xff]  }
  0x51   : > { %3645 = vmatprep.mubr.bf16.mxu0 %v1405_v52  ;;  %4191 = vmatprep.mubr.bf16.mxu1 %v1405_v52  ;;  %v1594_v37 = vsel %vm1200_vm0, %v1494_v7, %v1593_v29  ;;  %v14628_v7 = vld [vmem:[%s20582_s1 + $0xe20] ss:$16 sps:$4 sm:$0xff]  }
  0x52   : > { %v1695_v39 = vshrl.u32 %v12243_v34, 16  ;;  %v1689_v42 = vshll.u32 %v12242_v35, 16 }
  0x53   : > { %3697 = vmatpush1.bf16.msra.mxu0 %v14565_v40  ;;  %4243 = vmatpush1.bf16.msra.mxu1 %v14568_v41  ;;  %v1698_v40 = vshll.u32 %v12243_v34, 16  ;;  %v1686_v41 = vshrl.u32 %v12242_v35, 16  ;;  %v14656_v35 = vld [vmem:[%s20582_s1 + $0xea4] ss:$16 sps:$4 sm:$0xff]  }
  0x54   : > { %3698 = vmatprep.subr.bf16.mxu0 %v14573_v46  ;;  %4244 = vmatprep.subr.bf16.mxu1 %v14576_v47  ;;  %v1697_v44 = vrot.slane %v1695_v39, 1  ;;  %v1691_v47 = vrot.slane %v1689_v42, 2  ;;  %v1419_v42 = vshll.u32 %v14683_v31, 16 }
  0x55   : > { %v1700_v45 = vrot.slane %v1698_v40, 2  ;;  %v1688_v46 = vrot.slane %v1686_v41, 1  ;;  %v1416_v41 = vshrl.u32 %v14683_v31, 16 }
  0x56   : > { %3646 = vmatmul.mubr.bf16.gmra.mrb[4].mxu0 %v1396_v56  ;;  %4192 = vmatmul.mubr.bf16.gmra.mrb[4].mxu1 %v1396_v56 }
  0x57   : > { %3699 = vmatpush1.bf16.msra.mxu0 %v14571_v50  ;;  %4245 = vmatpush1.bf16.msra.mxu1 %v14574_v51  ;;  %v14618_v50 = vld [vmem:[%s20582_s1 + $0xdec] ss:$16 sps:$4 sm:$0xff]   ;;  %v1701_v51 = vor.u32 %v1700_v45, %v1697_v44  ;;  %v1692_v52 = vor.u32 %v1691_v47, %v1688_v46  ;;  %v14685_v45 = vld [vmem:[%s16433_s30 + $0xb8] ss:$44 sps:$4 sm:$0xff]  }
  0x58   : > { %3700 = vmatprep.subr.bf16.mxu0 %v14579_v55  ;;  %4246 = vmatprep.subr.bf16.mxu1 %v14582_v57  ;;  %v14616_v55 = vld [vmem:[%s20582_s1 + $0xde8] ss:$16 sps:$4 sm:$0xff]   ;;  %v14621_v57 = vld [vmem:[%s20582_s1 + $0xe04] ss:$16 sps:$4 sm:$0xff]   ;;  %v14665_v47 = vld [vmem:[%s20582_s1 + $0xecc] ss:$16 sps:$4 sm:$0xff]  }
  0x59   : > { %3655 = vmatprep.mubr.bf16.mxu0 %v1504_v10  ;;  %4201 = vmatprep.mubr.bf16.mxu1 %v1504_v10  ;;  %v1702_v54 = vsel %vm1200_vm0, %v1602_v28, %v1701_v51  ;;  %v1693_v56 = vsel %vm1200_vm0, %v1593_v29, %v1692_v52  ;;  %v14648_v28 = vld [vmem:[%s20582_s1 + $0xe80] ss:$16 sps:$4 sm:$0xff]   ;;  %v1244_v29 = vshrl.u32 %v14668_v23, 16  ;;  %v14663_v52 = vld [vmem:[%s20582_s1 + $0xec8] ss:$16 sps:$4 sm:$0xff]  }
  0x5a   : > { %v14698_v51 = vld [vmem:[%s16433_s30 + $0x114] ss:$44 sps:$4 sm:$0xff]  }
  0x5b   : > { %3701 = vmatpush1.bf16.msra.mxu0 %v14577_v62  ;;  %4247 = vmatpush1.bf16.msra.mxu1 %v14580_v63  ;;  %v14630_v62 = vld [vmem:[%s20582_s1 + $0xe24] ss:$16 sps:$4 sm:$0xff]   ;;  %v587_v63 = vld [vmem:[%s16433_s30 + $0x8] sm:$0xee]  ;;  %v1246_v39 = vrot.slane %v1244_v29, 1 }
  0x5c   : > { %3702 = vmatprep.subr.bf16.mxu0 %v14585_v4  ;;  %4248 = vmatprep.subr.bf16.mxu1 %v14588_v5  ;;  %v12190_v2 = vcombine.high %v587_v63, %v179_v61  ;;  %v1264_v4 = vshll.u32 %v14670_v0, 16  ;;  %v12189_v25 = vcombine.low %v587_v63, %v179_v61  ;;  %v1518_v63 = vshll.u32 %v14698_v51, 16  ;;  %v14692_v29 = vld [vmem:[%s20582_s1 + $0xf40] ss:$16 sps:$4 sm:$0xff]  }
  0x5e   : > { %3656 = vmatmul.mubr.bf16.gmra.mrb[8].mxu0 %v1495_v14  ;;  %4202 = vmatmul.mubr.bf16.gmra.mrb[8].mxu1 %v1495_v14  ;;  %v1253_v5 = vshrl.u32 %v12190_v2, 16  ;;  %v1256_v6 = vshll.u32 %v12190_v2, 16  ;;  %v1266_v10 = vrot.slane %v1264_v4, 2  ;;  %v1239_v34 = vshll.u32 %v12189_v25, 16  ;;  %v14679_v4 = vld [vmem:[%s20582_s1 + $0xf04] ss:$16 sps:$4 sm:$0xff]  }
  0x5f   : > { %3703 = vmatpush1.bf16.msra.mxu0 %v14583_v8  ;;  %4249 = vmatpush1.bf16.msra.mxu1 %v14586_v9  ;;  %v14631_v8 = vld [vmem:[%s20582_s1 + $0xe28] ss:$16 sps:$4 sm:$0xff]   ;;  %v1263_v9 = vrot.slane %v1261_v3, 1  ;;  %v14700_v3 = vld [vmem:[%s16433_s30 + $0x110] ss:$44 sps:$4 sm:$0xff]  }
  0x60   : > { %3704 = vmatprep.subr.bf16.mxu0 %v14591_v13  ;;  %4250 = vmatprep.subr.bf16.mxu1 %v14594_v15  ;;  %v1255_v13 = vrot.slane %v1253_v5, 1  ;;  %v1258_v14 = vrot.slane %v1256_v6, 2  ;;  %v14682_v5 = vld [vmem:[%s20582_s1 + $0xf0c] ss:$16 sps:$4 sm:$0xff]   ;;  %v14677_v6 = vld [vmem:[%s20582_s1 + $0xf00] ss:$16 sps:$4 sm:$0xff]  }
  0x61   : > { %3665 = vmatprep.mubr.bf16.mxu0 %v1603_v33  ;;  %4211 = vmatprep.mubr.bf16.mxu1 %v1603_v33  ;;  %v16661_v15 = vor.u32 %v1266_v10, %v1263_v9  ;;  %v1236_v33 = vshrl.u32 %v12189_v25, 16  ;;  %v1520_v9 = vrot.slane %v1518_v63, 2  ;;  %v14713_v10 = vld [vmem:[%s16433_s30 + $0x16c] ss:$44 sps:$4 sm:$0xff]  }
  0x62   : > { %v1259_v16 = vor.u32 %v1258_v14, %v1255_v13  ;;  %v14688_v13 = vld [vmem:[%s20582_s1 + $0xf24] ss:$16 sps:$4 sm:$0xff]   ;;  %v1506_v14 = vshrl.u32 %v14700_v3, 16 }
  0x63   : > { %3705 = vmatpush1.bf16.msra.mxu0 %v14589_v20  ;;  %4251 = vmatpush1.bf16.msra.mxu1 %v14592_v21  ;;  %v14647_v20 = vld [vmem:[%s20582_s1 + $0xe6c] ss:$16 sps:$4 sm:$0xff]  }
  0x64   : > { %3706 = vmatprep.subr.bf16.mxu0 %v14600_v26  ;;  %4252 = vmatprep.subr.bf16.mxu1 %v14603_v27  ;;  %v1268_v21 = vsel %vm1200_vm0, %v1259_v16, %v16661_v15  ;;  %v14650_v26 = vld [vmem:[%s20582_s1 + $0xe84] ss:$16 sps:$4 sm:$0xff]   ;;  %v14653_v27 = vld [vmem:[%s20582_s1 + $0xe8c] ss:$16 sps:$4 sm:$0xff]   ;;  %v1509_v16 = vshll.u32 %v14700_v3, 16  ;;  %v1508_v25 = vrot.slane %v1506_v14, 1 }
  0x65   : > { %v14724_v3 = vld [vmem:[%s20582_s1 + $0xfc4] ss:$16 sps:$4 sm:$0xff]  }
  0x66   : > { %3666 = vmatmul.mubr.bf16.gmra.mrb[12].mxu0 %v1594_v37  ;;  %4212 = vmatmul.mubr.bf16.gmra.mrb[12].mxu1 %v1594_v37  ;;  %v14654_v37 = vld [vmem:[%s20582_s1 + $0xea0] ss:$16 sps:$4 sm:$0xff]  }
  0x67   : > { %3707 = vmatpush1.bf16.msra.mxu0 %v14598_v30  ;;  %4253 = vmatpush1.bf16.msra.mxu1 %v14601_v32  ;;  %v1247_v30 = vshll.u32 %v14668_v23, 16  ;;  %v14651_v32 = vld [vmem:[%s20582_s1 + $0xe88] ss:$16 sps:$4 sm:$0xff]  }
  0x68   : > { %3708 = vmatprep.subr.bf16.mxu0 %v14606_v36  ;;  %4254 = vmatprep.subr.bf16.mxu1 %v14609_v38  ;;  %v14659_v36 = vld [vmem:[%s20582_s1 + $0xeac] ss:$16 sps:$4 sm:$0xff]   ;;  %v14657_v38 = vld [vmem:[%s20582_s1 + $0xea8] ss:$16 sps:$4 sm:$0xff]  }
  0x69   : > { %3675 = vmatprep.mubr.bf16.mxu0 %v1702_v54  ;;  %4221 = vmatprep.mubr.bf16.mxu1 %v1702_v54  ;;  %v1249_v40 = vrot.slane %v1247_v30, 2  ;;  %v14715_v23 = vld [vmem:[%s16433_s30 + $0x168] ss:$44 sps:$4 sm:$0xff]  }
  0x6b   : > { %3709 = vmatpush1.bf16.msra.mxu0 %v14604_v43  ;;  %4255 = vmatpush1.bf16.msra.mxu1 %v14607_v48  ;;  %v1238_v43 = vrot.slane %v1236_v33, 1  ;;  %v14660_v48 = vld [vmem:[%s20582_s1 + $0xec0] ss:$16 sps:$4 sm:$0xff]   ;;  %v1250_v54 = vor.u32 %v1249_v40, %v1246_v39  ;;  %v14706_v39 = vld [vmem:[%s20582_s1 + $0xf6c] ss:$16 sps:$4 sm:$0xff]  }
  0x6c   : > { %3710 = vmatprep.subr.bf16.mxu0 %v14615_v49  ;;  %4256 = vmatprep.subr.bf16.mxu1 %v14618_v50  ;;  %v1418_v49 = vrot.slane %v1416_v41, 1  ;;  %v1421_v50 = vrot.slane %v1419_v42, 2  ;;  %v14701_v40 = vld [vmem:[%s20582_s1 + $0xf60] ss:$16 sps:$4 sm:$0xff]  }
  0x6e   : > { %3676 = vmatmul.mubr.bf16.gmra.mrb[16].mxu0 %v1693_v56  ;;  %4222 = vmatmul.mubr.bf16.gmra.mrb[16].mxu1 %v1693_v56  ;;  %v1410_v56 = vshll.u32 %v14685_v45, 16  ;;  %v1422_v61 = vor.u32 %v1421_v50, %v1418_v49  ;;  %v14709_v49 = vld [vmem:[%s20582_s1 + $0xf84] ss:$16 sps:$4 sm:$0xff]   ;;  %v14712_v50 = vld [vmem:[%s20582_s1 + $0xf8c] ss:$16 sps:$4 sm:$0xff]  }
  0x6f   : > { %3711 = vmatpush1.bf16.msra.mxu0 %v14613_v53  ;;  %4257 = vmatpush1.bf16.msra.mxu1 %v14616_v55  ;;  %v1407_v55 = vshrl.u32 %v14685_v45, 16  ;;  %v14704_v45 = vld [vmem:[%s20582_s1 + $0xf68] ss:$16 sps:$4 sm:$0xff]  }
  0x70   : > { %3712 = vmatprep.subr.bf16.mxu0 %v14621_v57  ;;  %4258 = vmatprep.subr.bf16.mxu1 %v14624_v58  ;;  %v14673_v57 = vld [vmem:[%s20582_s1 + $0xee4] ss:$16 sps:$4 sm:$0xff]   ;;  %v14676_v58 = vld [vmem:[%s20582_s1 + $0xeec] ss:$16 sps:$4 sm:$0xff]   ;;  %v1412_v2 = vrot.slane %v1410_v56, 2 }
  0x71   : > { %3685 = vmatprep.mubr.bf16.mxu0 %v1697_v44  ;;  %4231 = vmatprep.mubr.bf16.mxu1 %v1697_v44  ;;  %v1241_v44 = vrot.slane %v1239_v34, 2  ;;  %v14695_v34 = vld [vmem:[%s20582_s1 + $0xf48] ss:$16 sps:$4 sm:$0xff]  }
  0x73   : > { %3713 = vmatpush1.bf16.msra.mxu0 %v14619_v59  ;;  %4259 = vmatpush1.bf16.msra.mxu1 %v14622_v60  ;;  %v1242_v53 = vor.u32 %v1241_v44, %v1238_v43  ;;  %v14671_v59 = vld [vmem:[%s20582_s1 + $0xee0] ss:$16 sps:$4 sm:$0xff]   ;;  %v14674_v60 = vld [vmem:[%s20582_s1 + $0xee8] ss:$16 sps:$4 sm:$0xff]  }
  0x74   : > { %3714 = vmatprep.subr.bf16.mxu0 %v14630_v62  ;;  %4260 = vmatprep.subr.bf16.mxu1 %v14633_v1  ;;  %v1515_v62 = vshrl.u32 %v14698_v51, 16  ;;  %v1409_v1 = vrot.slane %v1407_v55, 1  ;;  %v14707_v51 = vld [vmem:[%s20582_s1 + $0xf80] ss:$16 sps:$4 sm:$0xff]   ;;  %v14710_v55 = vld [vmem:[%s20582_s1 + $0xf88] ss:$16 sps:$4 sm:$0xff]  }
  0x75   : > { %v1251_v0 = vsel %vm1200_vm0, %v1242_v53, %v1250_v54 }
  0x76   : > { %3686 = vmatmul.mubr.bf16.gmra.mrb[20].mxu0 %v1688_v46  ;;  %4232 = vmatmul.mubr.bf16.gmra.mrb[20].mxu1 %v1688_v46  ;;  %v14662_v46 = vld [vmem:[%s20582_s1 + $0xec4] ss:$16 sps:$4 sm:$0xff]  }
  0x77   : > { %3715 = vmatpush1.bf16.msra.mxu0 %v14628_v7  ;;  %4261 = vmatpush1.bf16.msra.mxu1 %v14631_v8  ;;  %v1423_v7 = vsel %vm1200_vm0, %v16661_v15, %v1422_v61  ;;  %v1517_v8 = vrot.slane %v1515_v62, 1  ;;  %v14691_v15 = vld [vmem:[%s20582_s1 + $0xf2c] ss:$16 sps:$4 sm:$0xff]  }
  0x78   : > { %3716 = vmatprep.subr.bf16.mxu0 %v14636_v11  ;;  %4262 = vmatprep.subr.bf16.mxu1 %v14639_v12  ;;  %v14680_v11 = vld [vmem:[%s20582_s1 + $0xf08] ss:$16 sps:$4 sm:$0xff]   ;;  %v1413_v12 = vor.u32 %v1412_v2, %v1409_v1 }
  0x79   : > { %3726 = vmatprep.mubr.bf16.mxu0 %v1268_v21  ;;  %4272 = vmatprep.mubr.bf16.mxu1 %v1268_v21  ;;  %v1614_v21 = vshrl.u32 %v14713_v10, 16 }
  0x7b   : > { %3717 = vmatpush1.bf16.msra.mxu0 %v14634_v17  ;;  %4263 = vmatpush1.bf16.msra.mxu1 %v14637_v18  ;;  %v14686_v17 = vld [vmem:[%s20582_s1 + $0xf20] ss:$16 sps:$4 sm:$0xff]   ;;  %v14689_v18 = vld [vmem:[%s20582_s1 + $0xf28] ss:$16 sps:$4 sm:$0xff]   ;;  %v1616_v31 = vrot.slane %v1614_v21, 1 }
  0x7c   : > { %3718 = vmatprep.subr.bf16.mxu0 %v14644_v19  ;;  %4264 = vmatprep.subr.bf16.mxu1 %v14647_v20  ;;  %v14694_v19 = vld [vmem:[%s20582_s1 + $0xf44] ss:$16 sps:$4 sm:$0xff]   ;;  %v1521_v20 = vor.u32 %v1520_v9, %v1517_v8  ;;  %v16838_v8 = vld [vmem:[%s16433_s30 + $0x3c] sm:$0xff]  ;;  %v14733_v21 = vld [vmem:[%s20582_s1 + $0xfe8] ss:$16 sps:$4 sm:$0xff]  }
  0x7e   : > { %v1522_v30 = vsel %vm1200_vm0, %v1422_v61, %v1521_v20  ;;  %v14716_v61 = vld [vmem:[%s20582_s1 + $0xfa0] ss:$16 sps:$4 sm:$0xff]  }
  0x7f   : > { %3719 = vmatpush1.bf16.msra.mxu0 %v14642_v22  ;;  %4265 = vmatpush1.bf16.msra.mxu1 %v14645_v24  ;;  %v1617_v22 = vshll.u32 %v14713_v10, 16  ;;  %v1414_v24 = vsel %vm1200_vm0, %v1250_v54, %v1413_v12  ;;  %v14732_v10 = vld [vmem:[%s20582_s1 + $0xfe4] ss:$16 sps:$4 sm:$0xff]  }
  0x80   : > { %3720 = vmatprep.subr.bf16.mxu0 %v14650_v26  ;;  %4266 = vmatprep.subr.bf16.mxu1 %v14653_v27  ;;  %v1511_v26 = vrot.slane %v1509_v16, 2  ;;  %v593_v27 = vld [vmem:[%s16433_s30 + $0x1c0] sm:$0x33] }
  0x81   : > { %v12245_v33 = vcombine.high %v593_v27, %v593_v27 }
  0x83   : > { %3721 = vmatpush1.bf16.msra.mxu0 %v14648_v28  ;;  %4267 = vmatpush1.bf16.msra.mxu1 %v14651_v32  ;;  %v14697_v28 = vld [vmem:[%s20582_s1 + $0xf4c] ss:$16 sps:$4 sm:$0xff]   ;;  %v1619_v32 = vrot.slane %v1617_v22, 2  ;;  %v1713_v42 = vshrl.u32 %v12245_v33, 16  ;;  %v1716_v43 = vshll.u32 %v12245_v33, 16 }
  0x84   : > { %3722 = vmatprep.subr.bf16.mxu0 %v14656_v35  ;;  %4268 = vmatprep.subr.bf16.mxu1 %v14659_v36  ;;  %v1512_v35 = vor.u32 %v1511_v26, %v1508_v25  ;;  %v1605_v36 = vshrl.u32 %v14715_v23, 16  ;;  %v14738_v22 = vld [vmem:[%s20582_s1 + $0x1004] ss:$16 sps:$4 sm:$0xff]  }
  0x85   : > { %v1620_v41 = vor.u32 %v1619_v32, %v1616_v31  ;;  %v16803_v53 = vrot.slane %v1713_v42, 1  ;;  %v1718_v54 = vrot.slane %v1716_v43, 2  ;;  %v14747_v31 = vld [vmem:[%s20582_s1 + $0x102c] ss:$16 sps:$4 sm:$0xff]   ;;  %v14742_v32 = vld [vmem:[%s20582_s1 + $0x1020] ss:$16 sps:$4 sm:$0xff]  }
  0x86   : > { %v1513_v44 = vsel %vm1200_vm0, %v1413_v12, %v1512_v35  ;;  %v14782_v12 = vld [vmem:[%s16433_s30 + $0x6c] ss:$44 sps:$4 sm:$0xff]   ;;  %v14754_v43 = vld [vmem:[%s20582_s1 + $0x1060] ss:$16 sps:$4 sm:$0xff]  }
  0x87   : > { %3723 = vmatpush1.bf16.msra.mxu0 %v14654_v37  ;;  %4269 = vmatpush1.bf16.msra.mxu1 %v14657_v38  ;;  %v1608_v37 = vshll.u32 %v14715_v23, 16  ;;  %v14703_v38 = vld [vmem:[%s20582_s1 + $0xf64] ss:$16 sps:$4 sm:$0xff]   ;;  %v1719_v62 = vor.u32 %v1718_v54, %v16803_v53  ;;  %v14741_v23 = vld [vmem:[%s20582_s1 + $0x100c] ss:$16 sps:$4 sm:$0xff]  }
  0x88   : > { %3724 = vmatprep.subr.bf16.mxu0 %v14662_v46  ;;  %4270 = vmatprep.subr.bf16.mxu1 %v14665_v47  ;;  %v1607_v46 = vrot.slane %v1605_v36, 1  ;;  %v14750_v36 = vld [vmem:[%s20582_s1 + $0x1044] ss:$16 sps:$4 sm:$0xff]   ;;  %v14759_v42 = vld [vmem:[%s20582_s1 + $0x106c] ss:$16 sps:$4 sm:$0xff]  }
  0x89   : > { %v1610_v47 = vrot.slane %v1608_v37, 2  ;;  %v14753_v37 = vld [vmem:[%s20582_s1 + $0x104c] ss:$16 sps:$4 sm:$0xff]  }
  0x8b   : > { %3725 = vmatpush1.bf16.msra.mxu0 %v14660_v48  ;;  %4271 = vmatpush1.bf16.msra.mxu1 %v14663_v52  ;;  %v12244_v48 = vcombine.low %v593_v27, %v593_v27  ;;  %v1621_v52 = vsel %vm1200_vm0, %v1521_v20, %v1620_v41  ;;  %v1611_v56 = vor.u32 %v1610_v47, %v1607_v46  ;;  %v14730_v20 = vld [vmem:[%s20582_s1 + $0xfe0] ss:$16 sps:$4 sm:$0xff]   ;;  %v14762_v47 = vld [vmem:[%s20582_s1 + $0x1084] ss:$16 sps:$4 sm:$0xff]  }
  0x8c   : > { %3785 = vmatprep.subr.bf16.mxu0 %v14673_v57  ;;  %4331 = vmatprep.subr.bf16.mxu1 %v14676_v58 }
  0x8d   : > { %v1704_v57 = vshrl.u32 %v12244_v48, 16  ;;  %v1707_v58 = vshll.u32 %v12244_v48, 16  ;;  %v1612_v63 = vsel %vm1200_vm0, %v1512_v35, %v1611_v56  ;;  %v14745_v35 = vld [vmem:[%s20582_s1 + $0x1028] ss:$16 sps:$4 sm:$0xff]   ;;  %v14765_v48 = vld [vmem:[%s20582_s1 + $0x108c] ss:$16 sps:$4 sm:$0xff]  }
  0x8e   : > { %3727 = vmatmul.mubr.bf16.vlgmr.msra.gmra.mrb[0].mxu0 %v1251_v0  ;;  %4273 = vmatmul.mubr.bf16.vlgmr.msra.gmra.mrb[0].mxu1 %v1251_v0  ;;  %v14719_v0 = vld [vmem:[%s20582_s1 + $0xfa8] ss:$16 sps:$4 sm:$0xff]  }
  0x8f   : > { %3786 = vmatpush1.bf16.msra.mxu0 %v14671_v59  ;;  %4332 = vmatpush1.bf16.msra.mxu1 %v14674_v60  ;;  %v14718_v59 = vld [vmem:[%s20582_s1 + $0xfa4] ss:$16 sps:$4 sm:$0xff]   ;;  %v14721_v60 = vld [vmem:[%s20582_s1 + $0xfac] ss:$16 sps:$4 sm:$0xff]   ;;  %v16822_v1 = vrot.slane %v1704_v57, 1  ;;  %v1709_v2 = vrot.slane %v1707_v58, 2 }
  0x90   : > { %3787 = vmatprep.subr.bf16.mxu0 %v14679_v4  ;;  %4333 = vmatprep.subr.bf16.mxu1 %v14682_v5  ;;  %v14727_v4 = vld [vmem:[%s20582_s1 + $0xfcc] ss:$16 sps:$4 sm:$0xff]   ;;  %v14722_v5 = vld [vmem:[%s20582_s1 + $0xfc0] ss:$16 sps:$4 sm:$0xff]  }
  0x91   : > { %3736 = vmatprep.mubr.bf16.mxu0 %v1423_v7  ;;  %4282 = vmatprep.mubr.bf16.mxu1 %v1423_v7  ;;  %v1720_v7 = vsel %vm1200_vm0, %v1620_v41, %v1719_v62  ;;  %v1710_v9 = vor.u32 %v1709_v2, %v16822_v1  ;;  %v14756_v41 = vld [vmem:[%s20582_s1 + $0x1064] ss:$16 sps:$4 sm:$0xff]   ;;  %v14771_v57 = vld [vmem:[%s20582_s1 + $0x10ac] ss:$16 sps:$4 sm:$0xff]   ;;  %v14766_v58 = vld [vmem:[%s20582_s1 + $0x10a0] ss:$16 sps:$4 sm:$0xff]  }
  0x92   : > { %v14797_v2 = vld [vmem:[%s16433_s30 + $0xc0] ss:$44 sps:$4 sm:$0xff]  }
  0x93   : > { %3788 = vmatpush1.bf16.msra.mxu0 %v14677_v6  ;;  %4334 = vmatpush1.bf16.msra.mxu1 %v14680_v11  ;;  %v14725_v6 = vld [vmem:[%s20582_s1 + $0xfc8] ss:$16 sps:$4 sm:$0xff]   ;;  %v16845_v11 = vld [vmem:[%s16433_s30 + $0x10] sm:$0xee] }
  0x94   : > { %3789 = vmatprep.subr.bf16.mxu0 %v14688_v13  ;;  %4335 = vmatprep.subr.bf16.mxu1 %v14691_v15  ;;  %v14735_v13 = vld [vmem:[%s20582_s1 + $0xfec] ss:$16 sps:$4 sm:$0xff]   ;;  %v12192_v14 = vcombine.high %v16845_v11, %v16838_v8  ;;  %v12191_v46 = vcombine.low %v16845_v11, %v16838_v8 }
  0x95   : > { %v14810_v8 = vld [vmem:[%s16433_s30 + $0x11c] ss:$44 sps:$4 sm:$0xff]  }
  0x96   : > { %3737 = vmatmul.mubr.bf16.gmra.mrb[4].mxu0 %v1414_v24  ;;  %4283 = vmatmul.mubr.bf16.gmra.mrb[4].mxu1 %v1414_v24  ;;  %v1287_v16 = vshrl.u32 %v12192_v14, 16  ;;  %v1290_v15 = vshll.u32 %v12192_v14, 16  ;;  %v1270_v54 = vshrl.u32 %v12191_v46, 16  ;;  %v1428_v14 = vshll.u32 %v14797_v2, 16 }
  0x97   : > { %3790 = vmatpush1.bf16.msra.mxu0 %v14686_v17  ;;  %4336 = vmatpush1.bf16.msra.mxu1 %v14689_v18  ;;  %v1295_v17 = vshrl.u32 %v14782_v12, 16  ;;  %v1298_v18 = vshll.u32 %v14782_v12, 16  ;;  %v14785_v12 = vld [vmem:[%s20582_s1 + $0x10e4] ss:$16 sps:$4 sm:$0xff]  }
  0x98   : > { %3791 = vmatprep.subr.bf16.mxu0 %v14694_v19  ;;  %4337 = vmatprep.subr.bf16.mxu1 %v14697_v28  ;;  %v1711_v19 = vsel %vm1200_vm0, %v1611_v56, %v1710_v9  ;;  %v1289_v24 = vrot.slane %v1287_v16, 1  ;;  %v1292_v25 = vrot.slane %v1290_v15, 2  ;;  %v14736_v28 = vld [vmem:[%s20582_s1 + $0x1000] ss:$16 sps:$4 sm:$0xff]   ;;  %v14768_v56 = vld [vmem:[%s20582_s1 + $0x10a4] ss:$16 sps:$4 sm:$0xff]  }
  0x99   : > { %3746 = vmatprep.mubr.bf16.mxu0 %v1522_v30  ;;  %4292 = vmatprep.mubr.bf16.mxu1 %v1522_v30  ;;  %v1297_v26 = vrot.slane %v1295_v17, 1  ;;  %v1300_v27 = vrot.slane %v1298_v18, 2  ;;  %v14744_v30 = vld [vmem:[%s20582_s1 + $0x1024] ss:$16 sps:$4 sm:$0xff]   ;;  %v14775_v9 = vld [vmem:[%s20582_s1 + $0x10c8] ss:$16 sps:$4 sm:$0xff]  }
  0x9a   : > { %v1293_v33 = vor.u32 %v1292_v25, %v1289_v24  ;;  %v14788_v16 = vld [vmem:[%s20582_s1 + $0x10ec] ss:$16 sps:$4 sm:$0xff]   ;;  %v14783_v15 = vld [vmem:[%s20582_s1 + $0x10e0] ss:$16 sps:$4 sm:$0xff]   ;;  %v14786_v17 = vld [vmem:[%s20582_s1 + $0x10e8] ss:$16 sps:$4 sm:$0xff]  }
  0x9b   : > { %3792 = vmatpush1.bf16.msra.mxu0 %v14692_v29  ;;  %4338 = vmatpush1.bf16.msra.mxu1 %v14695_v34  ;;  %v14739_v29 = vld [vmem:[%s20582_s1 + $0x1008] ss:$16 sps:$4 sm:$0xff]   ;;  %v16883_v34 = vor.u32 %v1300_v27, %v1297_v26  ;;  %v14791_v18 = vld [vmem:[%s20582_s1 + $0x1104] ss:$16 sps:$4 sm:$0xff]   ;;  %v1430_v24 = vrot.slane %v1428_v14, 2 }
  0x9c   : > { %3793 = vmatprep.subr.bf16.mxu0 %v14703_v38  ;;  %4339 = vmatprep.subr.bf16.mxu1 %v14706_v39  ;;  %v14748_v39 = vld [vmem:[%s20582_s1 + $0x1040] ss:$16 sps:$4 sm:$0xff]   ;;  %v14812_v25 = vld [vmem:[%s16433_s30 + $0x118] ss:$44 sps:$4 sm:$0xff]   ;;  %v14794_v26 = vld [vmem:[%s20582_s1 + $0x110c] ss:$16 sps:$4 sm:$0xff]  }
  0x9d   : > { %v1302_v38 = vsel %vm1200_vm0, %v1293_v33, %v16883_v34  ;;  %v14789_v27 = vld [vmem:[%s20582_s1 + $0x1100] ss:$16 sps:$4 sm:$0xff]   ;;  %v14830_v14 = vld [vmem:[%s20582_s1 + $0x11a4] ss:$16 sps:$4 sm:$0xff]  }
  0x9e   : > { %3747 = vmatmul.mubr.bf16.gmra.mrb[8].mxu0 %v1513_v44  ;;  %4293 = vmatmul.mubr.bf16.gmra.mrb[8].mxu1 %v1513_v44  ;;  %v14780_v44 = vld [vmem:[%s16433_s30 + $0x68] ss:$44 sps:$4 sm:$0xff]  }
  0x9f   : > { %3794 = vmatpush1.bf16.msra.mxu0 %v14701_v40  ;;  %4340 = vmatpush1.bf16.msra.mxu1 %v14704_v45  ;;  %v14751_v40 = vld [vmem:[%s20582_s1 + $0x1048] ss:$16 sps:$4 sm:$0xff]  }
  0xa0   : > { %3795 = vmatprep.subr.bf16.mxu0 %v14709_v49  ;;  %4341 = vmatprep.subr.bf16.mxu1 %v14712_v50  ;;  %v14757_v45 = vld [vmem:[%s20582_s1 + $0x1068] ss:$16 sps:$4 sm:$0xff]   ;;  %v14760_v49 = vld [vmem:[%s20582_s1 + $0x1080] ss:$16 sps:$4 sm:$0xff]   ;;  %v1278_v50 = vshrl.u32 %v14780_v44, 16 }
  0xa1   : > { %3756 = vmatprep.mubr.bf16.mxu0 %v1621_v52  ;;  %4302 = vmatprep.mubr.bf16.mxu1 %v1621_v52  ;;  %v14795_v52 = vld [vmem:[%s16433_s30 + $0xc4] ss:$44 sps:$4 sm:$0xff]  }
  0xa2   : > { %v1434_v62 = vshrl.u32 %v14795_v52, 16 }
  0xa3   : > { %3796 = vmatpush1.bf16.msra.mxu0 %v14707_v51  ;;  %4342 = vmatpush1.bf16.msra.mxu1 %v14710_v55  ;;  %v1281_v51 = vshll.u32 %v14780_v44, 16  ;;  %v1273_v55 = vshll.u32 %v12191_v46, 16 }
  0xa4   : > { %3797 = vmatprep.subr.bf16.mxu0 %v14718_v59  ;;  %4343 = vmatprep.subr.bf16.mxu1 %v14721_v60  ;;  %v14769_v59 = vld [vmem:[%s20582_s1 + $0x10a8] ss:$16 sps:$4 sm:$0xff]   ;;  %v1280_v60 = vrot.slane %v1278_v50, 1  ;;  %v14804_v50 = vld [vmem:[%s20582_s1 + $0x1140] ss:$16 sps:$4 sm:$0xff]  }
  0xa6   : > { %3757 = vmatmul.mubr.bf16.gmra.mrb[12].mxu0 %v1612_v63  ;;  %4303 = vmatmul.mubr.bf16.gmra.mrb[12].mxu1 %v1612_v63  ;;  %v1437_v63 = vshll.u32 %v14795_v52, 16 }
  0xa7   : > { %3798 = vmatpush1.bf16.msra.mxu0 %v14716_v61  ;;  %4344 = vmatpush1.bf16.msra.mxu1 %v14719_v0  ;;  %v1283_v61 = vrot.slane %v1281_v51, 2  ;;  %v1272_v0 = vrot.slane %v1270_v54, 1 }
  0xa8   : > { %3799 = vmatprep.subr.bf16.mxu0 %v14724_v3  ;;  %4345 = vmatprep.subr.bf16.mxu1 %v14727_v4  ;;  %v14774_v3 = vld [vmem:[%s20582_s1 + $0x10c4] ss:$16 sps:$4 sm:$0xff]   ;;  %v14777_v4 = vld [vmem:[%s20582_s1 + $0x10cc] ss:$16 sps:$4 sm:$0xff]  }
  0xa9   : > { %3766 = vmatprep.mubr.bf16.mxu0 %v1720_v7  ;;  %4312 = vmatprep.mubr.bf16.mxu1 %v1720_v7  ;;  %v1439_v7 = vrot.slane %v1437_v63, 2  ;;  %v1284_v11 = vor.u32 %v1283_v61, %v1280_v60  ;;  %v14818_v60 = vld [vmem:[%s20582_s1 + $0x116c] ss:$16 sps:$4 sm:$0xff]   ;;  %v14813_v61 = vld [vmem:[%s20582_s1 + $0x1160] ss:$16 sps:$4 sm:$0xff]  }
  0xab   : > { %3800 = vmatpush1.bf16.msra.mxu0 %v14722_v5  ;;  %4346 = vmatpush1.bf16.msra.mxu1 %v14725_v6  ;;  %v14772_v5 = vld [vmem:[%s20582_s1 + $0x10c0] ss:$16 sps:$4 sm:$0xff]   ;;  %v1436_v6 = vrot.slane %v1434_v62, 1 }
  0xac   : > { %3801 = vmatprep.subr.bf16.mxu0 %v14732_v10  ;;  %4347 = vmatprep.subr.bf16.mxu1 %v14735_v13  ;;  %v1425_v13 = vshrl.u32 %v14797_v2, 16  ;;  %v14816_v2 = vld [vmem:[%s20582_s1 + $0x1168] ss:$16 sps:$4 sm:$0xff]  }
  0xae   : > { %3767 = vmatmul.mubr.bf16.gmra.mrb[16].mxu0 %v1711_v19  ;;  %4313 = vmatmul.mubr.bf16.gmra.mrb[16].mxu1 %v1711_v19  ;;  %v1440_v19 = vor.u32 %v1439_v7, %v1436_v6  ;;  %v14821_v6 = vld [vmem:[%s20582_s1 + $0x1184] ss:$16 sps:$4 sm:$0xff]   ;;  %v14824_v7 = vld [vmem:[%s20582_s1 + $0x118c] ss:$16 sps:$4 sm:$0xff]  }
  0xaf   : > { %3802 = vmatpush1.bf16.msra.mxu0 %v14730_v20  ;;  %4348 = vmatpush1.bf16.msra.mxu1 %v14733_v21  ;;  %v1533_v20 = vshrl.u32 %v14810_v8, 16  ;;  %v1536_v21 = vshll.u32 %v14810_v8, 16  ;;  %v14819_v8 = vld [vmem:[%s20582_s1 + $0x1180] ss:$16 sps:$4 sm:$0xff]  }
  0xb0   : > { %3803 = vmatprep.subr.bf16.mxu0 %v14738_v22  ;;  %4349 = vmatprep.subr.bf16.mxu1 %v14741_v23  ;;  %v1427_v23 = vrot.slane %v1425_v13, 1 }
  0xb1   : > { %3776 = vmatprep.mubr.bf16.mxu0 %v16803_v53  ;;  %4322 = vmatprep.mubr.bf16.mxu1 %v16803_v53  ;;  %v14763_v53 = vld [vmem:[%s20582_s1 + $0x1088] ss:$16 sps:$4 sm:$0xff]  }
  0xb2   : > { %v1431_v33 = vor.u32 %v1430_v24, %v1427_v23  ;;  %v17060_v24 = vld [vmem:[%s16433_s30 + $0x44] sm:$0xff] }
  0xb3   : > { %3804 = vmatpush1.bf16.msra.mxu0 %v14736_v28  ;;  %4350 = vmatpush1.bf16.msra.mxu1 %v14739_v29  ;;  %v1441_v28 = vsel %vm1200_vm0, %v16883_v34, %v1440_v19  ;;  %v1535_v29 = vrot.slane %v1533_v20, 1  ;;  %v14800_v34 = vld [vmem:[%s20582_s1 + $0x1124] ss:$16 sps:$4 sm:$0xff]  }
  0xb4   : > { %3805 = vmatprep.subr.bf16.mxu0 %v14744_v30  ;;  %4351 = vmatprep.subr.bf16.mxu1 %v14747_v31  ;;  %v1538_v30 = vrot.slane %v1536_v21, 2  ;;  %v14825_v31 = vld [vmem:[%s16433_s30 + $0x174] ss:$44 sps:$4 sm:$0xff]   ;;  %v1432_v44 = vsel %vm1200_vm0, %v1284_v11, %v1431_v33 }
  0xb6   : > { %3777 = vmatmul.mubr.bf16.gmra.mrb[24].mxu0 %v16822_v1  ;;  %4323 = vmatmul.mubr.bf16.gmra.mrb[24].mxu1 %v16822_v1  ;;  %v1275_v1 = vrot.slane %v1273_v55, 2  ;;  %v14807_v55 = vld [vmem:[%s20582_s1 + $0x1148] ss:$16 sps:$4 sm:$0xff]  }
  0xb7   : > { %3806 = vmatpush1.bf16.msra.mxu0 %v14742_v32  ;;  %4352 = vmatpush1.bf16.msra.mxu1 %v14745_v35  ;;  %v14792_v32 = vld [vmem:[%s20582_s1 + $0x1108] ss:$16 sps:$4 sm:$0xff]   ;;  %v1524_v35 = vshrl.u32 %v14812_v25, 16 }
  0xb8   : > { %3807 = vmatprep.subr.bf16.mxu0 %v14750_v36  ;;  %4353 = vmatprep.subr.bf16.mxu1 %v14753_v37  ;;  %v1276_v10 = vor.u32 %v1275_v1, %v1272_v0  ;;  %v1527_v36 = vshll.u32 %v14812_v25, 16  ;;  %v14803_v37 = vld [vmem:[%s20582_s1 + $0x112c] ss:$16 sps:$4 sm:$0xff]  }
  0xb9   : > { %3817 = vmatprep.mubr.bf16.mxu0 %v1302_v38  ;;  %4363 = vmatprep.mubr.bf16.mxu1 %v1302_v38  ;;  %v14798_v38 = vld [vmem:[%s20582_s1 + $0x1120] ss:$16 sps:$4 sm:$0xff]   ;;  %v17063_v25 = vld [vmem:[%s16433_s30 + $0x18] sm:$0xee] }
  0xba   : > { %v1285_v22 = vsel %vm1200_vm0, %v1276_v10, %v1284_v11  ;;  %v1529_v46 = vrot.slane %v1527_v36, 2  ;;  %v14847_v36 = vld [vmem:[%s20582_s1 + $0x11ec] ss:$16 sps:$4 sm:$0xff]  }
  0xbb   : > { %3808 = vmatpush1.bf16.msra.mxu0 %v14748_v39  ;;  %4354 = vmatpush1.bf16.msra.mxu1 %v14751_v40  ;;  %v14801_v39 = vld [vmem:[%s20582_s1 + $0x1128] ss:$16 sps:$4 sm:$0xff]   ;;  %v1539_v40 = vor.u32 %v1538_v30, %v1535_v29  ;;  %v12194_v29 = vcombine.high %v17063_v25, %v17060_v24  ;;  %v14894_v30 = vld [vmem:[%s16433_s30 + $0x74] ss:$44 sps:$4 sm:$0xff]  }
  0xbc   : > { %3809 = vmatprep.subr.bf16.mxu0 %v14756_v41  ;;  %4355 = vmatprep.subr.bf16.mxu1 %v14759_v42  ;;  %v1632_v41 = vshrl.u32 %v14825_v31, 16  ;;  %v1635_v42 = vshll.u32 %v14825_v31, 16  ;;  %v14834_v31 = vld [vmem:[%s20582_s1 + $0x11c0] ss:$16 sps:$4 sm:$0xff]  }
  0xbd   : > { %v1540_v51 = vsel %vm1200_vm0, %v1440_v19, %v1539_v40  ;;  %v14831_v19 = vld [vmem:[%s20582_s1 + $0x11a8] ss:$16 sps:$4 sm:$0xff]  }
  0xbe   : > { %v1634_v52 = vrot.slane %v1632_v41, 1 }
  0xbf   : > { %3810 = vmatpush1.bf16.msra.mxu0 %v14754_v43  ;;  %4356 = vmatpush1.bf16.msra.mxu1 %v14757_v45  ;;  %v14827_v43 = vld [vmem:[%s16433_s30 + $0x170] ss:$44 sps:$4 sm:$0xff]   ;;  %v1526_v45 = vrot.slane %v1524_v35, 1  ;;  %v14844_v35 = vld [vmem:[%s20582_s1 + $0x11e4] ss:$16 sps:$4 sm:$0xff]  }
  0xc0   : > { %3811 = vmatprep.subr.bf16.mxu0 %v14762_v47  ;;  %4357 = vmatprep.subr.bf16.mxu1 %v14765_v48  ;;  %v594_v47 = vld [vmem:[%s16433_s30 + $0x1c8] sm:$0x33]  ;;  %v14806_v48 = vld [vmem:[%s20582_s1 + $0x1144] ss:$16 sps:$4 sm:$0xff]  }
  0xc1   : > { %v12247_v54 = vcombine.high %v594_v47, %v594_v47 }
  0xc3   : > { %3812 = vmatpush1.bf16.msra.mxu0 %v14760_v49  ;;  %4358 = vmatpush1.bf16.msra.mxu1 %v14763_v53  ;;  %v14809_v49 = vld [vmem:[%s20582_s1 + $0x114c] ss:$16 sps:$4 sm:$0xff]   ;;  %v1637_v53 = vrot.slane %v1635_v42, 2  ;;  %v1731_v63 = vshrl.u32 %v12247_v54, 16  ;;  %v1734_v0 = vshll.u32 %v12247_v54, 16 }
  0xc4   : > { %3813 = vmatprep.subr.bf16.mxu0 %v14768_v56  ;;  %4359 = vmatprep.subr.bf16.mxu1 %v14771_v57  ;;  %v1530_v56 = vor.u32 %v1529_v46, %v1526_v45  ;;  %v1623_v57 = vshrl.u32 %v14827_v43, 16  ;;  %v14845_v42 = vld [vmem:[%s20582_s1 + $0x11e8] ss:$16 sps:$4 sm:$0xff]  }
  0xc5   : > { %v1638_v62 = vor.u32 %v1637_v53, %v1634_v52  ;;  %v17038_v10 = vrot.slane %v1731_v63, 1  ;;  %v1736_v11 = vrot.slane %v1734_v0, 2  ;;  %v14859_v52 = vld [vmem:[%s20582_s1 + $0x122c] ss:$16 sps:$4 sm:$0xff]   ;;  %v14854_v53 = vld [vmem:[%s20582_s1 + $0x1220] ss:$16 sps:$4 sm:$0xff]  }
  0xc6   : > { %v1531_v1 = vsel %vm1200_vm0, %v1431_v33, %v1530_v56  ;;  %v14871_v63 = vld [vmem:[%s20582_s1 + $0x126c] ss:$16 sps:$4 sm:$0xff]   ;;  %v14866_v0 = vld [vmem:[%s20582_s1 + $0x1260] ss:$16 sps:$4 sm:$0xff]  }
  0xc7   : > { %3814 = vmatpush1.bf16.msra.mxu0 %v14766_v58  ;;  %4360 = vmatpush1.bf16.msra.mxu1 %v14769_v59  ;;  %v1626_v58 = vshll.u32 %v14827_v43, 16  ;;  %v14815_v59 = vld [vmem:[%s20582_s1 + $0x1164] ss:$16 sps:$4 sm:$0xff]   ;;  %v1737_v20 = vor.u32 %v1736_v11, %v17038_v10 }
  0xc8   : > { %3815 = vmatprep.subr.bf16.mxu0 %v14774_v3  ;;  %4361 = vmatprep.subr.bf16.mxu1 %v14777_v4  ;;  %v1625_v3 = vrot.slane %v1623_v57, 1  ;;  %v14850_v43 = vld [vmem:[%s20582_s1 + $0x1204] ss:$16 sps:$4 sm:$0xff]  }
  0xc9   : > { %v1628_v4 = vrot.slane %v1626_v58, 2  ;;  %v14862_v57 = vld [vmem:[%s20582_s1 + $0x1244] ss:$16 sps:$4 sm:$0xff]   ;;  %v14865_v58 = vld [vmem:[%s20582_s1 + $0x124c] ss:$16 sps:$4 sm:$0xff]  }
  0xca   : > { %v14880_v11 = vld [vmem:[%s20582_s1 + $0x12a4] ss:$16 sps:$4 sm:$0xff]  }
  0xcb   : > { %3816 = vmatpush1.bf16.msra.mxu0 %v14772_v5  ;;  %4362 = vmatpush1.bf16.msra.mxu1 %v14775_v9  ;;  %v12246_v5 = vcombine.low %v594_v47, %v594_v47  ;;  %v1639_v9 = vsel %vm1200_vm0, %v1539_v40, %v1638_v62  ;;  %v1629_v13 = vor.u32 %v1628_v4, %v1625_v3  ;;  %v1332_v40 = vshll.u32 %v14894_v30, 16  ;;  %v14874_v4 = vld [vmem:[%s20582_s1 + $0x1284] ss:$16 sps:$4 sm:$0xff]  }
  0xcc   : > { %3876 = vmatprep.subr.bf16.mxu0 %v14785_v12  ;;  %4422 = vmatprep.subr.bf16.mxu1 %v14788_v16  ;;  %v14822_v12 = vld [vmem:[%s20582_s1 + $0x1188] ss:$16 sps:$4 sm:$0xff]   ;;  %v12193_v3 = vcombine.low %v17063_v25, %v17060_v24  ;;  %v14889_v25 = vld [vmem:[%s20582_s1 + $0x12cc] ss:$16 sps:$4 sm:$0xff]  }
  0xcd   : > { %v1722_v16 = vshrl.u32 %v12246_v5, 16  ;;  %v1630_v21 = vsel %vm1200_vm0, %v1530_v56, %v1629_v13  ;;  %v14857_v56 = vld [vmem:[%s20582_s1 + $0x1228] ss:$16 sps:$4 sm:$0xff]  }
  0xce   : > { %3818 = vmatmul.mubr.bf16.vlgmr.msra.gmra.mrb[0].mxu0 %v1285_v22  ;;  %4364 = vmatmul.mubr.bf16.vlgmr.msra.gmra.mrb[0].mxu1 %v1285_v22  ;;  %v14909_v24 = vld [vmem:[%s16433_s30 + $0xc8] ss:$44 sps:$4 sm:$0xff]  }
  0xcf   : > { %3877 = vmatpush1.bf16.msra.mxu0 %v14783_v15  ;;  %4423 = vmatpush1.bf16.msra.mxu1 %v14786_v17  ;;  %v1725_v15 = vshll.u32 %v12246_v5, 16  ;;  %v14833_v17 = vld [vmem:[%s20582_s1 + $0x11ac] ss:$16 sps:$4 sm:$0xff]   ;;  %v17057_v22 = vrot.slane %v1722_v16, 1  ;;  %v14878_v16 = vld [vmem:[%s20582_s1 + $0x12a0] ss:$16 sps:$4 sm:$0xff]  }
  0xd0   : > { %3878 = vmatprep.subr.bf16.mxu0 %v14791_v18  ;;  %4424 = vmatprep.subr.bf16.mxu1 %v14794_v26  ;;  %v14828_v18 = vld [vmem:[%s20582_s1 + $0x11a0] ss:$16 sps:$4 sm:$0xff]   ;;  %v14836_v26 = vld [vmem:[%s20582_s1 + $0x11c4] ss:$16 sps:$4 sm:$0xff]   ;;  %v14877_v5 = vld [vmem:[%s20582_s1 + $0x128c] ss:$16 sps:$4 sm:$0xff]  }
  0xd1   : > { %3827 = vmatprep.mubr.bf16.mxu0 %v1441_v28  ;;  %4373 = vmatprep.mubr.bf16.mxu1 %v1441_v28  ;;  %v1727_v23 = vrot.slane %v1725_v15, 2  ;;  %v1738_v28 = vsel %vm1200_vm0, %v1638_v62, %v1737_v20  ;;  %v14868_v62 = vld [vmem:[%s20582_s1 + $0x1264] ss:$16 sps:$4 sm:$0xff]   ;;  %v14881_v15 = vld [vmem:[%s20582_s1 + $0x12a8] ss:$16 sps:$4 sm:$0xff]  }
  0xd3   : > { %3879 = vmatpush1.bf16.msra.mxu0 %v14789_v27  ;;  %4425 = vmatpush1.bf16.msra.mxu1 %v14792_v32  ;;  %v14839_v27 = vld [vmem:[%s20582_s1 + $0x11cc] ss:$16 sps:$4 sm:$0xff]   ;;  %v14837_v32 = vld [vmem:[%s20582_s1 + $0x11c8] ss:$16 sps:$4 sm:$0xff]   ;;  %v1728_v33 = vor.u32 %v1727_v23, %v17057_v22 }
  0xd4   : > { %3880 = vmatprep.subr.bf16.mxu0 %v14800_v34  ;;  %4426 = vmatprep.subr.bf16.mxu1 %v14803_v37  ;;  %v14842_v34 = vld [vmem:[%s20582_s1 + $0x11e0] ss:$16 sps:$4 sm:$0xff]   ;;  %v1321_v37 = vshrl.u32 %v12194_v29, 16 }
  0xd5   : > { %v1729_v41 = vsel %vm1200_vm0, %v1629_v13, %v1728_v33  ;;  %v1307_v13 = vshll.u32 %v12193_v3, 16  ;;  %v1443_v33 = vshrl.u32 %v14909_v24, 16 }
  0xd6   : > { %3828 = vmatmul.mubr.bf16.gmra.mrb[4].mxu0 %v1432_v44  ;;  %4374 = vmatmul.mubr.bf16.gmra.mrb[4].mxu1 %v1432_v44  ;;  %v14853_v44 = vld [vmem:[%s20582_s1 + $0x120c] ss:$16 sps:$4 sm:$0xff]   ;;  %v1323_v45 = vrot.slane %v1321_v37, 1  ;;  %v14895_v37 = vld [vmem:[%s20582_s1 + $0x12e0] ss:$16 sps:$4 sm:$0xff]  }
  0xd7   : > { %3881 = vmatpush1.bf16.msra.mxu0 %v14798_v38  ;;  %4427 = vmatpush1.bf16.msra.mxu1 %v14801_v39  ;;  %v1324_v38 = vshll.u32 %v12194_v29, 16  ;;  %v1329_v39 = vshrl.u32 %v14894_v30, 16  ;;  %v1309_v23 = vrot.slane %v1307_v13, 2  ;;  %v14922_v29 = vld [vmem:[%s16433_s30 + $0x124] ss:$44 sps:$4 sm:$0xff]  }
  0xd8   : > { %3882 = vmatprep.subr.bf16.mxu0 %v14806_v48  ;;  %4428 = vmatprep.subr.bf16.mxu1 %v14809_v49  ;;  %v1334_v48 = vrot.slane %v1332_v40, 2  ;;  %v14848_v49 = vld [vmem:[%s20582_s1 + $0x1200] ss:$16 sps:$4 sm:$0xff]   ;;  %v14887_v30 = vld [vmem:[%s20582_s1 + $0x12c8] ss:$16 sps:$4 sm:$0xff]   ;;  %v1551_v40 = vshrl.u32 %v14922_v29, 16 }
  0xd9   : > { %3837 = vmatprep.mubr.bf16.mxu0 %v1540_v51  ;;  %4383 = vmatprep.mubr.bf16.mxu1 %v1540_v51  ;;  %v1326_v46 = vrot.slane %v1324_v38, 2  ;;  %v1331_v47 = vrot.slane %v1329_v39, 1  ;;  %v14856_v51 = vld [vmem:[%s20582_s1 + $0x1224] ss:$16 sps:$4 sm:$0xff]   ;;  %v14898_v38 = vld [vmem:[%s20582_s1 + $0x12e8] ss:$16 sps:$4 sm:$0xff]  }
  0xdb   : > { %3883 = vmatpush1.bf16.msra.mxu0 %v14804_v50  ;;  %4429 = vmatpush1.bf16.msra.mxu1 %v14807_v55  ;;  %v14851_v50 = vld [vmem:[%s20582_s1 + $0x1208] ss:$16 sps:$4 sm:$0xff]   ;;  %v1327_v54 = vor.u32 %v1326_v46, %v1323_v45  ;;  %v17118_v55 = vor.u32 %v1334_v48, %v1331_v47  ;;  %v14924_v45 = vld [vmem:[%s16433_s30 + $0x120] ss:$44 sps:$4 sm:$0xff]   ;;  %v14903_v46 = vld [vmem:[%s20582_s1 + $0x1304] ss:$16 sps:$4 sm:$0xff]  }
  0xdc   : > { %3884 = vmatprep.subr.bf16.mxu0 %v14815_v59  ;;  %4430 = vmatprep.subr.bf16.mxu1 %v14818_v60  ;;  %v14860_v60 = vld [vmem:[%s20582_s1 + $0x1240] ss:$16 sps:$4 sm:$0xff]   ;;  %v14906_v47 = vld [vmem:[%s20582_s1 + $0x130c] ss:$16 sps:$4 sm:$0xff]  }
  0xdd   : > { %v1336_v59 = vsel %vm1200_vm0, %v1327_v54, %v17118_v55  ;;  %v14901_v48 = vld [vmem:[%s20582_s1 + $0x1300] ss:$16 sps:$4 sm:$0xff]  }
  0xde   : > { %3838 = vmatmul.mubr.bf16.gmra.mrb[8].mxu0 %v1531_v1  ;;  %4384 = vmatmul.mubr.bf16.gmra.mrb[8].mxu1 %v1531_v1  ;;  %v14892_v1 = vld [vmem:[%s16433_s30 + $0x70] ss:$44 sps:$4 sm:$0xff]  }
  0xdf   : > { %3885 = vmatpush1.bf16.msra.mxu0 %v14813_v61  ;;  %4431 = vmatpush1.bf16.msra.mxu1 %v14816_v2  ;;  %v14863_v61 = vld [vmem:[%s20582_s1 + $0x1248] ss:$16 sps:$4 sm:$0xff]  }
  0xe0   : > { %3886 = vmatprep.subr.bf16.mxu0 %v14821_v6  ;;  %4432 = vmatprep.subr.bf16.mxu1 %v14824_v7  ;;  %v14869_v2 = vld [vmem:[%s20582_s1 + $0x1268] ss:$16 sps:$4 sm:$0xff]   ;;  %v14872_v6 = vld [vmem:[%s20582_s1 + $0x1280] ss:$16 sps:$4 sm:$0xff]   ;;  %v1312_v7 = vshrl.u32 %v14892_v1, 16 }
  0xe1   : > { %3847 = vmatprep.mubr.bf16.mxu0 %v1639_v9  ;;  %4393 = vmatprep.mubr.bf16.mxu1 %v1639_v9  ;;  %v14907_v9 = vld [vmem:[%s16433_s30 + $0xcc] ss:$44 sps:$4 sm:$0xff]  }
  0xe2   : > { %v1452_v20 = vshrl.u32 %v14907_v9, 16 }
  0xe3   : > { %3887 = vmatpush1.bf16.msra.mxu0 %v14819_v8  ;;  %4433 = vmatpush1.bf16.msra.mxu1 %v14822_v12  ;;  %v1315_v8 = vshll.u32 %v14892_v1, 16  ;;  %v1304_v12 = vshrl.u32 %v12193_v3, 16 }
  0xe4   : > { %3888 = vmatprep.subr.bf16.mxu0 %v14830_v14  ;;  %4434 = vmatprep.subr.bf16.mxu1 %v14833_v17  ;;  %v14883_v14 = vld [vmem:[%s20582_s1 + $0x12ac] ss:$16 sps:$4 sm:$0xff]   ;;  %v14886_v17 = vld [vmem:[%s20582_s1 + $0x12c4] ss:$16 sps:$4 sm:$0xff]  }
  0xe6   : > { %3848 = vmatmul.mubr.bf16.gmra.mrb[12].mxu0 %v1630_v21  ;;  %4394 = vmatmul.mubr.bf16.gmra.mrb[12].mxu1 %v1630_v21  ;;  %v1455_v21 = vshll.u32 %v14907_v9, 16 }
  0xe7   : > { %3889 = vmatpush1.bf16.msra.mxu0 %v14828_v18  ;;  %4435 = vmatpush1.bf16.msra.mxu1 %v14831_v19  ;;  %v1314_v18 = vrot.slane %v1312_v7, 1  ;;  %v1317_v19 = vrot.slane %v1315_v8, 2  ;;  %v14916_v7 = vld [vmem:[%s20582_s1 + $0x1340] ss:$16 sps:$4 sm:$0xff]  }
  0xe8   : > { %3890 = vmatprep.subr.bf16.mxu0 %v14836_v26  ;;  %4436 = vmatprep.subr.bf16.mxu1 %v14839_v27  ;;  %v14884_v26 = vld [vmem:[%s20582_s1 + $0x12c0] ss:$16 sps:$4 sm:$0xff]   ;;  %v1454_v27 = vrot.slane %v1452_v20, 1 }
  0xe9   : > { %3857 = vmatprep.mubr.bf16.mxu0 %v1738_v28  ;;  %4403 = vmatprep.mubr.bf16.mxu1 %v1738_v28  ;;  %v1457_v28 = vrot.slane %v1455_v21, 2 }
  0xeb   : > { %3891 = vmatpush1.bf16.msra.mxu0 %v14834_v31  ;;  %4437 = vmatpush1.bf16.msra.mxu1 %v14837_v32  ;;  %v1318_v32 = vor.u32 %v1317_v19, %v1314_v18  ;;  %v1458_v39 = vor.u32 %v1457_v28, %v1454_v27  ;;  %v14933_v27 = vld [vmem:[%s20582_s1 + $0x1384] ss:$16 sps:$4 sm:$0xff]   ;;  %v14936_v28 = vld [vmem:[%s20582_s1 + $0x138c] ss:$16 sps:$4 sm:$0xff]  }
  0xec   : > { %3892 = vmatprep.subr.bf16.mxu0 %v14844_v35  ;;  %4438 = vmatprep.subr.bf16.mxu1 %v14847_v36  ;;  %v1446_v35 = vshll.u32 %v14909_v24, 16  ;;  %v14897_v36 = vld [vmem:[%s20582_s1 + $0x12e4] ss:$16 sps:$4 sm:$0xff]  }
  0xee   : > { %3858 = vmatmul.mubr.bf16.gmra.mrb[16].mxu0 %v1729_v41  ;;  %4404 = vmatmul.mubr.bf16.gmra.mrb[16].mxu1 %v1729_v41  ;;  %v1554_v41 = vshll.u32 %v14922_v29, 16  ;;  %v14931_v29 = vld [vmem:[%s20582_s1 + $0x1380] ss:$16 sps:$4 sm:$0xff]  }
  0xef   : > { %3893 = vmatpush1.bf16.msra.mxu0 %v14842_v34  ;;  %4439 = vmatpush1.bf16.msra.mxu1 %v14845_v42  ;;  %v14900_v34 = vld [vmem:[%s20582_s1 + $0x12ec] ss:$16 sps:$4 sm:$0xff]  }
  0xf0   : > { %3894 = vmatprep.subr.bf16.mxu0 %v14850_v43  ;;  %4440 = vmatprep.subr.bf16.mxu1 %v14853_v44  ;;  %v1445_v43 = vrot.slane %v1443_v33, 1  ;;  %v1448_v44 = vrot.slane %v1446_v35, 2  ;;  %v14934_v33 = vld [vmem:[%s20582_s1 + $0x1388] ss:$16 sps:$4 sm:$0xff]  }
  0xf1   : > { %3867 = vmatprep.mubr.bf16.mxu0 %v17038_v10  ;;  %4413 = vmatprep.mubr.bf16.mxu1 %v17038_v10  ;;  %v14875_v10 = vld [vmem:[%s20582_s1 + $0x1288] ss:$16 sps:$4 sm:$0xff]  }
  0xf2   : > { %v1449_v54 = vor.u32 %v1448_v44, %v1445_v43 }
  0xf3   : > { %3895 = vmatpush1.bf16.msra.mxu0 %v14848_v49  ;;  %4441 = vmatpush1.bf16.msra.mxu1 %v14851_v50  ;;  %v1459_v49 = vsel %vm1200_vm0, %v17118_v55, %v1458_v39  ;;  %v1553_v50 = vrot.slane %v1551_v40, 1  ;;  %v14912_v55 = vld [vmem:[%s20582_s1 + $0x1324] ss:$16 sps:$4 sm:$0xff]   ;;  %v14943_v40 = vld [vmem:[%s20582_s1 + $0x13a8] ss:$16 sps:$4 sm:$0xff]  }
  0xf4   : > { %3896 = vmatprep.subr.bf16.mxu0 %v14856_v51  ;;  %4442 = vmatprep.subr.bf16.mxu1 %v14859_v52  ;;  %v1556_v51 = vrot.slane %v1554_v41, 2  ;;  %v14937_v52 = vld [vmem:[%s16433_s30 + $0x17c] ss:$44 sps:$4 sm:$0xff]   ;;  %v1450_v1 = vsel %vm1200_vm0, %v1318_v32, %v1449_v54  ;;  %v14948_v41 = vld [vmem:[%s20582_s1 + $0x13c4] ss:$16 sps:$4 sm:$0xff]  }
  0xf6   : > { %3868 = vmatmul.mubr.bf16.gmra.mrb[28].mxu0 %v17057_v22  ;;  %4414 = vmatmul.mubr.bf16.gmra.mrb[28].mxu1 %v17057_v22  ;;  %v1306_v22 = vrot.slane %v1304_v12, 1  ;;  %v14919_v12 = vld [vmem:[%s20582_s1 + $0x1348] ss:$16 sps:$4 sm:$0xff]  }
  0xf7   : > { %3897 = vmatpush1.bf16.msra.mxu0 %v14854_v53  ;;  %4443 = vmatpush1.bf16.msra.mxu1 %v14857_v56  ;;  %v14904_v53 = vld [vmem:[%s20582_s1 + $0x1308] ss:$16 sps:$4 sm:$0xff]   ;;  %v1542_v56 = vshrl.u32 %v14924_v45, 16 }
  0xf8   : > { %3898 = vmatprep.subr.bf16.mxu0 %v14862_v57  ;;  %4444 = vmatprep.subr.bf16.mxu1 %v14865_v58  ;;  %v1310_v31 = vor.u32 %v1309_v23, %v1306_v22  ;;  %v1545_v57 = vshll.u32 %v14924_v45, 16  ;;  %v14915_v58 = vld [vmem:[%s20582_s1 + $0x132c] ss:$16 sps:$4 sm:$0xff]   ;;  %v14925_v22 = vld [vmem:[%s20582_s1 + $0x1360] ss:$16 sps:$4 sm:$0xff]  }
  0xf9   : > { %3908 = vmatprep.mubr.bf16.mxu0 %v1336_v59  ;;  %4454 = vmatprep.mubr.bf16.mxu1 %v1336_v59  ;;  %v14910_v59 = vld [vmem:[%s20582_s1 + $0x1320] ss:$16 sps:$4 sm:$0xff]   ;;  %v14928_v23 = vld [vmem:[%s20582_s1 + $0x1368] ss:$16 sps:$4 sm:$0xff]  }
  0xfa   : > { %v1319_v42 = vsel %vm1200_vm0, %v1310_v31, %v1318_v32  ;;  %v1547_v3 = vrot.slane %v1545_v57, 2  ;;  %v14959_v57 = vld [vmem:[%s20582_s1 + $0x13ec] ss:$16 sps:$4 sm:$0xff]  }
  0xfb   : > { %3899 = vmatpush1.bf16.msra.mxu0 %v14860_v60  ;;  %4445 = vmatpush1.bf16.msra.mxu1 %v14863_v61  ;;  %v14913_v60 = vld [vmem:[%s20582_s1 + $0x1328] ss:$16 sps:$4 sm:$0xff]   ;;  %v1557_v61 = vor.u32 %v1556_v51, %v1553_v50 }
  0xfc   : > { %3900 = vmatprep.subr.bf16.mxu0 %v14868_v62  ;;  %4446 = vmatprep.subr.bf16.mxu1 %v14871_v63  ;;  %v1650_v62 = vshrl.u32 %v14937_v52, 16  ;;  %v1653_v63 = vshll.u32 %v14937_v52, 16  ;;  %v15006_v51 = vld [vmem:[%s16433_s30 + $0x7c] ss:$44 sps:$4 sm:$0xff]   ;;  %v14946_v52 = vld [vmem:[%s20582_s1 + $0x13c0] ss:$16 sps:$4 sm:$0xff]  }
  0xfd   : > { %v1558_v8 = vsel %vm1200_vm0, %v1458_v39, %v1557_v61  ;;  %v14940_v39 = vld [vmem:[%s20582_s1 + $0x13a0] ss:$16 sps:$4 sm:$0xff]  }
  0xfe   : > { %v1652_v9 = vrot.slane %v1650_v62, 1 }
  0xff   : > { %3901 = vmatpush1.bf16.msra.mxu0 %v14866_v0  ;;  %4447 = vmatpush1.bf16.msra.mxu1 %v14869_v2  ;;  %v14939_v0 = vld [vmem:[%s16433_s30 + $0x178] ss:$44 sps:$4 sm:$0xff]   ;;  %v1544_v2 = vrot.slane %v1542_v56, 1 }
 0x100   : > { %3902 = vmatprep.subr.bf16.mxu0 %v14874_v4  ;;  %4448 = vmatprep.subr.bf16.mxu1 %v14877_v5  ;;  %v595_v4 = vld [vmem:[%s16433_s30 + $0x1d0] sm:$0x33] }
 0x101   : > { %v14918_v5 = vld [vmem:[%s20582_s1 + $0x1344] ss:$16 sps:$4 sm:$0xff]   ;;  %v1548_v13 = vor.u32 %v1547_v3, %v1544_v2 }
 0x102   : > { %v14956_v56 = vld [vmem:[%s20582_s1 + $0x13e4] ss:$16 sps:$4 sm:$0xff]  }
 0x103   : > { %3903 = vmatpush1.bf16.msra.mxu0 %v14872_v6  ;;  %4449 = vmatpush1.bf16.msra.mxu1 %v14875_v10  ;;  %v14921_v6 = vld [vmem:[%s20582_s1 + $0x134c] ss:$16 sps:$4 sm:$0xff]   ;;  %v1655_v10 = vrot.slane %v1653_v63, 2  ;;  %v1549_v21 = vsel %vm1200_vm0, %v1449_v54, %v1548_v13  ;;  %v14957_v63 = vld [vmem:[%s20582_s1 + $0x13e8] ss:$16 sps:$4 sm:$0xff]  }
 0x104   : > { %3904 = vmatprep.subr.bf16.mxu0 %v14880_v11  ;;  %4450 = vmatprep.subr.bf16.mxu1 %v14883_v14  ;;  %v12249_v11 = vcombine.high %v595_v4, %v595_v4  ;;  %v14927_v14 = vld [vmem:[%s20582_s1 + $0x1364] ss:$16 sps:$4 sm:$0xff]  }
 0x105   : > { %v1656_v18 = vor.u32 %v1655_v10, %v1652_v9  ;;  %v14971_v9 = vld [vmem:[%s20582_s1 + $0x142c] ss:$16 sps:$4 sm:$0xff]   ;;  %v14966_v10 = vld [vmem:[%s20582_s1 + $0x1420] ss:$16 sps:$4 sm:$0xff]  }
 0x106   : > { %v1749_v19 = vshrl.u32 %v12249_v11, 16  ;;  %v1752_v20 = vshll.u32 %v12249_v11, 16  ;;  %v14969_v11 = vld [vmem:[%s20582_s1 + $0x1428] ss:$16 sps:$4 sm:$0xff]  }
 0x107   : > { %3905 = vmatpush1.bf16.msra.mxu0 %v14878_v16  ;;  %4451 = vmatpush1.bf16.msra.mxu1 %v14881_v15  ;;  %v1641_v16 = vshrl.u32 %v14939_v0, 16  ;;  %v1644_v15 = vshll.u32 %v14939_v0, 16  ;;  %v14962_v0 = vld [vmem:[%s20582_s1 + $0x1404] ss:$16 sps:$4 sm:$0xff]  }
 0x108   : > { %3906 = vmatprep.subr.bf16.mxu0 %v14886_v17  ;;  %4452 = vmatprep.subr.bf16.mxu1 %v14889_v25  ;;  %v14930_v17 = vld [vmem:[%s20582_s1 + $0x136c] ss:$16 sps:$4 sm:$0xff]   ;;  %v17273_v31 = vrot.slane %v1749_v19, 1  ;;  %v1754_v32 = vrot.slane %v1752_v20, 2  ;;  %v14980_v19 = vld [vmem:[%s20582_s1 + $0x1464] ss:$16 sps:$4 sm:$0xff]  }
 0x109   : > { %v1643_v24 = vrot.slane %v1641_v16, 1  ;;  %v1646_v25 = vrot.slane %v1644_v15, 2  ;;  %v14977_v16 = vld [vmem:[%s20582_s1 + $0x144c] ss:$16 sps:$4 sm:$0xff]   ;;  %v14972_v15 = vld [vmem:[%s20582_s1 + $0x1440] ss:$16 sps:$4 sm:$0xff]  }
 0x10a   : > { %v14983_v20 = vld [vmem:[%s20582_s1 + $0x146c] ss:$16 sps:$4 sm:$0xff]  }
 0x10b   : > { %3907 = vmatpush1.bf16.msra.mxu0 %v14884_v26  ;;  %4453 = vmatpush1.bf16.msra.mxu1 %v14887_v30  ;;  %v12248_v26 = vcombine.low %v595_v4, %v595_v4  ;;  %v1657_v30 = vsel %vm1200_vm0, %v1557_v61, %v1656_v18  ;;  %v1647_v35 = vor.u32 %v1646_v25, %v1643_v24  ;;  %v1366_v61 = vshll.u32 %v15006_v51, 16  ;;  %v14986_v24 = vld [vmem:[%s20582_s1 + $0x1484] ss:$16 sps:$4 sm:$0xff]  }
 0x10c   : > { %3967 = vmatprep.subr.bf16.mxu0 %v14897_v36  ;;  %4513 = vmatprep.subr.bf16.mxu1 %v14900_v34 }
 0x10d   : > { %v1740_v36 = vshrl.u32 %v12248_v26, 16  ;;  %v1743_v34 = vshll.u32 %v12248_v26, 16  ;;  %v1648_v43 = vsel %vm1200_vm0, %v1548_v13, %v1647_v35  ;;  %v14989_v26 = vld [vmem:[%s20582_s1 + $0x148c] ss:$16 sps:$4 sm:$0xff]  }
 0x10e   : > { %3909 = vmatmul.mubr.bf16.vlgmr.msra.gmra.mrb[0].mxu0 %v1319_v42  ;;  %4455 = vmatmul.mubr.bf16.vlgmr.msra.gmra.mrb[0].mxu1 %v1319_v42  ;;  %v1755_v42 = vor.u32 %v1754_v32, %v17273_v31  ;;  %v14992_v32 = vld [vmem:[%s20582_s1 + $0x14a4] ss:$16 sps:$4 sm:$0xff]  }
 0x10f   : > { %3968 = vmatpush1.bf16.msra.mxu0 %v14895_v37  ;;  %4514 = vmatpush1.bf16.msra.mxu1 %v14898_v38  ;;  %v14942_v37 = vld [vmem:[%s20582_s1 + $0x13a4] ss:$16 sps:$4 sm:$0xff]   ;;  %v14945_v38 = vld [vmem:[%s20582_s1 + $0x13ac] ss:$16 sps:$4 sm:$0xff]   ;;  %v1742_v44 = vrot.slane %v1740_v36, 1  ;;  %v1745_v45 = vrot.slane %v1743_v34, 2 }
 0x110   : > { %3969 = vmatprep.subr.bf16.mxu0 %v14903_v46  ;;  %4515 = vmatprep.subr.bf16.mxu1 %v14906_v47  ;;  %v17296_v46 = vld [vmem:[%s16433_s30 + $0x4c] sm:$0xff]  ;;  %v17299_v47 = vld [vmem:[%s16433_s30 + $0x20] sm:$0xee] }
 0x111   : > { %3918 = vmatprep.mubr.bf16.mxu0 %v1459_v49  ;;  %4464 = vmatprep.mubr.bf16.mxu1 %v1459_v49  ;;  %v1756_v49 = vsel %vm1200_vm0, %v1656_v18, %v1755_v42  ;;  %v12196_v50 = vcombine.high %v17299_v47, %v17296_v46  ;;  %v1746_v54 = vor.u32 %v1745_v45, %v1742_v44  ;;  %v14975_v18 = vld [vmem:[%s20582_s1 + $0x1448] ss:$16 sps:$4 sm:$0xff]   ;;  %v14995_v36 = vld [vmem:[%s20582_s1 + $0x14ac] ss:$16 sps:$4 sm:$0xff]   ;;  %v14990_v34 = vld [vmem:[%s20582_s1 + $0x14a0] ss:$16 sps:$4 sm:$0xff]  }
 0x112   : > { %v12195_v25 = vcombine.low %v17299_v47, %v17296_v46  ;;  %v15028_v46 = vld [vmem:[%s16433_s30 + $0x12c] ss:$44 sps:$4 sm:$0xff]  }
 0x113   : > { %3970 = vmatpush1.bf16.msra.mxu0 %v14901_v48  ;;  %4516 = vmatpush1.bf16.msra.mxu1 %v14904_v53  ;;  %v14951_v48 = vld [vmem:[%s20582_s1 + $0x13cc] ss:$16 sps:$4 sm:$0xff]   ;;  %v14949_v53 = vld [vmem:[%s20582_s1 + $0x13c8] ss:$16 sps:$4 sm:$0xff]   ;;  %v1747_v62 = vsel %vm1200_vm0, %v1647_v35, %v1746_v54 }
 0x114   : > { %3971 = vmatprep.subr.bf16.mxu0 %v14912_v55  ;;  %4517 = vmatprep.subr.bf16.mxu1 %v14915_v58  ;;  %v14954_v55 = vld [vmem:[%s20582_s1 + $0x13e0] ss:$16 sps:$4 sm:$0xff]   ;;  %v1355_v58 = vshrl.u32 %v12196_v50, 16  ;;  %v1341_v35 = vshll.u32 %v12195_v25, 16  ;;  %v15001_v47 = vld [vmem:[%s20582_s1 + $0x14cc] ss:$16 sps:$4 sm:$0xff]  }
 0x116   : > { %3919 = vmatmul.mubr.bf16.gmra.mrb[4].mxu0 %v1450_v1  ;;  %4465 = vmatmul.mubr.bf16.gmra.mrb[4].mxu1 %v1450_v1  ;;  %v14965_v1 = vld [vmem:[%s20582_s1 + $0x140c] ss:$16 sps:$4 sm:$0xff]   ;;  %v1357_v2 = vrot.slane %v1355_v58, 1  ;;  %v1343_v45 = vrot.slane %v1341_v35, 2  ;;  %v15009_v58 = vld [vmem:[%s20582_s1 + $0x14e4] ss:$16 sps:$4 sm:$0xff]  }
 0x117   : > { %3972 = vmatpush1.bf16.msra.mxu0 %v14910_v59  ;;  %4518 = vmatpush1.bf16.msra.mxu1 %v14913_v60  ;;  %v1358_v59 = vshll.u32 %v12196_v50, 16  ;;  %v1363_v60 = vshrl.u32 %v15006_v51, 16 }
 0x118   : > { %3973 = vmatprep.subr.bf16.mxu0 %v14918_v5  ;;  %4519 = vmatprep.subr.bf16.mxu1 %v14921_v6  ;;  %v1368_v5 = vrot.slane %v1366_v61, 2  ;;  %v14960_v6 = vld [vmem:[%s20582_s1 + $0x1400] ss:$16 sps:$4 sm:$0xff]   ;;  %v15010_v61 = vld [vmem:[%s20582_s1 + $0x14e8] ss:$16 sps:$4 sm:$0xff]  }
 0x119   : > { %3928 = vmatprep.mubr.bf16.mxu0 %v1558_v8  ;;  %4474 = vmatprep.mubr.bf16.mxu1 %v1558_v8  ;;  %v1360_v3 = vrot.slane %v1358_v59, 2  ;;  %v1365_v4 = vrot.slane %v1363_v60, 1  ;;  %v14968_v8 = vld [vmem:[%s20582_s1 + $0x1424] ss:$16 sps:$4 sm:$0xff]   ;;  %v15012_v59 = vld [vmem:[%s20582_s1 + $0x14ec] ss:$16 sps:$4 sm:$0xff]  }
 0x11a   : > { %v15007_v60 = vld [vmem:[%s20582_s1 + $0x14e0] ss:$16 sps:$4 sm:$0xff]  }
 0x11b   : > { %3974 = vmatpush1.bf16.msra.mxu0 %v14916_v7  ;;  %4520 = vmatpush1.bf16.msra.mxu1 %v14919_v12  ;;  %v14963_v7 = vld [vmem:[%s20582_s1 + $0x1408] ss:$16 sps:$4 sm:$0xff]   ;;  %v1361_v12 = vor.u32 %v1360_v3, %v1357_v2  ;;  %v17353_v13 = vor.u32 %v1368_v5, %v1365_v4  ;;  %v15017_v3 = vld [vmem:[%s20582_s1 + $0x1504] ss:$16 sps:$4 sm:$0xff]  }
 0x11c   : > { %3975 = vmatprep.subr.bf16.mxu0 %v14927_v14  ;;  %4521 = vmatprep.subr.bf16.mxu1 %v14930_v17  ;;  %v14974_v14 = vld [vmem:[%s20582_s1 + $0x1444] ss:$16 sps:$4 sm:$0xff]  }
 0x11d   : > { %v1370_v17 = vsel %vm1200_vm0, %v1361_v12, %v17353_v13 }
 0x11e   : > { %3929 = vmatmul.mubr.bf16.gmra.mrb[8].mxu0 %v1549_v21  ;;  %4475 = vmatmul.mubr.bf16.gmra.mrb[8].mxu1 %v1549_v21  ;;  %v15004_v21 = vld [vmem:[%s16433_s30 + $0x78] ss:$44 sps:$4 sm:$0xff]  }
 0x11f   : > { %3976 = vmatpush1.bf16.msra.mxu0 %v14925_v22  ;;  %4522 = vmatpush1.bf16.msra.mxu1 %v14928_v23  ;;  %v14978_v22 = vld [vmem:[%s20582_s1 + $0x1460] ss:$16 sps:$4 sm:$0xff]   ;;  %v14981_v23 = vld [vmem:[%s20582_s1 + $0x1468] ss:$16 sps:$4 sm:$0xff]  }
 0x120   : > { %3977 = vmatprep.subr.bf16.mxu0 %v14933_v27  ;;  %4523 = vmatprep.subr.bf16.mxu1 %v14936_v28  ;;  %v14984_v27 = vld [vmem:[%s20582_s1 + $0x1480] ss:$16 sps:$4 sm:$0xff]   ;;  %v14987_v28 = vld [vmem:[%s20582_s1 + $0x1488] ss:$16 sps:$4 sm:$0xff]  }
 0x121   : > { %3938 = vmatprep.mubr.bf16.mxu0 %v1657_v30  ;;  %4484 = vmatprep.mubr.bf16.mxu1 %v1657_v30  ;;  %v1346_v30 = vshrl.u32 %v15004_v21, 16 }
 0x123   : > { %3978 = vmatpush1.bf16.msra.mxu0 %v14931_v29  ;;  %4524 = vmatpush1.bf16.msra.mxu1 %v14934_v33  ;;  %v15013_v29 = vld [vmem:[%s16433_s30 + $0xd4] ss:$44 sps:$4 sm:$0xff]   ;;  %v1338_v33 = vshrl.u32 %v12195_v25, 16  ;;  %v1348_v42 = vrot.slane %v1346_v30, 1 }
 0x124   : > { %3979 = vmatprep.subr.bf16.mxu0 %v14942_v37  ;;  %4525 = vmatprep.subr.bf16.mxu1 %v14945_v38  ;;  %v1470_v37 = vshrl.u32 %v15013_v29, 16  ;;  %v1473_v38 = vshll.u32 %v15013_v29, 16 }
 0x126   : > { %3939 = vmatmul.mubr.bf16.gmra.mrb[12].mxu0 %v1648_v43  ;;  %4485 = vmatmul.mubr.bf16.gmra.mrb[12].mxu1 %v1648_v43 }
 0x127   : > { %3980 = vmatpush1.bf16.msra.mxu0 %v14940_v39  ;;  %4526 = vmatpush1.bf16.msra.mxu1 %v14943_v40  ;;  %v15021_v39 = vld [vmem:[%s16433_s30 + $0xd0] ss:$44 sps:$4 sm:$0xff]   ;;  %v14993_v40 = vld [vmem:[%s20582_s1 + $0x14a8] ss:$16 sps:$4 sm:$0xff]  }
 0x128   : > { %3981 = vmatprep.subr.bf16.mxu0 %v14948_v41  ;;  %4527 = vmatprep.subr.bf16.mxu1 %v14951_v48  ;;  %v14998_v41 = vld [vmem:[%s20582_s1 + $0x14c4] ss:$16 sps:$4 sm:$0xff]   ;;  %v1472_v48 = vrot.slane %v1470_v37, 1  ;;  %v1461_v50 = vshrl.u32 %v15021_v39, 16  ;;  %v1464_v51 = vshll.u32 %v15021_v39, 16 }
 0x129   : > { %3948 = vmatprep.mubr.bf16.mxu0 %v1756_v49  ;;  %4494 = vmatprep.mubr.bf16.mxu1 %v1756_v49  ;;  %v1475_v49 = vrot.slane %v1473_v38, 2  ;;  %v15033_v38 = vld [vmem:[%s20582_s1 + $0x1544] ss:$16 sps:$4 sm:$0xff]   ;;  %v15036_v39 = vld [vmem:[%s20582_s1 + $0x154c] ss:$16 sps:$4 sm:$0xff]  }
 0x12b   : > { %3982 = vmatpush1.bf16.msra.mxu0 %v14946_v52  ;;  %4528 = vmatpush1.bf16.msra.mxu1 %v14949_v53  ;;  %v14996_v52 = vld [vmem:[%s20582_s1 + $0x14c0] ss:$16 sps:$4 sm:$0xff]   ;;  %v14999_v53 = vld [vmem:[%s20582_s1 + $0x14c8] ss:$16 sps:$4 sm:$0xff]  }
 0x12c   : > { %3983 = vmatprep.subr.bf16.mxu0 %v14956_v56  ;;  %4529 = vmatprep.subr.bf16.mxu1 %v14959_v57  ;;  %v1569_v57 = vshrl.u32 %v15028_v46, 16 }
 0x12e   : > { %3949 = vmatmul.mubr.bf16.gmra.mrb[16].mxu0 %v1747_v62  ;;  %4495 = vmatmul.mubr.bf16.gmra.mrb[16].mxu1 %v1747_v62  ;;  %v1476_v62 = vor.u32 %v1475_v49, %v1472_v48  ;;  %v15045_v49 = vld [vmem:[%s20582_s1 + $0x156c] ss:$16 sps:$4 sm:$0xff]  }
 0x12f   : > { %3984 = vmatpush1.bf16.msra.mxu0 %v14954_v55  ;;  %4530 = vmatpush1.bf16.msra.mxu1 %v14957_v63  ;;  %v1572_v55 = vshll.u32 %v15028_v46, 16  ;;  %v1463_v63 = vrot.slane %v1461_v50, 1  ;;  %v15042_v46 = vld [vmem:[%s20582_s1 + $0x1564] ss:$16 sps:$4 sm:$0xff]  }
 0x130   : > { %3985 = vmatprep.subr.bf16.mxu0 %v14962_v0  ;;  %4531 = vmatprep.subr.bf16.mxu1 %v14965_v1  ;;  %v1466_v0 = vrot.slane %v1464_v51, 2 }
 0x131   : > { %3958 = vmatprep.mubr.bf16.mxu0 %v17273_v31  ;;  %4504 = vmatprep.mubr.bf16.mxu1 %v17273_v31  ;;  %v1349_v31 = vshll.u32 %v15004_v21, 16 }
 0x133   : > { %3986 = vmatpush1.bf16.msra.mxu0 %v14960_v6  ;;  %4532 = vmatpush1.bf16.msra.mxu1 %v14963_v7  ;;  %v1351_v43 = vrot.slane %v1349_v31, 2  ;;  %v15030_v6 = vld [vmem:[%s16433_s30 + $0x128] ss:$44 sps:$4 sm:$0xff]  }
 0x134   : > { %3987 = vmatprep.subr.bf16.mxu0 %v14968_v8  ;;  %4533 = vmatprep.subr.bf16.mxu1 %v14971_v9  ;;  %v1560_v21 = vshrl.u32 %v15030_v6, 16 }
 0x135   : > { %v1352_v56 = vor.u32 %v1351_v43, %v1348_v42  ;;  %v15034_v42 = vld [vmem:[%s20582_s1 + $0x1548] ss:$16 sps:$4 sm:$0xff]  }
 0x136   : > { %3959 = vmatmul.mubr.bf16.gmra.mrb[32].mxu0 %v1742_v44  ;;  %4505 = vmatmul.mubr.bf16.gmra.mrb[32].mxu1 %v1742_v44  ;;  %v1340_v44 = vrot.slane %v1338_v33, 1  ;;  %v1562_v30 = vrot.slane %v1560_v21, 1  ;;  %v15025_v33 = vld [vmem:[%s20582_s1 + $0x1528] ss:$16 sps:$4 sm:$0xff]  }
 0x137   : > { %3988 = vmatpush1.bf16.msra.mxu0 %v14966_v10  ;;  %4534 = vmatpush1.bf16.msra.mxu1 %v14969_v11  ;;  %v1571_v10 = vrot.slane %v1569_v57, 1  ;;  %v1574_v11 = vrot.slane %v1572_v55, 2  ;;  %v15043_v57 = vld [vmem:[%s20582_s1 + $0x1568] ss:$16 sps:$4 sm:$0xff]  }
 0x138   : > { %3989 = vmatprep.subr.bf16.mxu0 %v14974_v14  ;;  %4535 = vmatprep.subr.bf16.mxu1 %v14977_v16  ;;  %v1344_v54 = vor.u32 %v1343_v45, %v1340_v44  ;;  %v15037_v16 = vld [vmem:[%s16433_s30 + $0x184] ss:$44 sps:$4 sm:$0xff]  }
 0x139   : > { %3999 = vmatprep.mubr.bf16.mxu0 %v1370_v17  ;;  %4545 = vmatprep.mubr.bf16.mxu1 %v1370_v17  ;;  %v15015_v17 = vld [vmem:[%s20582_s1 + $0x1500] ss:$16 sps:$4 sm:$0xff]   ;;  %v1668_v25 = vshrl.u32 %v15037_v16, 16 }
 0x13a   : > { %v1353_v7 = vsel %vm1200_vm0, %v1344_v54, %v1352_v56 }
 0x13b   : > { %3990 = vmatpush1.bf16.msra.mxu0 %v14972_v15  ;;  %4536 = vmatpush1.bf16.msra.mxu1 %v14975_v18  ;;  %v1477_v15 = vsel %vm1200_vm0, %v17353_v13, %v1476_v62  ;;  %v15020_v18 = vld [vmem:[%s20582_s1 + $0x150c] ss:$16 sps:$4 sm:$0xff]   ;;  %v15024_v13 = vld [vmem:[%s20582_s1 + $0x1524] ss:$16 sps:$4 sm:$0xff]  }
 0x13c   : > { %3991 = vmatprep.subr.bf16.mxu0 %v14980_v19  ;;  %4537 = vmatprep.subr.bf16.mxu1 %v14983_v20  ;;  %v15018_v19 = vld [vmem:[%s20582_s1 + $0x1508] ss:$16 sps:$4 sm:$0xff]   ;;  %v1467_v20 = vor.u32 %v1466_v0, %v1463_v63 }
 0x13e   : > { %v1468_v29 = vsel %vm1200_vm0, %v1352_v56, %v1467_v20 }
 0x13f   : > { %3992 = vmatpush1.bf16.msra.mxu0 %v14978_v22  ;;  %4538 = vmatpush1.bf16.msra.mxu1 %v14981_v23  ;;  %v1563_v22 = vshll.u32 %v15030_v6, 16  ;;  %v15027_v23 = vld [vmem:[%s20582_s1 + $0x152c] ss:$16 sps:$4 sm:$0xff]   ;;  %v15051_v6 = vld [vmem:[%s20582_s1 + $0x1588] ss:$16 sps:$4 sm:$0xff]  }
 0x140   : > { %3993 = vmatprep.subr.bf16.mxu0 %v14986_v24  ;;  %4539 = vmatprep.subr.bf16.mxu1 %v14989_v26  ;;  %v1575_v24 = vor.u32 %v1574_v11, %v1571_v10  ;;  %v1671_v26 = vshll.u32 %v15037_v16, 16  ;;  %v15057_v16 = vld [vmem:[%s20582_s1 + $0x15a8] ss:$16 sps:$4 sm:$0xff]  }
 0x141   : > { %v1565_v31 = vrot.slane %v1563_v22, 2  ;;  %v15067_v22 = vld [vmem:[%s16433_s30 + $0x80] ss:$44 sps:$4 sm:$0xff]  }
 0x142   : > { %v1576_v35 = vsel %vm1200_vm0, %v1476_v62, %v1575_v24 }
 0x143   : > { %3994 = vmatpush1.bf16.msra.mxu0 %v14984_v27  ;;  %4540 = vmatpush1.bf16.msra.mxu1 %v14987_v28  ;;  %v596_v27 = vld [vmem:[%s16433_s30 + $0x1d8] sm:$0x33]  ;;  %v15022_v28 = vld [vmem:[%s20582_s1 + $0x1520] ss:$16 sps:$4 sm:$0xff]  }
 0x144   : > { %3995 = vmatprep.subr.bf16.mxu0 %v14992_v32  ;;  %4541 = vmatprep.subr.bf16.mxu1 %v14995_v36  ;;  %v15039_v32 = vld [vmem:[%s16433_s30 + $0x180] ss:$44 sps:$4 sm:$0xff]   ;;  %v1670_v36 = vrot.slane %v1668_v25, 1  ;;  %v12251_v37 = vcombine.high %v596_v27, %v596_v27  ;;  %v12250_v54 = vcombine.low %v596_v27, %v596_v27  ;;  %v1380_v25 = vshrl.u32 %v15067_v22, 16 }
 0x145   : > { %v1659_v43 = vshrl.u32 %v15039_v32, 16  ;;  %v1662_v44 = vshll.u32 %v15039_v32, 16  ;;  %v16262_v32 = vmov 0  }
 0x146   : > { %v1770_v48 = vshll.u32 %v12251_v37, 16  ;;  %v1758_v62 = vshrl.u32 %v12250_v54, 16  ;;  %v1761_v63 = vshll.u32 %v12250_v54, 16 }
 0x147   : > { %3996 = vmatpush1.bf16.msra.mxu0 %v14990_v34  ;;  %4542 = vmatpush1.bf16.msra.mxu1 %v14993_v40  ;;  %v1673_v34 = vrot.slane %v1671_v26, 2  ;;  %v15031_v40 = vld [vmem:[%s20582_s1 + $0x1540] ss:$16 sps:$4 sm:$0xff]   ;;  %v1661_v51 = vrot.slane %v1659_v43, 1  ;;  %v1383_v26 = vshll.u32 %v15067_v22, 16 }
 0x148   : > { %3997 = vmatprep.subr.bf16.mxu0 %v14998_v41  ;;  %4543 = vmatprep.subr.bf16.mxu1 %v15001_v47  ;;  %v1566_v41 = vor.u32 %v1565_v31, %v1562_v30  ;;  %v1767_v47 = vshrl.u32 %v12251_v37, 16  ;;  %v1760_v10 = vrot.slane %v1758_v62, 1  ;;  %v1763_v11 = vrot.slane %v1761_v63, 2  ;;  %v15080_v31 = vld [vmem:[%s16433_s30 + $0xd8] ss:$44 sps:$4 sm:$0xff]  }
 0x149   : > { %v17435_v1 = vpop.f32.mrb[20].mxu0  ;;  %v17437_v2 = vpop.f32.mrb[20].mxu1  ;;  %v1674_v45 = vor.u32 %v1673_v34, %v1670_v36  ;;  %v1385_v30 = vrot.slane %v1383_v26, 2  ;;  %v1479_v36 = vshrl.u32 %v15080_v31, 16  ;;  %v1482_v34 = vshll.u32 %v15080_v31, 16 }
 0x14a   : > { %v17442_v4 = vpop.f32.mrb[21].mxu0  ;;  %v17444_v5 = vpop.f32.mrb[21].mxu1  ;;  %v1567_v50 = vsel %vm1200_vm0, %v1467_v20, %v1566_v41  ;;  %v1769_v55 = vrot.slane %v1767_v47, 1  ;;  %v591_v20 = vld [vmem:[%s16433_s30 + $0x28] sm:$0xe] }
 0x14b   : > { %3998 = vmatpush1.bf16.msra.mxu0 %v14996_v52  ;;  %4544 = vmatpush1.bf16.msra.mxu1 %v14999_v53  ;;  %v3691_v8 = vpop.f32.mrb[22].mxu0  ;;  %v4237_v9 = vpop.f32.mrb[22].mxu1  ;;  %v1664_v52 = vrot.slane %v1662_v44, 2  ;;  %v15040_v53 = vld [vmem:[%s20582_s1 + $0x1560] ss:$16 sps:$4 sm:$0xff]   ;;  %v1675_v56 = vsel %vm1200_vm0, %v1575_v24, %v1674_v45 }
 0x14c   : > { %4058 = vmatprep.subr.bf16.mxu0 %v15009_v58  ;;  %4604 = vmatprep.subr.bf16.mxu1 %v15012_v59  ;;  %v3692_v12 = vpop.f32.mrb[23].mxu0  ;;  %v4238_v14 = vpop.f32.mrb[23].mxu1  ;;  %v1772_v58 = vrot.slane %v1770_v48, 2  ;;  %v15050_v59 = vld [vmem:[%s20582_s1 + $0x1584] ss:$16 sps:$4 sm:$0xff]  }
 0x14d   : > { %v15059_v8 = vld [vmem:[%s20582_s1 + $0x15ac] ss:$16 sps:$4 sm:$0xff]   ;;  %v15054_v14 = vld [vmem:[%s20582_s1 + $0x15a0] ss:$16 sps:$4 sm:$0xff]   ;;  %v15070_v43 = vld [vmem:[%s20582_s1 + $0x24] ss:$16 sps:$4 sm:$0xff]  }
 0x14e   : > { %4000 = vmatmul.mubr.bf16.vlgmr.msra.gmra.mrb[0].mxu0 %v1353_v7  ;;  %4546 = vmatmul.mubr.bf16.vlgmr.msra.gmra.mrb[0].mxu1 %v1353_v7  ;;  %v1773_v0 = vor.u32 %v1772_v58, %v1769_v55  ;;  %v15056_v7 = vld [vmem:[%s20582_s1 + $0x15a4] ss:$16 sps:$4 sm:$0xff]   ;;  %v15060_v37 = vld [vmem:[%s20582_s1] ss:$16 sps:$4 sm:$0xff]   ;;  %v15073_v44 = vld [vmem:[%s20582_s1 + $0x2c] ss:$16 sps:$4 sm:$0xff]  }
 0x14f   : > { %4059 = vmatpush1.bf16.msra.mxu0 %v15007_v60  ;;  %4605 = vmatpush1.bf16.msra.mxu1 %v15010_v61  ;;  %v15053_v60 = vld [vmem:[%s20582_s1 + $0x158c] ss:$16 sps:$4 sm:$0xff]   ;;  %v1665_v61 = vor.u32 %v1664_v52, %v1661_v51  ;;  %v15068_v47 = vld [vmem:[%s20582_s1 + $0x20] ss:$16 sps:$4 sm:$0xff]   ;;  %v15071_v48 = vld [vmem:[%s20582_s1 + $0x28] ss:$16 sps:$4 sm:$0xff]  }
 0x150   : > { %4009 = vmatprep.mubr.bf16.mxu0 %v1477_v15  ;;  %4060 = vmatprep.subr.bf16.mxu0 %v15017_v3  ;;  %v15048_v3 = vld [vmem:[%s20582_s1 + $0x1580] ss:$16 sps:$4 sm:$0xff]   ;;  %v1774_v12 = vsel %vm1200_vm0, %v1674_v45, %v1773_v0  ;;  %v15079_v51 = vld [vmem:[%s20582_s1 + $0x4c] ss:$16 sps:$4 sm:$0xff]   ;;  %v15106_v58 = vld [vmem:[%s16433_s30 + $0x188] ss:$44 sps:$4 sm:$0xff]  }
 0x151   : > { %4555 = vmatprep.mubr.bf16.mxu1 %v1477_v15  ;;  %4606 = vmatprep.subr.bf16.mxu1 %v15020_v18  ;;  %v1666_v9 = vsel %vm1200_vm0, %v1566_v41, %v1665_v61  ;;  %v15062_v15 = vld [vmem:[%s20582_s1 + $0x4] ss:$16 sps:$4 sm:$0xff]   ;;  %v1764_v18 = vor.u32 %v1763_v11, %v1760_v10  ;;  %v1481_v41 = vrot.slane %v1479_v36, 1  ;;  %v15074_v52 = vld [vmem:[%s20582_s1 + $0x40] ss:$16 sps:$4 sm:$0xff]   ;;  %v1677_v0 = vshrl.u32 %v15106_v58, 16 }
 0x152   : > { %v15089_v63 = vld [vmem:[%s20582_s1 + $0x84] ss:$16 sps:$4 sm:$0xff]   ;;  %v15099_v22 = vld [vmem:[%s20582_s1 + $0xac] ss:$16 sps:$4 sm:$0xff]   ;;  %v15103_v31 = vld [vmem:[%s20582_s1 + $0xc8] ss:$16 sps:$4 sm:$0xff]  }
 0x153   : > { %4061 = vmatpush1.bf16.msra.mxu0 %v15015_v17  ;;  %4607 = vmatpush1.bf16.msra.mxu1 %v15018_v19  ;;  %v15065_v17 = vld [vmem:[%s20582_s1 + $0xc] ss:$16 sps:$4 sm:$0xff]   ;;  %v183_v19 = vld [vmem:[%s16433_s30 + $0x54] sm:$0xf]  ;;  %v1765_v21 = vsel %vm1200_vm0, %v1665_v61, %v1764_v18  ;;  %v15084_v61 = vld [vmem:[%s20582_s1 + $0x68] ss:$16 sps:$4 sm:$0xff]  }
 0x154   : > { %4062 = vmatprep.subr.bf16.mxu0 %v15024_v13  ;;  %4608 = vmatprep.subr.bf16.mxu1 %v15027_v23  ;;  %v12197_v13 = vcombine.low %v591_v20, %v183_v19  ;;  %v15119_v18 = vld [vmem:[%s16433_s30 + $0x1e0] ss:$0 sps:$4 sm:$0x33]  }
 0x156   : > { %4010 = vmatmul.mubr.bf16.gmra.mrb[4].mxu0 %v1468_v29  ;;  %4556 = vmatmul.mubr.bf16.gmra.mrb[4].mxu1 %v1468_v29  ;;  %v1372_v23 = vshrl.u32 %v12197_v13, 16  ;;  %v1375_v24 = vshll.u32 %v12197_v13, 16  ;;  %v1382_v29 = vrot.slane %v1380_v25, 1  ;;  %v15102_v25 = vld [vmem:[%s20582_s1 + $0xc4] ss:$16 sps:$4 sm:$0xff]  }
 0x157   : > { %4019 = vmatprep.mubr.bf16.mxu0 %v1576_v35  ;;  %4063 = vmatpush1.bf16.msra.mxu0 %v15022_v28 }
 0x158   : > { %4565 = vmatprep.mubr.bf16.mxu1 %v1576_v35  ;;  %4609 = vmatpush1.bf16.msra.mxu1 %v15025_v33  ;;  %v1374_v27 = vrot.slane %v1372_v23, 1  ;;  %v1377_v28 = vrot.slane %v1375_v24, 2  ;;  %v1386_v35 = vor.u32 %v1385_v30, %v1382_v29  ;;  %v15105_v29 = vld [vmem:[%s20582_s1 + $0xcc] ss:$16 sps:$4 sm:$0xff]   ;;  %v15100_v30 = vld [vmem:[%s20582_s1 + $0xc0] ss:$16 sps:$4 sm:$0xff]  }
 0x159   : > { %4064 = vmatprep.subr.bf16.mxu0 %v15033_v38  ;;  %4610 = vmatprep.subr.bf16.mxu1 %v15036_v39  ;;  %v15093_v38 = vld [vmem:[%s16433_s30 + $0x130] ss:$44 sps:$4 sm:$0xff]   ;;  %v15063_v39 = vld [vmem:[%s20582_s1 + $0x8] ss:$16 sps:$4 sm:$0xff]  }
 0x15a   : > { %v1378_v33 = vor.u32 %v1377_v28, %v1374_v27  ;;  %v1578_v45 = vshrl.u32 %v15093_v38, 16  ;;  %v1776_v27 = vshrl.u32 %v15119_v18, 16  ;;  %v1779_v28 = vshll.u32 %v15119_v18, 16  ;;  %v15156_v18 = vld [vmem:[%s20582_s1 + $0x1e0] ss:$16 sps:$4 sm:$0xff]  }
 0x15b   : > { %4065 = vmatpush1.bf16.msra.mxu0 %v15031_v40 }
 0x15c   : > { %4611 = vmatpush1.bf16.msra.mxu1 %v15034_v42  ;;  %4066 = vmatprep.subr.bf16.mxu0 %v15042_v46  ;;  %v1387_v40 = vsel %vm1200_vm0, %v1378_v33, %v1386_v35  ;;  %v1484_v42 = vrot.slane %v1482_v34, 2  ;;  %v1581_v46 = vshll.u32 %v15093_v38, 16  ;;  %v1580_v54 = vrot.slane %v1578_v45, 1  ;;  %v15109_v34 = vld [vmem:[%s20582_s1 + $0xe4] ss:$16 sps:$4 sm:$0xff]  }
 0x15d   : > { %4612 = vmatprep.subr.bf16.mxu1 %v15045_v49  ;;  %v1781_v36 = vrot.slane %v1779_v28, 2  ;;  %v15107_v38 = vld [vmem:[%s20582_s1 + $0xe0] ss:$16 sps:$4 sm:$0xff]   ;;  %v16155_v28 = vld [vmem:[%s16433_s30 + $0x5c] ss:$44 sps:$4 sm:$0xff]  }
 0x15e   : > { %4020 = vmatmul.mubr.bf16.gmra.mrb[8].mxu0 %v1567_v50  ;;  %4566 = vmatmul.mubr.bf16.gmra.mrb[8].mxu1 %v1567_v50  ;;  %v1485_v49 = vor.u32 %v1484_v42, %v1481_v41  ;;  %v15076_v50 = vld [vmem:[%s20582_s1 + $0x44] ss:$16 sps:$4 sm:$0xff]   ;;  %v15118_v42 = vld [vmem:[%s20582_s1 + $0x10c] ss:$16 sps:$4 sm:$0xff]  }
 0x15f   : > { %4029 = vmatprep.mubr.bf16.mxu0 %v1675_v56  ;;  %4575 = vmatprep.mubr.bf16.mxu1 %v1675_v56  ;;  %v1583_v56 = vrot.slane %v1581_v46, 2  ;;  %v15115_v41 = vld [vmem:[%s20582_s1 + $0x104] ss:$16 sps:$4 sm:$0xff]  }
 0x160   : > { %4067 = vmatpush1.bf16.msra.mxu0 %v15040_v53  ;;  %4613 = vmatpush1.bf16.msra.mxu1 %v15043_v57  ;;  %v15077_v53 = vld [vmem:[%s20582_s1 + $0x48] ss:$16 sps:$4 sm:$0xff]   ;;  %v1486_v57 = vsel %vm1200_vm0, %v1386_v35, %v1485_v49  ;;  %v1778_v35 = vrot.slane %v1776_v27, 1  ;;  %v15122_v46 = vld [vmem:[%s20582_s1 + $0x124] ss:$16 sps:$4 sm:$0xff]  }
 0x161   : > { %4068 = vmatprep.subr.bf16.mxu0 %v15050_v59  ;;  %4614 = vmatprep.subr.bf16.mxu1 %v15053_v60  ;;  %v15086_v59 = vld [vmem:[%s20582_s1 + $0x6c] ss:$16 sps:$4 sm:$0xff]   ;;  %v15081_v60 = vld [vmem:[%s20582_s1 + $0x60] ss:$16 sps:$4 sm:$0xff]   ;;  %v1584_v62 = vor.u32 %v1583_v56, %v1580_v54  ;;  %v15129_v54 = vld [vmem:[%s20582_s1 + $0x148] ss:$16 sps:$4 sm:$0xff]  }
 0x162   : > { %v15134_v56 = vld [vmem:[%s20582_s1 + $0x164] ss:$16 sps:$4 sm:$0xff]   ;;  %v15181_v27 = vld [vmem:[%s20582_s1 + $0x24c] ss:$16 sps:$4 sm:$0xff]  }
 0x164   : > { %4069 = vmatpush1.bf16.msra.mxu0 %v15048_v3  ;;  %4615 = vmatpush1.bf16.msra.mxu1 %v15051_v6  ;;  %v1680_v3 = vshll.u32 %v15106_v58, 16  ;;  %v15092_v6 = vld [vmem:[%s20582_s1 + $0x8c] ss:$16 sps:$4 sm:$0xff]  }
 0x165   : > { %4070 = vmatprep.subr.bf16.mxu0 %v15056_v7  ;;  %4616 = vmatprep.subr.bf16.mxu1 %v15059_v8 }
 0x166   : > { %4030 = vmatmul.mubr.bf16.gmra.mrb[12].mxu0 %v1666_v9  ;;  %4576 = vmatmul.mubr.bf16.gmra.mrb[12].mxu1 %v1666_v9  ;;  %v15087_v9 = vld [vmem:[%s20582_s1 + $0x80] ss:$16 sps:$4 sm:$0xff]  }
 0x167   : > { %4039 = vmatprep.mubr.bf16.mxu0 %v1774_v12  ;;  %4585 = vmatprep.mubr.bf16.mxu1 %v1774_v12 }
 0x168   : > { %4071 = vmatpush1.bf16.msra.mxu0 %v15054_v14  ;;  %4617 = vmatpush1.bf16.msra.mxu1 %v15057_v16 }
 0x169   : > { %6565 = vmatprep.subr.bf16.mxu0 %v15062_v15  ;;  %7111 = vmatprep.subr.bf16.mxu1 %v15065_v17  ;;  %v1585_v15 = vsel %vm1200_vm0, %v1485_v49, %v1584_v62  ;;  %v15096_v17 = vld [vmem:[%s20582_s1 + $0xa4] ss:$16 sps:$4 sm:$0xff]   ;;  %v15123_v49 = vld [vmem:[%s20582_s1 + $0x128] ss:$16 sps:$4 sm:$0xff]  }
 0x16e   : > { %4040 = vmatmul.mubr.bf16.gmra.mrb[16].mxu0 %v1765_v21  ;;  %4586 = vmatmul.mubr.bf16.gmra.mrb[16].mxu1 %v1765_v21 }
 0x16f   : > { %4049 = vmatprep.mubr.bf16.mxu0 %v1769_v55  ;;  %4595 = vmatprep.mubr.bf16.mxu1 %v1769_v55  ;;  %v15083_v55 = vld [vmem:[%s20582_s1 + $0x64] ss:$16 sps:$4 sm:$0xff]  }
 0x176   : > { %4050 = vmatmul.mubr.bf16.gmra.mrb[36].mxu0 %v1760_v10  ;;  %4596 = vmatmul.mubr.bf16.gmra.mrb[36].mxu1 %v1760_v10  ;;  %v15090_v10 = vld [vmem:[%s20582_s1 + $0x88] ss:$16 sps:$4 sm:$0xff]  }
 0x177   : > { %4090 = vmatprep.mubr.bf16.mxu0 %v16262_v32  ;;  %4636 = vmatprep.mubr.bf16.mxu1 %v16262_v32 }
 0x17e   : > { %12601 = vmatmul.mubr.msk.bf16.vlgmr.msra.gmra.mrb[0].mxu0 %vm3584_vm1, %v1387_v40  ;;  %12607 = vmatmul.mubr.msk.bf16.vlgmr.msra.gmra.mrb[0].mxu1 %vm3584_vm1, %v1387_v40  ;;  %v1782_v40 = vor.u32 %v1781_v36, %v1778_v35  ;;  %v15185_v36 = vld [vmem:[%s20582_s1 + $0x268] ss:$16 sps:$4 sm:$0xff]  }
 0x17f   : > { %6566 = vmatpush1.bf16.msra.mxu0 %v15060_v37  ;;  %7112 = vmatpush1.bf16.msra.mxu1 %v15063_v39  ;;  %v15112_v37 = vld [vmem:[%s20582_s1 + $0xec] ss:$16 sps:$4 sm:$0xff]   ;;  %v15110_v39 = vld [vmem:[%s20582_s1 + $0xe8] ss:$16 sps:$4 sm:$0xff]  }
 0x180   : > { %6567 = vmatprep.subr.bf16.mxu0 %v15070_v43  ;;  %7113 = vmatprep.subr.bf16.mxu1 %v15073_v44  ;;  %v15113_v43 = vld [vmem:[%s20582_s1 + $0x100] ss:$16 sps:$4 sm:$0xff]   ;;  %v15116_v44 = vld [vmem:[%s20582_s1 + $0x108] ss:$16 sps:$4 sm:$0xff]  }
 0x181   : > { %4100 = vmatprep.mubr.bf16.mxu0 %v16262_v32  ;;  %4646 = vmatprep.mubr.bf16.mxu1 %v16262_v32 }
 0x183   : > { %6568 = vmatpush1.bf16.msra.mxu0 %v15068_v47  ;;  %7114 = vmatpush1.bf16.msra.mxu1 %v15071_v48  ;;  %v15125_v47 = vld [vmem:[%s20582_s1 + $0x12c] ss:$16 sps:$4 sm:$0xff]   ;;  %v15120_v48 = vld [vmem:[%s20582_s1 + $0x120] ss:$16 sps:$4 sm:$0xff]  }
 0x184   : > { %6569 = vmatprep.subr.bf16.mxu0 %v15076_v50  ;;  %7115 = vmatprep.subr.bf16.mxu1 %v15079_v51  ;;  %v15128_v50 = vld [vmem:[%s20582_s1 + $0x144] ss:$16 sps:$4 sm:$0xff]   ;;  %v15131_v51 = vld [vmem:[%s20582_s1 + $0x14c] ss:$16 sps:$4 sm:$0xff]  }
 0x186   : > { %12602 = vmatmul.mubr.msk.bf16.gmra.mrb[4].mxu0 %vm3584_vm1, %v1486_v57  ;;  %12608 = vmatmul.mubr.msk.bf16.gmra.mrb[4].mxu1 %vm3584_vm1, %v1486_v57  ;;  %v15137_v57 = vld [vmem:[%s20582_s1 + $0x16c] ss:$16 sps:$4 sm:$0xff]  }
 0x187   : > { %6570 = vmatpush1.bf16.msra.mxu0 %v15074_v52  ;;  %7116 = vmatpush1.bf16.msra.mxu1 %v15077_v53  ;;  %v15126_v52 = vld [vmem:[%s20582_s1 + $0x140] ss:$16 sps:$4 sm:$0xff]  }
 0x188   : > { %6571 = vmatprep.subr.bf16.mxu0 %v15083_v55  ;;  %7117 = vmatprep.subr.bf16.mxu1 %v15086_v59  ;;  %v172_v53 = vld [vmem:[%s16433_s30] sm:$0xff]  ;;  %v16154_v55 = vld [vmem:[%s16433_s30 + $0x2c] sm:$0xff] }
 0x189   : > { %v3778_v7 = vpop.f32.mrb[24].mxu0  ;;  %v4324_v8 = vpop.f32.mrb[24].mxu1  ;;  %4110 = vmatprep.mubr.bf16.mxu0 %v16262_v32  ;;  %4656 = vmatprep.mubr.bf16.mxu1 %v16262_v32  ;;  %v12614_v58 = vcombine.high %v172_v53, %v16154_v55  ;;  %v15132_v59 = vld [vmem:[%s20582_s1 + $0x160] ss:$16 sps:$4 sm:$0xff]  }
 0x18a   : > { %v17608_v11 = vadd.f32 %v3778_v7, %v17435_v1  ;;  %v17611_v12 = vadd.f32 %v4324_v8, %v17437_v2  ;;  %v3780_v14 = vpop.f32.mrb[25].mxu0  ;;  %v4326_v16 = vpop.f32.mrb[25].mxu1  ;;  %v1679_v1 = vrot.slane %v1677_v0, 1  ;;  %v1682_v2 = vrot.slane %v1680_v3, 2  ;;  %v15141_v0 = vld [vmem:[%s20582_s1 + $0x188] ss:$16 sps:$4 sm:$0xff]  }
 0x18b   : > { %v17619_v19 = vadd.f32 %v3780_v14, %v17442_v4  ;;  %v17622_v20 = vadd.f32 %v4326_v16, %v17444_v5  ;;  %6572 = vmatpush1.bf16.msra.mxu0 %v15081_v60  ;;  %7118 = vmatpush1.bf16.msra.mxu1 %v15084_v61  ;;  %v3782_v13 = vpop.f32.mrb[26].mxu0  ;;  %v4328_v21 = vpop.f32.mrb[26].mxu1  ;;  %v15094_v4 = vld [vmem:[%s20582_s1 + $0xa0] ss:$16 sps:$4 sm:$0xff]   ;;  %v15097_v5 = vld [vmem:[%s20582_s1 + $0xa8] ss:$16 sps:$4 sm:$0xff]  }
 0x18c   : > { %6573 = vmatprep.subr.bf16.mxu0 %v15089_v63  ;;  %7119 = vmatprep.subr.bf16.mxu1 %v15092_v6  ;;  %v3783_v23 = vpop.f32.mrb[27].mxu0  ;;  %v4329_v24 = vpop.f32.mrb[27].mxu1  ;;  %v1683_v26 = vor.u32 %v1682_v2, %v1679_v1  ;;  %v15135_v60 = vld [vmem:[%s20582_s1 + $0x168] ss:$16 sps:$4 sm:$0xff]   ;;  %v15140_v61 = vld [vmem:[%s20582_s1 + $0x184] ss:$16 sps:$4 sm:$0xff]   ;;  %v12613_v21 = vcombine.low %v172_v53, %v16154_v55 }
 0x18d   : > { %v15138_v63 = vld [vmem:[%s20582_s1 + $0x180] ss:$16 sps:$4 sm:$0xff]   ;;  %v15146_v3 = vld [vmem:[%s20582_s1 + $0x1a4] ss:$16 sps:$4 sm:$0xff]   ;;  %v15149_v6 = vld [vmem:[%s20582_s1 + $0x1ac] ss:$16 sps:$4 sm:$0xff]  }
 0x18e   : > { %12603 = vmatmul.mubr.msk.bf16.gmra.mrb[8].mxu0 %vm3584_vm1, %v1585_v15  ;;  %12609 = vmatmul.mubr.msk.bf16.gmra.mrb[8].mxu1 %vm3584_vm1, %v1585_v15  ;;  %v1684_v33 = vsel %vm1200_vm0, %v1584_v62, %v1683_v26  ;;  %v1783_v45 = vsel %vm1200_vm0, %v1683_v26, %v1782_v40  ;;  %v15143_v62 = vld [vmem:[%s20582_s1 + $0x18c] ss:$16 sps:$4 sm:$0xff]   ;;  %v15144_v7 = vld [vmem:[%s20582_s1 + $0x1a0] ss:$16 sps:$4 sm:$0xff]   ;;  %v15147_v8 = vld [vmem:[%s20582_s1 + $0x1a8] ss:$16 sps:$4 sm:$0xff]  }
 0x18f   : > { %6574 = vmatpush1.bf16.msra.mxu0 %v15087_v9  ;;  %7120 = vmatpush1.bf16.msra.mxu1 %v15090_v10  ;;  %v15152_v9 = vld [vmem:[%s20582_s1 + $0x1c4] ss:$16 sps:$4 sm:$0xff]   ;;  %v15155_v10 = vld [vmem:[%s20582_s1 + $0x1cc] ss:$16 sps:$4 sm:$0xff]   ;;  %v15150_v14 = vld [vmem:[%s20582_s1 + $0x1c0] ss:$16 sps:$4 sm:$0xff]  }
 0x190   : > { %6575 = vmatprep.subr.bf16.mxu0 %v15096_v17  ;;  %7121 = vmatprep.subr.bf16.mxu1 %v15099_v22  ;;  %v15153_v16 = vld [vmem:[%s20582_s1 + $0x1c8] ss:$16 sps:$4 sm:$0xff]   ;;  %v15158_v15 = vld [vmem:[%s20582_s1 + $0x1e4] ss:$16 sps:$4 sm:$0xff]   ;;  %v15161_v17 = vld [vmem:[%s20582_s1 + $0x1ec] ss:$16 sps:$4 sm:$0xff]  }
 0x191   : > { %4120 = vmatprep.mubr.bf16.mxu0 %v16262_v32  ;;  %4666 = vmatprep.mubr.bf16.mxu1 %v16262_v32  ;;  %v15159_v1 = vld [vmem:[%s20582_s1 + $0x1e8] ss:$16 sps:$4 sm:$0xff]   ;;  %v15166_v2 = vld [vmem:[%s20582_s1 + $0x204] ss:$16 sps:$4 sm:$0xff]   ;;  %v15169_v13 = vld [vmem:[%s20582_s1 + $0x20c] ss:$16 sps:$4 sm:$0xff]  }
 0x192   : > { %v15164_v22 = vld [vmem:[%s20582_s1 + $0x200] ss:$16 sps:$4 sm:$0xff]   ;;  %v15167_v23 = vld [vmem:[%s20582_s1 + $0x208] ss:$16 sps:$4 sm:$0xff]   ;;  %v15172_v24 = vld [vmem:[%s20582_s1 + $0x224] ss:$16 sps:$4 sm:$0xff]  }
 0x193   : > { %6576 = vmatpush1.bf16.msra.mxu0 %v15094_v4  ;;  %7122 = vmatpush1.bf16.msra.mxu1 %v15097_v5  ;;  %v15175_v4 = vld [vmem:[%s20582_s1 + $0x22c] ss:$16 sps:$4 sm:$0xff]   ;;  %v15170_v5 = vld [vmem:[%s20582_s1 + $0x220] ss:$16 sps:$4 sm:$0xff]   ;;  %v15178_v26 = vld [vmem:[%s20582_s1 + $0x244] ss:$16 sps:$4 sm:$0xff]  }
 0x194   : > { %6577 = vmatprep.subr.bf16.mxu0 %v15102_v25  ;;  %7123 = vmatprep.subr.bf16.mxu1 %v15105_v29  ;;  %v15173_v25 = vld [vmem:[%s20582_s1 + $0x228] ss:$16 sps:$4 sm:$0xff]   ;;  %v15176_v29 = vld [vmem:[%s20582_s1 + $0x240] ss:$16 sps:$4 sm:$0xff]  }
 0x195   : > { %v16158_v53 = vld [vmem:[%s16433_s30 + $0xb0] ss:$44 sps:$4 sm:$0xff]   ;;  %v16159_v55 = vld [vmem:[%s16433_s30 + $0x10c] ss:$44 sps:$4 sm:$0xff]  }
 0x196   : > { %12604 = vmatmul.mubr.msk.bf16.gmra.mrb[12].mxu0 %vm3584_vm1, %v1684_v33  ;;  %12610 = vmatmul.mubr.msk.bf16.gmra.mrb[12].mxu1 %vm3584_vm1, %v1684_v33  ;;  %v15187_v33 = vld [vmem:[%s20582_s1 + $0x26c] ss:$16 sps:$4 sm:$0xff]  }
 0x197   : > { %6578 = vmatpush1.bf16.msra.mxu0 %v15100_v30  ;;  %7124 = vmatpush1.bf16.msra.mxu1 %v15103_v31  ;;  %v15179_v30 = vld [vmem:[%s20582_s1 + $0x248] ss:$16 sps:$4 sm:$0xff]   ;;  %v15184_v31 = vld [vmem:[%s20582_s1 + $0x264] ss:$16 sps:$4 sm:$0xff]  }
 0x198   : > { %6579 = vmatprep.subr.bf16.mxu0 %v15109_v34  ;;  %7125 = vmatprep.subr.bf16.mxu1 %v15112_v37  ;;  %v16156_v34 = vld [vmem:[%s16433_s30 + $0x58] ss:$44 sps:$4 sm:$0xff]  }
 0x199   : > { %4130 = vmatprep.mubr.bf16.mxu0 %v16262_v32  ;;  %4676 = vmatprep.mubr.bf16.mxu1 %v16262_v32  ;;  %v15190_v37 = vld [vmem:[%s20582_s1 + $0x284] ss:$16 sps:$4 sm:$0xff]  }
 0x19b   : > { %6580 = vmatpush1.bf16.msra.mxu0 %v15107_v38  ;;  %7126 = vmatpush1.bf16.msra.mxu1 %v15110_v39  ;;  %v15193_v38 = vld [vmem:[%s20582_s1 + $0x28c] ss:$16 sps:$4 sm:$0xff]  }
 0x19c   : > { %6581 = vmatprep.subr.bf16.mxu0 %v15115_v41  ;;  %7127 = vmatprep.subr.bf16.mxu1 %v15118_v42  ;;  %v16157_v41 = vld [vmem:[%s16433_s30 + $0xb4] ss:$44 sps:$4 sm:$0xff]  }
 0x19d   : > { %v15188_v42 = vld [vmem:[%s20582_s1 + $0x280] ss:$16 sps:$4 sm:$0xff]  }
 0x19e   : > { %12605 = vmatmul.mubr.msk.bf16.gmra.mrb[16].mxu0 %vm3584_vm1, %v1783_v45  ;;  %12611 = vmatmul.mubr.msk.bf16.gmra.mrb[16].mxu1 %vm3584_vm1, %v1783_v45 }
 0x19f   : > { %6582 = vmatpush1.bf16.msra.mxu0 %v15113_v43  ;;  %7128 = vmatpush1.bf16.msra.mxu1 %v15116_v44  ;;  %v15191_v43 = vld [vmem:[%s20582_s1 + $0x288] ss:$16 sps:$4 sm:$0xff]  }
 0x1a0   : > { %6583 = vmatprep.subr.bf16.mxu0 %v15122_v46  ;;  %7129 = vmatprep.subr.bf16.mxu1 %v15125_v47 }
 0x1a1   : > { %4140 = vmatprep.mubr.bf16.mxu0 %v16262_v32  ;;  %4686 = vmatprep.mubr.bf16.mxu1 %v16262_v32 }
 0x1a3   : > { %6584 = vmatpush1.bf16.msra.mxu0 %v15120_v48  ;;  %7130 = vmatpush1.bf16.msra.mxu1 %v15123_v49 }
 0x1a4   : > { %6585 = vmatprep.subr.bf16.mxu0 %v15128_v50  ;;  %7131 = vmatprep.subr.bf16.mxu1 %v15131_v51 }
 0x1a6   : > { %12606 = vmatmul.mubr.msk.bf16.gmra.mrb[40].mxu0 %vm3584_vm1, %v1778_v35  ;;  %12612 = vmatmul.mubr.msk.bf16.gmra.mrb[40].mxu1 %vm3584_vm1, %v1778_v35  ;;  %v15182_v35 = vld [vmem:[%s20582_s1 + $0x260] ss:$16 sps:$4 sm:$0xff]  }
 0x1a7   : > { %6586 = vmatpush1.bf16.msra.mxu0 %v15126_v52  ;;  %7132 = vmatpush1.bf16.msra.mxu1 %v15129_v54  ;;  %v15197_v54 = vld [vmem:[%s20582_s1 + $0x2a8] ss:$16 sps:$4 sm:$0xff]  }
 0x1a8   : > { %6587 = vmatprep.subr.bf16.mxu0 %v15134_v56  ;;  %7133 = vmatprep.subr.bf16.mxu1 %v15137_v57  ;;  %v15202_v56 = vld [vmem:[%s20582_s1 + $0x2c4] ss:$16 sps:$4 sm:$0xff]   ;;  %v15205_v57 = vld [vmem:[%s20582_s1 + $0x2cc] ss:$16 sps:$4 sm:$0xff]  }
 0x1a9   : > { %6597 = vmatprep.mubr.bf16.mxu0 %v12614_v58  ;;  %7143 = vmatprep.mubr.bf16.mxu1 %v12614_v58  ;;  %v15200_v58 = vld [vmem:[%s20582_s1 + $0x2c0] ss:$16 sps:$4 sm:$0xff]  }
 0x1ab   : > { %6588 = vmatpush1.bf16.msra.mxu0 %v15132_v59  ;;  %7134 = vmatpush1.bf16.msra.mxu1 %v15135_v60  ;;  %v15203_v59 = vld [vmem:[%s20582_s1 + $0x2c8] ss:$16 sps:$4 sm:$0xff]   ;;  %v15208_v60 = vld [vmem:[%s20582_s1 + $0x2e4] ss:$16 sps:$4 sm:$0xff]  }
 0x1ac   : > { %6589 = vmatprep.subr.bf16.mxu0 %v15140_v61  ;;  %7135 = vmatprep.subr.bf16.mxu1 %v15143_v62  ;;  %v15211_v61 = vld [vmem:[%s20582_s1 + $0x2ec] ss:$16 sps:$4 sm:$0xff]   ;;  %v15206_v62 = vld [vmem:[%s20582_s1 + $0x2e0] ss:$16 sps:$4 sm:$0xff]  }
 0x1af   : > { %6590 = vmatpush1.bf16.msra.mxu0 %v15138_v63  ;;  %7136 = vmatpush1.bf16.msra.mxu1 %v15141_v0  ;;  %v16160_v63 = vld [vmem:[%s16433_s30 + $0x108] ss:$44 sps:$4 sm:$0xff]  }
 0x1b0   : > { %6591 = vmatprep.subr.bf16.mxu0 %v15146_v3  ;;  %7137 = vmatprep.subr.bf16.mxu1 %v15149_v6  ;;  %v15209_v0 = vld [vmem:[%s20582_s1 + $0x2e8] ss:$16 sps:$4 sm:$0xff]   ;;  %v15214_v3 = vld [vmem:[%s20582_s1 + $0x304] ss:$16 sps:$4 sm:$0xff]   ;;  %v15217_v6 = vld [vmem:[%s20582_s1 + $0x30c] ss:$16 sps:$4 sm:$0xff]  }
 0x1b3   : > { %6592 = vmatpush1.bf16.msra.mxu0 %v15144_v7  ;;  %7138 = vmatpush1.bf16.msra.mxu1 %v15147_v8  ;;  %v232_v7 = vld [vmem:[%s16433_s30 + $0x1b8] sm:$0x11]  ;;  %v16161_v8 = vld [vmem:[%s16433_s30 + $0x164] ss:$44 sps:$4 sm:$0xff]  }
 0x1b4   : > { %6593 = vmatprep.subr.bf16.mxu0 %v15152_v9  ;;  %7139 = vmatprep.subr.bf16.mxu1 %v15155_v10  ;;  %v15212_v9 = vld [vmem:[%s20582_s1 + $0x300] ss:$16 sps:$4 sm:$0xff]   ;;  %v15215_v10 = vld [vmem:[%s20582_s1 + $0x308] ss:$16 sps:$4 sm:$0xff]  }
 0x1b7   : > { %6594 = vmatpush1.bf16.msra.mxu0 %v15150_v14  ;;  %7140 = vmatpush1.bf16.msra.mxu1 %v15153_v16  ;;  %v15220_v14 = vld [vmem:[%s20582_s1 + $0x324] ss:$16 sps:$4 sm:$0xff]   ;;  %v15223_v16 = vld [vmem:[%s20582_s1 + $0x32c] ss:$16 sps:$4 sm:$0xff]  }
 0x1b8   : > { %6595 = vmatprep.subr.bf16.mxu0 %v15158_v15  ;;  %7141 = vmatprep.subr.bf16.mxu1 %v15161_v17  ;;  %v12625_v15 = vcombine.high %v232_v7, %v232_v7  ;;  %v16162_v17 = vld [vmem:[%s16433_s30 + $0x160] ss:$44 sps:$4 sm:$0xff]  }
 0x1bb   : > { %6596 = vmatpush1.bf16.msra.mxu0 %v15156_v18  ;;  %7142 = vmatpush1.bf16.msra.mxu1 %v15159_v1  ;;  %v15218_v18 = vld [vmem:[%s20582_s1 + $0x320] ss:$16 sps:$4 sm:$0xff]   ;;  %v15221_v1 = vld [vmem:[%s20582_s1 + $0x328] ss:$16 sps:$4 sm:$0xff]  }
 0x1bc   : > { %6656 = vmatprep.subr.bf16.mxu0 %v15166_v2  ;;  %7202 = vmatprep.subr.bf16.mxu1 %v15169_v13  ;;  %v15228_v2 = vld [vmem:[%s20582_s1 + $0x344] ss:$16 sps:$4 sm:$0xff]   ;;  %v15231_v13 = vld [vmem:[%s20582_s1 + $0x34c] ss:$16 sps:$4 sm:$0xff]  }
 0x1be   : > { %6598 = vmatmul.mubr.bf16.vlgmr.msra.gmra.mrb[0].mxu0 %v12613_v21  ;;  %7144 = vmatmul.mubr.bf16.vlgmr.msra.gmra.mrb[0].mxu1 %v12613_v21  ;;  %v15226_v21 = vld [vmem:[%s20582_s1 + $0x340] ss:$16 sps:$4 sm:$0xff]  }
 0x1bf   : > { %6657 = vmatpush1.bf16.msra.mxu0 %v15164_v22  ;;  %7203 = vmatpush1.bf16.msra.mxu1 %v15167_v23  ;;  %v15229_v22 = vld [vmem:[%s20582_s1 + $0x348] ss:$16 sps:$4 sm:$0xff]   ;;  %v12624_v23 = vcombine.low %v232_v7, %v232_v7 }
 0x1c0   : > { %6658 = vmatprep.subr.bf16.mxu0 %v15172_v24  ;;  %7204 = vmatprep.subr.bf16.mxu1 %v15175_v4  ;;  %v173_v24 = vld [vmem:[%s16433_s30 + $0x8] sm:$0xff]  ;;  %v15234_v4 = vld [vmem:[%s20582_s1 + $0x364] ss:$16 sps:$4 sm:$0xff]  }
 0x1c1   : > { %6607 = vmatprep.mubr.bf16.mxu0 %v16155_v28  ;;  %7153 = vmatprep.mubr.bf16.mxu1 %v16155_v28  ;;  %v15235_v28 = vld [vmem:[%s20582_s1 + $0x368] ss:$16 sps:$4 sm:$0xff]  }
 0x1c3   : > { %6659 = vmatpush1.bf16.msra.mxu0 %v15170_v5  ;;  %7205 = vmatpush1.bf16.msra.mxu1 %v15173_v25  ;;  %v15237_v5 = vld [vmem:[%s20582_s1 + $0x36c] ss:$16 sps:$4 sm:$0xff]   ;;  %v16163_v25 = vld [vmem:[%s16433_s30 + $0x34] sm:$0xff] }
 0x1c4   : > { %6660 = vmatprep.subr.bf16.mxu0 %v15178_v26  ;;  %7206 = vmatprep.subr.bf16.mxu1 %v15181_v27  ;;  %v12616_v26 = vcombine.high %v173_v24, %v16163_v25  ;;  %v15232_v27 = vld [vmem:[%s20582_s1 + $0x360] ss:$16 sps:$4 sm:$0xff]  }
 0x1c6   : > { %6608 = vmatmul.mubr.bf16.gmra.mrb[4].mxu0 %v16156_v34  ;;  %7154 = vmatmul.mubr.bf16.gmra.mrb[4].mxu1 %v16156_v34  ;;  %v15244_v34 = vld [vmem:[%s20582_s1 + $0x3a0] ss:$16 sps:$4 sm:$0xff]  }
 0x1c7   : > { %6661 = vmatpush1.bf16.msra.mxu0 %v15176_v29  ;;  %7207 = vmatpush1.bf16.msra.mxu1 %v15179_v30  ;;  %v15240_v29 = vld [vmem:[%s20582_s1 + $0x384] ss:$16 sps:$4 sm:$0xff]   ;;  %v15243_v30 = vld [vmem:[%s20582_s1 + $0x38c] ss:$16 sps:$4 sm:$0xff]  }
 0x1c8   : > { %6662 = vmatprep.subr.bf16.mxu0 %v15184_v31  ;;  %7208 = vmatprep.subr.bf16.mxu1 %v15187_v33  ;;  %v15238_v31 = vld [vmem:[%s20582_s1 + $0x380] ss:$16 sps:$4 sm:$0xff]   ;;  %v15241_v33 = vld [vmem:[%s20582_s1 + $0x388] ss:$16 sps:$4 sm:$0xff]  }
 0x1c9   : > { %v3869_v39 = vpop.f32.mrb[28].mxu0  ;;  %v4415_v40 = vpop.f32.mrb[28].mxu1  ;;  %6617 = vmatprep.mubr.bf16.mxu0 %v16157_v41  ;;  %7163 = vmatprep.mubr.bf16.mxu1 %v16157_v41  ;;  %v15253_v41 = vld [vmem:[%s20582_s1 + $0x3c8] ss:$16 sps:$4 sm:$0xff]  }
 0x1ca   : > { %v17835_v44 = vadd.f32 %v3869_v39, %v17608_v11  ;;  %v17838_v45 = vadd.f32 %v4415_v40, %v17611_v12  ;;  %v3871_v46 = vpop.f32.mrb[29].mxu0  ;;  %v4417_v47 = vpop.f32.mrb[29].mxu1  ;;  %v15196_v11 = vld [vmem:[%s20582_s1 + $0x2a4] ss:$16 sps:$4 sm:$0xff]   ;;  %v15199_v12 = vld [vmem:[%s20582_s1 + $0x2ac] ss:$16 sps:$4 sm:$0xff]  }
 0x1cb   : > { %v17841_v48 = vadd.f32 %v3871_v46, %v17619_v19  ;;  %v17844_v49 = vadd.f32 %v4417_v47, %v17622_v20  ;;  %6663 = vmatpush1.bf16.msra.mxu0 %v15182_v35  ;;  %7209 = vmatpush1.bf16.msra.mxu1 %v15185_v36  ;;  %v3873_v50 = vpop.f32.mrb[30].mxu0  ;;  %v4419_v51 = vpop.f32.mrb[30].mxu1  ;;  %v15194_v20 = vld [vmem:[%s20582_s1 + $0x2a0] ss:$16 sps:$4 sm:$0xff]   ;;  %v15246_v35 = vld [vmem:[%s20582_s1 + $0x3a4] ss:$16 sps:$4 sm:$0xff]  }
 0x1cc   : > { %6664 = vmatprep.subr.bf16.mxu0 %v15190_v37  ;;  %7210 = vmatprep.subr.bf16.mxu1 %v15193_v38  ;;  %v3874_v19 = vpop.f32.mrb[31].mxu0  ;;  %v4420_v52 = vpop.f32.mrb[31].mxu1  ;;  %v15249_v36 = vld [vmem:[%s20582_s1 + $0x3ac] ss:$16 sps:$4 sm:$0xff]   ;;  %v15247_v37 = vld [vmem:[%s20582_s1 + $0x3a8] ss:$16 sps:$4 sm:$0xff]  }
 0x1cd   : > { %v15252_v38 = vld [vmem:[%s20582_s1 + $0x3c4] ss:$16 sps:$4 sm:$0xff]   ;;  %v15255_v39 = vld [vmem:[%s20582_s1 + $0x3cc] ss:$16 sps:$4 sm:$0xff]   ;;  %v15250_v40 = vld [vmem:[%s20582_s1 + $0x3c0] ss:$16 sps:$4 sm:$0xff]  }
 0x1ce   : > { %6618 = vmatmul.mubr.bf16.gmra.mrb[8].mxu0 %v16158_v53  ;;  %7164 = vmatmul.mubr.bf16.gmra.mrb[8].mxu1 %v16158_v53  ;;  %v15256_v46 = vld [vmem:[%s20582_s1 + $0x3e0] ss:$16 sps:$4 sm:$0xff]   ;;  %v15259_v47 = vld [vmem:[%s20582_s1 + $0x3e8] ss:$16 sps:$4 sm:$0xff]   ;;  %v15266_v50 = vld [vmem:[%s20582_s1 + $0x404] ss:$16 sps:$4 sm:$0xff]  }
 0x1cf   : > { %6665 = vmatpush1.bf16.msra.mxu0 %v15188_v42  ;;  %7211 = vmatpush1.bf16.msra.mxu1 %v15191_v43  ;;  %v15258_v42 = vld [vmem:[%s20582_s1 + $0x3e4] ss:$16 sps:$4 sm:$0xff]   ;;  %v15261_v43 = vld [vmem:[%s20582_s1 + $0x3ec] ss:$16 sps:$4 sm:$0xff]   ;;  %v15267_v19 = vld [vmem:[%s20582_s1 + $0x408] ss:$16 sps:$4 sm:$0xff]  }
 0x1d0   : > { %6666 = vmatprep.subr.bf16.mxu0 %v15196_v11  ;;  %7212 = vmatprep.subr.bf16.mxu1 %v15199_v12  ;;  %v15269_v51 = vld [vmem:[%s20582_s1 + $0x40c] ss:$16 sps:$4 sm:$0xff]   ;;  %v15264_v11 = vld [vmem:[%s20582_s1 + $0x400] ss:$16 sps:$4 sm:$0xff]   ;;  %v12615_v12 = vcombine.low %v173_v24, %v16163_v25  ;;  %v15272_v52 = vld [vmem:[%s20582_s1 + $0x424] ss:$16 sps:$4 sm:$0xff]  }
 0x1d1   : > { %6627 = vmatprep.mubr.bf16.mxu0 %v16159_v55  ;;  %7173 = vmatprep.mubr.bf16.mxu1 %v16159_v55  ;;  %v15275_v53 = vld [vmem:[%s20582_s1 + $0x42c] ss:$16 sps:$4 sm:$0xff]   ;;  %v16164_v55 = vld [vmem:[%s16433_s30 + $0x64] ss:$44 sps:$4 sm:$0xff]   ;;  %v15297_v24 = vld [vmem:[%s20582_s1 + $0x4a8] ss:$16 sps:$4 sm:$0xff]  }
 0x1d2   : > { %v16168_v25 = vld [vmem:[%s16433_s30 + $0x114] ss:$44 sps:$4 sm:$0xff]  }
 0x1d3   : > { %6667 = vmatpush1.bf16.msra.mxu0 %v15194_v20  ;;  %7213 = vmatpush1.bf16.msra.mxu1 %v15197_v54  ;;  %v15270_v20 = vld [vmem:[%s20582_s1 + $0x420] ss:$16 sps:$4 sm:$0xff]   ;;  %v15273_v54 = vld [vmem:[%s20582_s1 + $0x428] ss:$16 sps:$4 sm:$0xff]  }
 0x1d4   : > { %6668 = vmatprep.subr.bf16.mxu0 %v15202_v56  ;;  %7214 = vmatprep.subr.bf16.mxu1 %v15205_v57  ;;  %v15278_v56 = vld [vmem:[%s20582_s1 + $0x444] ss:$16 sps:$4 sm:$0xff]   ;;  %v15281_v57 = vld [vmem:[%s20582_s1 + $0x44c] ss:$16 sps:$4 sm:$0xff]  }
 0x1d6   : > { %6628 = vmatmul.mubr.bf16.gmra.mrb[12].mxu0 %v16160_v63  ;;  %7174 = vmatmul.mubr.bf16.gmra.mrb[12].mxu1 %v16160_v63  ;;  %v15282_v63 = vld [vmem:[%s20582_s1 + $0x460] ss:$16 sps:$4 sm:$0xff]  }
 0x1d7   : > { %6669 = vmatpush1.bf16.msra.mxu0 %v15200_v58  ;;  %7215 = vmatpush1.bf16.msra.mxu1 %v15203_v59  ;;  %v15276_v58 = vld [vmem:[%s20582_s1 + $0x440] ss:$16 sps:$4 sm:$0xff]   ;;  %v15279_v59 = vld [vmem:[%s20582_s1 + $0x448] ss:$16 sps:$4 sm:$0xff]  }
 0x1d8   : > { %6670 = vmatprep.subr.bf16.mxu0 %v15208_v60  ;;  %7216 = vmatprep.subr.bf16.mxu1 %v15211_v61  ;;  %v15284_v60 = vld [vmem:[%s20582_s1 + $0x464] ss:$16 sps:$4 sm:$0xff]   ;;  %v15287_v61 = vld [vmem:[%s20582_s1 + $0x46c] ss:$16 sps:$4 sm:$0xff]  }
 0x1d9   : > { %6637 = vmatprep.mubr.bf16.mxu0 %v16161_v8  ;;  %7183 = vmatprep.mubr.bf16.mxu1 %v16161_v8 }
 0x1db   : > { %6671 = vmatpush1.bf16.msra.mxu0 %v15206_v62  ;;  %7217 = vmatpush1.bf16.msra.mxu1 %v15209_v0  ;;  %v16165_v62 = vld [vmem:[%s16433_s30 + $0x60] ss:$44 sps:$4 sm:$0xff]   ;;  %v15285_v0 = vld [vmem:[%s20582_s1 + $0x468] ss:$16 sps:$4 sm:$0xff]  }
 0x1dc   : > { %6672 = vmatprep.subr.bf16.mxu0 %v15214_v3  ;;  %7218 = vmatprep.subr.bf16.mxu1 %v15217_v6  ;;  %v15290_v3 = vld [vmem:[%s20582_s1 + $0x484] ss:$16 sps:$4 sm:$0xff]   ;;  %v15293_v6 = vld [vmem:[%s20582_s1 + $0x48c] ss:$16 sps:$4 sm:$0xff]  }
 0x1de   : > { %6638 = vmatmul.mubr.bf16.gmra.mrb[16].mxu0 %v16162_v17  ;;  %7184 = vmatmul.mubr.bf16.gmra.mrb[16].mxu1 %v16162_v17 }
 0x1df   : > { %6673 = vmatpush1.bf16.msra.mxu0 %v15212_v9  ;;  %7219 = vmatpush1.bf16.msra.mxu1 %v15215_v10  ;;  %v16166_v9 = vld [vmem:[%s16433_s30 + $0xbc] ss:$44 sps:$4 sm:$0xff]   ;;  %v15288_v10 = vld [vmem:[%s20582_s1 + $0x480] ss:$16 sps:$4 sm:$0xff]  }
 0x1e0   : > { %6674 = vmatprep.subr.bf16.mxu0 %v15220_v14  ;;  %7220 = vmatprep.subr.bf16.mxu1 %v15223_v16  ;;  %v15291_v14 = vld [vmem:[%s20582_s1 + $0x488] ss:$16 sps:$4 sm:$0xff]  }
 0x1e1   : > { %6647 = vmatprep.mubr.bf16.mxu0 %v12625_v15  ;;  %7193 = vmatprep.mubr.bf16.mxu1 %v12625_v15 }
 0x1e3   : > { %6675 = vmatpush1.bf16.msra.mxu0 %v15218_v18  ;;  %7221 = vmatpush1.bf16.msra.mxu1 %v15221_v1 }
 0x1e4   : > { %6676 = vmatprep.subr.bf16.mxu0 %v15228_v2  ;;  %7222 = vmatprep.subr.bf16.mxu1 %v15231_v13 }
 0x1e6   : > { %6648 = vmatmul.mubr.bf16.gmra.mrb[44].mxu0 %v12624_v23  ;;  %7194 = vmatmul.mubr.bf16.gmra.mrb[44].mxu1 %v12624_v23  ;;  %v16167_v23 = vld [vmem:[%s16433_s30 + $0xb8] ss:$44 sps:$4 sm:$0xff]  }
 0x1e7   : > { %6677 = vmatpush1.bf16.msra.mxu0 %v15226_v21  ;;  %7223 = vmatpush1.bf16.msra.mxu1 %v15229_v22 }
 0x1e8   : > { %6678 = vmatprep.subr.bf16.mxu0 %v15234_v4  ;;  %7224 = vmatprep.subr.bf16.mxu1 %v15237_v5  ;;  %v15302_v4 = vld [vmem:[%s20582_s1 + $0x4c4] ss:$16 sps:$4 sm:$0xff]   ;;  %v15305_v5 = vld [vmem:[%s20582_s1 + $0x4cc] ss:$16 sps:$4 sm:$0xff]  }
 0x1e9   : > { %6688 = vmatprep.mubr.bf16.mxu0 %v12616_v26  ;;  %7234 = vmatprep.mubr.bf16.mxu1 %v12616_v26  ;;  %v15300_v26 = vld [vmem:[%s20582_s1 + $0x4c0] ss:$16 sps:$4 sm:$0xff]  }
 0x1eb   : > { %6679 = vmatpush1.bf16.msra.mxu0 %v15232_v27  ;;  %7225 = vmatpush1.bf16.msra.mxu1 %v15235_v28  ;;  %v15303_v27 = vld [vmem:[%s20582_s1 + $0x4c8] ss:$16 sps:$4 sm:$0xff]   ;;  %v15308_v28 = vld [vmem:[%s20582_s1 + $0x4e4] ss:$16 sps:$4 sm:$0xff]  }
 0x1ec   : > { %6680 = vmatprep.subr.bf16.mxu0 %v15240_v29  ;;  %7226 = vmatprep.subr.bf16.mxu1 %v15243_v30  ;;  %v15311_v29 = vld [vmem:[%s20582_s1 + $0x4ec] ss:$16 sps:$4 sm:$0xff]   ;;  %v15306_v30 = vld [vmem:[%s20582_s1 + $0x4e0] ss:$16 sps:$4 sm:$0xff]  }
 0x1ef   : > { %6681 = vmatpush1.bf16.msra.mxu0 %v15238_v31  ;;  %7227 = vmatpush1.bf16.msra.mxu1 %v15241_v33  ;;  %v16169_v31 = vld [vmem:[%s16433_s30 + $0x110] ss:$44 sps:$4 sm:$0xff]   ;;  %v15309_v33 = vld [vmem:[%s20582_s1 + $0x4e8] ss:$16 sps:$4 sm:$0xff]  }
 0x1f0   : > { %6682 = vmatprep.subr.bf16.mxu0 %v15246_v35  ;;  %7228 = vmatprep.subr.bf16.mxu1 %v15249_v36  ;;  %v15314_v35 = vld [vmem:[%s20582_s1 + $0x504] ss:$16 sps:$4 sm:$0xff]   ;;  %v15317_v36 = vld [vmem:[%s20582_s1 + $0x50c] ss:$16 sps:$4 sm:$0xff]  }
 0x1f3   : > { %6683 = vmatpush1.bf16.msra.mxu0 %v15244_v34  ;;  %7229 = vmatpush1.bf16.msra.mxu1 %v15247_v37  ;;  %v233_v34 = vld [vmem:[%s16433_s30 + $0x1c0] sm:$0x11]  ;;  %v16170_v37 = vld [vmem:[%s16433_s30 + $0x16c] ss:$44 sps:$4 sm:$0xff]  }
 0x1f4   : > { %6684 = vmatprep.subr.bf16.mxu0 %v15252_v38  ;;  %7230 = vmatprep.subr.bf16.mxu1 %v15255_v39  ;;  %v15312_v38 = vld [vmem:[%s20582_s1 + $0x500] ss:$16 sps:$4 sm:$0xff]   ;;  %v15315_v39 = vld [vmem:[%s20582_s1 + $0x508] ss:$16 sps:$4 sm:$0xff]  }
 0x1f7   : > { %6685 = vmatpush1.bf16.msra.mxu0 %v15250_v40  ;;  %7231 = vmatpush1.bf16.msra.mxu1 %v15253_v41  ;;  %v15320_v40 = vld [vmem:[%s20582_s1 + $0x524] ss:$16 sps:$4 sm:$0xff]   ;;  %v15323_v41 = vld [vmem:[%s20582_s1 + $0x52c] ss:$16 sps:$4 sm:$0xff]  }
 0x1f8   : > { %6686 = vmatprep.subr.bf16.mxu0 %v15258_v42  ;;  %7232 = vmatprep.subr.bf16.mxu1 %v15261_v43  ;;  %v12627_v42 = vcombine.high %v233_v34, %v233_v34  ;;  %v16171_v43 = vld [vmem:[%s16433_s30 + $0x168] ss:$44 sps:$4 sm:$0xff]  }
 0x1fb   : > { %6687 = vmatpush1.bf16.msra.mxu0 %v15256_v46  ;;  %7233 = vmatpush1.bf16.msra.mxu1 %v15259_v47  ;;  %v15318_v46 = vld [vmem:[%s20582_s1 + $0x520] ss:$16 sps:$4 sm:$0xff]   ;;  %v15321_v47 = vld [vmem:[%s20582_s1 + $0x528] ss:$16 sps:$4 sm:$0xff]  }
 0x1fc   : > { %6747 = vmatprep.subr.bf16.mxu0 %v15266_v50  ;;  %7293 = vmatprep.subr.bf16.mxu1 %v15269_v51  ;;  %v15328_v50 = vld [vmem:[%s20582_s1 + $0x544] ss:$16 sps:$4 sm:$0xff]   ;;  %v15331_v51 = vld [vmem:[%s20582_s1 + $0x54c] ss:$16 sps:$4 sm:$0xff]  }
 0x1fe   : > { %6689 = vmatmul.mubr.bf16.vlgmr.msra.gmra.mrb[0].mxu0 %v12615_v12  ;;  %7235 = vmatmul.mubr.bf16.vlgmr.msra.gmra.mrb[0].mxu1 %v12615_v12  ;;  %v15329_v12 = vld [vmem:[%s20582_s1 + $0x548] ss:$16 sps:$4 sm:$0xff]  }
 0x1ff   : > { %6748 = vmatpush1.bf16.msra.mxu0 %v15264_v11  ;;  %7294 = vmatpush1.bf16.msra.mxu1 %v15267_v19  ;;  %v15326_v11 = vld [vmem:[%s20582_s1 + $0x540] ss:$16 sps:$4 sm:$0xff]   ;;  %v12626_v19 = vcombine.low %v233_v34, %v233_v34 }
 0x200   : > { %6749 = vmatprep.subr.bf16.mxu0 %v15272_v52  ;;  %7295 = vmatprep.subr.bf16.mxu1 %v15275_v53  ;;  %v174_v52 = vld [vmem:[%s16433_s30 + $0x10] sm:$0xff] }
 0x201   : > { %6698 = vmatprep.mubr.bf16.mxu0 %v16164_v55  ;;  %7244 = vmatprep.mubr.bf16.mxu1 %v16164_v55  ;;  %v15334_v53 = vld [vmem:[%s20582_s1 + $0x564] ss:$16 sps:$4 sm:$0xff]   ;;  %v15335_v55 = vld [vmem:[%s20582_s1 + $0x568] ss:$16 sps:$4 sm:$0xff]  }
 0x203   : > { %6750 = vmatpush1.bf16.msra.mxu0 %v15270_v20  ;;  %7296 = vmatpush1.bf16.msra.mxu1 %v15273_v54  ;;  %v15337_v20 = vld [vmem:[%s20582_s1 + $0x56c] ss:$16 sps:$4 sm:$0xff]  }
 0x204   : > { %6751 = vmatprep.subr.bf16.mxu0 %v15278_v56  ;;  %7297 = vmatprep.subr.bf16.mxu1 %v15281_v57  ;;  %v16172_v54 = vld [vmem:[%s16433_s30 + $0x3c] sm:$0xff] }
 0x205   : > { %v12618_v56 = vcombine.high %v174_v52, %v16172_v54  ;;  %v15332_v57 = vld [vmem:[%s20582_s1 + $0x560] ss:$16 sps:$4 sm:$0xff]  }
 0x206   : > { %6699 = vmatmul.mubr.bf16.gmra.mrb[4].mxu0 %v16165_v62  ;;  %7245 = vmatmul.mubr.bf16.gmra.mrb[4].mxu1 %v16165_v62  ;;  %v15346_v62 = vld [vmem:[%s20582_s1 + $0x5a4] ss:$16 sps:$4 sm:$0xff]  }
 0x207   : > { %6752 = vmatpush1.bf16.msra.mxu0 %v15276_v58  ;;  %7298 = vmatpush1.bf16.msra.mxu1 %v15279_v59  ;;  %v15340_v58 = vld [vmem:[%s20582_s1 + $0x584] ss:$16 sps:$4 sm:$0xff]   ;;  %v15343_v59 = vld [vmem:[%s20582_s1 + $0x58c] ss:$16 sps:$4 sm:$0xff]  }
 0x208   : > { %6753 = vmatprep.subr.bf16.mxu0 %v15284_v60  ;;  %7299 = vmatprep.subr.bf16.mxu1 %v15287_v61  ;;  %v15338_v60 = vld [vmem:[%s20582_s1 + $0x580] ss:$16 sps:$4 sm:$0xff]   ;;  %v15341_v61 = vld [vmem:[%s20582_s1 + $0x588] ss:$16 sps:$4 sm:$0xff]  }
 0x209   : > { %v3960_v7 = vpop.f32.mrb[32].mxu0  ;;  %v4506_v8 = vpop.f32.mrb[32].mxu1  ;;  %6708 = vmatprep.mubr.bf16.mxu0 %v16166_v9  ;;  %7254 = vmatprep.mubr.bf16.mxu1 %v16166_v9  ;;  %v15353_v9 = vld [vmem:[%s20582_s1 + $0x5c8] ss:$16 sps:$4 sm:$0xff]  }
 0x20a   : > { %v18050_v16 = vadd.f32 %v3960_v7, %v17835_v44  ;;  %v18053_v15 = vadd.f32 %v4506_v8, %v17838_v45  ;;  %v3962_v17 = vpop.f32.mrb[33].mxu0  ;;  %v4508_v18 = vpop.f32.mrb[33].mxu1  ;;  %v15296_v44 = vld [vmem:[%s20582_s1 + $0x4a4] ss:$16 sps:$4 sm:$0xff]   ;;  %v15299_v45 = vld [vmem:[%s20582_s1 + $0x4ac] ss:$16 sps:$4 sm:$0xff]  }
 0x20b   : > { %v18056_v1 = vadd.f32 %v3962_v17, %v17841_v48  ;;  %v18059_v2 = vadd.f32 %v4508_v18, %v17844_v49  ;;  %6754 = vmatpush1.bf16.msra.mxu0 %v15282_v63  ;;  %7300 = vmatpush1.bf16.msra.mxu1 %v15285_v0  ;;  %v3964_v13 = vpop.f32.mrb[34].mxu0  ;;  %v4510_v21 = vpop.f32.mrb[34].mxu1  ;;  %v15294_v49 = vld [vmem:[%s20582_s1 + $0x4a0] ss:$16 sps:$4 sm:$0xff]   ;;  %v15349_v63 = vld [vmem:[%s20582_s1 + $0x5ac] ss:$16 sps:$4 sm:$0xff]  }
 0x20c   : > { %6755 = vmatprep.subr.bf16.mxu0 %v15290_v3  ;;  %7301 = vmatprep.subr.bf16.mxu1 %v15293_v6  ;;  %v3965_v48 = vpop.f32.mrb[35].mxu0  ;;  %v4511_v22 = vpop.f32.mrb[35].mxu1  ;;  %v15344_v0 = vld [vmem:[%s20582_s1 + $0x5a0] ss:$16 sps:$4 sm:$0xff]   ;;  %v15347_v3 = vld [vmem:[%s20582_s1 + $0x5a8] ss:$16 sps:$4 sm:$0xff]  }
 0x20d   : > { %v15352_v6 = vld [vmem:[%s20582_s1 + $0x5c4] ss:$16 sps:$4 sm:$0xff]   ;;  %v15355_v7 = vld [vmem:[%s20582_s1 + $0x5cc] ss:$16 sps:$4 sm:$0xff]   ;;  %v15350_v8 = vld [vmem:[%s20582_s1 + $0x5c0] ss:$16 sps:$4 sm:$0xff]   ;;  %v12617_v48 = vcombine.low %v174_v52, %v16172_v54 }
 0x20e   : > { %6709 = vmatmul.mubr.bf16.gmra.mrb[8].mxu0 %v16167_v23  ;;  %7255 = vmatmul.mubr.bf16.gmra.mrb[8].mxu1 %v16167_v23  ;;  %v15356_v17 = vld [vmem:[%s20582_s1 + $0x5e0] ss:$16 sps:$4 sm:$0xff]   ;;  %v15359_v18 = vld [vmem:[%s20582_s1 + $0x5e8] ss:$16 sps:$4 sm:$0xff]   ;;  %v15366_v13 = vld [vmem:[%s20582_s1 + $0x604] ss:$16 sps:$4 sm:$0xff]  }
 0x20f   : > { %6756 = vmatpush1.bf16.msra.mxu0 %v15288_v10  ;;  %7302 = vmatpush1.bf16.msra.mxu1 %v15291_v14  ;;  %v15358_v10 = vld [vmem:[%s20582_s1 + $0x5e4] ss:$16 sps:$4 sm:$0xff]   ;;  %v15361_v14 = vld [vmem:[%s20582_s1 + $0x5ec] ss:$16 sps:$4 sm:$0xff]  }
 0x210   : > { %6757 = vmatprep.subr.bf16.mxu0 %v15296_v44  ;;  %7303 = vmatprep.subr.bf16.mxu1 %v15299_v45  ;;  %v15369_v21 = vld [vmem:[%s20582_s1 + $0x60c] ss:$16 sps:$4 sm:$0xff]   ;;  %v15364_v44 = vld [vmem:[%s20582_s1 + $0x600] ss:$16 sps:$4 sm:$0xff]   ;;  %v15367_v45 = vld [vmem:[%s20582_s1 + $0x608] ss:$16 sps:$4 sm:$0xff]  }
 0x211   : > { %6718 = vmatprep.mubr.bf16.mxu0 %v16168_v25  ;;  %7264 = vmatprep.mubr.bf16.mxu1 %v16168_v25  ;;  %v15372_v22 = vld [vmem:[%s20582_s1 + $0x624] ss:$16 sps:$4 sm:$0xff]   ;;  %v15375_v23 = vld [vmem:[%s20582_s1 + $0x62c] ss:$16 sps:$4 sm:$0xff]  }
 0x212   : > { %v16173_v25 = vld [vmem:[%s16433_s30 + $0x6c] ss:$44 sps:$4 sm:$0xff]   ;;  %v16177_v54 = vld [vmem:[%s16433_s30 + $0x11c] ss:$44 sps:$4 sm:$0xff]  }
 0x213   : > { %6758 = vmatpush1.bf16.msra.mxu0 %v15294_v49  ;;  %7304 = vmatpush1.bf16.msra.mxu1 %v15297_v24  ;;  %v15370_v49 = vld [vmem:[%s20582_s1 + $0x620] ss:$16 sps:$4 sm:$0xff]   ;;  %v15373_v24 = vld [vmem:[%s20582_s1 + $0x628] ss:$16 sps:$4 sm:$0xff]  }
 0x214   : > { %6759 = vmatprep.subr.bf16.mxu0 %v15302_v4  ;;  %7305 = vmatprep.subr.bf16.mxu1 %v15305_v5  ;;  %v15378_v4 = vld [vmem:[%s20582_s1 + $0x644] ss:$16 sps:$4 sm:$0xff]   ;;  %v15381_v5 = vld [vmem:[%s20582_s1 + $0x64c] ss:$16 sps:$4 sm:$0xff]  }
 0x215   : > { %v16176_v52 = vld [vmem:[%s16433_s30 + $0xc0] ss:$44 sps:$4 sm:$0xff]  }
 0x216   : > { %6719 = vmatmul.mubr.bf16.gmra.mrb[12].mxu0 %v16169_v31  ;;  %7265 = vmatmul.mubr.bf16.gmra.mrb[12].mxu1 %v16169_v31  ;;  %v15382_v31 = vld [vmem:[%s20582_s1 + $0x660] ss:$16 sps:$4 sm:$0xff]  }
 0x217   : > { %6760 = vmatpush1.bf16.msra.mxu0 %v15300_v26  ;;  %7306 = vmatpush1.bf16.msra.mxu1 %v15303_v27  ;;  %v15376_v26 = vld [vmem:[%s20582_s1 + $0x640] ss:$16 sps:$4 sm:$0xff]   ;;  %v15379_v27 = vld [vmem:[%s20582_s1 + $0x648] ss:$16 sps:$4 sm:$0xff]  }
 0x218   : > { %6761 = vmatprep.subr.bf16.mxu0 %v15308_v28  ;;  %7307 = vmatprep.subr.bf16.mxu1 %v15311_v29  ;;  %v15384_v28 = vld [vmem:[%s20582_s1 + $0x664] ss:$16 sps:$4 sm:$0xff]   ;;  %v15387_v29 = vld [vmem:[%s20582_s1 + $0x66c] ss:$16 sps:$4 sm:$0xff]  }
 0x219   : > { %6728 = vmatprep.mubr.bf16.mxu0 %v16170_v37  ;;  %7274 = vmatprep.mubr.bf16.mxu1 %v16170_v37 }
 0x21b   : > { %6762 = vmatpush1.bf16.msra.mxu0 %v15306_v30  ;;  %7308 = vmatpush1.bf16.msra.mxu1 %v15309_v33  ;;  %v16174_v30 = vld [vmem:[%s16433_s30 + $0x68] ss:$44 sps:$4 sm:$0xff]  }
 0x21c   : > { %6763 = vmatprep.subr.bf16.mxu0 %v15314_v35  ;;  %7309 = vmatprep.subr.bf16.mxu1 %v15317_v36  ;;  %v15385_v33 = vld [vmem:[%s20582_s1 + $0x668] ss:$16 sps:$4 sm:$0xff]   ;;  %v15390_v35 = vld [vmem:[%s20582_s1 + $0x684] ss:$16 sps:$4 sm:$0xff]   ;;  %v15393_v36 = vld [vmem:[%s20582_s1 + $0x68c] ss:$16 sps:$4 sm:$0xff]  }
 0x21e   : > { %6729 = vmatmul.mubr.bf16.gmra.mrb[16].mxu0 %v16171_v43  ;;  %7275 = vmatmul.mubr.bf16.gmra.mrb[16].mxu1 %v16171_v43 }
 0x21f   : > { %6764 = vmatpush1.bf16.msra.mxu0 %v15312_v38  ;;  %7310 = vmatpush1.bf16.msra.mxu1 %v15315_v39  ;;  %v16175_v38 = vld [vmem:[%s16433_s30 + $0xc4] ss:$44 sps:$4 sm:$0xff]  }
 0x220   : > { %6765 = vmatprep.subr.bf16.mxu0 %v15320_v40  ;;  %7311 = vmatprep.subr.bf16.mxu1 %v15323_v41  ;;  %v15388_v39 = vld [vmem:[%s20582_s1 + $0x680] ss:$16 sps:$4 sm:$0xff]   ;;  %v15391_v40 = vld [vmem:[%s20582_s1 + $0x688] ss:$16 sps:$4 sm:$0xff]  }
 0x221   : > { %6738 = vmatprep.mubr.bf16.mxu0 %v12627_v42  ;;  %7284 = vmatprep.mubr.bf16.mxu1 %v12627_v42 }
 0x223   : > { %6766 = vmatpush1.bf16.msra.mxu0 %v15318_v46  ;;  %7312 = vmatpush1.bf16.msra.mxu1 %v15321_v47  ;;  %v15396_v47 = vld [vmem:[%s20582_s1 + $0x6a4] ss:$16 sps:$4 sm:$0xff]  }
 0x224   : > { %6767 = vmatprep.subr.bf16.mxu0 %v15328_v50  ;;  %7313 = vmatprep.subr.bf16.mxu1 %v15331_v51  ;;  %v15399_v50 = vld [vmem:[%s20582_s1 + $0x6ac] ss:$16 sps:$4 sm:$0xff]  }
 0x226   : > { %6739 = vmatmul.mubr.bf16.gmra.mrb[48].mxu0 %v12626_v19  ;;  %7285 = vmatmul.mubr.bf16.gmra.mrb[48].mxu1 %v12626_v19 }
 0x227   : > { %6768 = vmatpush1.bf16.msra.mxu0 %v15326_v11  ;;  %7314 = vmatpush1.bf16.msra.mxu1 %v15329_v12 }
 0x228   : > { %6769 = vmatprep.subr.bf16.mxu0 %v15334_v53  ;;  %7315 = vmatprep.subr.bf16.mxu1 %v15337_v20  ;;  %v15402_v53 = vld [vmem:[%s20582_s1 + $0x6c4] ss:$16 sps:$4 sm:$0xff]   ;;  %v15405_v20 = vld [vmem:[%s20582_s1 + $0x6cc] ss:$16 sps:$4 sm:$0xff]  }
 0x229   : > { %6779 = vmatprep.mubr.bf16.mxu0 %v12618_v56  ;;  %7325 = vmatprep.mubr.bf16.mxu1 %v12618_v56  ;;  %v15400_v56 = vld [vmem:[%s20582_s1 + $0x6c0] ss:$16 sps:$4 sm:$0xff]  }
 0x22b   : > { %6770 = vmatpush1.bf16.msra.mxu0 %v15332_v57  ;;  %7316 = vmatpush1.bf16.msra.mxu1 %v15335_v55  ;;  %v15403_v57 = vld [vmem:[%s20582_s1 + $0x6c8] ss:$16 sps:$4 sm:$0xff]   ;;  %v15408_v55 = vld [vmem:[%s20582_s1 + $0x6e4] ss:$16 sps:$4 sm:$0xff]  }
 0x22c   : > { %6771 = vmatprep.subr.bf16.mxu0 %v15340_v58  ;;  %7317 = vmatprep.subr.bf16.mxu1 %v15343_v59  ;;  %v15411_v58 = vld [vmem:[%s20582_s1 + $0x6ec] ss:$16 sps:$4 sm:$0xff]   ;;  %v16178_v59 = vld [vmem:[%s16433_s30 + $0x118] ss:$44 sps:$4 sm:$0xff]  }
 0x22f   : > { %6772 = vmatpush1.bf16.msra.mxu0 %v15338_v60  ;;  %7318 = vmatpush1.bf16.msra.mxu1 %v15341_v61  ;;  %v15406_v60 = vld [vmem:[%s20582_s1 + $0x6e0] ss:$16 sps:$4 sm:$0xff]   ;;  %v15409_v61 = vld [vmem:[%s20582_s1 + $0x6e8] ss:$16 sps:$4 sm:$0xff]  }
 0x230   : > { %6773 = vmatprep.subr.bf16.mxu0 %v15346_v62  ;;  %7319 = vmatprep.subr.bf16.mxu1 %v15349_v63  ;;  %v15414_v62 = vld [vmem:[%s20582_s1 + $0x704] ss:$16 sps:$4 sm:$0xff]   ;;  %v15417_v63 = vld [vmem:[%s20582_s1 + $0x70c] ss:$16 sps:$4 sm:$0xff]  }
 0x233   : > { %6774 = vmatpush1.bf16.msra.mxu0 %v15344_v0  ;;  %7320 = vmatpush1.bf16.msra.mxu1 %v15347_v3  ;;  %v234_v0 = vld [vmem:[%s16433_s30 + $0x1c8] sm:$0x11]  ;;  %v16179_v3 = vld [vmem:[%s16433_s30 + $0x174] ss:$44 sps:$4 sm:$0xff]  }
 0x234   : > { %6775 = vmatprep.subr.bf16.mxu0 %v15352_v6  ;;  %7321 = vmatprep.subr.bf16.mxu1 %v15355_v7  ;;  %v15412_v6 = vld [vmem:[%s20582_s1 + $0x700] ss:$16 sps:$4 sm:$0xff]   ;;  %v15415_v7 = vld [vmem:[%s20582_s1 + $0x708] ss:$16 sps:$4 sm:$0xff]  }
 0x237   : > { %6776 = vmatpush1.bf16.msra.mxu0 %v15350_v8  ;;  %7322 = vmatpush1.bf16.msra.mxu1 %v15353_v9  ;;  %v15420_v8 = vld [vmem:[%s20582_s1 + $0x724] ss:$16 sps:$4 sm:$0xff]   ;;  %v15423_v9 = vld [vmem:[%s20582_s1 + $0x72c] ss:$16 sps:$4 sm:$0xff]  }
 0x238   : > { %6777 = vmatprep.subr.bf16.mxu0 %v15358_v10  ;;  %7323 = vmatprep.subr.bf16.mxu1 %v15361_v14  ;;  %v12629_v10 = vcombine.high %v234_v0, %v234_v0  ;;  %v16180_v14 = vld [vmem:[%s16433_s30 + $0x170] ss:$44 sps:$4 sm:$0xff]  }
 0x23b   : > { %6778 = vmatpush1.bf16.msra.mxu0 %v15356_v17  ;;  %7324 = vmatpush1.bf16.msra.mxu1 %v15359_v18  ;;  %v15418_v17 = vld [vmem:[%s20582_s1 + $0x720] ss:$16 sps:$4 sm:$0xff]   ;;  %v15421_v18 = vld [vmem:[%s20582_s1 + $0x728] ss:$16 sps:$4 sm:$0xff]  }
 0x23c   : > { %6838 = vmatprep.subr.bf16.mxu0 %v15366_v13  ;;  %7384 = vmatprep.subr.bf16.mxu1 %v15369_v21  ;;  %v15428_v13 = vld [vmem:[%s20582_s1 + $0x744] ss:$16 sps:$4 sm:$0xff]   ;;  %v15431_v21 = vld [vmem:[%s20582_s1 + $0x74c] ss:$16 sps:$4 sm:$0xff]  }
 0x23e   : > { %6780 = vmatmul.mubr.bf16.vlgmr.msra.gmra.mrb[0].mxu0 %v12617_v48  ;;  %7326 = vmatmul.mubr.bf16.vlgmr.msra.gmra.mrb[0].mxu1 %v12617_v48  ;;  %v15429_v48 = vld [vmem:[%s20582_s1 + $0x748] ss:$16 sps:$4 sm:$0xff]  }
 0x23f   : > { %6839 = vmatpush1.bf16.msra.mxu0 %v15364_v44  ;;  %7385 = vmatpush1.bf16.msra.mxu1 %v15367_v45  ;;  %v18349_v44 = vld [vmem:[%s16433_s30 + $0x18] sm:$0xff]  ;;  %v15426_v45 = vld [vmem:[%s20582_s1 + $0x740] ss:$16 sps:$4 sm:$0xff]  }
 0x240   : > { %6840 = vmatprep.subr.bf16.mxu0 %v15372_v22  ;;  %7386 = vmatprep.subr.bf16.mxu1 %v15375_v23  ;;  %v12628_v22 = vcombine.low %v234_v0, %v234_v0  ;;  %v15434_v23 = vld [vmem:[%s20582_s1 + $0x764] ss:$16 sps:$4 sm:$0xff]   ;;  %v15479_v0 = vld [vmem:[%s20582_s1 + $0x848] ss:$16 sps:$4 sm:$0xff]  }
 0x241   : > { %6789 = vmatprep.mubr.bf16.mxu0 %v16173_v25  ;;  %7335 = vmatprep.mubr.bf16.mxu1 %v16173_v25  ;;  %v15435_v25 = vld [vmem:[%s20582_s1 + $0x768] ss:$16 sps:$4 sm:$0xff]  }
 0x243   : > { %6841 = vmatpush1.bf16.msra.mxu0 %v15370_v49  ;;  %7387 = vmatpush1.bf16.msra.mxu1 %v15373_v24  ;;  %v15437_v49 = vld [vmem:[%s20582_s1 + $0x76c] ss:$16 sps:$4 sm:$0xff]   ;;  %v16181_v24 = vld [vmem:[%s16433_s30 + $0x44] sm:$0xff] }
 0x244   : > { %6842 = vmatprep.subr.bf16.mxu0 %v15378_v4  ;;  %7388 = vmatprep.subr.bf16.mxu1 %v15381_v5  ;;  %v12620_v4 = vcombine.high %v18349_v44, %v16181_v24  ;;  %v15432_v5 = vld [vmem:[%s20582_s1 + $0x760] ss:$16 sps:$4 sm:$0xff]  }
 0x246   : > { %6790 = vmatmul.mubr.bf16.gmra.mrb[4].mxu0 %v16174_v30  ;;  %7336 = vmatmul.mubr.bf16.gmra.mrb[4].mxu1 %v16174_v30  ;;  %v15446_v30 = vld [vmem:[%s20582_s1 + $0x7a4] ss:$16 sps:$4 sm:$0xff]  }
 0x247   : > { %6843 = vmatpush1.bf16.msra.mxu0 %v15376_v26  ;;  %7389 = vmatpush1.bf16.msra.mxu1 %v15379_v27  ;;  %v15440_v26 = vld [vmem:[%s20582_s1 + $0x784] ss:$16 sps:$4 sm:$0xff]   ;;  %v15443_v27 = vld [vmem:[%s20582_s1 + $0x78c] ss:$16 sps:$4 sm:$0xff]  }
 0x248   : > { %6844 = vmatprep.subr.bf16.mxu0 %v15384_v28  ;;  %7390 = vmatprep.subr.bf16.mxu1 %v15387_v29  ;;  %v15438_v28 = vld [vmem:[%s20582_s1 + $0x780] ss:$16 sps:$4 sm:$0xff]   ;;  %v15441_v29 = vld [vmem:[%s20582_s1 + $0x788] ss:$16 sps:$4 sm:$0xff]  }
 0x249   : > { %v4051_v34 = vpop.f32.mrb[36].mxu0  ;;  %v4597_v37 = vpop.f32.mrb[36].mxu1  ;;  %6799 = vmatprep.mubr.bf16.mxu0 %v16175_v38  ;;  %7345 = vmatprep.mubr.bf16.mxu1 %v16175_v38  ;;  %v15453_v38 = vld [vmem:[%s20582_s1 + $0x7c8] ss:$16 sps:$4 sm:$0xff]  }
 0x24a   : > { %v18265_v41 = vadd.f32 %v4051_v34, %v18050_v16  ;;  %v18268_v42 = vadd.f32 %v4597_v37, %v18053_v15  ;;  %v4053_v43 = vpop.f32.mrb[37].mxu0  ;;  %v4599_v46 = vpop.f32.mrb[37].mxu1  ;;  %v15455_v34 = vld [vmem:[%s20582_s1 + $0x7cc] ss:$16 sps:$4 sm:$0xff]   ;;  %v15450_v37 = vld [vmem:[%s20582_s1 + $0x7c0] ss:$16 sps:$4 sm:$0xff]  }
 0x24b   : > { %v18277_v51 = vadd.f32 %v4053_v43, %v18056_v1  ;;  %v18280_v16 = vadd.f32 %v4599_v46, %v18059_v2  ;;  %6845 = vmatpush1.bf16.msra.mxu0 %v15382_v31  ;;  %7391 = vmatpush1.bf16.msra.mxu1 %v15385_v33  ;;  %v4055_v15 = vpop.f32.mrb[38].mxu0  ;;  %v4601_v11 = vpop.f32.mrb[38].mxu1  ;;  %v15394_v1 = vld [vmem:[%s20582_s1 + $0x6a0] ss:$16 sps:$4 sm:$0xff]   ;;  %v15397_v2 = vld [vmem:[%s20582_s1 + $0x6a8] ss:$16 sps:$4 sm:$0xff]  }
 0x24c   : > { %v4056_v12 = vpop.f32.mrb[39].mxu0  ;;  %v4602_v19 = vpop.f32.mrb[39].mxu1  ;;  %6846 = vmatprep.subr.bf16.mxu0 %v15390_v35  ;;  %7392 = vmatprep.subr.bf16.mxu1 %v15393_v36  ;;  %v15449_v31 = vld [vmem:[%s20582_s1 + $0x7ac] ss:$16 sps:$4 sm:$0xff]   ;;  %v15444_v33 = vld [vmem:[%s20582_s1 + $0x7a0] ss:$16 sps:$4 sm:$0xff]  }
 0x24d   : > { %v15447_v35 = vld [vmem:[%s20582_s1 + $0x7a8] ss:$16 sps:$4 sm:$0xff]   ;;  %v15452_v36 = vld [vmem:[%s20582_s1 + $0x7c4] ss:$16 sps:$4 sm:$0xff]   ;;  %v15456_v43 = vld [vmem:[%s20582_s1 + $0x7e0] ss:$16 sps:$4 sm:$0xff]  }
 0x24e   : > { %6800 = vmatmul.mubr.bf16.gmra.mrb[8].mxu0 %v16176_v52  ;;  %7346 = vmatmul.mubr.bf16.gmra.mrb[8].mxu1 %v16176_v52  ;;  %v15459_v46 = vld [vmem:[%s20582_s1 + $0x7e8] ss:$16 sps:$4 sm:$0xff]  }
 0x24f   : > { %6847 = vmatpush1.bf16.msra.mxu0 %v15388_v39  ;;  %7393 = vmatpush1.bf16.msra.mxu1 %v15391_v40  ;;  %v15458_v39 = vld [vmem:[%s20582_s1 + $0x7e4] ss:$16 sps:$4 sm:$0xff]   ;;  %v15461_v40 = vld [vmem:[%s20582_s1 + $0x7ec] ss:$16 sps:$4 sm:$0xff]  }
 0x250   : > { %6848 = vmatprep.subr.bf16.mxu0 %v15396_v47  ;;  %7394 = vmatprep.subr.bf16.mxu1 %v15399_v50  ;;  %v15466_v47 = vld [vmem:[%s20582_s1 + $0x804] ss:$16 sps:$4 sm:$0xff]   ;;  %v15469_v50 = vld [vmem:[%s20582_s1 + $0x80c] ss:$16 sps:$4 sm:$0xff]  }
 0x251   : > { %6809 = vmatprep.mubr.bf16.mxu0 %v16177_v54  ;;  %7355 = vmatprep.mubr.bf16.mxu1 %v16177_v54 }
 0x253   : > { %6849 = vmatpush1.bf16.msra.mxu0 %v15394_v1  ;;  %7395 = vmatpush1.bf16.msra.mxu1 %v15397_v2  ;;  %v12619_v2 = vcombine.low %v18349_v44, %v16181_v24  ;;  %v15499_v44 = vld [vmem:[%s20582_s1 + $0x8ac] ss:$16 sps:$4 sm:$0xff]   ;;  %v16186_v24 = vld [vmem:[%s16433_s30 + $0x124] ss:$44 sps:$4 sm:$0xff]  }
 0x254   : > { %6850 = vmatprep.subr.bf16.mxu0 %v15402_v53  ;;  %7396 = vmatprep.subr.bf16.mxu1 %v15405_v20 }
 0x256   : > { %6810 = vmatmul.mubr.bf16.gmra.mrb[12].mxu0 %v16178_v59  ;;  %7356 = vmatmul.mubr.bf16.gmra.mrb[12].mxu1 %v16178_v59  ;;  %v15473_v59 = vld [vmem:[%s20582_s1 + $0x828] ss:$16 sps:$4 sm:$0xff]  }
 0x257   : > { %6851 = vmatpush1.bf16.msra.mxu0 %v15400_v56  ;;  %7397 = vmatpush1.bf16.msra.mxu1 %v15403_v57 }
 0x258   : > { %6852 = vmatprep.subr.bf16.mxu0 %v15408_v55  ;;  %7398 = vmatprep.subr.bf16.mxu1 %v15411_v58  ;;  %v15470_v58 = vld [vmem:[%s20582_s1 + $0x820] ss:$16 sps:$4 sm:$0xff]  }
 0x259   : > { %6819 = vmatprep.mubr.bf16.mxu0 %v16179_v3  ;;  %7365 = vmatprep.mubr.bf16.mxu1 %v16179_v3  ;;  %v15484_v3 = vld [vmem:[%s20582_s1 + $0x864] ss:$16 sps:$4 sm:$0xff]  }
 0x25b   : > { %6853 = vmatpush1.bf16.msra.mxu0 %v15406_v60  ;;  %7399 = vmatpush1.bf16.msra.mxu1 %v15409_v61  ;;  %v15478_v60 = vld [vmem:[%s20582_s1 + $0x844] ss:$16 sps:$4 sm:$0xff]   ;;  %v15481_v61 = vld [vmem:[%s20582_s1 + $0x84c] ss:$16 sps:$4 sm:$0xff]  }
 0x25c   : > { %6854 = vmatprep.subr.bf16.mxu0 %v15414_v62  ;;  %7400 = vmatprep.subr.bf16.mxu1 %v15417_v63  ;;  %v16182_v62 = vld [vmem:[%s16433_s30 + $0x74] ss:$44 sps:$4 sm:$0xff]  }
 0x25d   : > { %v15476_v63 = vld [vmem:[%s20582_s1 + $0x840] ss:$16 sps:$4 sm:$0xff]  }
 0x25e   : > { %6820 = vmatmul.mubr.bf16.gmra.mrb[16].mxu0 %v16180_v14  ;;  %7366 = vmatmul.mubr.bf16.gmra.mrb[16].mxu1 %v16180_v14  ;;  %v15493_v14 = vld [vmem:[%s20582_s1 + $0x88c] ss:$16 sps:$4 sm:$0xff]  }
 0x25f   : > { %6855 = vmatpush1.bf16.msra.mxu0 %v15412_v6  ;;  %7401 = vmatpush1.bf16.msra.mxu1 %v15415_v7  ;;  %v15487_v6 = vld [vmem:[%s20582_s1 + $0x86c] ss:$16 sps:$4 sm:$0xff]  }
 0x260   : > { %6856 = vmatprep.subr.bf16.mxu0 %v15420_v8  ;;  %7402 = vmatprep.subr.bf16.mxu1 %v15423_v9  ;;  %v16183_v7 = vld [vmem:[%s16433_s30 + $0x70] ss:$44 sps:$4 sm:$0xff]   ;;  %v15485_v9 = vld [vmem:[%s20582_s1 + $0x868] ss:$16 sps:$4 sm:$0xff]  }
 0x261   : > { %6829 = vmatprep.mubr.bf16.mxu0 %v12629_v10  ;;  %7375 = vmatprep.mubr.bf16.mxu1 %v12629_v10  ;;  %v15482_v8 = vld [vmem:[%s20582_s1 + $0x860] ss:$16 sps:$4 sm:$0xff]   ;;  %v15490_v10 = vld [vmem:[%s20582_s1 + $0x884] ss:$16 sps:$4 sm:$0xff]  }
 0x263   : > { %6857 = vmatpush1.bf16.msra.mxu0 %v15418_v17  ;;  %7403 = vmatpush1.bf16.msra.mxu1 %v15421_v18  ;;  %v16184_v17 = vld [vmem:[%s16433_s30 + $0xcc] ss:$44 sps:$4 sm:$0xff]   ;;  %v15488_v18 = vld [vmem:[%s20582_s1 + $0x880] ss:$16 sps:$4 sm:$0xff]  }
 0x264   : > { %6858 = vmatprep.subr.bf16.mxu0 %v15428_v13  ;;  %7404 = vmatprep.subr.bf16.mxu1 %v15431_v21  ;;  %v15491_v13 = vld [vmem:[%s20582_s1 + $0x888] ss:$16 sps:$4 sm:$0xff]   ;;  %v15496_v21 = vld [vmem:[%s20582_s1 + $0x8a4] ss:$16 sps:$4 sm:$0xff]  }
 0x266   : > { %6830 = vmatmul.mubr.bf16.gmra.mrb[52].mxu0 %v12628_v22  ;;  %7376 = vmatmul.mubr.bf16.gmra.mrb[52].mxu1 %v12628_v22  ;;  %v15497_v22 = vld [vmem:[%s20582_s1 + $0x8a8] ss:$16 sps:$4 sm:$0xff]  }
 0x267   : > { %6859 = vmatpush1.bf16.msra.mxu0 %v15426_v45  ;;  %7405 = vmatpush1.bf16.msra.mxu1 %v15429_v48  ;;  %v16185_v45 = vld [vmem:[%s16433_s30 + $0xc8] ss:$44 sps:$4 sm:$0xff]   ;;  %v15494_v48 = vld [vmem:[%s20582_s1 + $0x8a0] ss:$16 sps:$4 sm:$0xff]  }
 0x268   : > { %6860 = vmatprep.subr.bf16.mxu0 %v15434_v23  ;;  %7406 = vmatprep.subr.bf16.mxu1 %v15437_v49  ;;  %v15502_v23 = vld [vmem:[%s20582_s1 + $0x8c4] ss:$16 sps:$4 sm:$0xff]   ;;  %v15505_v49 = vld [vmem:[%s20582_s1 + $0x8cc] ss:$16 sps:$4 sm:$0xff]  }
 0x269   : > { %6870 = vmatprep.mubr.bf16.mxu0 %v12620_v4  ;;  %7416 = vmatprep.mubr.bf16.mxu1 %v12620_v4  ;;  %v15500_v4 = vld [vmem:[%s20582_s1 + $0x8c0] ss:$16 sps:$4 sm:$0xff]  }
 0x26b   : > { %6861 = vmatpush1.bf16.msra.mxu0 %v15432_v5  ;;  %7407 = vmatpush1.bf16.msra.mxu1 %v15435_v25  ;;  %v15503_v5 = vld [vmem:[%s20582_s1 + $0x8c8] ss:$16 sps:$4 sm:$0xff]   ;;  %v15508_v25 = vld [vmem:[%s20582_s1 + $0x8e4] ss:$16 sps:$4 sm:$0xff]  }
 0x26c   : > { %6862 = vmatprep.subr.bf16.mxu0 %v15440_v26  ;;  %7408 = vmatprep.subr.bf16.mxu1 %v15443_v27  ;;  %v15511_v26 = vld [vmem:[%s20582_s1 + $0x8ec] ss:$16 sps:$4 sm:$0xff]   ;;  %v15506_v27 = vld [vmem:[%s20582_s1 + $0x8e0] ss:$16 sps:$4 sm:$0xff]  }
 0x26f   : > { %6863 = vmatpush1.bf16.msra.mxu0 %v15438_v28  ;;  %7409 = vmatpush1.bf16.msra.mxu1 %v15441_v29  ;;  %v16187_v28 = vld [vmem:[%s16433_s30 + $0x120] ss:$44 sps:$4 sm:$0xff]   ;;  %v15509_v29 = vld [vmem:[%s20582_s1 + $0x8e8] ss:$16 sps:$4 sm:$0xff]  }
 0x270   : > { %6864 = vmatprep.subr.bf16.mxu0 %v15446_v30  ;;  %7410 = vmatprep.subr.bf16.mxu1 %v15449_v31  ;;  %v15514_v30 = vld [vmem:[%s20582_s1 + $0x904] ss:$16 sps:$4 sm:$0xff]   ;;  %v15517_v31 = vld [vmem:[%s20582_s1 + $0x90c] ss:$16 sps:$4 sm:$0xff]  }
 0x273   : > { %6865 = vmatpush1.bf16.msra.mxu0 %v15444_v33  ;;  %7411 = vmatpush1.bf16.msra.mxu1 %v15447_v35  ;;  %v235_v33 = vld [vmem:[%s16433_s30 + $0x1d0] sm:$0x11]  ;;  %v16188_v35 = vld [vmem:[%s16433_s30 + $0x17c] ss:$44 sps:$4 sm:$0xff]  }
 0x274   : > { %6866 = vmatprep.subr.bf16.mxu0 %v15452_v36  ;;  %7412 = vmatprep.subr.bf16.mxu1 %v15455_v34  ;;  %v15512_v36 = vld [vmem:[%s20582_s1 + $0x900] ss:$16 sps:$4 sm:$0xff]   ;;  %v15515_v34 = vld [vmem:[%s20582_s1 + $0x908] ss:$16 sps:$4 sm:$0xff]  }
 0x277   : > { %6867 = vmatpush1.bf16.msra.mxu0 %v15450_v37  ;;  %7413 = vmatpush1.bf16.msra.mxu1 %v15453_v38  ;;  %v15520_v37 = vld [vmem:[%s20582_s1 + $0x924] ss:$16 sps:$4 sm:$0xff]   ;;  %v15523_v38 = vld [vmem:[%s20582_s1 + $0x92c] ss:$16 sps:$4 sm:$0xff]  }
 0x278   : > { %6868 = vmatprep.subr.bf16.mxu0 %v15458_v39  ;;  %7414 = vmatprep.subr.bf16.mxu1 %v15461_v40  ;;  %v15518_v39 = vld [vmem:[%s20582_s1 + $0x920] ss:$16 sps:$4 sm:$0xff]   ;;  %v12631_v40 = vcombine.high %v235_v33, %v235_v33 }
 0x279   : > { %v4142_v15 = vpop.f32.mrb[40].mxu0  ;;  %v4688_v11 = vpop.f32.mrb[40].mxu1 }
 0x27a   : > { %v18426_v12 = vadd.f32 %v4142_v15, %v18265_v41  ;;  %v18429_v19 = vadd.f32 %v4688_v11, %v18268_v42  ;;  %v4144_v52 = vpop.f32.mrb[41].mxu0  ;;  %v4690_v1 = vpop.f32.mrb[41].mxu1  ;;  %v15464_v41 = vld [vmem:[%s20582_s1 + $0x800] ss:$16 sps:$4 sm:$0xff]   ;;  %v15467_v42 = vld [vmem:[%s20582_s1 + $0x808] ss:$16 sps:$4 sm:$0xff]   ;;  %v12630_v11 = vcombine.low %v235_v33, %v235_v33 }
 0x27b   : > { %v18433_v53 = vadd.f32 %v4144_v52, %v18277_v51  ;;  %v18436_v20 = vadd.f32 %v4690_v1, %v18280_v16  ;;  %6869 = vmatpush1.bf16.msra.mxu0 %v15456_v43  ;;  %7415 = vmatpush1.bf16.msra.mxu1 %v15459_v46  ;;  %v4146_v54 = vpop.f32.mrb[42].mxu0  ;;  %v4692_v56 = vpop.f32.mrb[42].mxu1  ;;  %v15472_v51 = vld [vmem:[%s20582_s1 + $0x824] ss:$16 sps:$4 sm:$0xff]   ;;  %v15475_v16 = vld [vmem:[%s20582_s1 + $0x82c] ss:$16 sps:$4 sm:$0xff]  }
 0x27c   : > { %6929 = vmatprep.subr.bf16.mxu0 %v15466_v47  ;;  %7475 = vmatprep.subr.bf16.mxu1 %v15469_v50  ;;  %v4147_v57 = vpop.f32.mrb[43].mxu0  ;;  %v4693_v55 = vpop.f32.mrb[43].mxu1  ;;  %v16189_v43 = vld [vmem:[%s16433_s30 + $0x178] ss:$44 sps:$4 sm:$0xff]   ;;  %v15531_v50 = vld [vmem:[%s20582_s1 + $0x94c] ss:$16 sps:$4 sm:$0xff]  }
 0x27d   : > { %v15521_v46 = vld [vmem:[%s20582_s1 + $0x928] ss:$16 sps:$4 sm:$0xff]   ;;  %v15528_v47 = vld [vmem:[%s20582_s1 + $0x944] ss:$16 sps:$4 sm:$0xff]   ;;  %v15526_v52 = vld [vmem:[%s20582_s1 + $0x940] ss:$16 sps:$4 sm:$0xff]  }
 0x27e   : > { %6871 = vmatmul.mubr.bf16.vlgmr.msra.gmra.mrb[0].mxu0 %v12619_v2  ;;  %7417 = vmatmul.mubr.bf16.vlgmr.msra.gmra.mrb[0].mxu1 %v12619_v2  ;;  %v18568_v15 = vld [vmem:[%s16433_s30 + $0x20] sm:$0xff]  ;;  %v15529_v1 = vld [vmem:[%s20582_s1 + $0x948] ss:$16 sps:$4 sm:$0xff]   ;;  %v15543_v57 = vld [vmem:[%s20582_s1 + $0x98c] ss:$16 sps:$4 sm:$0xff]  }
 0x27f   : > { %6930 = vmatpush1.bf16.msra.mxu0 %v15464_v41  ;;  %7476 = vmatpush1.bf16.msra.mxu1 %v15467_v42  ;;  %v15534_v2 = vld [vmem:[%s20582_s1 + $0x964] ss:$16 sps:$4 sm:$0xff]   ;;  %v15537_v41 = vld [vmem:[%s20582_s1 + $0x96c] ss:$16 sps:$4 sm:$0xff]   ;;  %v15532_v56 = vld [vmem:[%s20582_s1 + $0x960] ss:$16 sps:$4 sm:$0xff]  }
 0x280   : > { %6931 = vmatprep.subr.bf16.mxu0 %v15472_v51  ;;  %7477 = vmatprep.subr.bf16.mxu1 %v15475_v16  ;;  %v16190_v42 = vld [vmem:[%s16433_s30 + $0x4c] sm:$0xff]  ;;  %v15535_v51 = vld [vmem:[%s20582_s1 + $0x968] ss:$16 sps:$4 sm:$0xff]   ;;  %v15540_v16 = vld [vmem:[%s20582_s1 + $0x984] ss:$16 sps:$4 sm:$0xff]  }
 0x281   : > { %6880 = vmatprep.mubr.bf16.mxu0 %v16182_v62  ;;  %7426 = vmatprep.mubr.bf16.mxu1 %v16182_v62  ;;  %v12622_v54 = vcombine.high %v18568_v15, %v16190_v42  ;;  %v15538_v55 = vld [vmem:[%s20582_s1 + $0x980] ss:$16 sps:$4 sm:$0xff]   ;;  %v15547_v62 = vld [vmem:[%s20582_s1 + $0x9a8] ss:$16 sps:$4 sm:$0xff]  }
 0x282   : > { %v15579_v33 = vld [vmem:[%s20582_s1 + $0xa48] ss:$16 sps:$4 sm:$0xff]  }
 0x283   : > { %6932 = vmatpush1.bf16.msra.mxu0 %v15470_v58  ;;  %7478 = vmatpush1.bf16.msra.mxu1 %v15473_v59  ;;  %v15541_v58 = vld [vmem:[%s20582_s1 + $0x988] ss:$16 sps:$4 sm:$0xff]   ;;  %v15546_v59 = vld [vmem:[%s20582_s1 + $0x9a4] ss:$16 sps:$4 sm:$0xff]  }
 0x284   : > { %6933 = vmatprep.subr.bf16.mxu0 %v15478_v60  ;;  %7479 = vmatprep.subr.bf16.mxu1 %v15481_v61  ;;  %v15549_v60 = vld [vmem:[%s20582_s1 + $0x9ac] ss:$16 sps:$4 sm:$0xff]   ;;  %v15544_v61 = vld [vmem:[%s20582_s1 + $0x9a0] ss:$16 sps:$4 sm:$0xff]  }
 0x286   : > { %6881 = vmatmul.mubr.bf16.gmra.mrb[4].mxu0 %v16183_v7  ;;  %7427 = vmatmul.mubr.bf16.gmra.mrb[4].mxu1 %v16183_v7  ;;  %v15558_v7 = vld [vmem:[%s20582_s1 + $0x9e4] ss:$16 sps:$4 sm:$0xff]  }
 0x287   : > { %6934 = vmatpush1.bf16.msra.mxu0 %v15476_v63  ;;  %7480 = vmatpush1.bf16.msra.mxu1 %v15479_v0  ;;  %v15552_v63 = vld [vmem:[%s20582_s1 + $0x9c4] ss:$16 sps:$4 sm:$0xff]   ;;  %v15555_v0 = vld [vmem:[%s20582_s1 + $0x9cc] ss:$16 sps:$4 sm:$0xff]  }
 0x288   : > { %6935 = vmatprep.subr.bf16.mxu0 %v15484_v3  ;;  %7481 = vmatprep.subr.bf16.mxu1 %v15487_v6  ;;  %v15550_v3 = vld [vmem:[%s20582_s1 + $0x9c0] ss:$16 sps:$4 sm:$0xff]   ;;  %v15553_v6 = vld [vmem:[%s20582_s1 + $0x9c8] ss:$16 sps:$4 sm:$0xff]  }
 0x289   : > { %6890 = vmatprep.mubr.bf16.mxu0 %v16184_v17  ;;  %7436 = vmatprep.mubr.bf16.mxu1 %v16184_v17  ;;  %v15569_v17 = vld [vmem:[%s20582_s1 + $0xa0c] ss:$16 sps:$4 sm:$0xff]  }
 0x28b   : > { %6936 = vmatpush1.bf16.msra.mxu0 %v15482_v8  ;;  %7482 = vmatpush1.bf16.msra.mxu1 %v15485_v9  ;;  %v15561_v8 = vld [vmem:[%s20582_s1 + $0x9ec] ss:$16 sps:$4 sm:$0xff]   ;;  %v15556_v9 = vld [vmem:[%s20582_s1 + $0x9e0] ss:$16 sps:$4 sm:$0xff]  }
 0x28c   : > { %6937 = vmatprep.subr.bf16.mxu0 %v15490_v10  ;;  %7483 = vmatprep.subr.bf16.mxu1 %v15493_v14  ;;  %v15559_v10 = vld [vmem:[%s20582_s1 + $0x9e8] ss:$16 sps:$4 sm:$0xff]   ;;  %v15566_v14 = vld [vmem:[%s20582_s1 + $0xa04] ss:$16 sps:$4 sm:$0xff]  }
 0x28e   : > { %6891 = vmatmul.mubr.bf16.gmra.mrb[8].mxu0 %v16185_v45  ;;  %7437 = vmatmul.mubr.bf16.gmra.mrb[8].mxu1 %v16185_v45 }
 0x28f   : > { %6938 = vmatpush1.bf16.msra.mxu0 %v15488_v18  ;;  %7484 = vmatpush1.bf16.msra.mxu1 %v15491_v13 }
 0x290   : > { %6939 = vmatprep.subr.bf16.mxu0 %v15496_v21  ;;  %7485 = vmatprep.subr.bf16.mxu1 %v15499_v44 }
 0x291   : > { %6900 = vmatprep.mubr.bf16.mxu0 %v16186_v24  ;;  %7446 = vmatprep.mubr.bf16.mxu1 %v16186_v24 }
 0x293   : > { %6940 = vmatpush1.bf16.msra.mxu0 %v15494_v48  ;;  %7486 = vmatpush1.bf16.msra.mxu1 %v15497_v22  ;;  %v12621_v22 = vcombine.low %v18568_v15, %v16190_v42  ;;  %v15599_v15 = vld [vmem:[%s20582_s1 + $0xaac] ss:$16 sps:$4 sm:$0xff]  }
 0x294   : > { %6941 = vmatprep.subr.bf16.mxu0 %v15502_v23  ;;  %7487 = vmatprep.subr.bf16.mxu1 %v15505_v49  ;;  %v15607_v42 = vld [vmem:[%s20582_s1 + $0xacc] ss:$16 sps:$4 sm:$0xff]  }
 0x296   : > { %6901 = vmatmul.mubr.bf16.gmra.mrb[12].mxu0 %v16187_v28  ;;  %7447 = vmatmul.mubr.bf16.gmra.mrb[12].mxu1 %v16187_v28  ;;  %v16191_v28 = vld [vmem:[%s16433_s30 + $0x7c] ss:$44 sps:$4 sm:$0xff]  }
 0x297   : > { %6942 = vmatpush1.bf16.msra.mxu0 %v15500_v4  ;;  %7488 = vmatpush1.bf16.msra.mxu1 %v15503_v5 }
 0x298   : > { %6943 = vmatprep.subr.bf16.mxu0 %v15508_v25  ;;  %7489 = vmatprep.subr.bf16.mxu1 %v15511_v26  ;;  %v15575_v25 = vld [vmem:[%s20582_s1 + $0xa2c] ss:$16 sps:$4 sm:$0xff]   ;;  %v15570_v26 = vld [vmem:[%s20582_s1 + $0xa20] ss:$16 sps:$4 sm:$0xff]  }
 0x299   : > { %6910 = vmatprep.mubr.bf16.mxu0 %v16188_v35  ;;  %7456 = vmatprep.mubr.bf16.mxu1 %v16188_v35  ;;  %v15584_v35 = vld [vmem:[%s20582_s1 + $0xa64] ss:$16 sps:$4 sm:$0xff]  }
 0x29b   : > { %6944 = vmatpush1.bf16.msra.mxu0 %v15506_v27  ;;  %7490 = vmatpush1.bf16.msra.mxu1 %v15509_v29  ;;  %v15573_v27 = vld [vmem:[%s20582_s1 + $0xa28] ss:$16 sps:$4 sm:$0xff]   ;;  %v15578_v29 = vld [vmem:[%s20582_s1 + $0xa44] ss:$16 sps:$4 sm:$0xff]  }
 0x29c   : > { %6945 = vmatprep.subr.bf16.mxu0 %v15514_v30  ;;  %7491 = vmatprep.subr.bf16.mxu1 %v15517_v31  ;;  %v15581_v30 = vld [vmem:[%s20582_s1 + $0xa4c] ss:$16 sps:$4 sm:$0xff]   ;;  %v15576_v31 = vld [vmem:[%s20582_s1 + $0xa40] ss:$16 sps:$4 sm:$0xff]  }
 0x29e   : > { %6911 = vmatmul.mubr.bf16.gmra.mrb[16].mxu0 %v16189_v43  ;;  %7457 = vmatmul.mubr.bf16.gmra.mrb[16].mxu1 %v16189_v43  ;;  %v15593_v43 = vld [vmem:[%s20582_s1 + $0xa8c] ss:$16 sps:$4 sm:$0xff]  }
 0x29f   : > { %6946 = vmatpush1.bf16.msra.mxu0 %v15512_v36  ;;  %7492 = vmatpush1.bf16.msra.mxu1 %v15515_v34  ;;  %v15587_v36 = vld [vmem:[%s20582_s1 + $0xa6c] ss:$16 sps:$4 sm:$0xff]   ;;  %v16192_v34 = vld [vmem:[%s16433_s30 + $0x78] ss:$44 sps:$4 sm:$0xff]  }
 0x2a0   : > { %6947 = vmatprep.subr.bf16.mxu0 %v15520_v37  ;;  %7493 = vmatprep.subr.bf16.mxu1 %v15523_v38  ;;  %v16193_v37 = vld [vmem:[%s16433_s30 + $0xd4] ss:$44 sps:$4 sm:$0xff]  }
 0x2a1   : > { %6920 = vmatprep.mubr.bf16.mxu0 %v12631_v40  ;;  %7466 = vmatprep.mubr.bf16.mxu1 %v12631_v40  ;;  %v15582_v38 = vld [vmem:[%s20582_s1 + $0xa60] ss:$16 sps:$4 sm:$0xff]   ;;  %v15590_v40 = vld [vmem:[%s20582_s1 + $0xa84] ss:$16 sps:$4 sm:$0xff]  }
 0x2a3   : > { %6948 = vmatpush1.bf16.msra.mxu0 %v15518_v39  ;;  %7494 = vmatpush1.bf16.msra.mxu1 %v15521_v46  ;;  %v15585_v39 = vld [vmem:[%s20582_s1 + $0xa68] ss:$16 sps:$4 sm:$0xff]   ;;  %v15588_v46 = vld [vmem:[%s20582_s1 + $0xa80] ss:$16 sps:$4 sm:$0xff]  }
 0x2a4   : > { %6949 = vmatprep.subr.bf16.mxu0 %v15528_v47  ;;  %7495 = vmatprep.subr.bf16.mxu1 %v15531_v50  ;;  %v15591_v47 = vld [vmem:[%s20582_s1 + $0xa88] ss:$16 sps:$4 sm:$0xff]   ;;  %v15596_v50 = vld [vmem:[%s20582_s1 + $0xaa4] ss:$16 sps:$4 sm:$0xff]  }
 0x2a6   : > { %6921 = vmatmul.mubr.bf16.gmra.mrb[56].mxu0 %v12630_v11  ;;  %7467 = vmatmul.mubr.bf16.gmra.mrb[56].mxu1 %v12630_v11  ;;  %v16194_v11 = vld [vmem:[%s16433_s30 + $0xd0] ss:$44 sps:$4 sm:$0xff]  }
 0x2a7   : > { %6950 = vmatpush1.bf16.msra.mxu0 %v15526_v52  ;;  %7496 = vmatpush1.bf16.msra.mxu1 %v15529_v1  ;;  %v16195_v52 = vld [vmem:[%s16433_s30 + $0x12c] ss:$44 sps:$4 sm:$0xff]   ;;  %v15594_v1 = vld [vmem:[%s20582_s1 + $0xaa0] ss:$16 sps:$4 sm:$0xff]  }
 0x2a8   : > { %6951 = vmatprep.subr.bf16.mxu0 %v15534_v2  ;;  %7497 = vmatprep.subr.bf16.mxu1 %v15537_v41  ;;  %v15597_v2 = vld [vmem:[%s20582_s1 + $0xaa8] ss:$16 sps:$4 sm:$0xff]   ;;  %v15604_v41 = vld [vmem:[%s20582_s1 + $0xac4] ss:$16 sps:$4 sm:$0xff]  }
 0x2a9   : > { %6961 = vmatprep.mubr.bf16.mxu0 %v12622_v54  ;;  %7507 = vmatprep.mubr.bf16.mxu1 %v12622_v54  ;;  %v15602_v54 = vld [vmem:[%s20582_s1 + $0xac0] ss:$16 sps:$4 sm:$0xff]  }
 0x2ab   : > { %6952 = vmatpush1.bf16.msra.mxu0 %v15532_v56  ;;  %7498 = vmatpush1.bf16.msra.mxu1 %v15535_v51  ;;  %v15605_v56 = vld [vmem:[%s20582_s1 + $0xac8] ss:$16 sps:$4 sm:$0xff]   ;;  %v15610_v51 = vld [vmem:[%s20582_s1 + $0x15c4] ss:$16 sps:$4 sm:$0xff]  }
 0x2ac   : > { %6953 = vmatprep.subr.bf16.mxu0 %v15540_v16  ;;  %7499 = vmatprep.subr.bf16.mxu1 %v15543_v57  ;;  %v15613_v16 = vld [vmem:[%s20582_s1 + $0x15cc] ss:$16 sps:$4 sm:$0xff]   ;;  %v16196_v57 = vld [vmem:[%s16433_s30 + $0x128] ss:$44 sps:$4 sm:$0xff]  }
 0x2af   : > { %6954 = vmatpush1.bf16.msra.mxu0 %v15538_v55  ;;  %7500 = vmatpush1.bf16.msra.mxu1 %v15541_v58  ;;  %v16197_v55 = vld [vmem:[%s16433_s30 + $0x184] ss:$44 sps:$4 sm:$0xff]   ;;  %v236_v58 = vld [vmem:[%s16433_s30 + $0x1d8] sm:$0x11] }
 0x2b0   : > { %6955 = vmatprep.subr.bf16.mxu0 %v15546_v59  ;;  %7501 = vmatprep.subr.bf16.mxu1 %v15549_v60  ;;  %v12633_v59 = vcombine.high %v236_v58, %v236_v58  ;;  %v16198_v60 = vld [vmem:[%s16433_s30 + $0x180] ss:$44 sps:$4 sm:$0xff]  }
 0x2b3   : > { %6956 = vmatpush1.bf16.msra.mxu0 %v15544_v61  ;;  %7502 = vmatpush1.bf16.msra.mxu1 %v15547_v62  ;;  %v12632_v61 = vcombine.low %v236_v58, %v236_v58  ;;  %v177_v62 = vld [vmem:[%s16433_s30 + $0x28] sm:$0xf] }
 0x2b4   : > { %6957 = vmatprep.subr.bf16.mxu0 %v15552_v63  ;;  %7503 = vmatprep.subr.bf16.mxu1 %v15555_v0  ;;  %v16199_v63 = vld [vmem:[%s16433_s30 + $0x54] sm:$0xf]  ;;  %v15666_v58 = vld [vmem:[%s20582_s1 + $0x16e8] ss:$16 sps:$4 sm:$0xff]  }
 0x2b5   : > { %v12623_v0 = vcombine.low %v177_v62, %v16199_v63  ;;  %v18920_v63 = vld [vmem:[%s16433_s30 + $0x5c] ss:$44 sps:$4 sm:$0xff]  }
 0x2b7   : > { %6958 = vmatpush1.bf16.msra.mxu0 %v15550_v3  ;;  %7504 = vmatpush1.bf16.msra.mxu1 %v15553_v6  ;;  %v15608_v3 = vld [vmem:[%s20582_s1 + $0x15c0] ss:$16 sps:$4 sm:$0xff]   ;;  %v15611_v6 = vld [vmem:[%s20582_s1 + $0x15c8] ss:$16 sps:$4 sm:$0xff]  }
 0x2b8   : > { %6959 = vmatprep.subr.bf16.mxu0 %v15558_v7  ;;  %7505 = vmatprep.subr.bf16.mxu1 %v15561_v8  ;;  %v15617_v7 = vld [vmem:[%s20582_s1 + $0x15e4] ss:$16 sps:$4 sm:$0xff]   ;;  %v15620_v8 = vld [vmem:[%s20582_s1 + $0x15ec] ss:$16 sps:$4 sm:$0xff]  }
 0x2b9   : > { %v6649_v18 = vpop.f32.mrb[44].mxu0  ;;  %v7195_v13 = vpop.f32.mrb[44].mxu1 }
 0x2ba   : > { %v18645_v21 = vadd.f32 %v6649_v18, %v18426_v12  ;;  %v18648_v44 = vadd.f32 %v7195_v13, %v18429_v19  ;;  %v6651_v45 = vpop.f32.mrb[45].mxu0  ;;  %v7197_v48 = vpop.f32.mrb[45].mxu1  ;;  %v15564_v12 = vld [vmem:[%s20582_s1 + $0xa00] ss:$16 sps:$4 sm:$0xff]   ;;  %v15567_v19 = vld [vmem:[%s20582_s1 + $0xa08] ss:$16 sps:$4 sm:$0xff]  }
 0x2bb   : > { %v18652_v23 = vadd.f32 %v6651_v45, %v18433_v53  ;;  %v18655_v49 = vadd.f32 %v7197_v48, %v18436_v20  ;;  %6960 = vmatpush1.bf16.msra.mxu0 %v15556_v9  ;;  %7506 = vmatpush1.bf16.msra.mxu1 %v15559_v10  ;;  %v6653_v24 = vpop.f32.mrb[46].mxu0  ;;  %v7199_v4 = vpop.f32.mrb[46].mxu1  ;;  %v15572_v53 = vld [vmem:[%s20582_s1 + $0xa24] ss:$16 sps:$4 sm:$0xff]   ;;  %v15615_v9 = vld [vmem:[%s20582_s1 + $0x15e0] ss:$16 sps:$4 sm:$0xff]  }
 0x2bc   : > { %7020 = vmatprep.subr.bf16.mxu0 %v15566_v14  ;;  %7566 = vmatprep.subr.bf16.mxu1 %v15569_v17  ;;  %v6654_v20 = vpop.f32.mrb[47].mxu0  ;;  %v7200_v5 = vpop.f32.mrb[47].mxu1  ;;  %v15618_v10 = vld [vmem:[%s20582_s1 + $0x15e8] ss:$16 sps:$4 sm:$0xff]   ;;  %v15623_v14 = vld [vmem:[%s20582_s1 + $0x1604] ss:$16 sps:$4 sm:$0xff]  }
 0x2bd   : > { %v15626_v17 = vld [vmem:[%s20582_s1 + $0x160c] ss:$16 sps:$4 sm:$0xff]   ;;  %v15621_v18 = vld [vmem:[%s20582_s1 + $0x1600] ss:$16 sps:$4 sm:$0xff]   ;;  %v15624_v13 = vld [vmem:[%s20582_s1 + $0x1608] ss:$16 sps:$4 sm:$0xff]  }
 0x2be   : > { %6962 = vmatmul.mubr.bf16.vlgmr.msra.gmra.mrb[0].mxu0 %v12621_v22  ;;  %7508 = vmatmul.mubr.bf16.vlgmr.msra.gmra.mrb[0].mxu1 %v12621_v22  ;;  %v15629_v45 = vld [vmem:[%s20582_s1 + $0x1624] ss:$16 sps:$4 sm:$0xff]   ;;  %v15632_v48 = vld [vmem:[%s20582_s1 + $0x162c] ss:$16 sps:$4 sm:$0xff]  }
 0x2bf   : > { %7021 = vmatpush1.bf16.msra.mxu0 %v15564_v12  ;;  %7567 = vmatpush1.bf16.msra.mxu1 %v15567_v19  ;;  %v16200_v22 = vld [vmem:[%s16433_s30 + $0x80] ss:$44 sps:$4 sm:$0xff]   ;;  %v15630_v19 = vld [vmem:[%s20582_s1 + $0x1628] ss:$16 sps:$4 sm:$0xff]   ;;  %v15635_v24 = vld [vmem:[%s20582_s1 + $0x1644] ss:$16 sps:$4 sm:$0xff]  }
 0x2c0   : > { %6971 = vmatprep.mubr.bf16.mxu0 %v16191_v28  ;;  %7022 = vmatprep.subr.bf16.mxu0 %v15572_v53  ;;  %v15627_v12 = vld [vmem:[%s20582_s1 + $0x1620] ss:$16 sps:$4 sm:$0xff]   ;;  %v15638_v4 = vld [vmem:[%s20582_s1 + $0x164c] ss:$16 sps:$4 sm:$0xff]  }
 0x2c1   : > { %7517 = vmatprep.mubr.bf16.mxu1 %v16191_v28  ;;  %7568 = vmatprep.subr.bf16.mxu1 %v15575_v25 }
 0x2c3   : > { %7023 = vmatpush1.bf16.msra.mxu0 %v15570_v26  ;;  %7569 = vmatpush1.bf16.msra.mxu1 %v15573_v27 }
 0x2c4   : > { %7024 = vmatprep.subr.bf16.mxu0 %v15578_v29  ;;  %7570 = vmatprep.subr.bf16.mxu1 %v15581_v30  ;;  %v15633_v30 = vld [vmem:[%s20582_s1 + $0x1640] ss:$16 sps:$4 sm:$0xff]  }
 0x2c6   : > { %6972 = vmatmul.mubr.bf16.gmra.mrb[4].mxu0 %v16192_v34  ;;  %7518 = vmatmul.mubr.bf16.gmra.mrb[4].mxu1 %v16192_v34  ;;  %v15639_v34 = vld [vmem:[%s20582_s1 + $0x1660] ss:$16 sps:$4 sm:$0xff]  }
 0x2c7   : > { %6981 = vmatprep.mubr.bf16.mxu0 %v16193_v37  ;;  %7025 = vmatpush1.bf16.msra.mxu0 %v15576_v31 }
 0x2c8   : > { %7527 = vmatprep.mubr.bf16.mxu1 %v16193_v37  ;;  %7571 = vmatpush1.bf16.msra.mxu1 %v15579_v33  ;;  %v15642_v37 = vld [vmem:[%s20582_s1 + $0x1668] ss:$16 sps:$4 sm:$0xff]  }
 0x2c9   : > { %7026 = vmatprep.subr.bf16.mxu0 %v15584_v35  ;;  %7572 = vmatprep.subr.bf16.mxu1 %v15587_v36  ;;  %v16201_v36 = vld [vmem:[%s16433_s30 + $0xd8] ss:$44 sps:$4 sm:$0xff]  }
 0x2cb   : > { %7027 = vmatpush1.bf16.msra.mxu0 %v15582_v38  ;;  %v15647_v38 = vld [vmem:[%s20582_s1 + $0x1684] ss:$16 sps:$4 sm:$0xff]  }
 0x2cc   : > { %7573 = vmatpush1.bf16.msra.mxu1 %v15585_v39  ;;  %7028 = vmatprep.subr.bf16.mxu0 %v15590_v40  ;;  %v15650_v39 = vld [vmem:[%s20582_s1 + $0x168c] ss:$16 sps:$4 sm:$0xff]   ;;  %v15645_v40 = vld [vmem:[%s20582_s1 + $0x1680] ss:$16 sps:$4 sm:$0xff]  }
 0x2cd   : > { %7574 = vmatprep.subr.bf16.mxu1 %v15593_v43  ;;  %v15648_v43 = vld [vmem:[%s20582_s1 + $0x1688] ss:$16 sps:$4 sm:$0xff]  }
 0x2ce   : > { %6982 = vmatmul.mubr.bf16.gmra.mrb[8].mxu0 %v16194_v11  ;;  %7528 = vmatmul.mubr.bf16.gmra.mrb[8].mxu1 %v16194_v11  ;;  %v15654_v11 = vld [vmem:[%s20582_s1 + $0x16a8] ss:$16 sps:$4 sm:$0xff]  }
 0x2cf   : > { %6991 = vmatprep.mubr.bf16.mxu0 %v16195_v52  ;;  %7537 = vmatprep.mubr.bf16.mxu1 %v16195_v52  ;;  %v15659_v52 = vld [vmem:[%s20582_s1 + $0x16c4] ss:$16 sps:$4 sm:$0xff]  }
 0x2d0   : > { %7029 = vmatpush1.bf16.msra.mxu0 %v15588_v46  ;;  %7575 = vmatpush1.bf16.msra.mxu1 %v15591_v47  ;;  %v15653_v46 = vld [vmem:[%s20582_s1 + $0x16a4] ss:$16 sps:$4 sm:$0xff]   ;;  %v15656_v47 = vld [vmem:[%s20582_s1 + $0x16ac] ss:$16 sps:$4 sm:$0xff]  }
 0x2d1   : > { %7030 = vmatprep.subr.bf16.mxu0 %v15596_v50  ;;  %7576 = vmatprep.subr.bf16.mxu1 %v15599_v15  ;;  %v16202_v50 = vld [vmem:[%s16433_s30 + $0x130] ss:$44 sps:$4 sm:$0xff]  }
 0x2d2   : > { %v15651_v15 = vld [vmem:[%s20582_s1 + $0x16a0] ss:$16 sps:$4 sm:$0xff]  }
 0x2d4   : > { %7031 = vmatpush1.bf16.msra.mxu0 %v15594_v1  ;;  %7577 = vmatpush1.bf16.msra.mxu1 %v15597_v2  ;;  %v15662_v1 = vld [vmem:[%s20582_s1 + $0x16cc] ss:$16 sps:$4 sm:$0xff]   ;;  %v15657_v2 = vld [vmem:[%s20582_s1 + $0x16c0] ss:$16 sps:$4 sm:$0xff]  }
 0x2d5   : > { %7032 = vmatprep.subr.bf16.mxu0 %v15604_v41  ;;  %7578 = vmatprep.subr.bf16.mxu1 %v15607_v42  ;;  %v15660_v41 = vld [vmem:[%s20582_s1 + $0x16c8] ss:$16 sps:$4 sm:$0xff]   ;;  %v18888_v42 = vld [vmem:[%s16433_s30] sm:$0x88] }
 0x2d6   : > { %6992 = vmatmul.mubr.bf16.gmra.mrb[12].mxu0 %v16196_v57  ;;  %7538 = vmatmul.mubr.bf16.gmra.mrb[12].mxu1 %v16196_v57 }
 0x2d7   : > { %7001 = vmatprep.mubr.bf16.mxu0 %v16197_v55  ;;  %7547 = vmatprep.mubr.bf16.mxu1 %v16197_v55  ;;  %v15663_v55 = vld [vmem:[%s20582_s1 + $0x16e0] ss:$16 sps:$4 sm:$0xff]  }
 0x2d8   : > { %7033 = vmatpush1.bf16.msra.mxu0 %v15602_v54  ;;  %7579 = vmatpush1.bf16.msra.mxu1 %v15605_v56  ;;  %v15665_v54 = vld [vmem:[%s20582_s1 + $0x16e4] ss:$16 sps:$4 sm:$0xff]   ;;  %v15668_v56 = vld [vmem:[%s20582_s1 + $0x16ec] ss:$16 sps:$4 sm:$0xff]  }
 0x2d9   : > { %10014 = vmatprep.subr.bf16.mxu0 %v15610_v51  ;;  %10560 = vmatprep.subr.bf16.mxu1 %v15613_v16  ;;  %v16203_v51 = vld [vmem:[%s16433_s30 + $0x188] ss:$44 sps:$4 sm:$0xff]   ;;  %v18900_v16 = vld [vmem:[%s16433_s30 + $0x2c] sm:$0xff] }
 0x2da   : > { %v13344_v57 = vcombine.high %v18888_v42, %v18900_v16 }
 0x2dc   : > { %v8078_v62 = vrot.slane %v13344_v57, 3 }
 0x2de   : > { %7002 = vmatmul.mubr.bf16.gmra.mrb[16].mxu0 %v16198_v60  ;;  %7548 = vmatmul.mubr.bf16.gmra.mrb[16].mxu1 %v16198_v60  ;;  %v15674_v60 = vld [vmem:[%s20582_s1 + $0x170c] ss:$16 sps:$4 sm:$0xff]  }
 0x2df   : > { %7011 = vmatprep.mubr.bf16.mxu0 %v12633_v59  ;;  %7557 = vmatprep.mubr.bf16.mxu1 %v12633_v59  ;;  %v15671_v59 = vld [vmem:[%s20582_s1 + $0x1704] ss:$16 sps:$4 sm:$0xff]  }
 0x2e6   : > { %7012 = vmatmul.mubr.bf16.gmra.mrb[60].mxu0 %v12632_v61  ;;  %7558 = vmatmul.mubr.bf16.gmra.mrb[60].mxu1 %v12632_v61  ;;  %v15675_v61 = vld [vmem:[%s16433_s30 + $0x1e0] ss:$0 sps:$4 sm:$0x11]  }
 0x2e7   : > { %7052 = vmatprep.mubr.bf16.mxu0 %v16262_v32  ;;  %7598 = vmatprep.mubr.bf16.mxu1 %v16262_v32 }
 0x2ee   : > { %12983 = vmatmul.mubr.msk.bf16.vlgmr.msra.gmra.mrb[0].mxu0 %vm3584_vm1, %v12623_v0  ;;  %12989 = vmatmul.mubr.msk.bf16.vlgmr.msra.gmra.mrb[0].mxu1 %vm3584_vm1, %v12623_v0  ;;  %v8079_v0 = vrot.slane %v18920_v63, 3 }
 0x2ef   : > { %10015 = vmatpush1.bf16.msra.mxu0 %v15608_v3  ;;  %10561 = vmatpush1.bf16.msra.mxu1 %v15611_v6  ;;  %v15669_v3 = vld [vmem:[%s20582_s1 + $0x1700] ss:$16 sps:$4 sm:$0xff]   ;;  %v15672_v6 = vld [vmem:[%s20582_s1 + $0x1708] ss:$16 sps:$4 sm:$0xff]  }
 0x2f0   : > { %10016 = vmatprep.subr.bf16.mxu0 %v15617_v7  ;;  %10562 = vmatprep.subr.bf16.mxu1 %v15620_v8  ;;  %v15678_v7 = vld [vmem:[%s20582_s1 + $0x1724] ss:$16 sps:$4 sm:$0xff]   ;;  %v15681_v8 = vld [vmem:[%s20582_s1 + $0x172c] ss:$16 sps:$4 sm:$0xff]  }
 0x2f1   : > { %7062 = vmatprep.mubr.bf16.mxu0 %v16262_v32  ;;  %7608 = vmatprep.mubr.bf16.mxu1 %v16262_v32 }
 0x2f3   : > { %10017 = vmatpush1.bf16.msra.mxu0 %v15615_v9  ;;  %10563 = vmatpush1.bf16.msra.mxu1 %v15618_v10  ;;  %v8080_v9 = vsel %vm8074_vm2, %v8078_v62, %v8079_v0  ;;  %v15676_v10 = vld [vmem:[%s20582_s1 + $0x1720] ss:$16 sps:$4 sm:$0xff]   ;;  %v15737_v62 = vld [vmem:[%s20582_s1 + $0x184c] ss:$16 sps:$4 sm:$0xff]  }
 0x2f4   : > { %10018 = vmatprep.subr.bf16.mxu0 %v15623_v14  ;;  %10564 = vmatprep.subr.bf16.mxu1 %v15626_v17  ;;  %v15679_v14 = vld [vmem:[%s20582_s1 + $0x1728] ss:$16 sps:$4 sm:$0xff]   ;;  %v15684_v17 = vld [vmem:[%s20582_s1 + $0x1744] ss:$16 sps:$4 sm:$0xff]  }
 0x2f6   : > { %12984 = vmatmul.mubr.msk.bf16.gmra.mrb[4].mxu0 %vm3584_vm1, %v16200_v22  ;;  %12990 = vmatmul.mubr.msk.bf16.gmra.mrb[4].mxu1 %vm3584_vm1, %v16200_v22  ;;  %v15693_v22 = vld [vmem:[%s20582_s1 + $0x176c] ss:$16 sps:$4 sm:$0xff]  }
 0x2f7   : > { %10019 = vmatpush1.bf16.msra.mxu0 %v15621_v18  ;;  %10565 = vmatpush1.bf16.msra.mxu1 %v15624_v13  ;;  %v15687_v18 = vld [vmem:[%s20582_s1 + $0x174c] ss:$16 sps:$4 sm:$0xff]   ;;  %v15682_v13 = vld [vmem:[%s20582_s1 + $0x1740] ss:$16 sps:$4 sm:$0xff]  }
 0x2f8   : > { %10020 = vmatprep.subr.bf16.mxu0 %v15629_v45  ;;  %10566 = vmatprep.subr.bf16.mxu1 %v15632_v48  ;;  %v15685_v45 = vld [vmem:[%s20582_s1 + $0x1748] ss:$16 sps:$4 sm:$0xff]   ;;  %v15690_v48 = vld [vmem:[%s20582_s1 + $0x1764] ss:$16 sps:$4 sm:$0xff]  }
 0x2f9   : > { %v6740_v53 = vpop.f32.mrb[48].mxu0  ;;  %v7286_v20 = vpop.f32.mrb[48].mxu1  ;;  %7072 = vmatprep.mubr.bf16.mxu0 %v16262_v32  ;;  %7618 = vmatprep.mubr.bf16.mxu1 %v16262_v32 }
 0x2fa   : > { %v18812_v5 = vadd.f32 %v6740_v53, %v18645_v21  ;;  %v18815_v25 = vadd.f32 %v7286_v20, %v18648_v44  ;;  %v6742_v26 = vpop.f32.mrb[49].mxu0  ;;  %v7288_v27 = vpop.f32.mrb[49].mxu1  ;;  %v15636_v21 = vld [vmem:[%s20582_s1 + $0x1648] ss:$16 sps:$4 sm:$0xff]   ;;  %v15694_v53 = vld [vmem:[%s20582_s1 + $0x1780] ss:$16 sps:$4 sm:$0xff]  }
 0x2fb   : > { %v18818_v28 = vadd.f32 %v6742_v26, %v18652_v23  ;;  %v18821_v29 = vadd.f32 %v7288_v27, %v18655_v49  ;;  %10021 = vmatpush1.bf16.msra.mxu0 %v15627_v12  ;;  %10567 = vmatpush1.bf16.msra.mxu1 %v15630_v19  ;;  %v6744_v44 = vpop.f32.mrb[50].mxu0  ;;  %v7290_v31 = vpop.f32.mrb[50].mxu1  ;;  %v15641_v23 = vld [vmem:[%s20582_s1 + $0x1664] ss:$16 sps:$4 sm:$0xff]   ;;  %v15644_v49 = vld [vmem:[%s20582_s1 + $0x166c] ss:$16 sps:$4 sm:$0xff]   ;;  %v13343_v26 = vcombine.low %v18888_v42, %v18900_v16 }
 0x2fc   : > { %10022 = vmatprep.subr.bf16.mxu0 %v15635_v24  ;;  %10568 = vmatprep.subr.bf16.mxu1 %v15638_v4  ;;  %v6745_v33 = vpop.f32.mrb[51].mxu0  ;;  %v7291_v35 = vpop.f32.mrb[51].mxu1  ;;  %v15688_v12 = vld [vmem:[%s20582_s1 + $0x1760] ss:$16 sps:$4 sm:$0xff]   ;;  %v15691_v19 = vld [vmem:[%s20582_s1 + $0x1768] ss:$16 sps:$4 sm:$0xff]  }
 0x2fd   : > { %v15696_v24 = vld [vmem:[%s20582_s1 + $0x1784] ss:$16 sps:$4 sm:$0xff]   ;;  %v15699_v4 = vld [vmem:[%s20582_s1 + $0x178c] ss:$16 sps:$4 sm:$0xff]   ;;  %v15697_v20 = vld [vmem:[%s20582_s1 + $0x1788] ss:$16 sps:$4 sm:$0xff]  }
 0x2fe   : > { %12985 = vmatmul.mubr.msk.bf16.gmra.mrb[8].mxu0 %vm3584_vm1, %v16201_v36  ;;  %12991 = vmatmul.mubr.msk.bf16.gmra.mrb[8].mxu1 %vm3584_vm1, %v16201_v36  ;;  %v15702_v27 = vld [vmem:[%s20582_s1 + $0x17a4] ss:$16 sps:$4 sm:$0xff]   ;;  %v15703_v44 = vld [vmem:[%s20582_s1 + $0x17a8] ss:$16 sps:$4 sm:$0xff]   ;;  %v8075_v31 = vrot.slane %v13343_v26, 3 }
 0x2ff   : > { %10023 = vmatpush1.bf16.msra.mxu0 %v15633_v30  ;;  %10569 = vmatpush1.bf16.msra.mxu1 %v15636_v21  ;;  %v15705_v30 = vld [vmem:[%s20582_s1 + $0x17ac] ss:$16 sps:$4 sm:$0xff]   ;;  %v15700_v21 = vld [vmem:[%s20582_s1 + $0x17a0] ss:$16 sps:$4 sm:$0xff]   ;;  %v15710_v33 = vld [vmem:[%s20582_s1 + $0x17c4] ss:$16 sps:$4 sm:$0xff]  }
 0x300   : > { %10024 = vmatprep.subr.bf16.mxu0 %v15641_v23  ;;  %10570 = vmatprep.subr.bf16.mxu1 %v15644_v49  ;;  %v16206_v23 = vld [vmem:[%s16433_s30 + $0x58] ss:$44 sps:$4 sm:$0xff]   ;;  %v15713_v35 = vld [vmem:[%s20582_s1 + $0x17cc] ss:$16 sps:$4 sm:$0xff]   ;;  %v16207_v36 = vld [vmem:[%s16433_s30 + $0xb4] ss:$44 sps:$4 sm:$0xff]  }
 0x301   : > { %7082 = vmatprep.mubr.bf16.mxu0 %v16262_v32  ;;  %7628 = vmatprep.mubr.bf16.mxu1 %v16262_v32  ;;  %v8076_v49 = vrot.slane %v16206_v23, 3  ;;  %v15720_v42 = vld [vmem:[%s20582_s1 + $0x1800] ss:$16 sps:$4 sm:$0xff]   ;;  %v15731_v16 = vld [vmem:[%s20582_s1 + $0x182c] ss:$16 sps:$4 sm:$0xff]  }
 0x303   : > { %10025 = vmatpush1.bf16.msra.mxu0 %v15639_v34  ;;  %10571 = vmatpush1.bf16.msra.mxu1 %v15642_v37  ;;  %v8110_v34 = vrot.slane %v16207_v36, 3  ;;  %v15708_v37 = vld [vmem:[%s20582_s1 + $0x17c0] ss:$16 sps:$4 sm:$0xff]  }
 0x304   : > { %10026 = vmatprep.subr.bf16.mxu0 %v15647_v38  ;;  %10572 = vmatprep.subr.bf16.mxu1 %v15650_v39  ;;  %v15711_v38 = vld [vmem:[%s20582_s1 + $0x17c8] ss:$16 sps:$4 sm:$0xff]   ;;  %v8077_v39 = vsel %vm8074_vm2, %v8075_v31, %v8076_v49 }
 0x305   : > { %v15747_v31 = vld [vmem:[%s20582_s1 + $0x1888] ss:$16 sps:$4 sm:$0xff]  }
 0x306   : > { %12986 = vmatmul.mubr.msk.bf16.gmra.mrb[12].mxu0 %vm3584_vm1, %v16202_v50  ;;  %12992 = vmatmul.mubr.msk.bf16.gmra.mrb[12].mxu1 %vm3584_vm1, %v16202_v50  ;;  %v15717_v50 = vld [vmem:[%s20582_s1 + $0x17e8] ss:$16 sps:$4 sm:$0xff]  }
 0x307   : > { %10027 = vmatpush1.bf16.msra.mxu0 %v15645_v40  ;;  %10573 = vmatpush1.bf16.msra.mxu1 %v15648_v43  ;;  %v15716_v40 = vld [vmem:[%s20582_s1 + $0x17e4] ss:$16 sps:$4 sm:$0xff]   ;;  %v15719_v43 = vld [vmem:[%s20582_s1 + $0x17ec] ss:$16 sps:$4 sm:$0xff]  }
 0x308   : > { %10028 = vmatprep.subr.bf16.mxu0 %v15653_v46  ;;  %10574 = vmatprep.subr.bf16.mxu1 %v15656_v47  ;;  %v8111_v46 = vsel %vm8074_vm2, %v8079_v0, %v8110_v34  ;;  %v15714_v47 = vld [vmem:[%s20582_s1 + $0x17e0] ss:$16 sps:$4 sm:$0xff]  }
 0x309   : > { %7092 = vmatprep.mubr.bf16.mxu0 %v16262_v32  ;;  %7638 = vmatprep.mubr.bf16.mxu1 %v16262_v32 }
 0x30b   : > { %10029 = vmatpush1.bf16.msra.mxu0 %v15651_v15  ;;  %10575 = vmatpush1.bf16.msra.mxu1 %v15654_v11  ;;  %v16208_v15 = vld [vmem:[%s16433_s30 + $0xb0] ss:$44 sps:$4 sm:$0xff]  }
 0x30c   : > { %10030 = vmatprep.subr.bf16.mxu0 %v15659_v52  ;;  %10576 = vmatprep.subr.bf16.mxu1 %v15662_v1  ;;  %v8108_v11 = vrot.slane %v16208_v15, 3  ;;  %v15722_v52 = vld [vmem:[%s20582_s1 + $0x1804] ss:$16 sps:$4 sm:$0xff]   ;;  %v15725_v1 = vld [vmem:[%s20582_s1 + $0x180c] ss:$16 sps:$4 sm:$0xff]  }
 0x30d   : > { %v15764_v15 = vld [vmem:[%s20582_s1 + $0x18e4] ss:$16 sps:$4 sm:$0xff]  }
 0x30e   : > { %12987 = vmatmul.mubr.msk.bf16.gmra.mrb[16].mxu0 %vm3584_vm1, %v16203_v51  ;;  %12993 = vmatmul.mubr.msk.bf16.gmra.mrb[16].mxu1 %vm3584_vm1, %v16203_v51  ;;  %v15728_v51 = vld [vmem:[%s20582_s1 + $0x1824] ss:$16 sps:$4 sm:$0xff]  }
 0x30f   : > { %10031 = vmatpush1.bf16.msra.mxu0 %v15657_v2  ;;  %10577 = vmatpush1.bf16.msra.mxu1 %v15660_v41  ;;  %v16209_v2 = vld [vmem:[%s16433_s30 + $0x10c] ss:$44 sps:$4 sm:$0xff]  }
 0x310   : > { %10032 = vmatprep.subr.bf16.mxu0 %v15665_v54  ;;  %10578 = vmatprep.subr.bf16.mxu1 %v15668_v56  ;;  %v8132_v41 = vrot.slane %v16209_v2, 3  ;;  %v15723_v54 = vld [vmem:[%s20582_s1 + $0x1808] ss:$16 sps:$4 sm:$0xff]   ;;  %v8109_v56 = vsel %vm8074_vm2, %v8076_v49, %v8108_v11  ;;  %v15762_v2 = vld [vmem:[%s20582_s1 + $0x18e0] ss:$16 sps:$4 sm:$0xff]  }
 0x311   : > { %7102 = vmatprep.mubr.bf16.mxu0 %v16262_v32  ;;  %7648 = vmatprep.mubr.bf16.mxu1 %v16262_v32 }
 0x312   : > { %v8133_v57 = vsel %vm8074_vm2, %v8110_v34, %v8132_v41  ;;  %v15750_v34 = vld [vmem:[%s20582_s1 + $0x18a0] ss:$16 sps:$4 sm:$0xff]  }
 0x313   : > { %10033 = vmatpush1.bf16.msra.mxu0 %v15663_v55  ;;  %10579 = vmatpush1.bf16.msra.mxu1 %v15666_v58  ;;  %v15726_v55 = vld [vmem:[%s20582_s1 + $0x1820] ss:$16 sps:$4 sm:$0xff]   ;;  %v15729_v58 = vld [vmem:[%s20582_s1 + $0x1828] ss:$16 sps:$4 sm:$0xff]  }
 0x314   : > { %10034 = vmatprep.subr.bf16.mxu0 %v15671_v59  ;;  %10580 = vmatprep.subr.bf16.mxu1 %v15674_v60  ;;  %v16210_v59 = vld [vmem:[%s16433_s30 + $0x108] ss:$44 sps:$4 sm:$0xff]  }
 0x315   : > { %v8130_v60 = vrot.slane %v16210_v59, 3  ;;  %v15779_v59 = vld [vmem:[%s20582_s1 + $0x192c] ss:$16 sps:$4 sm:$0xff]  }
 0x316   : > { %12988 = vmatmul.mubr.msk.bf16.gmra.mrb[64].mxu0 %vm3584_vm1, %v15675_v61  ;;  %12994 = vmatmul.mubr.msk.bf16.gmra.mrb[64].mxu1 %vm3584_vm1, %v15675_v61  ;;  %v15734_v61 = vld [vmem:[%s20582_s1 + $0x1844] ss:$16 sps:$4 sm:$0xff]  }
 0x317   : > { %10035 = vmatpush1.bf16.msra.mxu0 %v15669_v3  ;;  %10581 = vmatpush1.bf16.msra.mxu1 %v15672_v6 }
 0x318   : > { %10036 = vmatprep.subr.bf16.mxu0 %v15678_v7  ;;  %10582 = vmatprep.subr.bf16.mxu1 %v15681_v8 }
 0x319   : > { %10046 = vmatprep.mubr.bf16.mxu0 %v8080_v9  ;;  %10592 = vmatprep.mubr.bf16.mxu1 %v8080_v9  ;;  %v15732_v9 = vld [vmem:[%s20582_s1 + $0x1840] ss:$16 sps:$4 sm:$0xff]  }
 0x31b   : > { %10037 = vmatpush1.bf16.msra.mxu0 %v15676_v10  ;;  %10583 = vmatpush1.bf16.msra.mxu1 %v15679_v14  ;;  %v16211_v10 = vld [vmem:[%s16433_s30 + $0x164] ss:$44 sps:$4 sm:$0xff]  }
 0x31c   : > { %10038 = vmatprep.subr.bf16.mxu0 %v15684_v17  ;;  %10584 = vmatprep.subr.bf16.mxu1 %v15687_v18  ;;  %v8154_v14 = vrot.slane %v16211_v10, 3  ;;  %v15793_v10 = vld [vmem:[%s20582_s1 + $0x196c] ss:$16 sps:$4 sm:$0xff]  }
 0x31f   : > { %10039 = vmatpush1.bf16.msra.mxu0 %v15682_v13  ;;  %10585 = vmatpush1.bf16.msra.mxu1 %v15685_v45  ;;  %v8131_v45 = vsel %vm8074_vm2, %v8108_v11, %v8130_v60  ;;  %v15767_v11 = vld [vmem:[%s20582_s1 + $0x18ec] ss:$16 sps:$4 sm:$0xff]  }
 0x320   : > { %10040 = vmatprep.subr.bf16.mxu0 %v15690_v48  ;;  %10586 = vmatprep.subr.bf16.mxu1 %v15693_v22  ;;  %v7663_v48 = vld [vmem:[%s16433_s30 + $0x1b8] sm:$0xff] }
 0x321   : > { %v13354_v49 = vcombine.low %v7663_v48, %v7663_v48 }
 0x323   : > { %10041 = vmatpush1.bf16.msra.mxu0 %v15688_v12  ;;  %10587 = vmatpush1.bf16.msra.mxu1 %v15691_v19  ;;  %v8155_v19 = vsel %vm8074_vm2, %v8132_v41, %v8154_v14  ;;  %v15765_v41 = vld [vmem:[%s20582_s1 + $0x18e8] ss:$16 sps:$4 sm:$0xff]  }
 0x324   : > { %10042 = vmatprep.subr.bf16.mxu0 %v15696_v24  ;;  %10588 = vmatprep.subr.bf16.mxu1 %v15699_v4  ;;  %v13355_v24 = vcombine.high %v7663_v48, %v7663_v48  ;;  %v15738_v4 = vld [vmem:[%s20582_s1 + $0x1860] ss:$16 sps:$4 sm:$0xff]   ;;  %v15797_v48 = vld [vmem:[%s20582_s1 + $0x1988] ss:$16 sps:$4 sm:$0xff]  }
 0x327   : > { %10043 = vmatpush1.bf16.msra.mxu0 %v15694_v53  ;;  %10589 = vmatpush1.bf16.msra.mxu1 %v15697_v20  ;;  %v15741_v53 = vld [vmem:[%s20582_s1 + $0x1868] ss:$16 sps:$4 sm:$0xff]   ;;  %v16212_v20 = vld [vmem:[%s16433_s30 + $0x160] ss:$44 sps:$4 sm:$0xff]  }
 0x328   : > { %10044 = vmatprep.subr.bf16.mxu0 %v15702_v27  ;;  %10590 = vmatprep.subr.bf16.mxu1 %v15705_v30  ;;  %v8152_v26 = vrot.slane %v16212_v20, 3  ;;  %v15746_v27 = vld [vmem:[%s20582_s1 + $0x1884] ss:$16 sps:$4 sm:$0xff]   ;;  %v15749_v30 = vld [vmem:[%s20582_s1 + $0x188c] ss:$16 sps:$4 sm:$0xff]  }
 0x329   : > { %v15810_v20 = vld [vmem:[%s20582_s1 + $0x19c4] ss:$16 sps:$4 sm:$0xff]  }
 0x32a   : > { %v8153_v23 = vsel %vm8074_vm2, %v8130_v60, %v8152_v26 }
 0x32b   : > { %10045 = vmatpush1.bf16.msra.mxu0 %v15700_v21  ;;  %10591 = vmatpush1.bf16.msra.mxu1 %v15703_v44  ;;  %v8176_v21 = vrot.slane %v13355_v24, 3  ;;  %v15744_v44 = vld [vmem:[%s20582_s1 + $0x1880] ss:$16 sps:$4 sm:$0xff]  }
 0x32c   : > { %10105 = vmatprep.subr.bf16.mxu0 %v15710_v33  ;;  %10651 = vmatprep.subr.bf16.mxu1 %v15713_v35  ;;  %v15752_v33 = vld [vmem:[%s20582_s1 + $0x18a4] ss:$16 sps:$4 sm:$0xff]   ;;  %v15755_v35 = vld [vmem:[%s20582_s1 + $0x18ac] ss:$16 sps:$4 sm:$0xff]  }
 0x32d   : > { %v8177_v36 = vsel %vm8074_vm2, %v8154_v14, %v8176_v21  ;;  %v15788_v14 = vld [vmem:[%s20582_s1 + $0x1960] ss:$16 sps:$4 sm:$0xff]  }
 0x32e   : > { %10047 = vmatmul.mubr.bf16.vlgmr.msra.gmra.mrb[0].mxu0 %v8077_v39  ;;  %10593 = vmatmul.mubr.bf16.vlgmr.msra.gmra.mrb[0].mxu1 %v8077_v39  ;;  %v15758_v39 = vld [vmem:[%s20582_s1 + $0x18c4] ss:$16 sps:$4 sm:$0xff]  }
 0x32f   : > { %10106 = vmatpush1.bf16.msra.mxu0 %v15708_v37  ;;  %10652 = vmatpush1.bf16.msra.mxu1 %v15711_v38  ;;  %v15753_v37 = vld [vmem:[%s20582_s1 + $0x18a8] ss:$16 sps:$4 sm:$0xff]   ;;  %v8174_v38 = vrot.slane %v13354_v49, 3  ;;  %v15819_v49 = vld [vmem:[%s20582_s1 + $0x19ec] ss:$16 sps:$4 sm:$0xff]  }
 0x330   : > { %10107 = vmatprep.subr.bf16.mxu0 %v15716_v40  ;;  %10653 = vmatprep.subr.bf16.mxu1 %v15719_v43  ;;  %v15761_v40 = vld [vmem:[%s20582_s1 + $0x18cc] ss:$16 sps:$4 sm:$0xff]   ;;  %v15756_v43 = vld [vmem:[%s20582_s1 + $0x18c0] ss:$16 sps:$4 sm:$0xff]  }
 0x331   : > { %10056 = vmatprep.mubr.bf16.mxu0 %v8111_v46  ;;  %10602 = vmatprep.mubr.bf16.mxu1 %v8111_v46  ;;  %v15759_v46 = vld [vmem:[%s20582_s1 + $0x18c8] ss:$16 sps:$4 sm:$0xff]  }
 0x333   : > { %10108 = vmatpush1.bf16.msra.mxu0 %v15714_v47  ;;  %10654 = vmatpush1.bf16.msra.mxu1 %v15717_v50  ;;  %v8175_v47 = vsel %vm8074_vm2, %v8152_v26, %v8174_v38  ;;  %v19136_v50 = vld [vmem:[%s16433_s30 + $0x8] sm:$0x88] }
 0x334   : > { %10109 = vmatprep.subr.bf16.mxu0 %v15722_v52  ;;  %10655 = vmatprep.subr.bf16.mxu1 %v15725_v1  ;;  %v19145_v52 = vld [vmem:[%s16433_s30 + $0x34] sm:$0xff]  ;;  %v15813_v26 = vld [vmem:[%s20582_s1 + $0x19cc] ss:$16 sps:$4 sm:$0xff]  }
 0x335   : > { %v13346_v1 = vcombine.high %v19136_v50, %v19145_v52 }
 0x336   : > { %10057 = vmatmul.mubr.bf16.gmra.mrb[4].mxu0 %v8109_v56  ;;  %10603 = vmatmul.mubr.bf16.gmra.mrb[4].mxu1 %v8109_v56 }
 0x337   : > { %10110 = vmatpush1.bf16.msra.mxu0 %v15720_v42  ;;  %10656 = vmatpush1.bf16.msra.mxu1 %v15723_v54  ;;  %v15770_v42 = vld [vmem:[%s20582_s1 + $0x1904] ss:$16 sps:$4 sm:$0xff]   ;;  %v15773_v54 = vld [vmem:[%s20582_s1 + $0x190c] ss:$16 sps:$4 sm:$0xff]   ;;  %v8084_v56 = vrot.slane %v13346_v1, 3 }
 0x338   : > { %10111 = vmatprep.subr.bf16.mxu0 %v15728_v51  ;;  %10657 = vmatprep.subr.bf16.mxu1 %v15731_v16  ;;  %v19162_v51 = vld [vmem:[%s16433_s30 + $0x64] ss:$44 sps:$4 sm:$0xff]  }
 0x339   : > { %v6831_v63 = vpop.f32.mrb[52].mxu0  ;;  %v7377_v0 = vpop.f32.mrb[52].mxu1  ;;  %10066 = vmatprep.mubr.bf16.mxu0 %v8133_v57  ;;  %10612 = vmatprep.mubr.bf16.mxu1 %v8133_v57  ;;  %v8085_v16 = vrot.slane %v19162_v51, 3  ;;  %v15768_v57 = vld [vmem:[%s20582_s1 + $0x1900] ss:$16 sps:$4 sm:$0xff]  }
 0x33a   : > { %v19062_v3 = vadd.f32 %v6831_v63, %v18812_v5  ;;  %v19065_v6 = vadd.f32 %v7377_v0, %v18815_v25  ;;  %v6833_v7 = vpop.f32.mrb[53].mxu0  ;;  %v7379_v8 = vpop.f32.mrb[53].mxu1  ;;  %v15735_v5 = vld [vmem:[%s20582_s1 + $0x1848] ss:$16 sps:$4 sm:$0xff]   ;;  %v15784_v63 = vld [vmem:[%s20582_s1 + $0x1944] ss:$16 sps:$4 sm:$0xff]  }
 0x33b   : > { %v19072_v17 = vadd.f32 %v6833_v7, %v18818_v28  ;;  %v19075_v18 = vadd.f32 %v7379_v8, %v18821_v29  ;;  %10112 = vmatpush1.bf16.msra.mxu0 %v15726_v55  ;;  %10658 = vmatpush1.bf16.msra.mxu1 %v15729_v58  ;;  %v6835_v25 = vpop.f32.mrb[54].mxu0  ;;  %v7381_v13 = vpop.f32.mrb[54].mxu1  ;;  %v15740_v28 = vld [vmem:[%s20582_s1 + $0x1864] ss:$16 sps:$4 sm:$0xff]   ;;  %v15743_v29 = vld [vmem:[%s20582_s1 + $0x186c] ss:$16 sps:$4 sm:$0xff]   ;;  %v8086_v60 = vsel %vm8074_vm2, %v8084_v56, %v8085_v16 }
 0x33c   : > { %10113 = vmatprep.subr.bf16.mxu0 %v15734_v61  ;;  %10659 = vmatprep.subr.bf16.mxu1 %v15737_v62  ;;  %v6836_v22 = vpop.f32.mrb[55].mxu0  ;;  %v7382_v12 = vpop.f32.mrb[55].mxu1  ;;  %v15771_v55 = vld [vmem:[%s20582_s1 + $0x1908] ss:$16 sps:$4 sm:$0xff]   ;;  %v15776_v58 = vld [vmem:[%s20582_s1 + $0x1924] ss:$16 sps:$4 sm:$0xff]  }
 0x33d   : > { %v15774_v61 = vld [vmem:[%s20582_s1 + $0x1920] ss:$16 sps:$4 sm:$0xff]   ;;  %v15777_v62 = vld [vmem:[%s20582_s1 + $0x1928] ss:$16 sps:$4 sm:$0xff]   ;;  %v15787_v0 = vld [vmem:[%s20582_s1 + $0x194c] ss:$16 sps:$4 sm:$0xff]  }
 0x33e   : > { %10067 = vmatmul.mubr.bf16.gmra.mrb[8].mxu0 %v8131_v45  ;;  %10613 = vmatmul.mubr.bf16.gmra.mrb[8].mxu1 %v8131_v45  ;;  %v15782_v7 = vld [vmem:[%s20582_s1 + $0x1940] ss:$16 sps:$4 sm:$0xff]   ;;  %v15785_v8 = vld [vmem:[%s20582_s1 + $0x1948] ss:$16 sps:$4 sm:$0xff]   ;;  %v15796_v25 = vld [vmem:[%s20582_s1 + $0x1984] ss:$16 sps:$4 sm:$0xff]  }
 0x33f   : > { %10114 = vmatpush1.bf16.msra.mxu0 %v15732_v9  ;;  %10660 = vmatpush1.bf16.msra.mxu1 %v15735_v5  ;;  %v15790_v9 = vld [vmem:[%s20582_s1 + $0x1964] ss:$16 sps:$4 sm:$0xff]   ;;  %v15791_v5 = vld [vmem:[%s20582_s1 + $0x1968] ss:$16 sps:$4 sm:$0xff]   ;;  %v15799_v13 = vld [vmem:[%s20582_s1 + $0x198c] ss:$16 sps:$4 sm:$0xff]  }
 0x340   : > { %10115 = vmatprep.subr.bf16.mxu0 %v15740_v28  ;;  %10661 = vmatprep.subr.bf16.mxu1 %v15743_v29  ;;  %v15794_v45 = vld [vmem:[%s20582_s1 + $0x1980] ss:$16 sps:$4 sm:$0xff]   ;;  %v13345_v28 = vcombine.low %v19136_v50, %v19145_v52  ;;  %v15802_v29 = vld [vmem:[%s20582_s1 + $0x19a4] ss:$16 sps:$4 sm:$0xff]   ;;  %v15805_v22 = vld [vmem:[%s20582_s1 + $0x19ac] ss:$16 sps:$4 sm:$0xff]  }
 0x341   : > { %10076 = vmatprep.mubr.bf16.mxu0 %v8155_v19  ;;  %10622 = vmatprep.mubr.bf16.mxu1 %v8155_v19  ;;  %v15800_v12 = vld [vmem:[%s20582_s1 + $0x19a0] ss:$16 sps:$4 sm:$0xff]   ;;  %v15803_v19 = vld [vmem:[%s20582_s1 + $0x19a8] ss:$16 sps:$4 sm:$0xff]   ;;  %v15837_v56 = vld [vmem:[%s20582_s1 + $0x1a4c] ss:$16 sps:$4 sm:$0xff]  }
 0x342   : > { %v8081_v24 = vrot.slane %v13345_v28, 3  ;;  %v15823_v50 = vld [vmem:[%s20582_s1 + $0x1a08] ss:$16 sps:$4 sm:$0xff]   ;;  %v15826_v1 = vld [vmem:[%s20582_s1 + $0x1a20] ss:$16 sps:$4 sm:$0xff]  }
 0x343   : > { %10116 = vmatpush1.bf16.msra.mxu0 %v15738_v4  ;;  %10662 = vmatpush1.bf16.msra.mxu1 %v15741_v53  ;;  %v16215_v4 = vld [vmem:[%s16433_s30 + $0x60] ss:$44 sps:$4 sm:$0xff]  }
 0x344   : > { %10117 = vmatprep.subr.bf16.mxu0 %v15746_v27  ;;  %10663 = vmatprep.subr.bf16.mxu1 %v15749_v30  ;;  %v8082_v53 = vrot.slane %v16215_v4, 3  ;;  %v16216_v27 = vld [vmem:[%s16433_s30 + $0xbc] ss:$44 sps:$4 sm:$0xff]  }
 0x345   : > { %v8114_v30 = vrot.slane %v16216_v27, 3  ;;  %v15847_v4 = vld [vmem:[%s20582_s1 + $0x1a88] ss:$16 sps:$4 sm:$0xff]  }
 0x346   : > { %10077 = vmatmul.mubr.bf16.gmra.mrb[12].mxu0 %v8153_v23  ;;  %10623 = vmatmul.mubr.bf16.gmra.mrb[12].mxu1 %v8153_v23  ;;  %v15816_v23 = vld [vmem:[%s20582_s1 + $0x19e4] ss:$16 sps:$4 sm:$0xff]  }
 0x347   : > { %10118 = vmatpush1.bf16.msra.mxu0 %v15744_v44  ;;  %10664 = vmatpush1.bf16.msra.mxu1 %v15747_v31  ;;  %v15808_v44 = vld [vmem:[%s20582_s1 + $0x19c0] ss:$16 sps:$4 sm:$0xff]   ;;  %v15811_v31 = vld [vmem:[%s20582_s1 + $0x19c8] ss:$16 sps:$4 sm:$0xff]  }
 0x348   : > { %10119 = vmatprep.subr.bf16.mxu0 %v15752_v33  ;;  %10665 = vmatprep.subr.bf16.mxu1 %v15755_v35  ;;  %v8115_v33 = vsel %vm8074_vm2, %v8085_v16, %v8114_v30  ;;  %v15814_v35 = vld [vmem:[%s20582_s1 + $0x19e0] ss:$16 sps:$4 sm:$0xff]  }
 0x349   : > { %10086 = vmatprep.mubr.bf16.mxu0 %v8177_v36  ;;  %10632 = vmatprep.mubr.bf16.mxu1 %v8177_v36  ;;  %v15817_v36 = vld [vmem:[%s20582_s1 + $0x19e8] ss:$16 sps:$4 sm:$0xff]  }
 0x34b   : > { %10120 = vmatpush1.bf16.msra.mxu0 %v15750_v34  ;;  %10666 = vmatpush1.bf16.msra.mxu1 %v15753_v37  ;;  %v16217_v34 = vld [vmem:[%s16433_s30 + $0xb8] ss:$44 sps:$4 sm:$0xff]  }
 0x34c   : > { %10121 = vmatprep.subr.bf16.mxu0 %v15758_v39  ;;  %10667 = vmatprep.subr.bf16.mxu1 %v15761_v40  ;;  %v8112_v37 = vrot.slane %v16217_v34, 3  ;;  %v15825_v39 = vld [vmem:[%s20582_s1 + $0x1a0c] ss:$16 sps:$4 sm:$0xff]   ;;  %v16218_v40 = vld [vmem:[%s16433_s30 + $0x114] ss:$44 sps:$4 sm:$0xff]  }
 0x34d   : > { %v15866_v34 = vld [vmem:[%s20582_s1 + $0x1ae4] ss:$16 sps:$4 sm:$0xff]  }
 0x34e   : > { %10087 = vmatmul.mubr.bf16.gmra.mrb[16].mxu0 %v8175_v47  ;;  %10633 = vmatmul.mubr.bf16.gmra.mrb[16].mxu1 %v8175_v47  ;;  %v15820_v47 = vld [vmem:[%s20582_s1 + $0x1a00] ss:$16 sps:$4 sm:$0xff]  }
 0x34f   : > { %10122 = vmatpush1.bf16.msra.mxu0 %v15756_v43  ;;  %10668 = vmatpush1.bf16.msra.mxu1 %v15759_v46  ;;  %v8136_v43 = vrot.slane %v16218_v40, 3  ;;  %v8113_v46 = vsel %vm8074_vm2, %v8082_v53, %v8112_v37  ;;  %v15864_v40 = vld [vmem:[%s20582_s1 + $0x1ae0] ss:$16 sps:$4 sm:$0xff]  }
 0x350   : > { %10123 = vmatprep.subr.bf16.mxu0 %v15764_v15  ;;  %10669 = vmatprep.subr.bf16.mxu1 %v15767_v11  ;;  %v15828_v15 = vld [vmem:[%s20582_s1 + $0x1a24] ss:$16 sps:$4 sm:$0xff]   ;;  %v15831_v11 = vld [vmem:[%s20582_s1 + $0x1a2c] ss:$16 sps:$4 sm:$0xff]  }
 0x351   : > { %10096 = vmatprep.mubr.bf16.mxu0 %v8176_v21  ;;  %10642 = vmatprep.mubr.bf16.mxu1 %v8176_v21  ;;  %v8083_v21 = vsel %vm8074_vm2, %v8081_v24, %v8082_v53  ;;  %v8137_v52 = vsel %vm8074_vm2, %v8114_v30, %v8136_v43  ;;  %v15844_v24 = vld [vmem:[%s20582_s1 + $0x1a80] ss:$16 sps:$4 sm:$0xff]  }
 0x352   : > { %v15850_v30 = vld [vmem:[%s20582_s1 + $0x1aa0] ss:$16 sps:$4 sm:$0xff]  }
 0x353   : > { %10124 = vmatpush1.bf16.msra.mxu0 %v15762_v2  ;;  %10670 = vmatpush1.bf16.msra.mxu1 %v15765_v41  ;;  %v15829_v2 = vld [vmem:[%s20582_s1 + $0x1a28] ss:$16 sps:$4 sm:$0xff]   ;;  %v16219_v41 = vld [vmem:[%s16433_s30 + $0x110] ss:$44 sps:$4 sm:$0xff]  }
 0x354   : > { %10125 = vmatprep.subr.bf16.mxu0 %v15770_v42  ;;  %10671 = vmatprep.subr.bf16.mxu1 %v15773_v54  ;;  %v8134_v42 = vrot.slane %v16219_v41, 3  ;;  %v15834_v54 = vld [vmem:[%s20582_s1 + $0x1a44] ss:$16 sps:$4 sm:$0xff]   ;;  %v15881_v41 = vld [vmem:[%s20582_s1 + $0x1b2c] ss:$16 sps:$4 sm:$0xff]  }
 0x356   : > { %10097 = vmatmul.mubr.bf16.gmra.mrb[68].mxu0 %v8174_v38  ;;  %10643 = vmatmul.mubr.bf16.gmra.mrb[68].mxu1 %v8174_v38  ;;  %v15822_v38 = vld [vmem:[%s20582_s1 + $0x1a04] ss:$16 sps:$4 sm:$0xff]  }
 0x357   : > { %10126 = vmatpush1.bf16.msra.mxu0 %v15768_v57  ;;  %10672 = vmatpush1.bf16.msra.mxu1 %v15771_v55 }
 0x358   : > { %10127 = vmatprep.subr.bf16.mxu0 %v15776_v58  ;;  %10673 = vmatprep.subr.bf16.mxu1 %v15779_v59 }
 0x359   : > { %10137 = vmatprep.mubr.bf16.mxu0 %v8086_v60  ;;  %10683 = vmatprep.mubr.bf16.mxu1 %v8086_v60  ;;  %v15832_v60 = vld [vmem:[%s20582_s1 + $0x1a40] ss:$16 sps:$4 sm:$0xff]  }
 0x35b   : > { %10128 = vmatpush1.bf16.msra.mxu0 %v15774_v61  ;;  %10674 = vmatpush1.bf16.msra.mxu1 %v15777_v62  ;;  %v16220_v61 = vld [vmem:[%s16433_s30 + $0x16c] ss:$44 sps:$4 sm:$0xff]  }
 0x35c   : > { %10129 = vmatprep.subr.bf16.mxu0 %v15784_v63  ;;  %10675 = vmatprep.subr.bf16.mxu1 %v15787_v0  ;;  %v8158_v62 = vrot.slane %v16220_v61, 3  ;;  %v15893_v61 = vld [vmem:[%s20582_s1 + $0x1b6c] ss:$16 sps:$4 sm:$0xff]  }
 0x35f   : > { %10130 = vmatpush1.bf16.msra.mxu0 %v15782_v7  ;;  %10676 = vmatpush1.bf16.msra.mxu1 %v15785_v8 }
 0x360   : > { %10131 = vmatprep.subr.bf16.mxu0 %v15790_v9  ;;  %10677 = vmatprep.subr.bf16.mxu1 %v15793_v10  ;;  %v7664_v9 = vld [vmem:[%s16433_s30 + $0x1c0] sm:$0xff] }
 0x361   : > { %v13356_v53 = vcombine.low %v7664_v9, %v7664_v9 }
 0x363   : > { %10132 = vmatpush1.bf16.msra.mxu0 %v15788_v14  ;;  %10678 = vmatpush1.bf16.msra.mxu1 %v15791_v5  ;;  %v8159_v5 = vsel %vm8074_vm2, %v8136_v43, %v8158_v62  ;;  %v15867_v43 = vld [vmem:[%s20582_s1 + $0x1ae8] ss:$16 sps:$4 sm:$0xff]  }
 0x364   : > { %10133 = vmatprep.subr.bf16.mxu0 %v15796_v25  ;;  %10679 = vmatprep.subr.bf16.mxu1 %v15799_v13  ;;  %v13357_v25 = vcombine.high %v7664_v9, %v7664_v9  ;;  %v15838_v13 = vld [vmem:[%s20582_s1 + $0x1a60] ss:$16 sps:$4 sm:$0xff]   ;;  %v15897_v9 = vld [vmem:[%s20582_s1 + $0x1b88] ss:$16 sps:$4 sm:$0xff]  }
 0x367   : > { %10134 = vmatpush1.bf16.msra.mxu0 %v15794_v45  ;;  %10680 = vmatpush1.bf16.msra.mxu1 %v15797_v48  ;;  %v15841_v45 = vld [vmem:[%s20582_s1 + $0x1a68] ss:$16 sps:$4 sm:$0xff]  }
 0x368   : > { %10135 = vmatprep.subr.bf16.mxu0 %v15802_v29  ;;  %10681 = vmatprep.subr.bf16.mxu1 %v15805_v22  ;;  %v16221_v48 = vld [vmem:[%s16433_s30 + $0x168] ss:$44 sps:$4 sm:$0xff]   ;;  %v15849_v22 = vld [vmem:[%s20582_s1 + $0x1a8c] ss:$16 sps:$4 sm:$0xff]  }
 0x369   : > { %v8156_v28 = vrot.slane %v16221_v48, 3  ;;  %v15846_v29 = vld [vmem:[%s20582_s1 + $0x1a84] ss:$16 sps:$4 sm:$0xff]  }
 0x36a   : > { %v15910_v48 = vld [vmem:[%s20582_s1 + $0x1bc4] ss:$16 sps:$4 sm:$0xff]  }
 0x36b   : > { %10136 = vmatpush1.bf16.msra.mxu0 %v15800_v12  ;;  %10682 = vmatpush1.bf16.msra.mxu1 %v15803_v19  ;;  %v8180_v12 = vrot.slane %v13357_v25, 3  ;;  %v8157_v19 = vsel %vm8074_vm2, %v8134_v42, %v8156_v28 }
 0x36c   : > { %10196 = vmatprep.subr.bf16.mxu0 %v15810_v20  ;;  %10742 = vmatprep.subr.bf16.mxu1 %v15813_v26  ;;  %v15852_v20 = vld [vmem:[%s20582_s1 + $0x1aa4] ss:$16 sps:$4 sm:$0xff]   ;;  %v15855_v26 = vld [vmem:[%s20582_s1 + $0x1aac] ss:$16 sps:$4 sm:$0xff]  }
 0x36d   : > { %v8181_v27 = vsel %vm8074_vm2, %v8158_v62, %v8180_v12  ;;  %v15888_v62 = vld [vmem:[%s20582_s1 + $0x1b60] ss:$16 sps:$4 sm:$0xff]  }
 0x36e   : > { %10138 = vmatmul.mubr.bf16.vlgmr.msra.gmra.mrb[0].mxu0 %v8083_v21  ;;  %10684 = vmatmul.mubr.bf16.vlgmr.msra.gmra.mrb[0].mxu1 %v8083_v21  ;;  %v15853_v21 = vld [vmem:[%s20582_s1 + $0x1aa8] ss:$16 sps:$4 sm:$0xff]  }
 0x36f   : > { %10197 = vmatpush1.bf16.msra.mxu0 %v15808_v44  ;;  %10743 = vmatpush1.bf16.msra.mxu1 %v15811_v31  ;;  %v8178_v44 = vrot.slane %v13356_v53, 3  ;;  %v15860_v31 = vld [vmem:[%s20582_s1 + $0x1ac4] ss:$16 sps:$4 sm:$0xff]   ;;  %v15919_v53 = vld [vmem:[%s20582_s1 + $0x1bec] ss:$16 sps:$4 sm:$0xff]  }
 0x370   : > { %10198 = vmatprep.subr.bf16.mxu0 %v15816_v23  ;;  %10744 = vmatprep.subr.bf16.mxu1 %v15819_v49  ;;  %v15863_v23 = vld [vmem:[%s20582_s1 + $0x1acc] ss:$16 sps:$4 sm:$0xff]  }
 0x371   : > { %10147 = vmatprep.mubr.bf16.mxu0 %v8115_v33  ;;  %10693 = vmatprep.mubr.bf16.mxu1 %v8115_v33  ;;  %v8179_v49 = vsel %vm8074_vm2, %v8156_v28, %v8178_v44  ;;  %v15858_v33 = vld [vmem:[%s20582_s1 + $0x1ac0] ss:$16 sps:$4 sm:$0xff]   ;;  %v15913_v28 = vld [vmem:[%s20582_s1 + $0x1bcc] ss:$16 sps:$4 sm:$0xff]  }
 0x373   : > { %10199 = vmatpush1.bf16.msra.mxu0 %v15814_v35  ;;  %10745 = vmatpush1.bf16.msra.mxu1 %v15817_v36  ;;  %v15861_v35 = vld [vmem:[%s20582_s1 + $0x1ac8] ss:$16 sps:$4 sm:$0xff]   ;;  %v19376_v36 = vld [vmem:[%s16433_s30 + $0x10] sm:$0x88] }
 0x374   : > { %10200 = vmatprep.subr.bf16.mxu0 %v15822_v38  ;;  %10746 = vmatprep.subr.bf16.mxu1 %v15825_v39  ;;  %v19385_v38 = vld [vmem:[%s16433_s30 + $0x3c] sm:$0xff] }
 0x375   : > { %v13348_v39 = vcombine.high %v19376_v36, %v19385_v38 }
 0x376   : > { %10148 = vmatmul.mubr.bf16.gmra.mrb[4].mxu0 %v8113_v46  ;;  %10694 = vmatmul.mubr.bf16.gmra.mrb[4].mxu1 %v8113_v46  ;;  %v15872_v46 = vld [vmem:[%s20582_s1 + $0x1b04] ss:$16 sps:$4 sm:$0xff]  }
 0x377   : > { %10201 = vmatpush1.bf16.msra.mxu0 %v15820_v47  ;;  %10747 = vmatpush1.bf16.msra.mxu1 %v15823_v50  ;;  %v15875_v47 = vld [vmem:[%s20582_s1 + $0x1b0c] ss:$16 sps:$4 sm:$0xff]   ;;  %v8090_v50 = vrot.slane %v13348_v39, 3  ;;  %v15926_v39 = vld [vmem:[%s20582_s1 + $0x1c20] ss:$16 sps:$4 sm:$0xff]  }
 0x378   : > { %10202 = vmatprep.subr.bf16.mxu0 %v15828_v15  ;;  %10748 = vmatprep.subr.bf16.mxu1 %v15831_v11  ;;  %v19402_v15 = vld [vmem:[%s16433_s30 + $0x6c] ss:$44 sps:$4 sm:$0xff]  }
 0x379   : > { %v6922_v51 = vpop.f32.mrb[56].mxu0  ;;  %v7468_v16 = vpop.f32.mrb[56].mxu1  ;;  %10157 = vmatprep.mubr.bf16.mxu0 %v8137_v52  ;;  %10703 = vmatprep.mubr.bf16.mxu1 %v8137_v52  ;;  %v8091_v11 = vrot.slane %v19402_v15, 3  ;;  %v15870_v52 = vld [vmem:[%s20582_s1 + $0x1b00] ss:$16 sps:$4 sm:$0xff]  }
 0x37a   : > { %v19302_v57 = vadd.f32 %v6922_v51, %v19062_v3  ;;  %v19305_v55 = vadd.f32 %v7468_v16, %v19065_v6  ;;  %v6924_v58 = vpop.f32.mrb[57].mxu0  ;;  %v7470_v59 = vpop.f32.mrb[57].mxu1  ;;  %v8135_v3 = vsel %vm8074_vm2, %v8112_v37, %v8134_v42  ;;  %v15835_v6 = vld [vmem:[%s20582_s1 + $0x1a48] ss:$16 sps:$4 sm:$0xff]   ;;  %v15869_v37 = vld [vmem:[%s20582_s1 + $0x1aec] ss:$16 sps:$4 sm:$0xff]  }
 0x37b   : > { %v19312_v63 = vadd.f32 %v6924_v58, %v19072_v17  ;;  %v19315_v0 = vadd.f32 %v7470_v59, %v19075_v18  ;;  %10203 = vmatpush1.bf16.msra.mxu0 %v15826_v1  ;;  %10749 = vmatpush1.bf16.msra.mxu1 %v15829_v2  ;;  %v6926_v7 = vpop.f32.mrb[58].mxu0  ;;  %v7472_v8 = vpop.f32.mrb[58].mxu1  ;;  %v15840_v17 = vld [vmem:[%s20582_s1 + $0x1a64] ss:$16 sps:$4 sm:$0xff]   ;;  %v15843_v18 = vld [vmem:[%s20582_s1 + $0x1a6c] ss:$16 sps:$4 sm:$0xff]   ;;  %v8092_v42 = vsel %vm8074_vm2, %v8090_v50, %v8091_v11 }
 0x37c   : > { %10204 = vmatprep.subr.bf16.mxu0 %v15834_v54  ;;  %10750 = vmatprep.subr.bf16.mxu1 %v15837_v56  ;;  %v6927_v10 = vpop.f32.mrb[59].mxu0  ;;  %v7473_v14 = vpop.f32.mrb[59].mxu1  ;;  %v15873_v1 = vld [vmem:[%s20582_s1 + $0x1b08] ss:$16 sps:$4 sm:$0xff]   ;;  %v15878_v2 = vld [vmem:[%s20582_s1 + $0x1b24] ss:$16 sps:$4 sm:$0xff]  }
 0x37d   : > { %v15876_v54 = vld [vmem:[%s20582_s1 + $0x1b20] ss:$16 sps:$4 sm:$0xff]   ;;  %v15879_v56 = vld [vmem:[%s20582_s1 + $0x1b28] ss:$16 sps:$4 sm:$0xff]   ;;  %v15884_v51 = vld [vmem:[%s20582_s1 + $0x1b44] ss:$16 sps:$4 sm:$0xff]  }
 0x37e   : > { %10158 = vmatmul.mubr.bf16.gmra.mrb[8].mxu0 %v8135_v3  ;;  %10704 = vmatmul.mubr.bf16.gmra.mrb[8].mxu1 %v8135_v3  ;;  %v15887_v16 = vld [vmem:[%s20582_s1 + $0x1b4c] ss:$16 sps:$4 sm:$0xff]   ;;  %v15882_v58 = vld [vmem:[%s20582_s1 + $0x1b40] ss:$16 sps:$4 sm:$0xff]   ;;  %v15885_v59 = vld [vmem:[%s20582_s1 + $0x1b48] ss:$16 sps:$4 sm:$0xff]  }
 0x37f   : > { %10205 = vmatpush1.bf16.msra.mxu0 %v15832_v60  ;;  %10751 = vmatpush1.bf16.msra.mxu1 %v15835_v6  ;;  %v15890_v60 = vld [vmem:[%s20582_s1 + $0x1b64] ss:$16 sps:$4 sm:$0xff]   ;;  %v15891_v3 = vld [vmem:[%s20582_s1 + $0x1b68] ss:$16 sps:$4 sm:$0xff]   ;;  %v15899_v7 = vld [vmem:[%s20582_s1 + $0x1b8c] ss:$16 sps:$4 sm:$0xff]  }
 0x380   : > { %10206 = vmatprep.subr.bf16.mxu0 %v15840_v17  ;;  %10752 = vmatprep.subr.bf16.mxu1 %v15843_v18  ;;  %v15896_v6 = vld [vmem:[%s20582_s1 + $0x1b84] ss:$16 sps:$4 sm:$0xff]   ;;  %v15894_v8 = vld [vmem:[%s20582_s1 + $0x1b80] ss:$16 sps:$4 sm:$0xff]   ;;  %v13347_v17 = vcombine.low %v19376_v36, %v19385_v38  ;;  %v15905_v10 = vld [vmem:[%s20582_s1 + $0x1bac] ss:$16 sps:$4 sm:$0xff]  }
 0x381   : > { %10167 = vmatprep.mubr.bf16.mxu0 %v8159_v5  ;;  %10713 = vmatprep.mubr.bf16.mxu1 %v8159_v5  ;;  %v15902_v18 = vld [vmem:[%s20582_s1 + $0x1ba4] ss:$16 sps:$4 sm:$0xff]   ;;  %v15900_v14 = vld [vmem:[%s20582_s1 + $0x1ba0] ss:$16 sps:$4 sm:$0xff]   ;;  %v15903_v5 = vld [vmem:[%s20582_s1 + $0x1ba8] ss:$16 sps:$4 sm:$0xff]  }
 0x382   : > { %v8087_v25 = vrot.slane %v13347_v17, 3  ;;  %v15923_v36 = vld [vmem:[%s20582_s1 + $0x1c08] ss:$16 sps:$4 sm:$0xff]   ;;  %v15937_v50 = vld [vmem:[%s20582_s1 + $0x1c4c] ss:$16 sps:$4 sm:$0xff]  }
 0x383   : > { %10207 = vmatpush1.bf16.msra.mxu0 %v15838_v13  ;;  %10753 = vmatpush1.bf16.msra.mxu1 %v15841_v45  ;;  %v16224_v13 = vld [vmem:[%s16433_s30 + $0x68] ss:$44 sps:$4 sm:$0xff]  }
 0x384   : > { %10208 = vmatprep.subr.bf16.mxu0 %v15846_v29  ;;  %10754 = vmatprep.subr.bf16.mxu1 %v15849_v22  ;;  %v8088_v45 = vrot.slane %v16224_v13, 3  ;;  %v16225_v29 = vld [vmem:[%s16433_s30 + $0xc4] ss:$44 sps:$4 sm:$0xff]   ;;  %v15947_v13 = vld [vmem:[%s20582_s1 + $0x1c88] ss:$16 sps:$4 sm:$0xff]  }
 0x385   : > { %v8118_v22 = vrot.slane %v16225_v29, 3 }
 0x386   : > { %10168 = vmatmul.mubr.bf16.gmra.mrb[12].mxu0 %v8157_v19  ;;  %10714 = vmatmul.mubr.bf16.gmra.mrb[12].mxu1 %v8157_v19  ;;  %v15908_v19 = vld [vmem:[%s20582_s1 + $0x1bc0] ss:$16 sps:$4 sm:$0xff]  }
 0x387   : > { %10209 = vmatpush1.bf16.msra.mxu0 %v15844_v24  ;;  %10755 = vmatpush1.bf16.msra.mxu1 %v15847_v4  ;;  %v15911_v24 = vld [vmem:[%s20582_s1 + $0x1bc8] ss:$16 sps:$4 sm:$0xff]   ;;  %v15916_v4 = vld [vmem:[%s20582_s1 + $0x1be4] ss:$16 sps:$4 sm:$0xff]  }
 0x388   : > { %10210 = vmatprep.subr.bf16.mxu0 %v15852_v20  ;;  %10756 = vmatprep.subr.bf16.mxu1 %v15855_v26  ;;  %v8119_v20 = vsel %vm8074_vm2, %v8091_v11, %v8118_v22  ;;  %v15914_v26 = vld [vmem:[%s20582_s1 + $0x1be0] ss:$16 sps:$4 sm:$0xff]  }
 0x389   : > { %10177 = vmatprep.mubr.bf16.mxu0 %v8181_v27  ;;  %10723 = vmatprep.mubr.bf16.mxu1 %v8181_v27  ;;  %v15917_v27 = vld [vmem:[%s20582_s1 + $0x1be8] ss:$16 sps:$4 sm:$0xff]  }
 0x38b   : > { %10211 = vmatpush1.bf16.msra.mxu0 %v15850_v30  ;;  %10757 = vmatpush1.bf16.msra.mxu1 %v15853_v21  ;;  %v16226_v30 = vld [vmem:[%s16433_s30 + $0xc0] ss:$44 sps:$4 sm:$0xff]  }
 0x38c   : > { %10212 = vmatprep.subr.bf16.mxu0 %v15860_v31  ;;  %10758 = vmatprep.subr.bf16.mxu1 %v15863_v23  ;;  %v8116_v21 = vrot.slane %v16226_v30, 3  ;;  %v15925_v31 = vld [vmem:[%s20582_s1 + $0x1c0c] ss:$16 sps:$4 sm:$0xff]   ;;  %v15966_v30 = vld [vmem:[%s20582_s1 + $0x1ce4] ss:$16 sps:$4 sm:$0xff]  }
 0x38d   : > { %v16227_v23 = vld [vmem:[%s16433_s30 + $0x11c] ss:$44 sps:$4 sm:$0xff]  }
 0x38e   : > { %10178 = vmatmul.mubr.bf16.gmra.mrb[16].mxu0 %v8179_v49  ;;  %10724 = vmatmul.mubr.bf16.gmra.mrb[16].mxu1 %v8179_v49  ;;  %v8140_v49 = vrot.slane %v16227_v23, 3  ;;  %v15964_v23 = vld [vmem:[%s20582_s1 + $0x1ce0] ss:$16 sps:$4 sm:$0xff]  }
 0x38f   : > { %10213 = vmatpush1.bf16.msra.mxu0 %v15858_v33  ;;  %10759 = vmatpush1.bf16.msra.mxu1 %v15861_v35  ;;  %v8117_v33 = vsel %vm8074_vm2, %v8088_v45, %v8116_v21  ;;  %v15920_v35 = vld [vmem:[%s20582_s1 + $0x1c00] ss:$16 sps:$4 sm:$0xff]  }
 0x390   : > { %10214 = vmatprep.subr.bf16.mxu0 %v15866_v34  ;;  %10760 = vmatprep.subr.bf16.mxu1 %v15869_v37  ;;  %v15928_v34 = vld [vmem:[%s20582_s1 + $0x1c24] ss:$16 sps:$4 sm:$0xff]   ;;  %v15931_v37 = vld [vmem:[%s20582_s1 + $0x1c2c] ss:$16 sps:$4 sm:$0xff]   ;;  %v8141_v38 = vsel %vm8074_vm2, %v8118_v22, %v8140_v49  ;;  %v15950_v22 = vld [vmem:[%s20582_s1 + $0x1ca0] ss:$16 sps:$4 sm:$0xff]  }
 0x391   : > { %10187 = vmatprep.mubr.bf16.mxu0 %v8180_v12  ;;  %10733 = vmatprep.mubr.bf16.mxu1 %v8180_v12  ;;  %v8089_v12 = vsel %vm8074_vm2, %v8087_v25, %v8088_v45  ;;  %v15944_v25 = vld [vmem:[%s20582_s1 + $0x1c80] ss:$16 sps:$4 sm:$0xff]  }
 0x393   : > { %10215 = vmatpush1.bf16.msra.mxu0 %v15864_v40  ;;  %10761 = vmatpush1.bf16.msra.mxu1 %v15867_v43  ;;  %v15929_v40 = vld [vmem:[%s20582_s1 + $0x1c28] ss:$16 sps:$4 sm:$0xff]  }
 0x394   : > { %10216 = vmatprep.subr.bf16.mxu0 %v15872_v46  ;;  %10762 = vmatprep.subr.bf16.mxu1 %v15875_v47  ;;  %v16228_v43 = vld [vmem:[%s16433_s30 + $0x118] ss:$44 sps:$4 sm:$0xff]  }
 0x395   : > { %v8138_v46 = vrot.slane %v16228_v43, 3  ;;  %v15934_v47 = vld [vmem:[%s20582_s1 + $0x1c44] ss:$16 sps:$4 sm:$0xff]   ;;  %v15981_v43 = vld [vmem:[%s20582_s1 + $0x1d2c] ss:$16 sps:$4 sm:$0xff]  }
 0x396   : > { %10188 = vmatmul.mubr.bf16.gmra.mrb[72].mxu0 %v8178_v44  ;;  %10734 = vmatmul.mubr.bf16.gmra.mrb[72].mxu1 %v8178_v44  ;;  %v15922_v44 = vld [vmem:[%s20582_s1 + $0x1c04] ss:$16 sps:$4 sm:$0xff]  }
 0x397   : > { %10217 = vmatpush1.bf16.msra.mxu0 %v15870_v52  ;;  %10763 = vmatpush1.bf16.msra.mxu1 %v15873_v1 }
 0x398   : > { %10218 = vmatprep.subr.bf16.mxu0 %v15878_v2  ;;  %10764 = vmatprep.subr.bf16.mxu1 %v15881_v41 }
 0x399   : > { %10228 = vmatprep.mubr.bf16.mxu0 %v8092_v42  ;;  %10774 = vmatprep.mubr.bf16.mxu1 %v8092_v42  ;;  %v15932_v42 = vld [vmem:[%s20582_s1 + $0x1c40] ss:$16 sps:$4 sm:$0xff]  }
 0x39b   : > { %10219 = vmatpush1.bf16.msra.mxu0 %v15876_v54  ;;  %10765 = vmatpush1.bf16.msra.mxu1 %v15879_v56  ;;  %v16229_v54 = vld [vmem:[%s16433_s30 + $0x174] ss:$44 sps:$4 sm:$0xff]  }
 0x39c   : > { %10220 = vmatprep.subr.bf16.mxu0 %v15884_v51  ;;  %10766 = vmatprep.subr.bf16.mxu1 %v15887_v16  ;;  %v8162_v56 = vrot.slane %v16229_v54, 3  ;;  %v15993_v54 = vld [vmem:[%s20582_s1 + $0x1d6c] ss:$16 sps:$4 sm:$0xff]  }
 0x39f   : > { %10221 = vmatpush1.bf16.msra.mxu0 %v15882_v58  ;;  %10767 = vmatpush1.bf16.msra.mxu1 %v15885_v59  ;;  %v15935_v59 = vld [vmem:[%s20582_s1 + $0x1c48] ss:$16 sps:$4 sm:$0xff]  }
 0x3a0   : > { %10222 = vmatprep.subr.bf16.mxu0 %v15890_v60  ;;  %10768 = vmatprep.subr.bf16.mxu1 %v15893_v61  ;;  %v7665_v60 = vld [vmem:[%s16433_s30 + $0x1c8] sm:$0xff] }
 0x3a1   : > { %v13358_v45 = vcombine.low %v7665_v60, %v7665_v60 }
 0x3a3   : > { %10223 = vmatpush1.bf16.msra.mxu0 %v15888_v62  ;;  %10769 = vmatpush1.bf16.msra.mxu1 %v15891_v3  ;;  %v8163_v3 = vsel %vm8074_vm2, %v8140_v49, %v8162_v56  ;;  %v15967_v49 = vld [vmem:[%s20582_s1 + $0x1ce8] ss:$16 sps:$4 sm:$0xff]  }
 0x3a4   : > { %10224 = vmatprep.subr.bf16.mxu0 %v15896_v6  ;;  %10770 = vmatprep.subr.bf16.mxu1 %v15899_v7  ;;  %v13359_v6 = vcombine.high %v7665_v60, %v7665_v60  ;;  %v15938_v7 = vld [vmem:[%s20582_s1 + $0x1c60] ss:$16 sps:$4 sm:$0xff]   ;;  %v15997_v60 = vld [vmem:[%s20582_s1 + $0x1d88] ss:$16 sps:$4 sm:$0xff]  }
 0x3a7   : > { %10225 = vmatpush1.bf16.msra.mxu0 %v15894_v8  ;;  %10771 = vmatpush1.bf16.msra.mxu1 %v15897_v9  ;;  %v15941_v8 = vld [vmem:[%s20582_s1 + $0x1c68] ss:$16 sps:$4 sm:$0xff]   ;;  %v16230_v9 = vld [vmem:[%s16433_s30 + $0x170] ss:$44 sps:$4 sm:$0xff]  }
 0x3a8   : > { %10226 = vmatprep.subr.bf16.mxu0 %v15902_v18  ;;  %10772 = vmatprep.subr.bf16.mxu1 %v15905_v10  ;;  %v8160_v17 = vrot.slane %v16230_v9, 3  ;;  %v15946_v18 = vld [vmem:[%s20582_s1 + $0x1c84] ss:$16 sps:$4 sm:$0xff]   ;;  %v15949_v10 = vld [vmem:[%s20582_s1 + $0x1c8c] ss:$16 sps:$4 sm:$0xff]  }
 0x3a9   : > { %v16010_v9 = vld [vmem:[%s20582_s1 + $0x1dc4] ss:$16 sps:$4 sm:$0xff]  }
 0x3ab   : > { %10227 = vmatpush1.bf16.msra.mxu0 %v15900_v14  ;;  %10773 = vmatpush1.bf16.msra.mxu1 %v15903_v5  ;;  %v8184_v14 = vrot.slane %v13359_v6, 3  ;;  %v8161_v5 = vsel %vm8074_vm2, %v8138_v46, %v8160_v17 }
 0x3ac   : > { %10287 = vmatprep.subr.bf16.mxu0 %v15910_v48  ;;  %10833 = vmatprep.subr.bf16.mxu1 %v15913_v28  ;;  %v15952_v48 = vld [vmem:[%s20582_s1 + $0x1ca4] ss:$16 sps:$4 sm:$0xff]   ;;  %v15955_v28 = vld [vmem:[%s20582_s1 + $0x1cac] ss:$16 sps:$4 sm:$0xff]  }
 0x3ad   : > { %v8185_v29 = vsel %vm8074_vm2, %v8162_v56, %v8184_v14  ;;  %v15988_v56 = vld [vmem:[%s20582_s1 + $0x1d60] ss:$16 sps:$4 sm:$0xff]  }
 0x3ae   : > { %10229 = vmatmul.mubr.bf16.vlgmr.msra.gmra.mrb[0].mxu0 %v8089_v12  ;;  %10775 = vmatmul.mubr.bf16.vlgmr.msra.gmra.mrb[0].mxu1 %v8089_v12  ;;  %v15953_v12 = vld [vmem:[%s20582_s1 + $0x1ca8] ss:$16 sps:$4 sm:$0xff]  }
 0x3af   : > { %10288 = vmatpush1.bf16.msra.mxu0 %v15908_v19  ;;  %10834 = vmatpush1.bf16.msra.mxu1 %v15911_v24  ;;  %v8182_v19 = vrot.slane %v13358_v45, 3  ;;  %v15960_v24 = vld [vmem:[%s20582_s1 + $0x1cc4] ss:$16 sps:$4 sm:$0xff]   ;;  %v16234_v45 = vld [vmem:[%s16433_s30 + $0xcc] ss:$44 sps:$4 sm:$0xff]  }
 0x3b0   : > { %10289 = vmatprep.subr.bf16.mxu0 %v15916_v4  ;;  %10835 = vmatprep.subr.bf16.mxu1 %v15919_v53  ;;  %v15963_v4 = vld [vmem:[%s20582_s1 + $0x1ccc] ss:$16 sps:$4 sm:$0xff]  }
 0x3b1   : > { %10238 = vmatprep.mubr.bf16.mxu0 %v8119_v20  ;;  %10784 = vmatprep.mubr.bf16.mxu1 %v8119_v20  ;;  %v8183_v53 = vsel %vm8074_vm2, %v8160_v17, %v8182_v19  ;;  %v15958_v20 = vld [vmem:[%s20582_s1 + $0x1cc0] ss:$16 sps:$4 sm:$0xff]   ;;  %v16013_v17 = vld [vmem:[%s20582_s1 + $0x1dcc] ss:$16 sps:$4 sm:$0xff]  }
 0x3b3   : > { %10290 = vmatpush1.bf16.msra.mxu0 %v15914_v26  ;;  %10836 = vmatpush1.bf16.msra.mxu1 %v15917_v27  ;;  %v15961_v26 = vld [vmem:[%s20582_s1 + $0x1cc8] ss:$16 sps:$4 sm:$0xff]  }
 0x3b4   : > { %10291 = vmatprep.subr.bf16.mxu0 %v15922_v44  ;;  %10837 = vmatprep.subr.bf16.mxu1 %v15925_v31  ;;  %v19616_v27 = vld [vmem:[%s16433_s30 + $0x18] sm:$0x88]  ;;  %v19625_v44 = vld [vmem:[%s16433_s30 + $0x44] sm:$0xff] }
 0x3b5   : > { %v13350_v31 = vcombine.high %v19616_v27, %v19625_v44 }
 0x3b6   : > { %10239 = vmatmul.mubr.bf16.gmra.mrb[4].mxu0 %v8117_v33  ;;  %10785 = vmatmul.mubr.bf16.gmra.mrb[4].mxu1 %v8117_v33  ;;  %v15972_v33 = vld [vmem:[%s20582_s1 + $0x1d04] ss:$16 sps:$4 sm:$0xff]  }
 0x3b7   : > { %10292 = vmatpush1.bf16.msra.mxu0 %v15920_v35  ;;  %10838 = vmatpush1.bf16.msra.mxu1 %v15923_v36  ;;  %v15975_v35 = vld [vmem:[%s20582_s1 + $0x1d0c] ss:$16 sps:$4 sm:$0xff]   ;;  %v8096_v36 = vrot.slane %v13350_v31, 3  ;;  %v16236_v31 = vld [vmem:[%s16433_s30 + $0x124] ss:$44 sps:$4 sm:$0xff]  }
 0x3b8   : > { %10293 = vmatprep.subr.bf16.mxu0 %v15928_v34  ;;  %10839 = vmatprep.subr.bf16.mxu1 %v15931_v37  ;;  %v19642_v34 = vld [vmem:[%s16433_s30 + $0x74] ss:$44 sps:$4 sm:$0xff]  }
 0x3b9   : > { %v7013_v15 = vpop.f32.mrb[60].mxu0  ;;  %v7559_v11 = vpop.f32.mrb[60].mxu1  ;;  %10248 = vmatprep.mubr.bf16.mxu0 %v8141_v38  ;;  %10794 = vmatprep.mubr.bf16.mxu1 %v8141_v38  ;;  %v8097_v37 = vrot.slane %v19642_v34, 3  ;;  %v15970_v38 = vld [vmem:[%s20582_s1 + $0x1d00] ss:$16 sps:$4 sm:$0xff]  }
 0x3ba   : > { %v19542_v52 = vadd.f32 %v7013_v15, %v19302_v57  ;;  %v19545_v1 = vadd.f32 %v7559_v11, %v19305_v55  ;;  %v7015_v2 = vpop.f32.mrb[61].mxu0  ;;  %v7561_v41 = vpop.f32.mrb[61].mxu1  ;;  %v8139_v55 = vsel %vm8074_vm2, %v8116_v21, %v8138_v46  ;;  %v15969_v21 = vld [vmem:[%s20582_s1 + $0x1cec] ss:$16 sps:$4 sm:$0xff]   ;;  %v15984_v15 = vld [vmem:[%s20582_s1 + $0x1d44] ss:$16 sps:$4 sm:$0xff]  }
 0x3bb   : > { %v19552_v51 = vadd.f32 %v7015_v2, %v19312_v63  ;;  %v19555_v16 = vadd.f32 %v7561_v41, %v19315_v0  ;;  %10294 = vmatpush1.bf16.msra.mxu0 %v15926_v39  ;;  %10840 = vmatpush1.bf16.msra.mxu1 %v15929_v40  ;;  %v7017_v57 = vpop.f32.mrb[62].mxu0  ;;  %v7563_v58 = vpop.f32.mrb[62].mxu1  ;;  %v15940_v63 = vld [vmem:[%s20582_s1 + $0x1c64] ss:$16 sps:$4 sm:$0xff]   ;;  %v15943_v0 = vld [vmem:[%s20582_s1 + $0x1c6c] ss:$16 sps:$4 sm:$0xff]   ;;  %v8098_v46 = vsel %vm8074_vm2, %v8096_v36, %v8097_v37 }
 0x3bc   : > { %v7018_v61 = vpop.f32.mrb[63].mxu0  ;;  %v7564_v62 = vpop.f32.mrb[63].mxu1  ;;  %10295 = vmatprep.subr.bf16.mxu0 %v15934_v47  ;;  %10841 = vmatprep.subr.bf16.mxu1 %v15937_v50  ;;  %v15973_v39 = vld [vmem:[%s20582_s1 + $0x1d08] ss:$16 sps:$4 sm:$0xff]   ;;  %v15978_v40 = vld [vmem:[%s20582_s1 + $0x1d24] ss:$16 sps:$4 sm:$0xff]  }
 0x3bd   : > { %v15976_v47 = vld [vmem:[%s20582_s1 + $0x1d20] ss:$16 sps:$4 sm:$0xff]   ;;  %v15979_v50 = vld [vmem:[%s20582_s1 + $0x1d28] ss:$16 sps:$4 sm:$0xff]   ;;  %v15987_v11 = vld [vmem:[%s20582_s1 + $0x1d4c] ss:$16 sps:$4 sm:$0xff]   ;;  %v13349_v61 = vcombine.low %v19616_v27, %v19625_v44 }
 0x3be   : > { %10249 = vmatmul.mubr.bf16.gmra.mrb[8].mxu0 %v8139_v55  ;;  %10795 = vmatmul.mubr.bf16.gmra.mrb[8].mxu1 %v8139_v55  ;;  %v15982_v2 = vld [vmem:[%s20582_s1 + $0x1d40] ss:$16 sps:$4 sm:$0xff]   ;;  %v15985_v41 = vld [vmem:[%s20582_s1 + $0x1d48] ss:$16 sps:$4 sm:$0xff]   ;;  %v15996_v58 = vld [vmem:[%s20582_s1 + $0x1d84] ss:$16 sps:$4 sm:$0xff]  }
 0x3bf   : > { %10296 = vmatpush1.bf16.msra.mxu0 %v15932_v42  ;;  %10842 = vmatpush1.bf16.msra.mxu1 %v15935_v59  ;;  %v15990_v42 = vld [vmem:[%s20582_s1 + $0x1d64] ss:$16 sps:$4 sm:$0xff]   ;;  %v15991_v57 = vld [vmem:[%s20582_s1 + $0x1d68] ss:$16 sps:$4 sm:$0xff]   ;;  %v15999_v55 = vld [vmem:[%s20582_s1 + $0x1d8c] ss:$16 sps:$4 sm:$0xff]  }
 0x3c0   : > { %10297 = vmatprep.subr.bf16.mxu0 %v15940_v63  ;;  %10843 = vmatprep.subr.bf16.mxu1 %v15943_v0  ;;  %v15994_v59 = vld [vmem:[%s20582_s1 + $0x1d80] ss:$16 sps:$4 sm:$0xff]   ;;  %v16002_v62 = vld [vmem:[%s20582_s1 + $0x1da4] ss:$16 sps:$4 sm:$0xff]   ;;  %v16005_v63 = vld [vmem:[%s20582_s1 + $0x1dac] ss:$16 sps:$4 sm:$0xff]  }
 0x3c1   : > { %10258 = vmatprep.mubr.bf16.mxu0 %v8163_v3  ;;  %10804 = vmatprep.mubr.bf16.mxu1 %v8163_v3  ;;  %v16000_v0 = vld [vmem:[%s20582_s1 + $0x1da0] ss:$16 sps:$4 sm:$0xff]   ;;  %v16003_v3 = vld [vmem:[%s20582_s1 + $0x1da8] ss:$16 sps:$4 sm:$0xff]   ;;  %v8093_v6 = vrot.slane %v13349_v61, 3 }
 0x3c2   : > { %v16235_v27 = vld [vmem:[%s16433_s30 + $0xc8] ss:$44 sps:$4 sm:$0xff]   ;;  %v16025_v44 = vld [vmem:[%s20582_s1 + $0x1e0c] ss:$16 sps:$4 sm:$0xff]  }
 0x3c3   : > { %10298 = vmatpush1.bf16.msra.mxu0 %v15938_v7  ;;  %10844 = vmatpush1.bf16.msra.mxu1 %v15941_v8  ;;  %v16233_v7 = vld [vmem:[%s16433_s30 + $0x70] ss:$44 sps:$4 sm:$0xff]   ;;  %v16028_v36 = vld [vmem:[%s20582_s1 + $0x1e24] ss:$16 sps:$4 sm:$0xff]  }
 0x3c4   : > { %10299 = vmatprep.subr.bf16.mxu0 %v15946_v18  ;;  %10845 = vmatprep.subr.bf16.mxu1 %v15949_v10  ;;  %v8094_v8 = vrot.slane %v16233_v7, 3  ;;  %v16031_v34 = vld [vmem:[%s20582_s1 + $0x1e2c] ss:$16 sps:$4 sm:$0xff]   ;;  %v16047_v7 = vld [vmem:[%s20582_s1 + $0x1e88] ss:$16 sps:$4 sm:$0xff]  }
 0x3c6   : > { %10259 = vmatmul.mubr.bf16.gmra.mrb[12].mxu0 %v8161_v5  ;;  %10805 = vmatmul.mubr.bf16.gmra.mrb[12].mxu1 %v8161_v5 }
 0x3c7   : > { %10300 = vmatpush1.bf16.msra.mxu0 %v15944_v25  ;;  %10846 = vmatpush1.bf16.msra.mxu1 %v15947_v13 }
 0x3c8   : > { %10301 = vmatprep.subr.bf16.mxu0 %v15952_v48  ;;  %10847 = vmatprep.subr.bf16.mxu1 %v15955_v28  ;;  %v8122_v48 = vrot.slane %v16234_v45, 3  ;;  %v16060_v45 = vld [vmem:[%s20582_s1 + $0x1ec4] ss:$16 sps:$4 sm:$0xff]  }
 0x3c9   : > { %10268 = vmatprep.mubr.bf16.mxu0 %v8185_v29  ;;  %10814 = vmatprep.mubr.bf16.mxu1 %v8185_v29 }
 0x3cb   : > { %10302 = vmatpush1.bf16.msra.mxu0 %v15950_v22  ;;  %10848 = vmatpush1.bf16.msra.mxu1 %v15953_v12  ;;  %v8095_v22 = vsel %vm8074_vm2, %v8093_v6, %v8094_v8  ;;  %v16044_v6 = vld [vmem:[%s20582_s1 + $0x1e80] ss:$16 sps:$4 sm:$0xff]  }
 0x3cc   : > { %10303 = vmatprep.subr.bf16.mxu0 %v15960_v24  ;;  %10849 = vmatprep.subr.bf16.mxu1 %v15963_v4 }
 0x3ce   : > { %10269 = vmatmul.mubr.bf16.gmra.mrb[16].mxu0 %v8183_v53  ;;  %10815 = vmatmul.mubr.bf16.gmra.mrb[16].mxu1 %v8183_v53  ;;  %v8123_v53 = vsel %vm8074_vm2, %v8097_v37, %v8122_v48 }
 0x3cf   : > { %10304 = vmatpush1.bf16.msra.mxu0 %v15958_v20  ;;  %10850 = vmatpush1.bf16.msra.mxu1 %v15961_v26  ;;  %v16014_v20 = vld [vmem:[%s20582_s1 + $0x1de0] ss:$16 sps:$4 sm:$0xff]   ;;  %v16017_v26 = vld [vmem:[%s20582_s1 + $0x1de8] ss:$16 sps:$4 sm:$0xff]  }
 0x3d0   : > { %10305 = vmatprep.subr.bf16.mxu0 %v15966_v30  ;;  %10851 = vmatprep.subr.bf16.mxu1 %v15969_v21  ;;  %v8120_v30 = vrot.slane %v16235_v27, 3  ;;  %v16022_v21 = vld [vmem:[%s20582_s1 + $0x1e04] ss:$16 sps:$4 sm:$0xff]  }
 0x3d1   : > { %10278 = vmatprep.mubr.bf16.mxu0 %v8184_v14  ;;  %10824 = vmatprep.mubr.bf16.mxu1 %v8184_v14 }
 0x3d3   : > { %10306 = vmatpush1.bf16.msra.mxu0 %v15964_v23  ;;  %10852 = vmatpush1.bf16.msra.mxu1 %v15967_v49  ;;  %v8144_v23 = vrot.slane %v16236_v31, 3  ;;  %v8121_v49 = vsel %vm8074_vm2, %v8094_v8, %v8120_v30  ;;  %v16073_v31 = vld [vmem:[%s20582_s1 + $0x1f08] ss:$16 sps:$4 sm:$0xff]  }
 0x3d4   : > { %10307 = vmatprep.subr.bf16.mxu0 %v15972_v33  ;;  %10853 = vmatprep.subr.bf16.mxu1 %v15975_v35  ;;  %v16020_v33 = vld [vmem:[%s20582_s1 + $0x1e00] ss:$16 sps:$4 sm:$0xff]   ;;  %v16023_v35 = vld [vmem:[%s20582_s1 + $0x1e08] ss:$16 sps:$4 sm:$0xff]  }
 0x3d5   : > { %v8145_v37 = vsel %vm8074_vm2, %v8122_v48, %v8144_v23  ;;  %v16063_v48 = vld [vmem:[%s20582_s1 + $0x1ecc] ss:$16 sps:$4 sm:$0xff]  }
 0x3d6   : > { %10279 = vmatmul.mubr.bf16.gmra.mrb[76].mxu0 %v8182_v19  ;;  %10825 = vmatmul.mubr.bf16.gmra.mrb[76].mxu1 %v8182_v19 }
 0x3d7   : > { %10308 = vmatpush1.bf16.msra.mxu0 %v15970_v38  ;;  %10854 = vmatpush1.bf16.msra.mxu1 %v15973_v39  ;;  %v16026_v38 = vld [vmem:[%s20582_s1 + $0x1e20] ss:$16 sps:$4 sm:$0xff]   ;;  %v16029_v39 = vld [vmem:[%s20582_s1 + $0x1e28] ss:$16 sps:$4 sm:$0xff]  }
 0x3d8   : > { %10309 = vmatprep.subr.bf16.mxu0 %v15978_v40  ;;  %10855 = vmatprep.subr.bf16.mxu1 %v15981_v43  ;;  %v16237_v40 = vld [vmem:[%s16433_s30 + $0x120] ss:$44 sps:$4 sm:$0xff]  }
 0x3d9   : > { %10319 = vmatprep.mubr.bf16.mxu0 %v8098_v46  ;;  %10865 = vmatprep.mubr.bf16.mxu1 %v8098_v46  ;;  %v8142_v43 = vrot.slane %v16237_v40, 3  ;;  %v16034_v46 = vld [vmem:[%s20582_s1 + $0x1e44] ss:$16 sps:$4 sm:$0xff]  }
 0x3da   : > { %v16090_v40 = vld [vmem:[%s20582_s1 + $0x1f64] ss:$16 sps:$4 sm:$0xff]  }
 0x3db   : > { %10310 = vmatpush1.bf16.msra.mxu0 %v15976_v47  ;;  %10856 = vmatpush1.bf16.msra.mxu1 %v15979_v50  ;;  %v16037_v47 = vld [vmem:[%s20582_s1 + $0x1e4c] ss:$16 sps:$4 sm:$0xff]  }
 0x3dc   : > { %10311 = vmatprep.subr.bf16.mxu0 %v15984_v15  ;;  %10857 = vmatprep.subr.bf16.mxu1 %v15987_v11  ;;  %v16238_v50 = vld [vmem:[%s16433_s30 + $0x17c] ss:$44 sps:$4 sm:$0xff]   ;;  %v8143_v11 = vsel %vm8074_vm2, %v8120_v30, %v8142_v43 }
 0x3dd   : > { %v8166_v15 = vrot.slane %v16238_v50, 3  ;;  %v19882_v30 = vld [vmem:[%s16433_s30 + $0x7c] ss:$44 sps:$4 sm:$0xff]   ;;  %v16096_v50 = vld [vmem:[%s20582_s1 + $0x1f84] ss:$16 sps:$4 sm:$0xff]  }
 0x3df   : > { %10312 = vmatpush1.bf16.msra.mxu0 %v15982_v2  ;;  %10858 = vmatpush1.bf16.msra.mxu1 %v15985_v41  ;;  %v16032_v2 = vld [vmem:[%s20582_s1 + $0x1e40] ss:$16 sps:$4 sm:$0xff]   ;;  %v16035_v41 = vld [vmem:[%s20582_s1 + $0x1e48] ss:$16 sps:$4 sm:$0xff]  }
 0x3e0   : > { %10313 = vmatprep.subr.bf16.mxu0 %v15990_v42  ;;  %10859 = vmatprep.subr.bf16.mxu1 %v15993_v54  ;;  %v7666_v42 = vld [vmem:[%s16433_s30 + $0x1d0] sm:$0xff] }
 0x3e1   : > { %v16040_v54 = vld [vmem:[%s20582_s1 + $0x1e64] ss:$16 sps:$4 sm:$0xff]   ;;  %v13360_v8 = vcombine.low %v7666_v42, %v7666_v42 }
 0x3e3   : > { %10314 = vmatpush1.bf16.msra.mxu0 %v15988_v56  ;;  %10860 = vmatpush1.bf16.msra.mxu1 %v15991_v57  ;;  %v16043_v56 = vld [vmem:[%s20582_s1 + $0x1e6c] ss:$16 sps:$4 sm:$0xff]   ;;  %v8167_v57 = vsel %vm8074_vm2, %v8144_v23, %v8166_v15  ;;  %v16078_v23 = vld [vmem:[%s20582_s1 + $0x1f24] ss:$16 sps:$4 sm:$0xff]  }
 0x3e4   : > { %10315 = vmatprep.subr.bf16.mxu0 %v15996_v58  ;;  %10861 = vmatprep.subr.bf16.mxu1 %v15999_v55  ;;  %v13361_v58 = vcombine.high %v7666_v42, %v7666_v42  ;;  %v16038_v55 = vld [vmem:[%s20582_s1 + $0x1e60] ss:$16 sps:$4 sm:$0xff]   ;;  %v16102_v42 = vld [vmem:[%s20582_s1 + $0x1fa4] ss:$16 sps:$4 sm:$0xff]  }
 0x3e7   : > { %10316 = vmatpush1.bf16.msra.mxu0 %v15994_v59  ;;  %10862 = vmatpush1.bf16.msra.mxu1 %v15997_v60  ;;  %v16041_v59 = vld [vmem:[%s20582_s1 + $0x1e68] ss:$16 sps:$4 sm:$0xff]  }
 0x3e8   : > { %10317 = vmatprep.subr.bf16.mxu0 %v16002_v62  ;;  %10863 = vmatprep.subr.bf16.mxu1 %v16005_v63  ;;  %v16239_v60 = vld [vmem:[%s16433_s30 + $0x178] ss:$44 sps:$4 sm:$0xff]   ;;  %v16049_v63 = vld [vmem:[%s20582_s1 + $0x1e8c] ss:$16 sps:$4 sm:$0xff]  }
 0x3e9   : > { %v7104_v18 = vpop.f32.mrb[64].mxu0  ;;  %v7650_v10 = vpop.f32.mrb[64].mxu1  ;;  %v8164_v61 = vrot.slane %v16239_v60, 3  ;;  %v16046_v62 = vld [vmem:[%s20582_s1 + $0x1e84] ss:$16 sps:$4 sm:$0xff]  }
 0x3ea   : > { %v19724_v14 = vadd.f32 %v7104_v18, %v19542_v52  ;;  %v19727_v5 = vadd.f32 %v7650_v10, %v19545_v1  ;;  %v7106_v25 = vpop.f32.mrb[65].mxu0  ;;  %v7652_v13 = vpop.f32.mrb[65].mxu1  ;;  %v16008_v52 = vld [vmem:[%s20582_s1 + $0x1dc0] ss:$16 sps:$4 sm:$0xff]   ;;  %v16011_v1 = vld [vmem:[%s20582_s1 + $0x1dc8] ss:$16 sps:$4 sm:$0xff]  }
 0x3eb   : > { %v19731_v28 = vadd.f32 %v7106_v25, %v19552_v51  ;;  %v19734_v29 = vadd.f32 %v7652_v13, %v19555_v16  ;;  %10318 = vmatpush1.bf16.msra.mxu0 %v16000_v0  ;;  %10864 = vmatpush1.bf16.msra.mxu1 %v16003_v3  ;;  %v7108_v12 = vpop.f32.mrb[66].mxu0  ;;  %v7654_v19 = vpop.f32.mrb[66].mxu1  ;;  %v16016_v51 = vld [vmem:[%s20582_s1 + $0x1de4] ss:$16 sps:$4 sm:$0xff]   ;;  %v16019_v16 = vld [vmem:[%s20582_s1 + $0x1dec] ss:$16 sps:$4 sm:$0xff]   ;;  %v8165_v3 = vsel %vm8074_vm2, %v8142_v43, %v8164_v61 }
 0x3ec   : > { %10378 = vmatprep.subr.bf16.mxu0 %v16010_v9  ;;  %10924 = vmatprep.subr.bf16.mxu1 %v16013_v17  ;;  %v7109_v24 = vpop.f32.mrb[67].mxu0  ;;  %v7655_v4 = vpop.f32.mrb[67].mxu1  ;;  %v8188_v0 = vrot.slane %v13361_v58, 3  ;;  %v16052_v9 = vld [vmem:[%s20582_s1 + $0x1ea4] ss:$16 sps:$4 sm:$0xff]   ;;  %v8186_v13 = vrot.slane %v13360_v8, 3 }
 0x3ed   : > { %20585 = vst [vmem:[#allocation2_spill] sm:$0xff] %v19731_v28  ;;  %20586 = vst [vmem:[#allocation3_spill] sm:$0xff] %v19734_v29  ;;  %v16055_v17 = vld [vmem:[%s20582_s1 + $0x1eac] ss:$16 sps:$4 sm:$0xff]   ;;  %v16050_v10 = vld [vmem:[%s20582_s1 + $0x1ea0] ss:$16 sps:$4 sm:$0xff]  }
 0x3ee   : > { %10320 = vmatmul.mubr.bf16.vlgmr.msra.gmra.mrb[0].mxu0 %v8095_v22  ;;  %10866 = vmatmul.mubr.bf16.vlgmr.msra.gmra.mrb[0].mxu1 %v8095_v22  ;;  %v8189_v18 = vsel %vm8074_vm2, %v8166_v15, %v8188_v0  ;;  %v16053_v25 = vld [vmem:[%s20582_s1 + $0x1ea8] ss:$16 sps:$4 sm:$0xff]   ;;  %v8187_v22 = vsel %vm8074_vm2, %v8164_v61, %v8186_v13  ;;  %v19856_v12 = vld [vmem:[%s16433_s30 + $0x20] sm:$0x88]  ;;  %v16093_v43 = vld [vmem:[%s20582_s1 + $0x1f6c] ss:$16 sps:$4 sm:$0xff]  }
 0x3ef   : > { %10379 = vmatpush1.bf16.msra.mxu0 %v16008_v52  ;;  %10925 = vmatpush1.bf16.msra.mxu1 %v16011_v1  ;;  %v16058_v52 = vld [vmem:[%s20582_s1 + $0x1ec0] ss:$16 sps:$4 sm:$0xff]   ;;  %v16061_v1 = vld [vmem:[%s20582_s1 + $0x1ec8] ss:$16 sps:$4 sm:$0xff]   ;;  %v16066_v19 = vld [vmem:[%s20582_s1 + $0x1ee4] ss:$16 sps:$4 sm:$0xff]  }
 0x3f0   : > { %10380 = vmatprep.subr.bf16.mxu0 %v16016_v51  ;;  %10926 = vmatprep.subr.bf16.mxu1 %v16019_v16  ;;  %v16069_v51 = vld [vmem:[%s20582_s1 + $0x1eec] ss:$16 sps:$4 sm:$0xff]   ;;  %v16064_v4 = vld [vmem:[%s20582_s1 + $0x1ee0] ss:$16 sps:$4 sm:$0xff]   ;;  %v16110_v60 = vld [vmem:[%s20582_s1 + $0x1fc4] ss:$16 sps:$4 sm:$0xff]  }
 0x3f1   : > { %10329 = vmatprep.mubr.bf16.mxu0 %v8123_v53  ;;  %10875 = vmatprep.mubr.bf16.mxu1 %v8123_v53  ;;  %v19865_v16 = vld [vmem:[%s16433_s30 + $0x4c] sm:$0xff]  ;;  %v16067_v53 = vld [vmem:[%s20582_s1 + $0x1ee8] ss:$16 sps:$4 sm:$0xff]  }
 0x3f2   : > { %v13352_v24 = vcombine.high %v19856_v12, %v19865_v16  ;;  %v16099_v15 = vld [vmem:[%s20582_s1 + $0x1f8c] ss:$16 sps:$4 sm:$0xff]  }
 0x3f3   : > { %10381 = vmatpush1.bf16.msra.mxu0 %v16014_v20  ;;  %10927 = vmatpush1.bf16.msra.mxu1 %v16017_v26  ;;  %v16072_v20 = vld [vmem:[%s20582_s1 + $0x1f04] ss:$16 sps:$4 sm:$0xff]   ;;  %v16075_v26 = vld [vmem:[%s20582_s1 + $0x1f0c] ss:$16 sps:$4 sm:$0xff]  }
 0x3f4   : > { %10382 = vmatprep.subr.bf16.mxu0 %v16022_v21  ;;  %10928 = vmatprep.subr.bf16.mxu1 %v16025_v44  ;;  %v8102_v27 = vrot.slane %v13352_v24, 3  ;;  %v8103_v21 = vrot.slane %v19882_v30, 3  ;;  %v16070_v44 = vld [vmem:[%s20582_s1 + $0x1f00] ss:$16 sps:$4 sm:$0xff]   ;;  %v16113_v61 = vld [vmem:[%s20582_s1 + $0x1fcc] ss:$16 sps:$4 sm:$0xff]  }
 0x3f5   : > { %v16245_v24 = vld [vmem:[%s16433_s30 + $0x12c] ss:$44 sps:$4 sm:$0xff]   ;;  %v16128_v30 = vld [vmem:[%s20582_s1 + $0x2024] ss:$16 sps:$4 sm:$0xff]  }
 0x3f6   : > { %10330 = vmatmul.mubr.bf16.gmra.mrb[4].mxu0 %v8121_v49  ;;  %10876 = vmatmul.mubr.bf16.gmra.mrb[4].mxu1 %v8121_v49  ;;  %v16081_v49 = vld [vmem:[%s20582_s1 + $0x1f2c] ss:$16 sps:$4 sm:$0xff]  }
 0x3f7   : > { %10383 = vmatpush1.bf16.msra.mxu0 %v16020_v33  ;;  %10929 = vmatpush1.bf16.msra.mxu1 %v16023_v35  ;;  %v8104_v33 = vsel %vm8074_vm2, %v8102_v27, %v8103_v21  ;;  %v16076_v35 = vld [vmem:[%s20582_s1 + $0x1f20] ss:$16 sps:$4 sm:$0xff]  }
 0x3f8   : > { %10384 = vmatprep.subr.bf16.mxu0 %v16028_v36  ;;  %10930 = vmatprep.subr.bf16.mxu1 %v16031_v34  ;;  %v16079_v36 = vld [vmem:[%s20582_s1 + $0x1f28] ss:$16 sps:$4 sm:$0xff]   ;;  %v16084_v34 = vld [vmem:[%s20582_s1 + $0x1f44] ss:$16 sps:$4 sm:$0xff]  }
 0x3f9   : > { %10339 = vmatprep.mubr.bf16.mxu0 %v8145_v37  ;;  %10885 = vmatprep.mubr.bf16.mxu1 %v8145_v37  ;;  %v16087_v37 = vld [vmem:[%s20582_s1 + $0x1f4c] ss:$16 sps:$4 sm:$0xff]  }
 0x3fb   : > { %10385 = vmatpush1.bf16.msra.mxu0 %v16026_v38  ;;  %10931 = vmatpush1.bf16.msra.mxu1 %v16029_v39  ;;  %v16082_v38 = vld [vmem:[%s20582_s1 + $0x1f40] ss:$16 sps:$4 sm:$0xff]   ;;  %v16085_v39 = vld [vmem:[%s20582_s1 + $0x1f48] ss:$16 sps:$4 sm:$0xff]  }
 0x3fc   : > { %10386 = vmatprep.subr.bf16.mxu0 %v16034_v46  ;;  %10932 = vmatprep.subr.bf16.mxu1 %v16037_v47  ;;  %v16088_v46 = vld [vmem:[%s20582_s1 + $0x1f60] ss:$16 sps:$4 sm:$0xff]   ;;  %v16091_v47 = vld [vmem:[%s20582_s1 + $0x1f68] ss:$16 sps:$4 sm:$0xff]  }
 0x3fe   : > { %10340 = vmatmul.mubr.bf16.gmra.mrb[8].mxu0 %v8143_v11  ;;  %10886 = vmatmul.mubr.bf16.gmra.mrb[8].mxu1 %v8143_v11  ;;  %v16094_v11 = vld [vmem:[%s20582_s1 + $0x1f80] ss:$16 sps:$4 sm:$0xff]  }
 0x3ff   : > { %10387 = vmatpush1.bf16.msra.mxu0 %v16032_v2  ;;  %10933 = vmatpush1.bf16.msra.mxu1 %v16035_v41  ;;  %v16097_v2 = vld [vmem:[%s20582_s1 + $0x1f88] ss:$16 sps:$4 sm:$0xff]   ;;  %v13351_v41 = vcombine.low %v19856_v12, %v19865_v16  ;;  %v16244_v12 = vld [vmem:[%s16433_s30 + $0xd0] ss:$44 sps:$4 sm:$0xff]  }
 0x400   : > { %10388 = vmatprep.subr.bf16.mxu0 %v16040_v54  ;;  %10934 = vmatprep.subr.bf16.mxu1 %v16043_v56  ;;  %v16105_v54 = vld [vmem:[%s20582_s1 + $0x1fac] ss:$16 sps:$4 sm:$0xff]   ;;  %v16100_v56 = vld [vmem:[%s20582_s1 + $0x1fa0] ss:$16 sps:$4 sm:$0xff]  }
 0x401   : > { %10349 = vmatprep.mubr.bf16.mxu0 %v8167_v57  ;;  %10895 = vmatprep.mubr.bf16.mxu1 %v8167_v57  ;;  %v16103_v57 = vld [vmem:[%s20582_s1 + $0x1fa8] ss:$16 sps:$4 sm:$0xff]   ;;  %v8099_v58 = vrot.slane %v13351_v41, 3  ;;  %v16125_v16 = vld [vmem:[%s20582_s1 + $0x200c] ss:$16 sps:$4 sm:$0xff]  }
 0x402   : > { %v16140_v41 = vld [vmem:[%s20582_s1 + $0x2060] ss:$16 sps:$4 sm:$0xff]  }
 0x403   : > { %10389 = vmatpush1.bf16.msra.mxu0 %v16038_v55  ;;  %10935 = vmatpush1.bf16.msra.mxu1 %v16041_v59  ;;  %v16242_v55 = vld [vmem:[%s16433_s30 + $0x78] ss:$44 sps:$4 sm:$0xff]  }
 0x404   : > { %10390 = vmatprep.subr.bf16.mxu0 %v16046_v62  ;;  %10936 = vmatprep.subr.bf16.mxu1 %v16049_v63  ;;  %v8100_v59 = vrot.slane %v16242_v55, 3  ;;  %v16243_v62 = vld [vmem:[%s16433_s30 + $0xd4] ss:$44 sps:$4 sm:$0xff]  }
 0x405   : > { %v8126_v63 = vrot.slane %v16243_v62, 3 }
 0x406   : > { %10350 = vmatmul.mubr.bf16.gmra.mrb[12].mxu0 %v8165_v3  ;;  %10896 = vmatmul.mubr.bf16.gmra.mrb[12].mxu1 %v8165_v3  ;;  %v8101_v8 = vsel %vm8074_vm2, %v8099_v58, %v8100_v59 }
 0x407   : > { %10391 = vmatpush1.bf16.msra.mxu0 %v16044_v6  ;;  %10937 = vmatpush1.bf16.msra.mxu1 %v16047_v7 }
 0x408   : > { %10392 = vmatprep.subr.bf16.mxu0 %v16052_v9  ;;  %10938 = vmatprep.subr.bf16.mxu1 %v16055_v17  ;;  %v16108_v9 = vld [vmem:[%s20582_s1 + $0x1fc0] ss:$16 sps:$4 sm:$0xff]   ;;  %v16111_v17 = vld [vmem:[%s20582_s1 + $0x1fc8] ss:$16 sps:$4 sm:$0xff]  }
 0x409   : > { %10359 = vmatprep.mubr.bf16.mxu0 %v8189_v18  ;;  %10905 = vmatprep.mubr.bf16.mxu1 %v8189_v18 }
 0x40b   : > { %10393 = vmatpush1.bf16.msra.mxu0 %v16050_v10  ;;  %10939 = vmatpush1.bf16.msra.mxu1 %v16053_v25  ;;  %v16116_v25 = vld [vmem:[%s20582_s1 + $0x1fe4] ss:$16 sps:$4 sm:$0xff]  }
 0x40c   : > { %10394 = vmatprep.subr.bf16.mxu0 %v16060_v45  ;;  %10940 = vmatprep.subr.bf16.mxu1 %v16063_v48  ;;  %v8127_v48 = vsel %vm8074_vm2, %v8103_v21, %v8126_v63  ;;  %v16131_v21 = vld [vmem:[%s20582_s1 + $0x202c] ss:$16 sps:$4 sm:$0xff]  }
 0x40e   : > { %10360 = vmatmul.mubr.bf16.gmra.mrb[16].mxu0 %v8187_v22  ;;  %10906 = vmatmul.mubr.bf16.gmra.mrb[16].mxu1 %v8187_v22  ;;  %v16119_v22 = vld [vmem:[%s20582_s1 + $0x1fec] ss:$16 sps:$4 sm:$0xff]  }
 0x40f   : > { %10395 = vmatpush1.bf16.msra.mxu0 %v16058_v52  ;;  %10941 = vmatpush1.bf16.msra.mxu1 %v16061_v1  ;;  %v16114_v52 = vld [vmem:[%s20582_s1 + $0x1fe0] ss:$16 sps:$4 sm:$0xff]   ;;  %v16117_v1 = vld [vmem:[%s20582_s1 + $0x1fe8] ss:$16 sps:$4 sm:$0xff]  }
 0x410   : > { %10396 = vmatprep.subr.bf16.mxu0 %v16066_v19  ;;  %10942 = vmatprep.subr.bf16.mxu1 %v16069_v51  ;;  %v8124_v19 = vrot.slane %v16244_v12, 3  ;;  %v16122_v51 = vld [vmem:[%s20582_s1 + $0x2004] ss:$16 sps:$4 sm:$0xff]  }
 0x411   : > { %10369 = vmatprep.mubr.bf16.mxu0 %v8188_v0  ;;  %10915 = vmatprep.mubr.bf16.mxu1 %v8188_v0 }
 0x413   : > { %10397 = vmatpush1.bf16.msra.mxu0 %v16064_v4  ;;  %10943 = vmatpush1.bf16.msra.mxu1 %v16067_v53  ;;  %v8148_v4 = vrot.slane %v16245_v24, 3  ;;  %v8125_v53 = vsel %vm8074_vm2, %v8100_v59, %v8124_v19  ;;  %v16146_v59 = vld [vmem:[%s20582_s1 + $0x2080] ss:$16 sps:$4 sm:$0xff]  }
 0x414   : > { %10398 = vmatprep.subr.bf16.mxu0 %v16072_v20  ;;  %10944 = vmatprep.subr.bf16.mxu1 %v16075_v26  ;;  %v16120_v20 = vld [vmem:[%s20582_s1 + $0x2000] ss:$16 sps:$4 sm:$0xff]   ;;  %v16123_v26 = vld [vmem:[%s20582_s1 + $0x2008] ss:$16 sps:$4 sm:$0xff]  }
 0x415   : > { %v8149_v27 = vsel %vm8074_vm2, %v8126_v63, %v8148_v4  ;;  %v7662_v63 = vld [vmem:[%s16433_s30 + $0x28] sm:$0x8] }
 0x416   : > { %10370 = vmatmul.mubr.bf16.gmra.mrb[80].mxu0 %v8186_v13  ;;  %10916 = vmatmul.mubr.bf16.gmra.mrb[80].mxu1 %v8186_v13 }
 0x417   : > { %10399 = vmatpush1.bf16.msra.mxu0 %v16070_v44  ;;  %10945 = vmatpush1.bf16.msra.mxu1 %v16073_v31  ;;  %v16246_v44 = vld [vmem:[%s16433_s30 + $0x128] ss:$44 sps:$4 sm:$0xff]  }
 0x418   : > { %10400 = vmatprep.subr.bf16.mxu0 %v16078_v23  ;;  %10946 = vmatprep.subr.bf16.mxu1 %v16081_v49  ;;  %v8146_v31 = vrot.slane %v16246_v44, 3  ;;  %v16126_v23 = vld [vmem:[%s20582_s1 + $0x2020] ss:$16 sps:$4 sm:$0xff]   ;;  %v16129_v49 = vld [vmem:[%s20582_s1 + $0x2028] ss:$16 sps:$4 sm:$0xff]  }
 0x419   : > { %10410 = vmatprep.mubr.bf16.mxu0 %v8104_v33  ;;  %10956 = vmatprep.mubr.bf16.mxu1 %v8104_v33  ;;  %v16247_v33 = vld [vmem:[%s16433_s30 + $0x184] ss:$44 sps:$4 sm:$0xff]   ;;  %v16153_v44 = vld [vmem:[%s16433_s30 + $0x1e0] ss:$0 sps:$4 sm:$0xff]  }
 0x41b   : > { %10401 = vmatpush1.bf16.msra.mxu0 %v16076_v35  ;;  %10947 = vmatpush1.bf16.msra.mxu1 %v16079_v36  ;;  %v8170_v35 = vrot.slane %v16247_v33, 3  ;;  %v16134_v36 = vld [vmem:[%s20582_s1 + $0x2044] ss:$16 sps:$4 sm:$0xff]  }
 0x41c   : > { %10402 = vmatprep.subr.bf16.mxu0 %v16084_v34  ;;  %10948 = vmatprep.subr.bf16.mxu1 %v16087_v37  ;;  %v16137_v34 = vld [vmem:[%s20582_s1 + $0x204c] ss:$16 sps:$4 sm:$0xff]  }
 0x41d   : > { %v7667_v37 = vld [vmem:[%s16433_s30 + $0x1d8] sm:$0xff] }
 0x41e   : > { %v13362_v58 = vcombine.low %v7667_v37, %v7667_v37 }
 0x41f   : > { %10403 = vmatpush1.bf16.msra.mxu0 %v16082_v38  ;;  %10949 = vmatpush1.bf16.msra.mxu1 %v16085_v39  ;;  %v8147_v38 = vsel %vm8074_vm2, %v8124_v19, %v8146_v31  ;;  %v8171_v39 = vsel %vm8074_vm2, %v8148_v4, %v8170_v35 }
 0x420   : > { %10404 = vmatprep.subr.bf16.mxu0 %v16090_v40  ;;  %10950 = vmatprep.subr.bf16.mxu1 %v16093_v43  ;;  %v16132_v40 = vld [vmem:[%s20582_s1 + $0x2040] ss:$16 sps:$4 sm:$0xff]   ;;  %v16135_v43 = vld [vmem:[%s20582_s1 + $0x2048] ss:$16 sps:$4 sm:$0xff]  }
 0x423   : > { %10405 = vmatpush1.bf16.msra.mxu0 %v16088_v46  ;;  %10951 = vmatpush1.bf16.msra.mxu1 %v16091_v47  ;;  %v13363_v46 = vcombine.high %v7667_v37, %v7667_v37  ;;  %v16142_v47 = vld [vmem:[%s20582_s1 + $0x2064] ss:$16 sps:$4 sm:$0xff]  }
 0x424   : > { %10406 = vmatprep.subr.bf16.mxu0 %v16096_v50  ;;  %10952 = vmatprep.subr.bf16.mxu1 %v16099_v15  ;;  %v16145_v50 = vld [vmem:[%s20582_s1 + $0x206c] ss:$16 sps:$4 sm:$0xff]  }
 0x425   : > { %v16248_v15 = vld [vmem:[%s16433_s30 + $0x180] ss:$44 sps:$4 sm:$0xff]  }
 0x427   : > { %10407 = vmatpush1.bf16.msra.mxu0 %v16094_v11  ;;  %10953 = vmatpush1.bf16.msra.mxu1 %v16097_v2  ;;  %v8168_v11 = vrot.slane %v16248_v15, 3  ;;  %v8192_v2 = vrot.slane %v13363_v46, 3 }
 0x428   : > { %10408 = vmatprep.subr.bf16.mxu0 %v16102_v42  ;;  %10954 = vmatprep.subr.bf16.mxu1 %v16105_v54  ;;  %v16143_v42 = vld [vmem:[%s20582_s1 + $0x2068] ss:$16 sps:$4 sm:$0xff]   ;;  %v16148_v54 = vld [vmem:[%s20582_s1 + $0x2084] ss:$16 sps:$4 sm:$0xff]  }
 0x429   : > { %v19964_v0 = vpop.f32.mrb[68].mxu0  ;;  %v19966_v3 = vpop.f32.mrb[68].mxu1  ;;  %v8193_v55 = vsel %vm8074_vm2, %v8170_v35, %v8192_v2 }
 0x42a   : > { %v19968_v6 = vpop.f32.mrb[69].mxu0  ;;  %v19970_v7 = vpop.f32.mrb[69].mxu1 }
 0x42b   : > { %10409 = vmatpush1.bf16.msra.mxu0 %v16100_v56  ;;  %10955 = vmatpush1.bf16.msra.mxu1 %v16103_v57  ;;  %v10102_v18 = vpop.f32.mrb[70].mxu0  ;;  %v10648_v10 = vpop.f32.mrb[70].mxu1  ;;  %v16151_v56 = vld [vmem:[%s20582_s1 + $0x208c] ss:$16 sps:$4 sm:$0xff]   ;;  %v8169_v57 = vsel %vm8074_vm2, %v8146_v31, %v8168_v11 }
 0x42c   : > { %10469 = vmatprep.subr.bf16.mxu0 %v16110_v60  ;;  %11015 = vmatprep.subr.bf16.mxu1 %v16113_v61  ;;  %v10103_v13 = vpop.f32.mrb[71].mxu0  ;;  %v10649_v45 = vpop.f32.mrb[71].mxu1  ;;  %v16149_v60 = vld [vmem:[%s20582_s1 + $0x2088] ss:$16 sps:$4 sm:$0xff]   ;;  %v8190_v61 = vrot.slane %v13362_v58, 3 }
 0x42d   : > { %v16250_v18 = vld [vmem:[%s16433_s30 + $0x80] ss:$44 sps:$4 sm:$0xff]   ;;  %v16251_v13 = vld [vmem:[%s16433_s30 + $0xd8] ss:$44 sps:$4 sm:$0xff]  }
 0x42e   : > { %10411 = vmatmul.mubr.bf16.vlgmr.msra.gmra.mrb[0].mxu0 %v8101_v8  ;;  %10957 = vmatmul.mubr.bf16.vlgmr.msra.gmra.mrb[0].mxu1 %v8101_v8  ;;  %v8191_v62 = vsel %vm8074_vm2, %v8168_v11, %v8190_v61  ;;  %v16249_v8 = vld [vmem:[%s16433_s30 + $0x54] sm:$0xf]  ;;  %v8106_v10 = vrot.slane %v16250_v18, 3  ;;  %v8128_v45 = vrot.slane %v16251_v13, 3 }
 0x42f   : > { %10470 = vmatpush1.bf16.msra.mxu0 %v16108_v9  ;;  %11016 = vmatpush1.bf16.msra.mxu1 %v16111_v17  ;;  %v13353_v9 = vcombine.low %v7662_v63, %v16249_v8 }
 0x430   : > { %10420 = vmatprep.mubr.bf16.mxu0 %v8127_v48  ;;  %10471 = vmatprep.subr.bf16.mxu0 %v16116_v25 }
 0x431   : > { %10966 = vmatprep.mubr.bf16.mxu1 %v8127_v48  ;;  %11017 = vmatprep.subr.bf16.mxu1 %v16119_v22  ;;  %v8105_v17 = vrot.slane %v13353_v9, 3  ;;  %v8129_v48 = vsel %vm8074_vm2, %v8106_v10, %v8128_v45  ;;  %v16252_v22 = vld [vmem:[%s16433_s30 + $0x130] ss:$44 sps:$4 sm:$0xff]  }
 0x433   : > { %10472 = vmatpush1.bf16.msra.mxu0 %v16114_v52  ;;  %11018 = vmatpush1.bf16.msra.mxu1 %v16117_v1  ;;  %v8107_v25 = vsel %vm8074_vm2, %v8105_v17, %v8106_v10  ;;  %v8150_v52 = vrot.slane %v16252_v22, 3 }
 0x434   : > { %10473 = vmatprep.subr.bf16.mxu0 %v16122_v51  ;;  %11019 = vmatprep.subr.bf16.mxu1 %v16125_v16 }
 0x436   : > { %10421 = vmatmul.mubr.bf16.gmra.mrb[4].mxu0 %v8125_v53  ;;  %10967 = vmatmul.mubr.bf16.gmra.mrb[4].mxu1 %v8125_v53 }
 0x437   : > { %10430 = vmatprep.mubr.bf16.mxu0 %v8149_v27  ;;  %10474 = vmatpush1.bf16.msra.mxu0 %v16120_v20  ;;  %v8151_v20 = vsel %vm8074_vm2, %v8128_v45, %v8150_v52 }
 0x438   : > { %10976 = vmatprep.mubr.bf16.mxu1 %v8149_v27  ;;  %11020 = vmatpush1.bf16.msra.mxu1 %v16123_v26 }
 0x439   : > { %10475 = vmatprep.subr.bf16.mxu0 %v16128_v30  ;;  %11021 = vmatprep.subr.bf16.mxu1 %v16131_v21 }
 0x43b   : > { %10476 = vmatpush1.bf16.msra.mxu0 %v16126_v23 }
 0x43c   : > { %11022 = vmatpush1.bf16.msra.mxu1 %v16129_v49  ;;  %10477 = vmatprep.subr.bf16.mxu0 %v16134_v36 }
 0x43d   : > { %11023 = vmatprep.subr.bf16.mxu1 %v16137_v34 }
 0x43e   : > { %10431 = vmatmul.mubr.bf16.gmra.mrb[8].mxu0 %v8147_v38  ;;  %10977 = vmatmul.mubr.bf16.gmra.mrb[8].mxu1 %v8147_v38 }
 0x43f   : > { %10440 = vmatprep.mubr.bf16.mxu0 %v8171_v39  ;;  %10986 = vmatprep.mubr.bf16.mxu1 %v8171_v39 }
 0x440   : > { %10478 = vmatpush1.bf16.msra.mxu0 %v16132_v40  ;;  %11024 = vmatpush1.bf16.msra.mxu1 %v16135_v43 }
 0x441   : > { %10479 = vmatprep.subr.bf16.mxu0 %v16142_v47  ;;  %11025 = vmatprep.subr.bf16.mxu1 %v16145_v50 }
 0x444   : > { %10480 = vmatpush1.bf16.msra.mxu0 %v16140_v41  ;;  %11026 = vmatpush1.bf16.msra.mxu1 %v16143_v42 }
 0x445   : > { %10481 = vmatprep.subr.bf16.mxu0 %v16148_v54  ;;  %11027 = vmatprep.subr.bf16.mxu1 %v16151_v56 }
 0x446   : > { %10441 = vmatmul.mubr.bf16.gmra.mrb[12].mxu0 %v8169_v57  ;;  %10987 = vmatmul.mubr.bf16.gmra.mrb[12].mxu1 %v8169_v57 }
 0x447   : > { %10450 = vmatprep.mubr.bf16.mxu0 %v8193_v55  ;;  %10996 = vmatprep.mubr.bf16.mxu1 %v8193_v55  ;;  %v11152_v55 = vlaneseq }
 0x448   : > { %10482 = vmatpush1.bf16.msra.mxu0 %v16146_v59  ;;  %11028 = vmatpush1.bf16.msra.mxu1 %v16149_v60 }
 0x449   : > { %v11153_v59 = vshrl.u32 %v11152_v55, 7 }
 0x44b   : > { %v11154_v17 = vsub.s32 0, %v11153_v59  ;;  %v11162_v18 = vsub.s32 2, %v11153_v59  ;;  %v11158_v22 = vsub.s32 1, %v11153_v59 }
 0x44e   : > { %10451 = vmatmul.mubr.bf16.gmra.mrb[16].mxu0 %v8191_v62  ;;  %10997 = vmatmul.mubr.bf16.gmra.mrb[16].mxu1 %v8191_v62 }
 0x44f   : > { %10460 = vmatprep.mubr.bf16.mxu0 %v8192_v2  ;;  %11006 = vmatprep.mubr.bf16.mxu1 %v8192_v2 }
 0x456   : > { %10461 = vmatmul.mubr.bf16.gmra.mrb[84].mxu0 %v8190_v61  ;;  %11007 = vmatmul.mubr.bf16.gmra.mrb[84].mxu1 %v8190_v61 }
 0x457   : > { %10501 = vmatprep.mubr.bf16.mxu0 %v16262_v32  ;;  %11047 = vmatprep.mubr.bf16.mxu1 %v16262_v32 }
 0x45e   : > { %13713 = vmatmul.mubr.msk.bf16.vlgmr.msra.gmra.mrb[0].mxu0 %vm3584_vm1, %v8107_v25  ;;  %13719 = vmatmul.mubr.msk.bf16.vlgmr.msra.gmra.mrb[0].mxu1 %vm3584_vm1, %v8107_v25 }
 0x45f   : > { %10511 = vmatprep.mubr.bf16.mxu0 %v16262_v32  ;;  %11057 = vmatprep.mubr.bf16.mxu1 %v16262_v32 }
 0x466   : > { %13714 = vmatmul.mubr.msk.bf16.gmra.mrb[4].mxu0 %vm3584_vm1, %v8129_v48  ;;  %13720 = vmatmul.mubr.msk.bf16.gmra.mrb[4].mxu1 %vm3584_vm1, %v8129_v48  ;;  %v11150_v48 = vld [vmem:[%s20583_s2] sm:$0xf] }
 0x467   : > { %10521 = vmatprep.mubr.bf16.mxu0 %v16262_v32  ;;  %11067 = vmatprep.mubr.bf16.mxu1 %v16262_v32 }
 0x469   : > { %v10189_v1 = vpop.f32.mrb[72].mxu0  ;;  %v10735_v12 = vpop.f32.mrb[72].mxu1 }
 0x46a   : > { %v10190_v19 = vadd.f32 %v10189_v1, %v19964_v0  ;;  %v10736_v51 = vadd.f32 %v10735_v12, %v19966_v3  ;;  %v10191_v16 = vpop.f32.mrb[73].mxu0  ;;  %v10737_v24 = vpop.f32.mrb[73].mxu1  ;;  %v16253_v0 = vld [vmem:[%s16433_s30 + $0x188] ss:$44 sps:$4 sm:$0xff]  }
 0x46b   : > { %v10192_v4 = vadd.f32 %v10191_v16, %v19968_v6  ;;  %v10738_v53 = vadd.f32 %v10737_v24, %v19970_v7  ;;  %v10193_v26 = vpop.f32.mrb[74].mxu0  ;;  %v10739_v27 = vpop.f32.mrb[74].mxu1  ;;  %v8172_v3 = vrot.slane %v16253_v0, 3  ;;  %v8194_v7 = vrot.slane %v16153_v44, 3 }
 0x46c   : > { %v10194_v30 = vpop.f32.mrb[75].mxu0  ;;  %v10740_v21 = vpop.f32.mrb[75].mxu1  ;;  %v20122_v16 = vrot.slane %v11150_v48, %v11158_v22 }
 0x46d   : > { %v8173_v6 = vsel %vm8074_vm2, %v8150_v52, %v8172_v3  ;;  %v8195_v31 = vsel %vm8074_vm2, %v8172_v3, %v8194_v7  ;;  %v11166_v52 = vsub.s32 3, %v11153_v59 }
 0x46e   : > { %13715 = vmatmul.mubr.msk.bf16.gmra.mrb[8].mxu0 %vm3584_vm1, %v8151_v20  ;;  %13721 = vmatmul.mubr.msk.bf16.gmra.mrb[8].mxu1 %vm3584_vm1, %v8151_v20 }
 0x46f   : > { %10531 = vmatprep.mubr.bf16.mxu0 %v16262_v32  ;;  %11077 = vmatprep.mubr.bf16.mxu1 %v16262_v32  ;;  %v20124_v24 = vrot.slane %v11150_v48, %v11166_v52 }
 0x476   : > { %13716 = vmatmul.mubr.msk.bf16.gmra.mrb[12].mxu0 %vm3584_vm1, %v8173_v6  ;;  %13722 = vmatmul.mubr.msk.bf16.gmra.mrb[12].mxu1 %vm3584_vm1, %v8173_v6 }
 0x477   : > { %10541 = vmatprep.mubr.bf16.mxu0 %v16262_v32  ;;  %11087 = vmatprep.mubr.bf16.mxu1 %v16262_v32 }
 0x47e   : > { %13717 = vmatmul.mubr.msk.bf16.gmra.mrb[16].mxu0 %vm3584_vm1, %v8195_v31  ;;  %13723 = vmatmul.mubr.msk.bf16.gmra.mrb[16].mxu1 %vm3584_vm1, %v8195_v31 }
 0x47f   : > { %10551 = vmatprep.mubr.bf16.mxu0 %v16262_v32  ;;  %11097 = vmatprep.mubr.bf16.mxu1 %v16262_v32 }
 0x486   : > { %13718 = vmatmul.mubr.msk.bf16.gmra.mrb[88].mxu0 %vm3584_vm1, %v8194_v7  ;;  %13724 = vmatmul.mubr.msk.bf16.gmra.mrb[88].mxu1 %vm3584_vm1, %v8194_v7 }
 0x4a9   : > { %v10280_v23 = vpop.f32.mrb[76].mxu0  ;;  %v10826_v49 = vpop.f32.mrb[76].mxu1 }
 0x4aa   : > { %v10281_v33 = vadd.f32 %v10280_v23, %v10190_v19  ;;  %v10827_v35 = vadd.f32 %v10826_v49, %v10736_v51  ;;  %v10282_v36 = vpop.f32.mrb[77].mxu0  ;;  %v10828_v34 = vpop.f32.mrb[77].mxu1  ;;  %v20118_v19 = vrot.slane %v11150_v48, %v11154_v17  ;;  %v20120_v51 = vrot.slane %v11150_v48, %v11162_v18 }
 0x4ab   : > { %v10283_v37 = vadd.f32 %v10282_v36, %v10192_v4  ;;  %v10829_v38 = vadd.f32 %v10828_v34, %v10738_v53  ;;  %v10284_v39 = vpop.f32.mrb[78].mxu0  ;;  %v10830_v40 = vpop.f32.mrb[78].mxu1 }
 0x4ac   : > { %v10285_v43 = vpop.f32.mrb[79].mxu0  ;;  %v10831_v46 = vpop.f32.mrb[79].mxu1 }
 0x4e9   : > { %v10371_v47 = vpop.f32.mrb[80].mxu0  ;;  %v10917_v50 = vpop.f32.mrb[80].mxu1 }
 0x4ea   : > { %v10372_v15 = vadd.f32 %v10371_v47, %v10281_v33  ;;  %v10918_v32 = vadd.f32 %v10917_v50, %v10827_v35  ;;  %v10373_v11 = vpop.f32.mrb[81].mxu0  ;;  %v10919_v2 = vpop.f32.mrb[81].mxu1 }
 0x4eb   : > { %v10374_v41 = vadd.f32 %v10373_v11, %v10283_v37  ;;  %v10920_v42 = vadd.f32 %v10919_v2, %v10829_v38  ;;  %v10375_v54 = vpop.f32.mrb[82].mxu0  ;;  %v10921_v56 = vpop.f32.mrb[82].mxu1 }
 0x4ec   : > { %v10376_v57 = vpop.f32.mrb[83].mxu0  ;;  %v10922_v58 = vpop.f32.mrb[83].mxu1 }
 0x529   : > { %v10462_v60 = vpop.f32.mrb[84].mxu0  ;;  %v11008_v61 = vpop.f32.mrb[84].mxu1 }
 0x52a   : > { %v20107_v62 = vadd.f32 %v10462_v60, %v10372_v15  ;;  %v20109_v63 = vadd.f32 %v11008_v61, %v10918_v32  ;;  %v10464_v8 = vpop.f32.mrb[85].mxu0  ;;  %v11010_v9 = vpop.f32.mrb[85].mxu1 }
 0x52b   : > { %v20111_v10 = vadd.f32 %v10464_v8, %v10374_v41  ;;  %v20113_v25 = vadd.f32 %v11010_v9, %v10920_v42  ;;  %v10466_v13 = vpop.f32.mrb[86].mxu0  ;;  %v11012_v45 = vpop.f32.mrb[86].mxu1 }
 0x52c   : > { %v10467_v1 = vpop.f32.mrb[87].mxu0  ;;  %v11013_v12 = vpop.f32.mrb[87].mxu1 }
 0x531   : > { %v10503_v4 = vpop.f32.mrb[0].mxu0  ;;  %v11049_v53 = vpop.f32.mrb[0].mxu1 }
 0x532   : > { %v11172_v20 = vadd.f32 %v20118_v19, %v10503_v4  ;;  %v11174_v26 = vadd.f32 %v20120_v51, %v11049_v53  ;;  %v10505_v27 = vpop.f32.mrb[1].mxu0  ;;  %v11051_v30 = vpop.f32.mrb[1].mxu1 }
 0x533   : > { %v11173_v21 = vadd.f32 %v20122_v16, %v10505_v27  ;;  %v11175_v0 = vadd.f32 %v20124_v24, %v11051_v30  ;;  %v10507_v3 = vpop.f32.mrb[2].mxu0  ;;  %v11053_v6 = vpop.f32.mrb[2].mxu1 }
 0x534   : > { %v11216_v44 = vmax.f32 %v11172_v20, 0.0  ;;  %v11218_v7 = vmax.f32 %v11174_v26, 0.0  ;;  %v11176_v31 = vadd.f32 %v20118_v19, %v10507_v3  ;;  %v11178_v23 = vadd.f32 %v20120_v51, %v11053_v6  ;;  %v10509_v49 = vpop.f32.mrb[3].mxu0  ;;  %v11055_v33 = vpop.f32.mrb[3].mxu1 }
 0x535   : > { %v11217_v35 = vmax.f32 %v11173_v21, 0.0  ;;  %v11219_v36 = vmax.f32 %v11175_v0, 0.0  ;;  %v11177_v34 = vadd.f32 %v20122_v16, %v10509_v49  ;;  %v11179_v37 = vadd.f32 %v20124_v24, %v11055_v33 }
 0x536   : > { %v11301_v38 = vrot.slane %v11216_v44, 3  ;;  %v11462_v39 = vrot.slane %v11216_v44, 6  ;;  %v11307_v40 = vrot.slane %v11218_v7, 3  ;;  %v11468_v43 = vrot.slane %v11218_v7, 6 }
 0x537   : > { %v20134_v46 = vmax.f32 %v11176_v31, 0.0  ;;  %v20136_v47 = vmax.f32 %v11178_v23, 0.0  ;;  %v20138_v50 = vmax.f32 %v11177_v34, 0.0  ;;  %v20140_v15 = vmax.f32 %v11179_v37, 0.0 }
 0x538   : > { %v11304_v32 = vrot.slane %v11217_v35, 3  ;;  %v11465_v11 = vrot.slane %v11217_v35, 6  ;;  %v11310_v2 = vrot.slane %v11219_v36, 3  ;;  %v11471_v41 = vrot.slane %v11219_v36, 6 }
 0x539   : > { %v10513_v42 = vpop.f32.mrb[4].mxu0  ;;  %v11059_v54 = vpop.f32.mrb[4].mxu1  ;;  %v11302_v56 = vrot.slane %v20134_v46, 3  ;;  %v11463_v57 = vrot.slane %v20134_v46, 6  ;;  %v11308_v58 = vrot.slane %v20136_v47, 3  ;;  %v11469_v55 = vrot.slane %v20136_v47, 6 }
 0x53a   : > { %v10515_v59 = vpop.f32.mrb[5].mxu0  ;;  %v11061_v60 = vpop.f32.mrb[5].mxu1  ;;  %v11305_v61 = vrot.slane %v20138_v50, 3  ;;  %v11466_v8 = vrot.slane %v20138_v50, 6  ;;  %v11311_v9 = vrot.slane %v20140_v15, 3  ;;  %v11472_v17 = vrot.slane %v20140_v15, 6 }
 0x53b   : > { %v10517_v18 = vpop.f32.mrb[6].mxu0  ;;  %v11063_v13 = vpop.f32.mrb[6].mxu1  ;;  %v11303_v45 = vsel %vm8074_vm2, %v11301_v38, %v11302_v56  ;;  %v11464_v48 = vsel %vm11461_vm3, %v11462_v39, %v11463_v57  ;;  %v11309_v22 = vsel %vm8074_vm2, %v11307_v40, %v11308_v58  ;;  %v11470_v52 = vsel %vm11461_vm3, %v11468_v43, %v11469_v55 }
 0x53c   : > { %v20154_v1 = vpop.f32.mrb[7].mxu0  ;;  %v20156_v12 = vpop.f32.mrb[7].mxu1  ;;  %v11417_v4 = vmax.f32 %v11216_v44, %v11303_v45  ;;  %v11419_v53 = vmax.f32 %v11218_v7, %v11309_v22  ;;  %v11306_v20 = vsel %vm8074_vm2, %v11304_v32, %v11305_v61  ;;  %v11467_v26 = vsel %vm11461_vm3, %v11465_v11, %v11466_v8 }
 0x53d   : > { %v11418_v27 = vmax.f32 %v11217_v35, %v11306_v20  ;;  %v11312_v30 = vsel %vm8074_vm2, %v11310_v2, %v11311_v9  ;;  %v11473_v21 = vsel %vm11461_vm3, %v11471_v41, %v11472_v17  ;;  %v11180_v0 = vadd.f32 %v20118_v19, %v10513_v42 }
 0x53e   : > { %v11586_v3 = vmax.f32 %v11417_v4, %v11464_v48  ;;  %v11588_v6 = vmax.f32 %v11419_v53, %v11470_v52  ;;  %v11420_v44 = vmax.f32 %v11219_v36, %v11312_v30  ;;  %v11182_v7 = vadd.f32 %v20120_v51, %v11059_v54 }
 0x53f   : > { %v11587_v31 = vmax.f32 %v11418_v27, %v11467_v26  ;;  %v20169_v23 = vmax.f32 %v11180_v0, 0.0  ;;  %v11181_v49 = vadd.f32 %v20122_v16, %v10515_v59  ;;  %v11183_v33 = vadd.f32 %v20124_v24, %v11061_v60 }
 0x540   : > { %v11589_v35 = vmax.f32 %v11420_v44, %v11473_v21  ;;  %v20178_v34 = vmax.f32 %v11182_v7, 0.0  ;;  %v11184_v37 = vadd.f32 %v20118_v19, %v10517_v18  ;;  %v11186_v36 = vadd.f32 %v20120_v51, %v11063_v13 }
 0x541   : > { %v20182_v38 = vpop.f32.mrb[8].mxu0  ;;  %v20184_v39 = vpop.f32.mrb[8].mxu1  ;;  %v13747_v40 = vpack.c.bf16 %v11587_v31, %v11586_v3  ;;  %v11313_v43 = vrot.slane %v20169_v23, 3  ;;  %v11474_v32 = vrot.slane %v20169_v23, 6  ;;  %v20188_v11 = vmax.f32 %v11181_v49, 0.0 }
 0x542   : > { %v20190_v2 = vpop.f32.mrb[9].mxu0  ;;  %v20192_v41 = vpop.f32.mrb[9].mxu1  ;;  %v13748_v42 = vpack.c.bf16 %v11589_v35, %v11588_v6  ;;  %v11317_v54 = vrot.slane %v20178_v34, 3  ;;  %v11478_v59 = vrot.slane %v20178_v34, 6  ;;  %v20196_v60 = vmax.f32 %v11183_v33, 0.0 }
 0x543   : > { %v20198_v18 = vpop.f32.mrb[10].mxu0  ;;  %v20200_v13 = vpop.f32.mrb[10].mxu1  ;;  %11746 = vst [vmem:[%s20176_s17] sm:$0xff] %v13747_v40  ;;  %v11314_v45 = vsel %vm8074_vm2, %v11302_v56, %v11313_v43  ;;  %v11475_v48 = vsel %vm11461_vm3, %v11463_v57, %v11474_v32  ;;  %v11315_v22 = vrot.slane %v20188_v11, 3  ;;  %v11476_v52 = vrot.slane %v20188_v11, 6 }
 0x544   : > { %v20207_v4 = vpop.f32.mrb[11].mxu0  ;;  %v20209_v53 = vpop.f32.mrb[11].mxu1  ;;  %11747 = vst [vmem:[%s20176_s17 + $0x8] sm:$0xff] %v13748_v42  ;;  %v11421_v20 = vmax.f32 %v20134_v46, %v11314_v45  ;;  %v11318_v26 = vsel %vm8074_vm2, %v11308_v58, %v11317_v54  ;;  %v11479_v27 = vsel %vm11461_vm3, %v11469_v55, %v11478_v59  ;;  %v11319_v30 = vrot.slane %v20196_v60, 3 }
 0x545   : > { %v11423_v56 = vmax.f32 %v20136_v47, %v11318_v26  ;;  %v11316_v57 = vsel %vm8074_vm2, %v11305_v61, %v11315_v22  ;;  %v11477_v21 = vsel %vm11461_vm3, %v11466_v8, %v11476_v52  ;;  %v11480_v0 = vrot.slane %v20196_v60, 6 }
 0x546   : > { %v11590_v3 = vmax.f32 %v11421_v20, %v11475_v48  ;;  %v11422_v6 = vmax.f32 %v20138_v50, %v11316_v57  ;;  %v11320_v46 = vsel %vm8074_vm2, %v11311_v9, %v11319_v30  ;;  %v20224_v58 = vmax.f32 %v11184_v37, 0.0 }
 0x547   : > { %v11592_v55 = vmax.f32 %v11423_v56, %v11479_v27  ;;  %v11424_v44 = vmax.f32 %v20140_v15, %v11320_v46  ;;  %v11481_v47 = vsel %vm11461_vm3, %v11472_v17, %v11480_v0  ;;  %v20230_v61 = vmax.f32 %v11186_v36, 0.0 }
 0x548   : > { %v11591_v8 = vmax.f32 %v11422_v6, %v11477_v21  ;;  %v11321_v7 = vrot.slane %v20224_v58, 3  ;;  %v11482_v50 = vrot.slane %v20224_v58, 6  ;;  %v11185_v31 = vadd.f32 %v20122_v16, %v20154_v1 }
 0x549   : > { %v20236_v9 = vpop.f32.mrb[12].mxu0  ;;  %v20238_v49 = vpop.f32.mrb[12].mxu1  ;;  %v11593_v33 = vmax.f32 %v11424_v44, %v11481_v47  ;;  %v11325_v35 = vrot.slane %v20230_v61, 3  ;;  %v11486_v15 = vrot.slane %v20230_v61, 6  ;;  %v11187_v17 = vadd.f32 %v20124_v24, %v20156_v12 }
 0x54a   : > { %v20244_v37 = vpop.f32.mrb[13].mxu0  ;;  %v20246_v36 = vpop.f32.mrb[13].mxu1  ;;  %v13749_v40 = vpack.c.bf16 %v11591_v8, %v11590_v3  ;;  %v11322_v1 = vsel %vm8074_vm2, %v11313_v43, %v11321_v7  ;;  %v11483_v42 = vsel %vm11461_vm3, %v11474_v32, %v11482_v50  ;;  %v20252_v45 = vmax.f32 %v11185_v31, 0.0 }
 0x54b   : > { %v20254_v48 = vpop.f32.mrb[14].mxu0  ;;  %v20256_v20 = vpop.f32.mrb[14].mxu1  ;;  %v13750_v26 = vpack.c.bf16 %v11593_v33, %v11592_v55  ;;  %v11425_v12 = vmax.f32 %v20169_v23, %v11322_v1  ;;  %v11326_v27 = vsel %vm8074_vm2, %v11317_v54, %v11325_v35  ;;  %v11487_v56 = vsel %vm11461_vm3, %v11478_v59, %v11486_v15 }
 0x54c   : > { %v20261_v57 = vpop.f32.mrb[15].mxu0  ;;  %v20263_v43 = vpop.f32.mrb[15].mxu1  ;;  %11748 = vst [vmem:[%s20176_s17 + $0x10] sm:$0xff] %v13749_v40  ;;  %v11427_v32 = vmax.f32 %v20178_v34, %v11326_v27  ;;  %v11323_v21 = vrot.slane %v20252_v45, 3  ;;  %v11484_v3 = vrot.slane %v20252_v45, 6  ;;  %v20269_v6 = vmax.f32 %v11187_v17, 0.0 }
 0x54d   : > { %11749 = vst [vmem:[%s20176_s17 + $0x18] sm:$0xff] %v13750_v26  ;;  %v11594_v46 = vmax.f32 %v11425_v12, %v11483_v42  ;;  %v11188_v23 = vadd.f32 %v20118_v19, %v20182_v38  ;;  %v11190_v54 = vadd.f32 %v20120_v51, %v20184_v39  ;;  %v11189_v59 = vadd.f32 %v20122_v16, %v20190_v2 }
 0x54e   : > { %v11596_v55 = vmax.f32 %v11427_v32, %v11487_v56  ;;  %v11324_v34 = vsel %vm8074_vm2, %v11315_v22, %v11323_v21  ;;  %v11485_v44 = vsel %vm11461_vm3, %v11476_v52, %v11484_v3  ;;  %v11327_v47 = vrot.slane %v20269_v6, 3 }
 0x54f   : > { %v11426_v8 = vmax.f32 %v20188_v11, %v11324_v34  ;;  %v11488_v31 = vrot.slane %v20269_v6, 6  ;;  %v20283_v33 = vmax.f32 %v11188_v23, 0.0  ;;  %v20285_v38 = vmax.f32 %v11190_v54, 0.0 }
 0x550   : > { %v11328_v39 = vsel %vm8074_vm2, %v11319_v30, %v11327_v47  ;;  %v20288_v17 = vmax.f32 %v11189_v59, 0.0  ;;  %v11191_v2 = vadd.f32 %v20124_v24, %v20192_v41  ;;  %v11192_v22 = vadd.f32 %v20118_v19, %v20198_v18 }
 0x551   : > { %v20294_v52 = vpop.f32.mrb[16].mxu0  ;;  %v20296_v40 = vpop.f32.mrb[16].mxu1  ;;  %v11595_v11 = vmax.f32 %v11426_v8, %v11485_v44  ;;  %v11428_v1 = vmax.f32 %v20196_v60, %v11328_v39  ;;  %v11489_v42 = vsel %vm11461_vm3, %v11480_v0, %v11488_v31  ;;  %v11329_v26 = vrot.slane %v20283_v33, 3 }
 0x552   : > { %v20301_v30 = vpop.f32.mrb[17].mxu0  ;;  %v20303_v12 = vpop.f32.mrb[17].mxu1  ;;  %v11490_v41 = vrot.slane %v20283_v33, 6  ;;  %v11333_v18 = vrot.slane %v20285_v38, 3  ;;  %v11494_v27 = vrot.slane %v20285_v38, 6  ;;  %v11492_v59 = vrot.slane %v20288_v17, 6 }
 0x553   : > { %v20309_v32 = vpop.f32.mrb[18].mxu0  ;;  %v20311_v60 = vpop.f32.mrb[18].mxu1  ;;  %v13751_v0 = vpack.c.bf16 %v11595_v11, %v11594_v46  ;;  %v11597_v23 = vmax.f32 %v11428_v1, %v11489_v42  ;;  %v11330_v54 = vsel %vm8074_vm2, %v11321_v7, %v11329_v26  ;;  %v20587_v1 = vrot.slane %v20288_v17, 3 }
 0x554   : > { %v20315_v34 = vpop.f32.mrb[19].mxu0  ;;  %v20317_v44 = vpop.f32.mrb[19].mxu1  ;;  %v11429_v8 = vmax.f32 %v20224_v58, %v11330_v54  ;;  %v11491_v39 = vsel %vm11461_vm3, %v11482_v50, %v11490_v41  ;;  %v11334_v56 = vsel %vm8074_vm2, %v11325_v35, %v11333_v18  ;;  %v11495_v46 = vsel %vm11461_vm3, %v11486_v15, %v11494_v27 }
 0x555   : > { %11750 = vst [vmem:[%s20176_s17 + $0x20] sm:$0xff] %v13751_v0  ;;  %v13752_v7 = vpack.c.bf16 %v11597_v23, %v11596_v55  ;;  %v11431_v11 = vmax.f32 %v20230_v61, %v11334_v56  ;;  %v11332_v42 = vsel %vm8074_vm2, %v11323_v21, %v20587_v1  ;;  %v11493_v54 = vsel %vm11461_vm3, %v11484_v3, %v11492_v59 }
 0x556   : > { %v11598_v29 = vmax.f32 %v11429_v8, %v11491_v39  ;;  %v11430_v58 = vmax.f32 %v20252_v45, %v11332_v42  ;;  %v11235_v50 = vmax.f32 %v11191_v2, 0.0  ;;  %v20334_v28 = vmax.f32 %v11192_v22, 0.0 }
 0x557   : > { %11751 = vst [vmem:[%s20176_s17 + $0x28] sm:$0xff] %v13752_v7  ;;  %v11600_v35 = vmax.f32 %v11431_v11, %v11495_v46  ;;  %v11194_v15 = vadd.f32 %v20120_v51, %v20200_v13  ;;  %v11193_v61 = vadd.f32 %v20122_v16, %v20207_v4  ;;  %v11195_v55 = vadd.f32 %v20124_v24, %v20209_v53 }
 0x558   : > { %v11599_v21 = vmax.f32 %v11430_v58, %v11493_v54  ;;  %v11335_v56 = vrot.slane %v11235_v50, 3  ;;  %v11496_v3 = vrot.slane %v11235_v50, 6  ;;  %v11337_v0 = vrot.slane %v20334_v28, 3 }
 0x559   : > { %v20344_v45 = vpop.f32.mrb[88].mxu0  ;;  %v20346_v2 = vpop.f32.mrb[88].mxu1  ;;  %v11498_v22 = vrot.slane %v20334_v28, 6  ;;  %v20349_v23 = vmax.f32 %v11194_v15, 0.0  ;;  %v20351_v13 = vmax.f32 %v11193_v61, 0.0  ;;  %v20353_v4 = vmax.f32 %v11195_v55, 0.0 }
 0x55a   : > { %v20355_v8 = vpop.f32.mrb[89].mxu0  ;;  %v20357_v53 = vpop.f32.mrb[89].mxu1  ;;  %v13753_v39 = vpack.c.bf16 %v11599_v21, %v11598_v29  ;;  %v11336_v46 = vsel %vm8074_vm2, %v11327_v47, %v11335_v56  ;;  %v11497_v7 = vsel %vm11461_vm3, %v11488_v31, %v11496_v3  ;;  %v11338_v11 = vsel %vm8074_vm2, %v11329_v26, %v11337_v0 }
 0x55b   : > { %v10557_v1 = vpop.f32.mrb[90].mxu0  ;;  %v11103_v42 = vpop.f32.mrb[90].mxu1  ;;  %v11432_v54 = vmax.f32 %v20269_v6, %v11336_v46  ;;  %v11433_v58 = vmax.f32 %v20283_v33, %v11338_v11  ;;  %v11499_v15 = vsel %vm11461_vm3, %v11490_v41, %v11498_v22  ;;  %v11341_v29 = vrot.slane %v20349_v23, 3 }
 0x55c   : > { %v10558_v61 = vpop.f32.mrb[91].mxu0  ;;  %v11104_v47 = vpop.f32.mrb[91].mxu1  ;;  %11752 = vst [vmem:[%s20176_s17 + $0x30] sm:$0xff] %v13753_v39  ;;  %v11502_v31 = vrot.slane %v20349_v23, 6  ;;  %v11339_v55 = vrot.slane %v20351_v13, 3  ;;  %v11500_v26 = vrot.slane %v20351_v13, 6 }
 0x55d   : > { %v11343_v21 = vrot.slane %v20353_v4, 3  ;;  %v11601_v6 = vmax.f32 %v11432_v54, %v11497_v7  ;;  %v11602_v33 = vmax.f32 %v11433_v58, %v11499_v15  ;;  %v11342_v46 = vsel %vm8074_vm2, %v11333_v18, %v11341_v29 }
 0x55e   : > { %v11504_v41 = vrot.slane %v20353_v4, 6  ;;  %v11435_v11 = vmax.f32 %v20285_v38, %v11342_v46  ;;  %v11503_v39 = vsel %vm11461_vm3, %v11494_v27, %v11502_v31  ;;  %v20588_v1 = vrot.slane %v20288_v17, 3 }
 0x55f   : > { %v11501_v61 = vsel %vm11461_vm3, %v11492_v59, %v11500_v26  ;;  %v13754_v47 = vpack.c.bf16 %v11601_v6, %v11600_v35  ;;  %v11344_v54 = vsel %vm8074_vm2, %v11335_v56, %v11343_v21  ;;  %v11196_v38 = vadd.f32 %v20118_v19, %v20236_v9 }
 0x560   : > { %v11340_v42 = vsel %vm8074_vm2, %v20588_v1, %v11339_v55  ;;  %v11505_v18 = vsel %vm11461_vm3, %v11496_v3, %v11504_v41  ;;  %v11604_v58 = vmax.f32 %v11435_v11, %v11503_v39  ;;  %v11436_v15 = vmax.f32 %v11235_v50, %v11344_v54 }
 0x561   : > { %v11434_v7 = vmax.f32 %v20288_v17, %v11340_v42  ;;  %v11198_v27 = vadd.f32 %v20120_v51, %v20238_v49  ;;  %11753 = vst [vmem:[%s20176_s17 + $0x38] sm:$0xff] %v13754_v47  ;;  %v11197_v59 = vadd.f32 %v20122_v16, %v20244_v37  ;;  %v11199_v17 = vadd.f32 %v20124_v24, %v20246_v36 }
 0x562   : > { %v11200_v35 = vadd.f32 %v20118_v19, %v20254_v48  ;;  %v11605_v56 = vmax.f32 %v11436_v15, %v11505_v18  ;;  %v11240_v50 = vmax.f32 %v11196_v38, 0.0  ;;  %v11202_v9 = vadd.f32 %v20120_v51, %v20256_v20 }
 0x563   : > { %v11603_v46 = vmax.f32 %v11434_v7, %v11501_v61  ;;  %v20399_v3 = vmax.f32 %v11198_v27, 0.0  ;;  %v20403_v6 = vmax.f32 %v11197_v59, 0.0  ;;  %v20405_v11 = vmax.f32 %v11199_v17, 0.0 }
 0x564   : > { %v20407_v37 = vmax.f32 %v11200_v35, 0.0  ;;  %v13756_v39 = vpack.c.bf16 %v11605_v56, %v11604_v58  ;;  %v11345_v36 = vrot.slane %v11240_v50, 3  ;;  %v11506_v1 = vrot.slane %v11240_v50, 6 }
 0x565   : > { %v13755_v49 = vpack.c.bf16 %v11603_v46, %v11602_v33  ;;  %v11349_v48 = vrot.slane %v20399_v3, 3  ;;  %v11510_v42 = vrot.slane %v20399_v3, 6  ;;  %v11347_v61 = vrot.slane %v20403_v6, 3 }
 0x566   : > { %v11508_v47 = vrot.slane %v20403_v6, 6  ;;  %v11351_v20 = vrot.slane %v20405_v11, 3  ;;  %11755 = vst [vmem:[%s20176_s17 + $0x48] sm:$0xff] %v13756_v39  ;;  %v11346_v33 = vsel %vm8074_vm2, %v11337_v0, %v11345_v36  ;;  %v11507_v7 = vsel %vm11461_vm3, %v11498_v22, %v11506_v1 }
 0x567   : > { %11754 = vst [vmem:[%s20176_s17 + $0x40] sm:$0xff] %v13755_v49  ;;  %v11350_v54 = vsel %vm8074_vm2, %v11341_v29, %v11349_v48  ;;  %v11512_v18 = vrot.slane %v20405_v11, 6  ;;  %v11437_v58 = vmax.f32 %v20334_v28, %v11346_v33  ;;  %v11511_v38 = vsel %vm11461_vm3, %v11502_v31, %v11510_v42 }
 0x568   : > { %v11439_v15 = vmax.f32 %v20349_v23, %v11350_v54  ;;  %v11348_v27 = vsel %vm8074_vm2, %v11339_v55, %v11347_v61  ;;  %v11509_v0 = vsel %vm11461_vm3, %v11500_v26, %v11508_v47  ;;  %v11352_v59 = vsel %vm8074_vm2, %v11343_v21, %v11351_v20 }
 0x569   : > { %v11438_v46 = vmax.f32 %v20351_v13, %v11348_v27  ;;  %v11513_v22 = vsel %vm11461_vm3, %v11504_v41, %v11512_v18  ;;  %v11606_v17 = vmax.f32 %v11437_v58, %v11507_v7  ;;  %v11440_v35 = vmax.f32 %v20353_v4, %v11352_v59 }
 0x56a   : > { %v11608_v29 = vmax.f32 %v11439_v15, %v11511_v38  ;;  %v11353_v28 = vrot.slane %v20407_v37, 3  ;;  %v11514_v23 = vrot.slane %v20407_v37, 6  ;;  %v11246_v31 = vmax.f32 %v11202_v9, 0.0 }
 0x56b   : > { %v11607_v56 = vmax.f32 %v11438_v46, %v11509_v0  ;;  %v11201_v13 = vadd.f32 %v20122_v16, %v20261_v57  ;;  %v11609_v55 = vmax.f32 %v11440_v35, %v11513_v22  ;;  %v11203_v21 = vadd.f32 %v20124_v24, %v20263_v43 }
 0x56c   : > { %v11354_v26 = vsel %vm8074_vm2, %v11345_v36, %v11353_v28  ;;  %v11204_v4 = vadd.f32 %v20118_v19, %v20294_v52  ;;  %v11515_v39 = vsel %vm11461_vm3, %v11506_v1, %v11514_v23  ;;  %v11357_v33 = vrot.slane %v11246_v31, 3 }
 0x56d   : > { %v13757_v41 = vpack.c.bf16 %v11607_v56, %v11606_v17  ;;  %v11441_v49 = vmax.f32 %v11240_v50, %v11354_v26  ;;  %v13758_v7 = vpack.c.bf16 %v11609_v55, %v11608_v29  ;;  %v11518_v9 = vrot.slane %v11246_v31, 6 }
 0x56e   : > { %v20443_v54 = vmax.f32 %v11201_v13, 0.0  ;;  %v20445_v57 = vmax.f32 %v11203_v21, 0.0  ;;  %v11358_v58 = vsel %vm8074_vm2, %v11349_v48, %v11357_v33  ;;  %v20449_v15 = vmax.f32 %v11204_v4, 0.0 }
 0x56f   : > { %11756 = vst [vmem:[%s20176_s17 + $0x50] sm:$0xff] %v13757_v41  ;;  %v11610_v36 = vmax.f32 %v11441_v49, %v11515_v39  ;;  %v11206_v43 = vadd.f32 %v20120_v51, %v20296_v40  ;;  %11757 = vst [vmem:[%s20176_s17 + $0x58] sm:$0xff] %v13758_v7  ;;  %v11443_v52 = vmax.f32 %v20399_v3, %v11358_v58 }
 0x570   : > { %v11519_v50 = vsel %vm11461_vm3, %v11510_v42, %v11518_v9  ;;  %v11355_v1 = vrot.slane %v20443_v54, 3  ;;  %v11516_v38 = vrot.slane %v20443_v54, 6  ;;  %v11359_v27 = vrot.slane %v20445_v57, 3 }
 0x571   : > { %v11520_v46 = vrot.slane %v20445_v57, 6  ;;  %v11361_v48 = vrot.slane %v20449_v15, 3  ;;  %v11522_v0 = vrot.slane %v20449_v15, 6  ;;  %v11612_v59 = vmax.f32 %v11443_v52, %v11519_v50 }
 0x572   : > { %v11356_v40 = vsel %vm8074_vm2, %v11347_v61, %v11355_v1  ;;  %v11517_v22 = vsel %vm11461_vm3, %v11508_v47, %v11516_v38  ;;  %v20464_v3 = vmax.f32 %v11206_v43, 0.0  ;;  %v11360_v17 = vsel %vm8074_vm2, %v11351_v20, %v11359_v27 }
 0x573   : > { %v11442_v42 = vmax.f32 %v20403_v6, %v11356_v40  ;;  %v11521_v29 = vsel %vm11461_vm3, %v11512_v18, %v11520_v46  ;;  %v11362_v35 = vsel %vm8074_vm2, %v11353_v28, %v11361_v48  ;;  %v11444_v56 = vmax.f32 %v20405_v11, %v11360_v17 }
 0x574   : > { %v11445_v13 = vmax.f32 %v20407_v37, %v11362_v35  ;;  %v11523_v55 = vsel %vm11461_vm3, %v11514_v23, %v11522_v0  ;;  %v11365_v61 = vrot.slane %v20464_v3, 3  ;;  %v11526_v47 = vrot.slane %v20464_v3, 6 }
 0x575   : > { %v11611_v26 = vmax.f32 %v11442_v42, %v11517_v22  ;;  %v11205_v6 = vadd.f32 %v20122_v16, %v20301_v30  ;;  %v11207_v20 = vadd.f32 %v20124_v24, %v20303_v12  ;;  %v11613_v18 = vmax.f32 %v11444_v56, %v11521_v29 }
 0x576   : > { %v11614_v28 = vmax.f32 %v11445_v13, %v11523_v55  ;;  %v11366_v11 = vsel %vm8074_vm2, %v11357_v33, %v11365_v61  ;;  %v11208_v37 = vadd.f32 %v20118_v19, %v20309_v32  ;;  %v11527_v4 = vsel %vm11461_vm3, %v11518_v9, %v11526_v47 }
 0x577   : > { %v13759_v23 = vpack.c.bf16 %v11611_v26, %v11610_v36  ;;  %v11447_v21 = vmax.f32 %v11246_v31, %v11366_v11  ;;  %v11249_v41 = vmax.f32 %v11205_v6, 0.0  ;;  %v13760_v49 = vpack.c.bf16 %v11613_v18, %v11612_v59 }
 0x578   : > { %v20483_v39 = vmax.f32 %v11207_v20, 0.0  ;;  %v20485_v30 = vmax.f32 %v11208_v37, 0.0  ;;  %v11210_v12 = vadd.f32 %v20120_v51, %v20311_v60  ;;  %v11209_v32 = vadd.f32 %v20122_v16, %v20315_v34 }
 0x579   : > { %11758 = vst [vmem:[%s20176_s17 + $0x60] sm:$0xff] %v13759_v23  ;;  %v11616_v7 = vmax.f32 %v11447_v21, %v11527_v4  ;;  %v11363_v58 = vrot.slane %v11249_v41, 3  ;;  %v11524_v33 = vrot.slane %v11249_v41, 6  ;;  %11759 = vst [vmem:[%s20176_s17 + $0x68] sm:$0xff] %v13760_v49  ;;  %v10554_v37 = vadd.f32 %v20344_v45, %v20107_v62  ;;  %v20589_v62 = vld [vmem:[#allocation2_spill] sm:$0xff]  ;;  %v20590_v49 = vld [vmem:[#allocation3_spill] sm:$0xff] }
 0x57a   : > { %v11367_v31 = vrot.slane %v20483_v39, 3  ;;  %v11528_v9 = vrot.slane %v20483_v39, 6  ;;  %v11369_v36 = vrot.slane %v20485_v30, 3  ;;  %v11530_v43 = vrot.slane %v20485_v30, 6 }
 0x57b   : > { %v11364_v52 = vsel %vm8074_vm2, %v11355_v1, %v11363_v58  ;;  %v11525_v60 = vsel %vm11461_vm3, %v11516_v38, %v11524_v33  ;;  %v20499_v50 = vmax.f32 %v11210_v12, 0.0  ;;  %v20501_v59 = vmax.f32 %v11209_v32, 0.0 }
 0x57c   : > { %v11446_v40 = vmax.f32 %v20443_v54, %v11364_v52  ;;  %v11368_v34 = vsel %vm8074_vm2, %v11359_v27, %v11367_v31  ;;  %v11529_v22 = vsel %vm11461_vm3, %v11520_v46, %v11528_v9  ;;  %v11370_v42 = vsel %vm8074_vm2, %v11361_v48, %v11369_v36 }
 0x57d   : > { %v11448_v17 = vmax.f32 %v20445_v57, %v11368_v34  ;;  %v11449_v1 = vmax.f32 %v20449_v15, %v11370_v42  ;;  %v11531_v38 = vsel %vm11461_vm3, %v11522_v0, %v11530_v43  ;;  %v11373_v54 = vrot.slane %v20499_v50, 3 }
 0x57e   : > { %v11615_v29 = vmax.f32 %v11446_v40, %v11525_v60  ;;  %v11534_v27 = vrot.slane %v20499_v50, 6  ;;  %v11371_v46 = vrot.slane %v20501_v59, 3  ;;  %v11532_v48 = vrot.slane %v20501_v59, 6 }
 0x57f   : > { %v11617_v35 = vmax.f32 %v11448_v17, %v11529_v22  ;;  %v11618_v56 = vmax.f32 %v11449_v1, %v11531_v38  ;;  %v11211_v57 = vadd.f32 %v20124_v24, %v20317_v44  ;;  %v11374_v13 = vsel %vm8074_vm2, %v11365_v61, %v11373_v54 }
 0x580   : > { %v13761_v15 = vpack.c.bf16 %v11615_v29, %v11614_v28  ;;  %v11535_v0 = vsel %vm11461_vm3, %v11526_v47, %v11534_v27  ;;  %v11451_v26 = vmax.f32 %v20464_v3, %v11374_v13  ;;  %v11372_v6 = vsel %vm8074_vm2, %v11363_v58, %v11371_v46  ;;  %v11771_v29 = vld [vmem:[%s20176_s17 + $0x90] sm:$0x33] }
 0x581   : > { %v13762_v55 = vpack.c.bf16 %v11617_v35, %v11616_v7  ;;  %v11450_v20 = vmax.f32 %v11249_v41, %v11372_v6  ;;  %v11533_v18 = vsel %vm11461_vm3, %v11524_v33, %v11532_v48  ;;  %v11255_v11 = vmax.f32 %v11211_v57, 0.0 }
 0x582   : > { %11760 = vst [vmem:[%s20176_s17 + $0x70] sm:$0xff] %v13761_v15  ;;  %v11620_v44 = vmax.f32 %v11451_v26, %v11535_v0  ;;  %v11100_v61 = vadd.f32 %v20346_v2, %v20109_v63  ;;  %v10556_v47 = vadd.f32 %v20355_v8, %v20111_v10  ;;  %v11102_v3 = vadd.f32 %v20357_v53, %v20113_v25 }
 0x583   : > { %11761 = vst [vmem:[%s20176_s17 + $0x78] sm:$0xff] %v13762_v55  ;;  %v11619_v28 = vmax.f32 %v11450_v20, %v11533_v18  ;;  %v11375_v23 = vrot.slane %v11255_v11, 3  ;;  %v11536_v21 = vrot.slane %v11255_v11, 6  ;;  %v11146_v4 = vadd.f32 %v10554_v37, %v19724_v14 }
 0x584   : > { %v11148_v41 = vadd.f32 %v11100_v61, %v19727_v5  ;;  %v11147_v45 = vadd.f32 %v10556_v47, %v20589_v62  ;;  %v11149_v12 = vadd.f32 %v11102_v3, %v20590_v49  ;;  %v11454_v60 = vmax.f32 %v20501_v59, %v11371_v46  ;;  %v11774_v46 = vld [vmem:[%s20176_s17 + $0x98] sm:$0x33] }
 0x585   : > { %v13763_v7 = vpack.c.bf16 %v11619_v28, %v11618_v56  ;;  %v11376_v63 = vsel %vm8074_vm2, %v11367_v31, %v11375_v23  ;;  %v11537_v10 = vsel %vm11461_vm3, %v11528_v9, %v11536_v21  ;;  %v11212_v25 = vadd.f32 %v20118_v19, %v11146_v4 }
 0x586   : > { %v11452_v2 = vmax.f32 %v20483_v39, %v11376_v63  ;;  %v11214_v8 = vadd.f32 %v20120_v51, %v11148_v41  ;;  %v11213_v53 = vadd.f32 %v20122_v16, %v11147_v45  ;;  %v11215_v14 = vadd.f32 %v20124_v24, %v11149_v12 }
 0x587   : > { %11762 = vst [vmem:[%s20176_s17 + $0x80] sm:$0xff] %v13763_v7  ;;  %v11256_v58 = vmax.f32 %v11212_v25, 0.0  ;;  %v11453_v16 = vmax.f32 %v20485_v30, %v11369_v36  ;;  %v11455_v24 = vmax.f32 %v20499_v50, %v11373_v54  ;;  %v11456_v22 = vmax.f32 %v11255_v11, %v11375_v23 }
 0x588   : > { %v11621_v5 = vmax.f32 %v11452_v2, %v11537_v10  ;;  %v11258_v33 = vmax.f32 %v11214_v8, 0.0  ;;  %v11257_v32 = vmax.f32 %v11213_v53, 0.0  ;;  %v11259_v31 = vmax.f32 %v11215_v14, 0.0 }
 0x589   : > { %v11538_v39 = vrot.slane %v11256_v58, 6 }
 0x58a   : > { %v13764_v9 = vpack.c.bf16 %v11621_v5, %v11620_v44  ;;  %v11542_v52 = vrot.slane %v11258_v33, 6  ;;  %v11540_v19 = vrot.slane %v11257_v32, 6  ;;  %v11544_v34 = vrot.slane %v11259_v31, 6 }
 0x58b   : > { %v11539_v42 = vsel %vm11461_vm3, %v11530_v43, %v11538_v39 }
 0x58c   : > { %11763 = vst [vmem:[%s20176_s17 + $0x88] sm:$0xff] %v13764_v9  ;;  %v11543_v36 = vsel %vm11461_vm3, %v11534_v27, %v11542_v52  ;;  %v11541_v50 = vsel %vm11461_vm3, %v11532_v48, %v11540_v19  ;;  %v11622_v59 = vmax.f32 %v11453_v16, %v11539_v42  ;;  %v11545_v38 = vsel %vm11461_vm3, %v11536_v21, %v11544_v34 }
 0x58d   : > { %v11624_v17 = vmax.f32 %v11455_v24, %v11543_v36  ;;  %v11623_v1 = vmax.f32 %v11454_v60, %v11541_v50  ;;  %v11625_v54 = vmax.f32 %v11456_v22, %v11545_v38 }
 0x58f   : > { %v13765_v30 = vpack.c.bf16 %v11623_v1, %v11622_v59  ;;  %v13766_v43 = vpack.c.bf16 %v11625_v54, %v11624_v17 }
 0x591   : > { %v11772_v35 = vsel %vm11770_vm9, %v13765_v30, %v11771_v29  ;;  %v11775_v27 = vsel %vm11770_vm9, %v13766_v43, %v11774_v46 }
 0x592   : > { %11773 = vst [vmem:[%s20176_s17 + $0x90] sm:$0x33] %v11772_v35  ;;  %11776 = vst [vmem:[%s20176_s17 + $0x98] sm:$0x33] %v11775_v27 }
 0x593 PF: > { %s13_s12 = sadd.s32 1, %s16260_s12  }
 0x594   : > { %p10_p4 = scmp.ge.s32.totalorder %s13_s12, 4  }
 0x596   :  { %12 = sbr.rel (!%p10_p4) target bundleno = 1 (0x1), region = 64 }

// kernel: tomato_forward.4
= control target key start
LH: loop header
LB: loop body
LE: loop exit
PB: predicated region body
PF: predicated region fallthrough
CT: control target
= control target key end

     0   :  { %s2955_s12 = smov 0   ;;  %s3825_s0 = inlined_call_operand.vmem [shape: bf16[2,45,256], index: 0, kind: input, shape index: {}]   ;;  %s3826_s1 = inlined_call_operand.vmem [shape: bf16[3,256,512], index: 1, kind: input, shape index: {}]   ;;  %s3827_s2 = inlined_call_operand.vmem [shape: f32[1,512], index: 2, kind: input, shape index: {}]   ;;  %s3828_s3 = inlined_call_operand.vmem [shape: bf16[2,33,512], index: 3, kind: output, shape index: {}]  }
   0x1 LB: > { %s2219_s13 = sadd.s32 4294967295, %s2933_s12   ;;  %p2223_p0 = scmp.ge.s32.totalorder %s2933_s12, 1  ;;  %s2933_s12 = sphi %s2955_s12, %s13_s12  }
   0x2   : > { %p137_p1 = scmp.lt.s32.totalorder %s2933_s12, 3 }
   0x4   : > { %p138_p2 = pnand %p2223_p0, %p137_p1 }
   0x5   : > { %v2624_v0 = vld [vmem:[%s3826_s1 + $0x204] ss:$16 sps:$4 sm:$0xff] (!%p138_p2)   ;;  %v2626_v1 = vld [vmem:[%s3826_s1 + $0x20c] ss:$16 sps:$4 sm:$0xff] (!%p138_p2)   ;;  %v2628_v2 = vld [vmem:[%s3826_s1 + $0x200] ss:$16 sps:$4 sm:$0xff] (!%p138_p2)  }
   0x6   : > { %141 = sbr.rel (%p138_p2) target bundleno = 460 (0x1cc), region = 32  ;;  %710 = vmatprep.subr.bf16.mxu0 (!%p138_p2), %v2624_v0  ;;  %v2629_v3 = vld [vmem:[%s3826_s1 + $0x208] ss:$16 sps:$4 sm:$0xff] (!%p138_p2)   ;;  %771 = vmatprep.subr.bf16.mxu1 (!%p138_p2), %v2626_v1  ;;  %v2630_v4 = vld [vmem:[%s3826_s1 + $0x224] ss:$16 sps:$4 sm:$0xff] (!%p138_p2)   ;;  %p161_p3 = scmp.lt.s32.totalorder (!%p138_p2), %s2219_s13, 1 }
   0x7   : > { %711 = vmatpush1.bf16.msra.mxu0 (!%p138_p2), %v2628_v2  ;;  %772 = vmatpush1.bf16.msra.mxu1 (!%p138_p2), %v2629_v3  ;;  %v2632_v5 = vld [vmem:[%s3826_s1 + $0x22c] ss:$16 sps:$4 sm:$0xff] (!%p138_p2)   ;;  %v2634_v6 = vld [vmem:[%s3826_s1 + $0x220] ss:$16 sps:$4 sm:$0xff] (!%p138_p2)   ;;  %v2635_v7 = vld [vmem:[%s3826_s1 + $0x228] ss:$16 sps:$4 sm:$0xff] (!%p138_p2)  }
   0x8   : > { %712 = vmatprep.subr.bf16.mxu0 (!%p138_p2), %v2630_v4  ;;  %773 = vmatprep.subr.bf16.mxu1 (!%p138_p2), %v2632_v5  ;;  %v2636_v8 = vld [vmem:[%s3826_s1 + $0x244] ss:$16 sps:$4 sm:$0xff] (!%p138_p2)   ;;  %v2638_v9 = vld [vmem:[%s3826_s1 + $0x24c] ss:$16 sps:$4 sm:$0xff] (!%p138_p2)   ;;  %v2640_v10 = vld [vmem:[%s3826_s1 + $0x240] ss:$16 sps:$4 sm:$0xff] (!%p138_p2)  }
   0x9   : > { %v2641_v11 = vld [vmem:[%s3826_s1 + $0x248] ss:$16 sps:$4 sm:$0xff] (!%p138_p2)   ;;  %v2642_v12 = vld [vmem:[%s3826_s1 + $0x264] ss:$16 sps:$4 sm:$0xff] (!%p138_p2)   ;;  %v2644_v13 = vld [vmem:[%s3826_s1 + $0x26c] ss:$16 sps:$4 sm:$0xff] (!%p138_p2)  }
   0xa   : > { %v2646_v14 = vld [vmem:[%s3826_s1 + $0x260] ss:$16 sps:$4 sm:$0xff] (!%p138_p2)   ;;  %v2647_v15 = vld [vmem:[%s3826_s1 + $0x268] ss:$16 sps:$4 sm:$0xff] (!%p138_p2)   ;;  %v2648_v16 = vld [vmem:[%s3826_s1 + $0x284] ss:$16 sps:$4 sm:$0xff] (!%p138_p2)  }
   0xb   : > { %713 = vmatpush1.bf16.msra.mxu0 (!%p138_p2), %v2634_v6  ;;  %774 = vmatpush1.bf16.msra.mxu1 (!%p138_p2), %v2635_v7  ;;  %v2650_v17 = vld [vmem:[%s3826_s1 + $0x28c] ss:$16 sps:$4 sm:$0xff] (!%p138_p2)   ;;  %v2652_v18 = vld [vmem:[%s3826_s1 + $0x280] ss:$16 sps:$4 sm:$0xff] (!%p138_p2)   ;;  %v2653_v19 = vld [vmem:[%s3826_s1 + $0x288] ss:$16 sps:$4 sm:$0xff] (!%p138_p2)  }
   0xc   : > { %714 = vmatprep.subr.bf16.mxu0 (!%p138_p2), %v2636_v8  ;;  %775 = vmatprep.subr.bf16.mxu1 (!%p138_p2), %v2638_v9  ;;  %v2654_v20 = vld [vmem:[%s3826_s1 + $0x2a4] ss:$16 sps:$4 sm:$0xff] (!%p138_p2)   ;;  %v2656_v21 = vld [vmem:[%s3826_s1 + $0x2ac] ss:$16 sps:$4 sm:$0xff] (!%p138_p2)   ;;  %v2658_v22 = vld [vmem:[%s3826_s1 + $0x2a0] ss:$16 sps:$4 sm:$0xff] (!%p138_p2)  }
   0xd   : > { %v2659_v23 = vld [vmem:[%s3826_s1 + $0x2a8] ss:$16 sps:$4 sm:$0xff]   ;;  %v2660_v24 = vld [vmem:[%s3826_s1 + $0x2c4] ss:$16 sps:$4 sm:$0xff]   ;;  %v2662_v25 = vld [vmem:[%s3826_s1 + $0x2cc] ss:$16 sps:$4 sm:$0xff]  }
   0xe   : > { %v2664_v26 = vld [vmem:[%s3826_s1 + $0x2c0] ss:$16 sps:$4 sm:$0xff]   ;;  %v2665_v27 = vld [vmem:[%s3826_s1 + $0x2c8] ss:$16 sps:$4 sm:$0xff]   ;;  %v2666_v28 = vld [vmem:[%s3826_s1 + $0x2e4] ss:$16 sps:$4 sm:$0xff]  }
   0xf   : > { %715 = vmatpush1.bf16.msra.mxu0 %v2640_v10  ;;  %776 = vmatpush1.bf16.msra.mxu1 %v2641_v11  ;;  %v2668_v29 = vld [vmem:[%s3826_s1 + $0x2ec] ss:$16 sps:$4 sm:$0xff]   ;;  %v2670_v30 = vld [vmem:[%s3826_s1 + $0x2e0] ss:$16 sps:$4 sm:$0xff]   ;;  %v2671_v31 = vld [vmem:[%s3826_s1 + $0x2e8] ss:$16 sps:$4 sm:$0xff]  }
  0x10   : > { %716 = vmatprep.subr.bf16.mxu0 %v2642_v12  ;;  %777 = vmatprep.subr.bf16.mxu1 %v2644_v13  ;;  %v2672_v32 = vld [vmem:[%s3826_s1 + $0x304] ss:$16 sps:$4 sm:$0xff]   ;;  %v2674_v33 = vld [vmem:[%s3826_s1 + $0x30c] ss:$16 sps:$4 sm:$0xff]   ;;  %v2676_v34 = vld [vmem:[%s3826_s1 + $0x300] ss:$16 sps:$4 sm:$0xff]  }
  0x11   : > { %v2677_v35 = vld [vmem:[%s3826_s1 + $0x308] ss:$16 sps:$4 sm:$0xff]   ;;  %s3834_s13 = smov (!%p161_p3, %s2219_s13), 1  ;;  %v2678_v36 = vld [vmem:[%s3826_s1 + $0x324] ss:$16 sps:$4 sm:$0xff]   ;;  %vm1364_vm1 = vcmask 1044480  }
  0x12   : > { %v2680_v37 = vld [vmem:[%s3826_s1 + $0x32c] ss:$16 sps:$4 sm:$0xff]   ;;  %v2682_v38 = vld [vmem:[%s3826_s1 + $0x320] ss:$16 sps:$4 sm:$0xff]   ;;  %s2614_s17 = smul.u32 48, %s3834_s13  ;;  %vm2002_vm2 = vcmask 1041408  }
  0x13   : > { %717 = vmatpush1.bf16.msra.mxu0 %v2646_v14  ;;  %778 = vmatpush1.bf16.msra.mxu1 %v2647_v15  ;;  %v2683_v39 = vld [vmem:[%s3826_s1 + $0x328] ss:$16 sps:$4 sm:$0xff]   ;;  %v2684_v40 = vld [vmem:[%s3826_s1 + $0x344] ss:$16 sps:$4 sm:$0xff]   ;;  %v2686_v41 = vld [vmem:[%s3826_s1 + $0x34c] ss:$16 sps:$4 sm:$0xff]  }
  0x14   : > { %718 = vmatprep.subr.bf16.mxu0 %v2648_v16  ;;  %779 = vmatprep.subr.bf16.mxu1 %v2650_v17  ;;  %v2688_v42 = vld [vmem:[%s3826_s1 + $0x340] ss:$16 sps:$4 sm:$0xff]   ;;  %v2689_v43 = vld [vmem:[%s3826_s1 + $0x348] ss:$16 sps:$4 sm:$0xff]   ;;  %s3105_s30 = scalar_lea.vmem %s3825_s0, %s2614_s17  ;;  %v2690_v44 = vld [vmem:[%s3826_s1 + $0x364] ss:$16 sps:$4 sm:$0xff]  }
  0x15   : > { %v2692_v45 = vld [vmem:[%s3826_s1 + $0x36c] ss:$16 sps:$4 sm:$0xff]   ;;  %v2694_v46 = vld [vmem:[%s3826_s1 + $0x360] ss:$16 sps:$4 sm:$0xff]   ;;  %v2695_v47 = vld [vmem:[%s3826_s1 + $0x368] ss:$16 sps:$4 sm:$0xff]  }
  0x16   : > { %v3120_v48 = vld [vmem:[%s3105_s30 + $0x8] sm:$0xff]  ;;  %v240_v49 = vld [vmem:[%s3105_s30] sm:$0xee]  ;;  %v3125_v51 = vld [vmem:[%s3105_s30 + $0x14] ss:$8 sps:$4 sm:$0xff]   ;;  %s2615_s15 = smul.u32 80, %s3834_s13 }
  0x17   : > { %719 = vmatpush1.bf16.msra.mxu0 %v2652_v18  ;;  %780 = vmatpush1.bf16.msra.mxu1 %v2653_v19  ;;  %v2291_v50 = vcombine.high %v240_v49, %v3120_v48  ;;  %v2696_v52 = vld [vmem:[%s3826_s1 + $0x384] ss:$16 sps:$4 sm:$0xff]   ;;  %v2698_v53 = vld [vmem:[%s3826_s1 + $0x38c] ss:$16 sps:$4 sm:$0xff]   ;;  %v358_v56 = vshrl.u32 %v3125_v51, 16  ;;  %v361_v57 = vshll.u32 %v3125_v51, 16  ;;  %v2290_v60 = vcombine.low %v240_v49, %v3120_v48 }
  0x18   : > { %720 = vmatprep.subr.bf16.mxu0 %v2654_v20  ;;  %781 = vmatprep.subr.bf16.mxu1 %v2656_v21  ;;  %v2700_v58 = vld [vmem:[%s3826_s1 + $0x380] ss:$16 sps:$4 sm:$0xff]   ;;  %v2701_v59 = vld [vmem:[%s3826_s1 + $0x388] ss:$16 sps:$4 sm:$0xff]   ;;  %v2702_v2 = vld [vmem:[%s3826_s1 + $0x3a4] ss:$16 sps:$4 sm:$0xff]   ;;  %s3689_s17 = scalar_lea.vmem %s3828_s3, %s2615_s15 }
  0x19   : > { %v350_v54 = vshrl.u32 %v2291_v50, 16  ;;  %v353_v55 = vshll.u32 %v2291_v50, 16  ;;  %v3143_v61 = vld [vmem:[%s3105_s30 + $0x10] ss:$8 sps:$4 sm:$0xff]   ;;  %v360_v0 = vrot.slane %v358_v56, 1  ;;  %v363_v1 = vrot.slane %v361_v57, 2 }
  0x1a   : > { %v2704_v3 = vld [vmem:[%s3826_s1 + $0x3ac] ss:$16 sps:$4 sm:$0xff]   ;;  %vm331_vm0 = vsmask.f32 6400  ;;  %v2706_v4 = vld [vmem:[%s3826_s1 + $0x3a0] ss:$16 sps:$4 sm:$0xff]  }
  0x1b   : > { %721 = vmatpush1.bf16.msra.mxu0 %v2658_v22  ;;  %782 = vmatpush1.bf16.msra.mxu1 %v2659_v23  ;;  %v352_v62 = vrot.slane %v350_v54, 1  ;;  %v355_v63 = vrot.slane %v353_v55, 2  ;;  %v3154_v6 = vor.u32 %v363_v1, %v360_v0  ;;  %v2707_v7 = vld [vmem:[%s3826_s1 + $0x3a8] ss:$16 sps:$4 sm:$0xff]   ;;  %v2708_v8 = vld [vmem:[%s3826_s1 + $0x3c4] ss:$16 sps:$4 sm:$0xff]  }
  0x1c   : > { %722 = vmatprep.subr.bf16.mxu0 %v2660_v24  ;;  %783 = vmatprep.subr.bf16.mxu1 %v2662_v25  ;;  %v333_v9 = vshrl.u32 %v2290_v60, 16  ;;  %v336_v11 = vshll.u32 %v2290_v60, 16  ;;  %v341_v12 = vshrl.u32 %v3143_v61, 16  ;;  %v344_v13 = vshll.u32 %v3143_v61, 16  ;;  %v2710_v14 = vld [vmem:[%s3826_s1 + $0x3cc] ss:$16 sps:$4 sm:$0xff]  }
  0x1d   : > { %v356_v5 = vor.u32 %v355_v63, %v352_v62  ;;  %v2712_v15 = vld [vmem:[%s3826_s1 + $0x3c0] ss:$16 sps:$4 sm:$0xff]   ;;  %v2713_v16 = vld [vmem:[%s3826_s1 + $0x3c8] ss:$16 sps:$4 sm:$0xff]   ;;  %v2714_v17 = vld [vmem:[%s3826_s1 + $0x3e4] ss:$16 sps:$4 sm:$0xff]  }
  0x1e   : > { %v335_v18 = vrot.slane %v333_v9, 1  ;;  %v338_v19 = vrot.slane %v336_v11, 2  ;;  %v343_v20 = vrot.slane %v341_v12, 1  ;;  %v346_v21 = vrot.slane %v344_v13, 2  ;;  %v2716_v22 = vld [vmem:[%s3826_s1 + $0x3ec] ss:$16 sps:$4 sm:$0xff]  }
  0x1f   : > { %723 = vmatpush1.bf16.msra.mxu0 %v2664_v26  ;;  %784 = vmatpush1.bf16.msra.mxu1 %v2665_v27  ;;  %v365_v10 = vsel %vm331_vm0, %v356_v5, %v3154_v6  ;;  %v2718_v23 = vld [vmem:[%s3826_s1 + $0x3e0] ss:$16 sps:$4 sm:$0xff]   ;;  %v2719_v24 = vld [vmem:[%s3826_s1 + $0x3e8] ss:$16 sps:$4 sm:$0xff]   ;;  %v2725_v25 = vld [vmem:[%s3826_s1 + $0x4] ss:$16 sps:$4 sm:$0xff]  }
  0x20   : > { %724 = vmatprep.subr.bf16.mxu0 %v2666_v28  ;;  %785 = vmatprep.subr.bf16.mxu1 %v2668_v29  ;;  %v339_v26 = vor.u32 %v338_v19, %v335_v18  ;;  %v3190_v27 = vor.u32 %v346_v21, %v343_v20  ;;  %v2728_v28 = vld [vmem:[%s3826_s1 + $0xc] ss:$16 sps:$4 sm:$0xff]   ;;  %v2723_v29 = vld [vmem:[%s3826_s1] ss:$16 sps:$4 sm:$0xff]   ;;  %v2752_v50 = vld [vmem:[%s3826_s1 + $0x88] ss:$16 sps:$4 sm:$0xff]  }
  0x21   : > { %742 = vmatprep.mubr.bf16.mxu0 %v365_v10  ;;  %803 = vmatprep.mubr.bf16.mxu1 %v365_v10  ;;  %v2749_v49 = vld [vmem:[%s3826_s1 + $0x80] ss:$16 sps:$4 sm:$0xff]   ;;  %v2757_v54 = vld [vmem:[%s3826_s1 + $0xa4] ss:$16 sps:$4 sm:$0xff]   ;;  %v2760_v55 = vld [vmem:[%s3826_s1 + $0xac] ss:$16 sps:$4 sm:$0xff]  }
  0x22   : > { %v2755_v60 = vld [vmem:[%s3826_s1 + $0xa0] ss:$16 sps:$4 sm:$0xff]   ;;  %v2758_v62 = vld [vmem:[%s3826_s1 + $0xa8] ss:$16 sps:$4 sm:$0xff]   ;;  %v2769_v10 = vld [vmem:[%s3826_s1 + $0xe4] ss:$16 sps:$4 sm:$0xff]  }
  0x23   : > { %725 = vmatpush1.bf16.msra.mxu0 %v2670_v30  ;;  %786 = vmatpush1.bf16.msra.mxu1 %v2671_v31  ;;  %v2726_v30 = vld [vmem:[%s3826_s1 + $0x8] ss:$16 sps:$4 sm:$0xff]   ;;  %v348_v31 = vsel %vm331_vm0, %v339_v26, %v3190_v27  ;;  %v2772_v13 = vld [vmem:[%s3826_s1 + $0xec] ss:$16 sps:$4 sm:$0xff]   ;;  %v3307_v18 = vld [vmem:[%s3105_s30] sm:$0xff]  ;;  %vm2151_vm3 = vcmask 1040384  }
  0x24   : > { %726 = vmatprep.subr.bf16.mxu0 %v2672_v32  ;;  %787 = vmatprep.subr.bf16.mxu1 %v2674_v33  ;;  %v2733_v32 = vld [vmem:[%s3826_s1 + $0x24] ss:$16 sps:$4 sm:$0xff]   ;;  %v2736_v33 = vld [vmem:[%s3826_s1 + $0x2c] ss:$16 sps:$4 sm:$0xff]   ;;  %v2764_v9 = vld [vmem:[%s3826_s1 + $0xc8] ss:$16 sps:$4 sm:$0xff]  }
  0x25   : > { %v2776_v19 = vld [vmem:[%s3826_s1 + $0x108] ss:$16 sps:$4 sm:$0xff]   ;;  %v2781_v20 = vld [vmem:[%s3826_s1 + $0x124] ss:$16 sps:$4 sm:$0xff]   ;;  %v2784_v21 = vld [vmem:[%s3826_s1 + $0x12c] ss:$16 sps:$4 sm:$0xff]  }
  0x26   : > { %v2790_v26 = vld [vmem:[%s3826_s1 + $0x14c] ss:$16 sps:$4 sm:$0xff]   ;;  %vm2152_vm4 = vsmask.f32 256  ;;  %vm2154_vm5 = vcmask 1044484  }
  0x27   : > { %727 = vmatpush1.bf16.msra.mxu0 %v2676_v34  ;;  %788 = vmatpush1.bf16.msra.mxu1 %v2677_v35  ;;  %v2731_v34 = vld [vmem:[%s3826_s1 + $0x20] ss:$16 sps:$4 sm:$0xff]   ;;  %v2734_v35 = vld [vmem:[%s3826_s1 + $0x28] ss:$16 sps:$4 sm:$0xff]   ;;  %vm2155_vm6 = vsmask.f32 4352  ;;  %vm3784_vm7 = vmand %vm2151_vm3, %vm2152_vm4 }
  0x28   : > { %728 = vmatprep.subr.bf16.mxu0 %v2678_v36  ;;  %789 = vmatprep.subr.bf16.mxu1 %v2680_v37  ;;  %v2739_v36 = vld [vmem:[%s3826_s1 + $0x44] ss:$16 sps:$4 sm:$0xff]   ;;  %v2742_v37 = vld [vmem:[%s3826_s1 + $0x4c] ss:$16 sps:$4 sm:$0xff]   ;;  %vm3793_vm8 = vmand %vm2154_vm5, %vm2155_vm6 }
  0x29   : > { %vm2157_vm9 = vmor %vm3793_vm8, %vm3784_vm7 }
  0x2b   : > { %729 = vmatpush1.bf16.msra.mxu0 %v2682_v38  ;;  %790 = vmatpush1.bf16.msra.mxu1 %v2683_v39  ;;  %v2737_v38 = vld [vmem:[%s3826_s1 + $0x40] ss:$16 sps:$4 sm:$0xff]   ;;  %v2740_v39 = vld [vmem:[%s3826_s1 + $0x48] ss:$16 sps:$4 sm:$0xff]  }
  0x2c   : > { %730 = vmatprep.subr.bf16.mxu0 %v2684_v40  ;;  %791 = vmatprep.subr.bf16.mxu1 %v2686_v41  ;;  %v2745_v40 = vld [vmem:[%s3826_s1 + $0x64] ss:$16 sps:$4 sm:$0xff]   ;;  %v2748_v41 = vld [vmem:[%s3826_s1 + $0x6c] ss:$16 sps:$4 sm:$0xff]  }
  0x2f   : > { %731 = vmatpush1.bf16.msra.mxu0 %v2688_v42  ;;  %792 = vmatpush1.bf16.msra.mxu1 %v2689_v43  ;;  %v2743_v42 = vld [vmem:[%s3826_s1 + $0x60] ss:$16 sps:$4 sm:$0xff]   ;;  %v2746_v43 = vld [vmem:[%s3826_s1 + $0x68] ss:$16 sps:$4 sm:$0xff]  }
  0x30   : > { %732 = vmatprep.subr.bf16.mxu0 %v2690_v44  ;;  %793 = vmatprep.subr.bf16.mxu1 %v2692_v45  ;;  %v2751_v44 = vld [vmem:[%s3826_s1 + $0x84] ss:$16 sps:$4 sm:$0xff]   ;;  %v2754_v45 = vld [vmem:[%s3826_s1 + $0x8c] ss:$16 sps:$4 sm:$0xff]  }
  0x33   : > { %733 = vmatpush1.bf16.msra.mxu0 %v2694_v46  ;;  %794 = vmatpush1.bf16.msra.mxu1 %v2695_v47  ;;  %v3246_v46 = vld [vmem:[%s3105_s30 + $0x20] sm:$0xff]  ;;  %v241_v47 = vld [vmem:[%s3105_s30 + $0x28] sm:$0x11] }
  0x34   : > { %734 = vmatprep.subr.bf16.mxu0 %v2696_v52  ;;  %795 = vmatprep.subr.bf16.mxu1 %v2698_v53  ;;  %v2295_v52 = vcombine.high %v3246_v46, %v241_v47  ;;  %v2294_v53 = vcombine.low %v3246_v46, %v241_v47  ;;  %v2822_v47 = vld [vmem:[%s3826_s1 + $0x1ec] ss:$16 sps:$4 sm:$0xff]  }
  0x36   : > { %v376_v56 = vshrl.u32 %v2295_v52, 16  ;;  %v379_v57 = vshll.u32 %v2295_v52, 16  ;;  %v2827_v52 = vld [vmem:[%s3826_s1 + $0x404] ss:$16 sps:$4 sm:$0xff]  }
  0x37   : > { %735 = vmatpush1.bf16.msra.mxu0 %v2700_v58  ;;  %796 = vmatpush1.bf16.msra.mxu1 %v2701_v59  ;;  %v367_v58 = vshrl.u32 %v2294_v53, 16  ;;  %v370_v59 = vshll.u32 %v2294_v53, 16  ;;  %v2830_v53 = vld [vmem:[%s3826_s1 + $0x40c] ss:$16 sps:$4 sm:$0xff]  }
  0x38   : > { %736 = vmatprep.subr.bf16.mxu0 %v2702_v2  ;;  %797 = vmatprep.subr.bf16.mxu1 %v2704_v3  ;;  %v378_v63 = vrot.slane %v376_v56, 1  ;;  %v381_v0 = vrot.slane %v379_v57, 2  ;;  %v2763_v3 = vld [vmem:[%s3826_s1 + $0xc4] ss:$16 sps:$4 sm:$0xff]   ;;  %v2828_v56 = vld [vmem:[%s3826_s1 + $0x408] ss:$16 sps:$4 sm:$0xff]  }
  0x39   : > { %v369_v1 = vrot.slane %v367_v58, 1  ;;  %v372_v2 = vrot.slane %v370_v59, 2  ;;  %v2833_v57 = vld [vmem:[%s3826_s1 + $0x424] ss:$16 sps:$4 sm:$0xff]   ;;  %v2836_v58 = vld [vmem:[%s3826_s1 + $0x42c] ss:$16 sps:$4 sm:$0xff]  }
  0x3a   : > { %v382_v5 = vor.u32 %v381_v0, %v378_v63  ;;  %v2831_v59 = vld [vmem:[%s3826_s1 + $0x420] ss:$16 sps:$4 sm:$0xff]   ;;  %v2842_v63 = vld [vmem:[%s3826_s1 + $0x44c] ss:$16 sps:$4 sm:$0xff]  }
  0x3b   : > { %737 = vmatpush1.bf16.msra.mxu0 %v2706_v4  ;;  %798 = vmatpush1.bf16.msra.mxu1 %v2707_v7  ;;  %v2766_v4 = vld [vmem:[%s3826_s1 + $0xcc] ss:$16 sps:$4 sm:$0xff]   ;;  %v373_v7 = vor.u32 %v372_v2, %v369_v1  ;;  %v2837_v0 = vld [vmem:[%s3826_s1 + $0x440] ss:$16 sps:$4 sm:$0xff]   ;;  %v2840_v1 = vld [vmem:[%s3826_s1 + $0x448] ss:$16 sps:$4 sm:$0xff]  }
  0x3c   : > { %738 = vmatprep.subr.bf16.mxu0 %v2708_v8  ;;  %799 = vmatprep.subr.bf16.mxu1 %v2710_v14  ;;  %v2761_v8 = vld [vmem:[%s3826_s1 + $0xc0] ss:$16 sps:$4 sm:$0xff]   ;;  %v383_v11 = vsel %vm331_vm0, %v3154_v6, %v382_v5  ;;  %v2770_v6 = vld [vmem:[%s3826_s1 + $0xe8] ss:$16 sps:$4 sm:$0xff]  }
  0x3d   : > { %v374_v12 = vsel %vm331_vm0, %v3190_v27, %v373_v7  ;;  %v2767_v14 = vld [vmem:[%s3826_s1 + $0xe0] ss:$16 sps:$4 sm:$0xff]  }
  0x3e   : > { %v2785_v27 = vld [vmem:[%s3826_s1 + $0x140] ss:$16 sps:$4 sm:$0xff]  }
  0x3f   : > { %739 = vmatpush1.bf16.msra.mxu0 %v2712_v15  ;;  %800 = vmatpush1.bf16.msra.mxu1 %v2713_v16  ;;  %v2775_v15 = vld [vmem:[%s3826_s1 + $0x104] ss:$16 sps:$4 sm:$0xff]   ;;  %v2778_v16 = vld [vmem:[%s3826_s1 + $0x10c] ss:$16 sps:$4 sm:$0xff]  }
  0x40   : > { %740 = vmatprep.subr.bf16.mxu0 %v2714_v17  ;;  %801 = vmatprep.subr.bf16.mxu1 %v2716_v22  ;;  %v2773_v17 = vld [vmem:[%s3826_s1 + $0x100] ss:$16 sps:$4 sm:$0xff]   ;;  %v2361_v22 = vcombine.high %v3307_v18, %v3120_v48 }
  0x41   : > { %v3439_v2 = vld [vmem:[%s3105_s30] sm:$0x88] }
  0x43   : > { %741 = vmatpush1.bf16.msra.mxu0 %v2718_v23  ;;  %802 = vmatpush1.bf16.msra.mxu1 %v2719_v24  ;;  %v2779_v23 = vld [vmem:[%s3826_s1 + $0x120] ss:$16 sps:$4 sm:$0xff]   ;;  %v2782_v24 = vld [vmem:[%s3826_s1 + $0x128] ss:$16 sps:$4 sm:$0xff]  }
  0x44   : > { %1165 = vmatprep.subr.bf16.mxu0 %v2725_v25  ;;  %1226 = vmatprep.subr.bf16.mxu1 %v2728_v28  ;;  %v2787_v25 = vld [vmem:[%s3826_s1 + $0x144] ss:$16 sps:$4 sm:$0xff]   ;;  %v2788_v28 = vld [vmem:[%s3826_s1 + $0x148] ss:$16 sps:$4 sm:$0xff]  }
  0x46   : > { %743 = vmatmul.mubr.bf16.vlgmr.msra.gmra.mrb[0].mxu0 %v348_v31  ;;  %804 = vmatmul.mubr.bf16.vlgmr.msra.gmra.mrb[0].mxu1 %v348_v31  ;;  %v2791_v31 = vld [vmem:[%s3826_s1 + $0x160] ss:$16 sps:$4 sm:$0xff]  }
  0x47   : > { %1166 = vmatpush1.bf16.msra.mxu0 %v2723_v29  ;;  %1227 = vmatpush1.bf16.msra.mxu1 %v2726_v30  ;;  %v2793_v29 = vld [vmem:[%s3826_s1 + $0x164] ss:$16 sps:$4 sm:$0xff]   ;;  %v2796_v30 = vld [vmem:[%s3826_s1 + $0x16c] ss:$16 sps:$4 sm:$0xff]  }
  0x48   : > { %1167 = vmatprep.subr.bf16.mxu0 %v2733_v32  ;;  %1228 = vmatprep.subr.bf16.mxu1 %v2736_v33  ;;  %v2794_v32 = vld [vmem:[%s3826_s1 + $0x168] ss:$16 sps:$4 sm:$0xff]   ;;  %v2801_v33 = vld [vmem:[%s3826_s1 + $0x184] ss:$16 sps:$4 sm:$0xff]  }
  0x49   : > { %752 = vmatprep.mubr.bf16.mxu0 %v383_v11  ;;  %813 = vmatprep.mubr.bf16.mxu1 %v383_v11  ;;  %v2856_v11 = vld [vmem:[%s3826_s1 + $0x48c] ss:$16 sps:$4 sm:$0xff]  }
  0x4b   : > { %1168 = vmatpush1.bf16.msra.mxu0 %v2731_v34  ;;  %1229 = vmatpush1.bf16.msra.mxu1 %v2734_v35  ;;  %v2804_v34 = vld [vmem:[%s3826_s1 + $0x18c] ss:$16 sps:$4 sm:$0xff]   ;;  %v2799_v35 = vld [vmem:[%s3826_s1 + $0x180] ss:$16 sps:$4 sm:$0xff]  }
  0x4c   : > { %1169 = vmatprep.subr.bf16.mxu0 %v2739_v36  ;;  %1230 = vmatprep.subr.bf16.mxu1 %v2742_v37  ;;  %v2802_v36 = vld [vmem:[%s3826_s1 + $0x188] ss:$16 sps:$4 sm:$0xff]   ;;  %v2807_v37 = vld [vmem:[%s3826_s1 + $0x1a4] ss:$16 sps:$4 sm:$0xff]  }
  0x4e   : > { %753 = vmatmul.mubr.bf16.gmra.mrb[4].mxu0 %v374_v12  ;;  %814 = vmatmul.mubr.bf16.gmra.mrb[4].mxu1 %v374_v12  ;;  %v2362_v12 = vcombine.low %v3246_v46, %v3246_v46 }
  0x4f   : > { %1170 = vmatpush1.bf16.msra.mxu0 %v2737_v38  ;;  %1231 = vmatpush1.bf16.msra.mxu1 %v2740_v39  ;;  %v2810_v38 = vld [vmem:[%s3826_s1 + $0x1ac] ss:$16 sps:$4 sm:$0xff]   ;;  %v2805_v39 = vld [vmem:[%s3826_s1 + $0x1a0] ss:$16 sps:$4 sm:$0xff]  }
  0x50   : > { %1171 = vmatprep.subr.bf16.mxu0 %v2745_v40  ;;  %1232 = vmatprep.subr.bf16.mxu1 %v2748_v41  ;;  %v2808_v40 = vld [vmem:[%s3826_s1 + $0x1a8] ss:$16 sps:$4 sm:$0xff]   ;;  %v2813_v41 = vld [vmem:[%s3826_s1 + $0x1c4] ss:$16 sps:$4 sm:$0xff]  }
  0x51   : > { %762 = vmatprep.mubr.bf16.mxu0 %v382_v5  ;;  %823 = vmatprep.mubr.bf16.mxu1 %v382_v5  ;;  %v2363_v5 = vcombine.high %v3246_v46, %v3246_v46 }
  0x53   : > { %1172 = vmatpush1.bf16.msra.mxu0 %v2743_v42  ;;  %1233 = vmatpush1.bf16.msra.mxu1 %v2746_v43  ;;  %v2816_v42 = vld [vmem:[%s3826_s1 + $0x1cc] ss:$16 sps:$4 sm:$0xff]   ;;  %v2811_v43 = vld [vmem:[%s3826_s1 + $0x1c0] ss:$16 sps:$4 sm:$0xff]  }
  0x54   : > { %1173 = vmatprep.subr.bf16.mxu0 %v2751_v44  ;;  %1234 = vmatprep.subr.bf16.mxu1 %v2754_v45  ;;  %v2814_v44 = vld [vmem:[%s3826_s1 + $0x1c8] ss:$16 sps:$4 sm:$0xff]   ;;  %v2819_v45 = vld [vmem:[%s3826_s1 + $0x1e4] ss:$16 sps:$4 sm:$0xff]  }
  0x56   : > { %763 = vmatmul.mubr.bf16.gmra.mrb[8].mxu0 %v373_v7  ;;  %824 = vmatmul.mubr.bf16.gmra.mrb[8].mxu1 %v373_v7  ;;  %v2493_v7 = vcombine.high %v3439_v2, %v3120_v48 }
  0x57   : > { %1174 = vmatpush1.bf16.msra.mxu0 %v2749_v49  ;;  %1235 = vmatpush1.bf16.msra.mxu1 %v2752_v50  ;;  %v2817_v49 = vld [vmem:[%s3826_s1 + $0x1e0] ss:$16 sps:$4 sm:$0xff]   ;;  %v2820_v50 = vld [vmem:[%s3826_s1 + $0x1e8] ss:$16 sps:$4 sm:$0xff]  }
  0x58   : > { %1175 = vmatprep.subr.bf16.mxu0 %v2757_v54  ;;  %1236 = vmatprep.subr.bf16.mxu1 %v2760_v55  ;;  %v2360_v54 = vcombine.low %v3307_v18, %v3120_v48  ;;  %v2825_v55 = vld [vmem:[%s3826_s1 + $0x400] ss:$16 sps:$4 sm:$0xff]  }
  0x59   : > { %1197 = vmatprep.mubr.bf16.mxu0 %v2361_v22  ;;  %1258 = vmatprep.mubr.bf16.mxu1 %v2361_v22  ;;  %v2868_v22 = vld [vmem:[%s3826_s1 + $0x4cc] ss:$16 sps:$4 sm:$0xff]  }
  0x5b   : > { %1176 = vmatpush1.bf16.msra.mxu0 %v2755_v60  ;;  %1237 = vmatpush1.bf16.msra.mxu1 %v2758_v62  ;;  %v2834_v60 = vld [vmem:[%s3826_s1 + $0x428] ss:$16 sps:$4 sm:$0xff]   ;;  %v2839_v62 = vld [vmem:[%s3826_s1 + $0x444] ss:$16 sps:$4 sm:$0xff]  }
  0x5c   : > { %1177 = vmatprep.subr.bf16.mxu0 %v2763_v3  ;;  %1238 = vmatprep.subr.bf16.mxu1 %v2766_v4  ;;  %v2845_v3 = vld [vmem:[%s3826_s1 + $0x464] ss:$16 sps:$4 sm:$0xff]   ;;  %v2848_v4 = vld [vmem:[%s3826_s1 + $0x46c] ss:$16 sps:$4 sm:$0xff]  }
  0x5f   : > { %1178 = vmatpush1.bf16.msra.mxu0 %v2761_v8  ;;  %1239 = vmatpush1.bf16.msra.mxu1 %v2764_v9  ;;  %v2843_v8 = vld [vmem:[%s3826_s1 + $0x460] ss:$16 sps:$4 sm:$0xff]   ;;  %v2846_v9 = vld [vmem:[%s3826_s1 + $0x468] ss:$16 sps:$4 sm:$0xff]  }
  0x60   : > { %1179 = vmatprep.subr.bf16.mxu0 %v2769_v10  ;;  %1240 = vmatprep.subr.bf16.mxu1 %v2772_v13  ;;  %v2853_v10 = vld [vmem:[%s3826_s1 + $0x484] ss:$16 sps:$4 sm:$0xff]   ;;  %v1368_v13 = vrot.slane %v2493_v7, 3 }
  0x63   : > { %1180 = vmatpush1.bf16.msra.mxu0 %v2767_v14  ;;  %1241 = vmatpush1.bf16.msra.mxu1 %v2770_v6  ;;  %v1369_v14 = vrot.slane %v3125_v51, 3  ;;  %v2851_v6 = vld [vmem:[%s3826_s1 + $0x480] ss:$16 sps:$4 sm:$0xff]  }
  0x64   : > { %1181 = vmatprep.subr.bf16.mxu0 %v2775_v15  ;;  %1242 = vmatprep.subr.bf16.mxu1 %v2778_v16  ;;  %v2854_v15 = vld [vmem:[%s3826_s1 + $0x488] ss:$16 sps:$4 sm:$0xff]   ;;  %v2859_v16 = vld [vmem:[%s3826_s1 + $0x4a4] ss:$16 sps:$4 sm:$0xff]  }
  0x65   : > { %v1370_v18 = vsel %vm1364_vm1, %v1368_v13, %v1369_v14 }
  0x67   : > { %1182 = vmatpush1.bf16.msra.mxu0 %v2773_v17  ;;  %1243 = vmatpush1.bf16.msra.mxu1 %v2776_v19  ;;  %v2862_v17 = vld [vmem:[%s3826_s1 + $0x4ac] ss:$16 sps:$4 sm:$0xff]   ;;  %v2857_v19 = vld [vmem:[%s3826_s1 + $0x4a0] ss:$16 sps:$4 sm:$0xff]  }
  0x68   : > { %1183 = vmatprep.subr.bf16.mxu0 %v2781_v20  ;;  %1244 = vmatprep.subr.bf16.mxu1 %v2784_v21  ;;  %v2860_v20 = vld [vmem:[%s3826_s1 + $0x4a8] ss:$16 sps:$4 sm:$0xff]   ;;  %v2865_v21 = vld [vmem:[%s3826_s1 + $0x4c4] ss:$16 sps:$4 sm:$0xff]  }
  0x6b   : > { %1184 = vmatpush1.bf16.msra.mxu0 %v2779_v23  ;;  %1245 = vmatpush1.bf16.msra.mxu1 %v2782_v24  ;;  %v2863_v23 = vld [vmem:[%s3826_s1 + $0x4c0] ss:$16 sps:$4 sm:$0xff]   ;;  %v2866_v24 = vld [vmem:[%s3826_s1 + $0x4c8] ss:$16 sps:$4 sm:$0xff]  }
  0x6c   : > { %1185 = vmatprep.subr.bf16.mxu0 %v2787_v25  ;;  %1246 = vmatprep.subr.bf16.mxu1 %v2790_v26  ;;  %v2871_v25 = vld [vmem:[%s3826_s1 + $0x4e4] ss:$16 sps:$4 sm:$0xff]   ;;  %v2874_v26 = vld [vmem:[%s3826_s1 + $0x4ec] ss:$16 sps:$4 sm:$0xff]  }
  0x6f   : > { %1186 = vmatpush1.bf16.msra.mxu0 %v2785_v27  ;;  %1247 = vmatpush1.bf16.msra.mxu1 %v2788_v28  ;;  %v2869_v27 = vld [vmem:[%s3826_s1 + $0x4e0] ss:$16 sps:$4 sm:$0xff]   ;;  %v2872_v28 = vld [vmem:[%s3826_s1 + $0x4e8] ss:$16 sps:$4 sm:$0xff]  }
  0x70   : > { %1187 = vmatprep.subr.bf16.mxu0 %v2793_v29  ;;  %1248 = vmatprep.subr.bf16.mxu1 %v2796_v30  ;;  %v2877_v29 = vld [vmem:[%s3826_s1 + $0x504] ss:$16 sps:$4 sm:$0xff]   ;;  %v2880_v30 = vld [vmem:[%s3826_s1 + $0x50c] ss:$16 sps:$4 sm:$0xff]  }
  0x73   : > { %1188 = vmatpush1.bf16.msra.mxu0 %v2791_v31  ;;  %1249 = vmatpush1.bf16.msra.mxu1 %v2794_v32  ;;  %v2875_v31 = vld [vmem:[%s3826_s1 + $0x500] ss:$16 sps:$4 sm:$0xff]   ;;  %v2878_v32 = vld [vmem:[%s3826_s1 + $0x508] ss:$16 sps:$4 sm:$0xff]  }
  0x74   : > { %1189 = vmatprep.subr.bf16.mxu0 %v2801_v33  ;;  %1250 = vmatprep.subr.bf16.mxu1 %v2804_v34  ;;  %v2883_v33 = vld [vmem:[%s3826_s1 + $0x524] ss:$16 sps:$4 sm:$0xff]   ;;  %v2886_v34 = vld [vmem:[%s3826_s1 + $0x52c] ss:$16 sps:$4 sm:$0xff]  }
  0x77   : > { %1190 = vmatpush1.bf16.msra.mxu0 %v2799_v35  ;;  %1251 = vmatpush1.bf16.msra.mxu1 %v2802_v36  ;;  %v2881_v35 = vld [vmem:[%s3826_s1 + $0x520] ss:$16 sps:$4 sm:$0xff]   ;;  %v2884_v36 = vld [vmem:[%s3826_s1 + $0x528] ss:$16 sps:$4 sm:$0xff]  }
  0x78   : > { %1191 = vmatprep.subr.bf16.mxu0 %v2807_v37  ;;  %1252 = vmatprep.subr.bf16.mxu1 %v2810_v38  ;;  %v2889_v37 = vld [vmem:[%s3826_s1 + $0x544] ss:$16 sps:$4 sm:$0xff]   ;;  %v2892_v38 = vld [vmem:[%s3826_s1 + $0x54c] ss:$16 sps:$4 sm:$0xff]  }
  0x7b   : > { %1192 = vmatpush1.bf16.msra.mxu0 %v2805_v39  ;;  %1253 = vmatpush1.bf16.msra.mxu1 %v2808_v40  ;;  %v2887_v39 = vld [vmem:[%s3826_s1 + $0x540] ss:$16 sps:$4 sm:$0xff]   ;;  %v2890_v40 = vld [vmem:[%s3826_s1 + $0x548] ss:$16 sps:$4 sm:$0xff]  }
  0x7c   : > { %1193 = vmatprep.subr.bf16.mxu0 %v2813_v41  ;;  %1254 = vmatprep.subr.bf16.mxu1 %v2816_v42  ;;  %v2895_v41 = vld [vmem:[%s3826_s1 + $0x564] ss:$16 sps:$4 sm:$0xff]   ;;  %v2898_v42 = vld [vmem:[%s3826_s1 + $0x56c] ss:$16 sps:$4 sm:$0xff]  }
  0x7f   : > { %1194 = vmatpush1.bf16.msra.mxu0 %v2811_v43  ;;  %1255 = vmatpush1.bf16.msra.mxu1 %v2814_v44  ;;  %v2893_v43 = vld [vmem:[%s3826_s1 + $0x560] ss:$16 sps:$4 sm:$0xff]   ;;  %v2896_v44 = vld [vmem:[%s3826_s1 + $0x568] ss:$16 sps:$4 sm:$0xff]  }
  0x80   : > { %1195 = vmatprep.subr.bf16.mxu0 %v2819_v45  ;;  %1256 = vmatprep.subr.bf16.mxu1 %v2822_v47  ;;  %v2901_v45 = vld [vmem:[%s3826_s1 + $0x584] ss:$16 sps:$4 sm:$0xff]   ;;  %v2904_v47 = vld [vmem:[%s3826_s1 + $0x58c] ss:$16 sps:$4 sm:$0xff]  }
  0x83   : > { %1196 = vmatpush1.bf16.msra.mxu0 %v2817_v49  ;;  %1257 = vmatpush1.bf16.msra.mxu1 %v2820_v50  ;;  %v2899_v49 = vld [vmem:[%s3826_s1 + $0x580] ss:$16 sps:$4 sm:$0xff]   ;;  %v2902_v50 = vld [vmem:[%s3826_s1 + $0x588] ss:$16 sps:$4 sm:$0xff]  }
  0x84   : > { %1701 = vmatprep.subr.bf16.mxu0 %v2827_v52  ;;  %1762 = vmatprep.subr.bf16.mxu1 %v2830_v53  ;;  %v2907_v52 = vld [vmem:[%s3826_s1 + $0x5a4] ss:$16 sps:$4 sm:$0xff]   ;;  %v2910_v53 = vld [vmem:[%s3826_s1 + $0x5ac] ss:$16 sps:$4 sm:$0xff]  }
  0x86   : > { %1198 = vmatmul.mubr.bf16.vlgmr.msra.gmra.mrb[0].mxu0 %v2360_v54  ;;  %1259 = vmatmul.mubr.bf16.vlgmr.msra.gmra.mrb[0].mxu1 %v2360_v54  ;;  %v2905_v54 = vld [vmem:[%s3826_s1 + $0x5a0] ss:$16 sps:$4 sm:$0xff]  }
  0x87   : > { %1702 = vmatpush1.bf16.msra.mxu0 %v2825_v55  ;;  %1763 = vmatpush1.bf16.msra.mxu1 %v2828_v56  ;;  %v2908_v55 = vld [vmem:[%s3826_s1 + $0x5a8] ss:$16 sps:$4 sm:$0xff]   ;;  %v2913_v56 = vld [vmem:[%s3826_s1 + $0x5c4] ss:$16 sps:$4 sm:$0xff]  }
  0x88   : > { %1703 = vmatprep.subr.bf16.mxu0 %v2833_v57  ;;  %1764 = vmatprep.subr.bf16.mxu1 %v2836_v58  ;;  %v2916_v57 = vld [vmem:[%s3826_s1 + $0x5cc] ss:$16 sps:$4 sm:$0xff]  }
  0x89   : > { %1207 = vmatprep.mubr.bf16.mxu0 %v3125_v51  ;;  %1268 = vmatprep.mubr.bf16.mxu1 %v3125_v51  ;;  %v1288_v58 = vld [vmem:[%s3105_s30 + $0x28] sm:$0x77] }
  0x8b   : > { %1704 = vmatpush1.bf16.msra.mxu0 %v2831_v59  ;;  %1765 = vmatpush1.bf16.msra.mxu1 %v2834_v60  ;;  %v2911_v59 = vld [vmem:[%s3826_s1 + $0x5c0] ss:$16 sps:$4 sm:$0xff]   ;;  %v2914_v60 = vld [vmem:[%s3826_s1 + $0x5c8] ss:$16 sps:$4 sm:$0xff]  }
  0x8c   : > { %1705 = vmatprep.subr.bf16.mxu0 %v2839_v62  ;;  %1766 = vmatprep.subr.bf16.mxu1 %v2842_v63  ;;  %v2492_v62 = vcombine.low %v3439_v2, %v3120_v48  ;;  %v2919_v63 = vld [vmem:[%s3826_s1 + $0x5e4] ss:$16 sps:$4 sm:$0xff]   ;;  %v2920_v48 = vld [vmem:[%s3826_s1 + $0x5e8] ss:$16 sps:$4 sm:$0xff]  }
  0x8e   : > { %1208 = vmatmul.mubr.bf16.gmra.mrb[4].mxu0 %v3143_v61  ;;  %1269 = vmatmul.mubr.bf16.gmra.mrb[4].mxu1 %v3143_v61  ;;  %v1365_v2 = vrot.slane %v2492_v62, 3 }
  0x8f   : > { %1706 = vmatpush1.bf16.msra.mxu0 %v2837_v0  ;;  %1767 = vmatpush1.bf16.msra.mxu1 %v2840_v1  ;;  %v2922_v0 = vld [vmem:[%s3826_s1 + $0x5ec] ss:$16 sps:$4 sm:$0xff]   ;;  %v2495_v1 = vcombine.high %v3246_v46, %v1288_v58 }
  0x90   : > { %1707 = vmatprep.subr.bf16.mxu0 %v2845_v3  ;;  %1768 = vmatprep.subr.bf16.mxu1 %v2848_v4  ;;  %v2917_v3 = vld [vmem:[%s3826_s1 + $0x5e0] ss:$16 sps:$4 sm:$0xff]   ;;  %v1366_v4 = vrot.slane %v3143_v61, 3 }
  0x91   : > { %1217 = vmatprep.mubr.bf16.mxu0 %v2363_v5  ;;  %1278 = vmatprep.mubr.bf16.mxu1 %v2363_v5  ;;  %v1373_v5 = vrot.slane %v2495_v1, 3 }
  0x92   : > { %v1367_v7 = vsel %vm1364_vm1, %v1365_v2, %v1366_v4 }
  0x93   : > { %1708 = vmatpush1.bf16.msra.mxu0 %v2843_v8  ;;  %1769 = vmatpush1.bf16.msra.mxu1 %v2846_v9  ;;  %v2494_v8 = vcombine.low %v3246_v46, %v1288_v58  ;;  %v1374_v9 = vsel %vm1364_vm1, %v1369_v14, %v1373_v5 }
  0x94   : > { %1709 = vmatprep.subr.bf16.mxu0 %v2853_v10  ;;  %1770 = vmatprep.subr.bf16.mxu1 %v2856_v11 }
  0x95   : > { %v1371_v10 = vrot.slane %v2494_v8, 3 }
  0x96   : > { %1218 = vmatmul.mubr.bf16.gmra.mrb[12].mxu0 %v2362_v12  ;;  %1279 = vmatmul.mubr.bf16.gmra.mrb[12].mxu1 %v2362_v12 }
  0x97   : > { %1710 = vmatpush1.bf16.msra.mxu0 %v2851_v6  ;;  %1771 = vmatpush1.bf16.msra.mxu1 %v2854_v15  ;;  %v1372_v61 = vsel %vm1364_vm1, %v1366_v4, %v1371_v10 }
  0x98   : > { %1711 = vmatprep.subr.bf16.mxu0 %v2859_v16  ;;  %1772 = vmatprep.subr.bf16.mxu1 %v2862_v17 }
  0x99   : > { %1733 = vmatprep.mubr.bf16.mxu0 %v1370_v18  ;;  %1794 = vmatprep.mubr.bf16.mxu1 %v1370_v18 }
  0x9b   : > { %1712 = vmatpush1.bf16.msra.mxu0 %v2857_v19  ;;  %1773 = vmatpush1.bf16.msra.mxu1 %v2860_v20 }
  0x9c   : > { %1713 = vmatprep.subr.bf16.mxu0 %v2865_v21  ;;  %1774 = vmatprep.subr.bf16.mxu1 %v2868_v22 }
  0x9f   : > { %1714 = vmatpush1.bf16.msra.mxu0 %v2863_v23  ;;  %1775 = vmatpush1.bf16.msra.mxu1 %v2866_v24 }
  0xa0   : > { %1715 = vmatprep.subr.bf16.mxu0 %v2871_v25  ;;  %1776 = vmatprep.subr.bf16.mxu1 %v2874_v26 }
  0xa3   : > { %1716 = vmatpush1.bf16.msra.mxu0 %v2869_v27  ;;  %1777 = vmatpush1.bf16.msra.mxu1 %v2872_v28  ;;  %v1845_v28 = vlaneseq }
  0xa4   : > { %1717 = vmatprep.subr.bf16.mxu0 %v2877_v29  ;;  %1778 = vmatprep.subr.bf16.mxu1 %v2880_v30 }
  0xa5   : > { %v1846_v29 = vshrl.u32 %v1845_v28, 7 }
  0xa7   : > { %1718 = vmatpush1.bf16.msra.mxu0 %v2875_v31  ;;  %1779 = vmatpush1.bf16.msra.mxu1 %v2878_v32  ;;  %v1847_v30 = vsub.s32 0, %v1846_v29  ;;  %v1855_v31 = vsub.s32 2, %v1846_v29  ;;  %v1843_v32 = vld [vmem:[%s3827_s2] sm:$0xf] }
  0xa8   : > { %1719 = vmatprep.subr.bf16.mxu0 %v2883_v33  ;;  %1780 = vmatprep.subr.bf16.mxu1 %v2886_v34  ;;  %v1851_v33 = vsub.s32 1, %v1846_v29  ;;  %v1859_v34 = vsub.s32 3, %v1846_v29 }
  0xab   : > { %1720 = vmatpush1.bf16.msra.mxu0 %v2881_v35  ;;  %1781 = vmatpush1.bf16.msra.mxu1 %v2884_v36  ;;  %v3631_v35 = vrot.slane %v1843_v32, %v1847_v30  ;;  %v3633_v36 = vrot.slane %v1843_v32, %v1855_v31 }
  0xac   : > { %1721 = vmatprep.subr.bf16.mxu0 %v2889_v37  ;;  %1782 = vmatprep.subr.bf16.mxu1 %v2892_v38  ;;  %v3635_v37 = vrot.slane %v1843_v32, %v1851_v33  ;;  %v3637_v38 = vrot.slane %v1843_v32, %v1859_v34 }
  0xaf   : > { %1722 = vmatpush1.bf16.msra.mxu0 %v2887_v39  ;;  %1783 = vmatpush1.bf16.msra.mxu1 %v2890_v40 }
  0xb0   : > { %1723 = vmatprep.subr.bf16.mxu0 %v2895_v41  ;;  %1784 = vmatprep.subr.bf16.mxu1 %v2898_v42 }
  0xb3   : > { %1724 = vmatpush1.bf16.msra.mxu0 %v2893_v43  ;;  %1785 = vmatpush1.bf16.msra.mxu1 %v2896_v44 }
  0xb4   : > { %1725 = vmatprep.subr.bf16.mxu0 %v2901_v45  ;;  %1786 = vmatprep.subr.bf16.mxu1 %v2904_v47 }
  0xb7   : > { %1726 = vmatpush1.bf16.msra.mxu0 %v2899_v49  ;;  %1787 = vmatpush1.bf16.msra.mxu1 %v2902_v50 }
  0xb8   : > { %1727 = vmatprep.subr.bf16.mxu0 %v2907_v52  ;;  %1788 = vmatprep.subr.bf16.mxu1 %v2910_v53 }
  0xbb   : > { %1728 = vmatpush1.bf16.msra.mxu0 %v2905_v54  ;;  %1789 = vmatpush1.bf16.msra.mxu1 %v2908_v55 }
  0xbc   : > { %1729 = vmatprep.subr.bf16.mxu0 %v2913_v56  ;;  %1790 = vmatprep.subr.bf16.mxu1 %v2916_v57 }
  0xbf   : > { %1730 = vmatpush1.bf16.msra.mxu0 %v2911_v59  ;;  %1791 = vmatpush1.bf16.msra.mxu1 %v2914_v60 }
  0xc0   : > { %1731 = vmatprep.subr.bf16.mxu0 %v2919_v63  ;;  %1792 = vmatprep.subr.bf16.mxu1 %v2922_v0 }
  0xc3   : > { %1732 = vmatpush1.bf16.msra.mxu0 %v2917_v3  ;;  %1793 = vmatpush1.bf16.msra.mxu1 %v2920_v48 }
  0xc6   : > { %1734 = vmatmul.mubr.bf16.vlgmr.msra.gmra.mrb[0].mxu0 %v1367_v7  ;;  %1795 = vmatmul.mubr.bf16.vlgmr.msra.gmra.mrb[0].mxu1 %v1367_v7 }
  0xc7   : > { %1743 = vmatprep.mubr.bf16.mxu0 %v1374_v9  ;;  %1804 = vmatprep.mubr.bf16.mxu1 %v1374_v9 }
  0xce   : > { %1744 = vmatmul.mubr.bf16.gmra.mrb[4].mxu0 %v1372_v61  ;;  %1805 = vmatmul.mubr.bf16.gmra.mrb[4].mxu1 %v1372_v61 }
  0xcf   : > { %1753 = vmatprep.mubr.bf16.mxu0 %v1373_v5  ;;  %1814 = vmatprep.mubr.bf16.mxu1 %v1373_v5 }
  0xd6   : > { %1754 = vmatmul.mubr.bf16.gmra.mrb[16].mxu0 %v1371_v10  ;;  %1815 = vmatmul.mubr.bf16.gmra.mrb[16].mxu1 %v1371_v10 }
 0x129   : > { %v764_v11 = vpop.f32.mrb[8].mxu0  ;;  %v825_v12 = vpop.f32.mrb[8].mxu1 }
 0x12a   : > { %v766_v46 = vpop.f32.mrb[9].mxu0  ;;  %v827_v13 = vpop.f32.mrb[9].mxu1 }
 0x12b   : > { %v768_v51 = vpop.f32.mrb[10].mxu0  ;;  %v829_v6 = vpop.f32.mrb[10].mxu1 }
 0x12c   : > { %v769_v14 = vpop.f32.mrb[11].mxu0  ;;  %v830_v15 = vpop.f32.mrb[11].mxu1 }
 0x169   : > { %v1219_v16 = vpop.f32.mrb[12].mxu0  ;;  %v1280_v17 = vpop.f32.mrb[12].mxu1 }
 0x16a   : > { %v3620_v18 = vadd.f32 %v1219_v16, %v764_v11  ;;  %v3622_v19 = vadd.f32 %v1280_v17, %v825_v12  ;;  %v1221_v20 = vpop.f32.mrb[13].mxu0  ;;  %v1282_v21 = vpop.f32.mrb[13].mxu1 }
 0x16b   : > { %v3624_v22 = vadd.f32 %v1221_v20, %v766_v46  ;;  %v3626_v23 = vadd.f32 %v1282_v21, %v827_v13  ;;  %v1223_v24 = vpop.f32.mrb[14].mxu0  ;;  %v1284_v25 = vpop.f32.mrb[14].mxu1 }
 0x16c   : > { %v1224_v26 = vpop.f32.mrb[15].mxu0  ;;  %v1285_v27 = vpop.f32.mrb[15].mxu1 }
 0x199   : > { %v1735_v39 = vpop.f32.mrb[0].mxu0  ;;  %v1796_v40 = vpop.f32.mrb[0].mxu1 }
 0x19a   : > { %v1865_v41 = vadd.f32 %v3631_v35, %v1735_v39  ;;  %v1867_v42 = vadd.f32 %v3633_v36, %v1796_v40  ;;  %v1737_v43 = vpop.f32.mrb[1].mxu0  ;;  %v1798_v44 = vpop.f32.mrb[1].mxu1 }
 0x19b   : > { %v1866_v45 = vadd.f32 %v3635_v37, %v1737_v43  ;;  %v1868_v47 = vadd.f32 %v3637_v38, %v1798_v44  ;;  %v1739_v49 = vpop.f32.mrb[2].mxu0  ;;  %v1800_v50 = vpop.f32.mrb[2].mxu1 }
 0x19c   : > { %v1885_v52 = vmax.f32 %v1865_v41, 0.0  ;;  %v1887_v53 = vmax.f32 %v1867_v42, 0.0  ;;  %v1869_v54 = vadd.f32 %v3631_v35, %v1739_v49  ;;  %v1871_v55 = vadd.f32 %v3633_v36, %v1800_v50  ;;  %v1741_v56 = vpop.f32.mrb[3].mxu0  ;;  %v1802_v57 = vpop.f32.mrb[3].mxu1 }
 0x19d   : > { %v1886_v58 = vmax.f32 %v1866_v45, 0.0  ;;  %v1888_v59 = vmax.f32 %v1868_v47, 0.0  ;;  %v1870_v60 = vadd.f32 %v3635_v37, %v1741_v56  ;;  %v1872_v62 = vadd.f32 %v3637_v38, %v1802_v57 }
 0x19e   : > { %v1926_v63 = vrot.slane %v1885_v52, 3  ;;  %v2003_v0 = vrot.slane %v1885_v52, 6  ;;  %v1932_v1 = vrot.slane %v1887_v53, 3  ;;  %v2009_v3 = vrot.slane %v1887_v53, 6 }
 0x19f   : > { %v3647_v48 = vmax.f32 %v1869_v54, 0.0  ;;  %v3649_v2 = vmax.f32 %v1871_v55, 0.0  ;;  %v3651_v4 = vmax.f32 %v1870_v60, 0.0  ;;  %v3653_v5 = vmax.f32 %v1872_v62, 0.0 }
 0x1a0   : > { %v1929_v7 = vrot.slane %v1886_v58, 3  ;;  %v2006_v8 = vrot.slane %v1886_v58, 6  ;;  %v1935_v9 = vrot.slane %v1888_v59, 3  ;;  %v2012_v10 = vrot.slane %v1888_v59, 6 }
 0x1a1   : > { %v1745_v61 = vpop.f32.mrb[4].mxu0  ;;  %v1806_v11 = vpop.f32.mrb[4].mxu1  ;;  %v1927_v12 = vrot.slane %v3647_v48, 3  ;;  %v2004_v46 = vrot.slane %v3647_v48, 6  ;;  %v1933_v13 = vrot.slane %v3649_v2, 3  ;;  %v2010_v51 = vrot.slane %v3649_v2, 6 }
 0x1a2   : > { %v1747_v6 = vpop.f32.mrb[5].mxu0  ;;  %v1808_v14 = vpop.f32.mrb[5].mxu1  ;;  %v1930_v15 = vrot.slane %v3651_v4, 3  ;;  %v2007_v16 = vrot.slane %v3651_v4, 6  ;;  %v1936_v17 = vrot.slane %v3653_v5, 3  ;;  %v2013_v20 = vrot.slane %v3653_v5, 6 }
 0x1a3   : > { %v1749_v21 = vpop.f32.mrb[6].mxu0  ;;  %v1810_v24 = vpop.f32.mrb[6].mxu1  ;;  %v1928_v25 = vsel %vm1364_vm1, %v1926_v63, %v1927_v12  ;;  %v2005_v26 = vsel %vm2002_vm2, %v2003_v0, %v2004_v46  ;;  %v1934_v27 = vsel %vm1364_vm1, %v1932_v1, %v1933_v13  ;;  %v2011_v28 = vsel %vm2002_vm2, %v2009_v3, %v2010_v51 }
 0x1a4   : > { %v3667_v29 = vpop.f32.mrb[7].mxu0  ;;  %v3669_v30 = vpop.f32.mrb[7].mxu1  ;;  %v1982_v31 = vmax.f32 %v1885_v52, %v1928_v25  ;;  %v1984_v32 = vmax.f32 %v1887_v53, %v1934_v27  ;;  %v1931_v33 = vsel %vm1364_vm1, %v1929_v7, %v1930_v15  ;;  %v2008_v34 = vsel %vm2002_vm2, %v2006_v8, %v2007_v16 }
 0x1a5   : > { %v1983_v39 = vmax.f32 %v1886_v58, %v1931_v33  ;;  %v1937_v40 = vsel %vm1364_vm1, %v1935_v9, %v1936_v17  ;;  %v2014_v41 = vsel %vm2002_vm2, %v2012_v10, %v2013_v20  ;;  %v1873_v42 = vadd.f32 %v3631_v35, %v1745_v61 }
 0x1a6   : > { %v2059_v43 = vmax.f32 %v1982_v31, %v2005_v26  ;;  %v2061_v44 = vmax.f32 %v1984_v32, %v2011_v28  ;;  %v1985_v45 = vmax.f32 %v1888_v59, %v1937_v40  ;;  %v1875_v47 = vadd.f32 %v3633_v36, %v1806_v11 }
 0x1a7   : > { %v2060_v49 = vmax.f32 %v1983_v39, %v2008_v34  ;;  %v3682_v50 = vmax.f32 %v1873_v42, 0.0  ;;  %v1874_v52 = vadd.f32 %v3635_v37, %v1747_v6  ;;  %v1876_v53 = vadd.f32 %v3637_v38, %v1808_v14 }
 0x1a8   : > { %v2062_v54 = vmax.f32 %v1985_v45, %v2014_v41  ;;  %v3691_v55 = vmax.f32 %v1875_v47, 0.0  ;;  %v1877_v56 = vadd.f32 %v3631_v35, %v1749_v21  ;;  %v1879_v57 = vadd.f32 %v3633_v36, %v1810_v24 }
 0x1a9   : > { %v3695_v58 = vpop.f32.mrb[16].mxu0  ;;  %v3697_v59 = vpop.f32.mrb[16].mxu1  ;;  %v2572_v60 = vpack.c.bf16 %v2060_v49, %v2059_v43  ;;  %v1938_v62 = vrot.slane %v3682_v50, 3  ;;  %v2015_v63 = vrot.slane %v3682_v50, 6  ;;  %v3701_v0 = vmax.f32 %v1874_v52, 0.0 }
 0x1aa   : > { %v1757_v1 = vpop.f32.mrb[17].mxu0  ;;  %v3703_v3 = vpop.f32.mrb[17].mxu1  ;;  %v2573_v7 = vpack.c.bf16 %v2062_v54, %v2061_v44  ;;  %v1942_v8 = vrot.slane %v3691_v55, 3  ;;  %v2019_v9 = vrot.slane %v3691_v55, 6  ;;  %v3707_v10 = vmax.f32 %v1876_v53, 0.0 }
 0x1ab   : > { %v1759_v61 = vpop.f32.mrb[18].mxu0  ;;  %v1820_v11 = vpop.f32.mrb[18].mxu1  ;;  %2143 = vst [vmem:[%s3689_s17] sm:$0xff] %v2572_v60  ;;  %v1939_v6 = vsel %vm1364_vm1, %v1927_v12, %v1938_v62  ;;  %v2016_v14 = vsel %vm2002_vm2, %v2004_v46, %v2015_v63  ;;  %v1940_v21 = vrot.slane %v3701_v0, 3  ;;  %v2017_v24 = vrot.slane %v3701_v0, 6 }
 0x1ac   : > { %v1760_v25 = vpop.f32.mrb[19].mxu0  ;;  %v1821_v26 = vpop.f32.mrb[19].mxu1  ;;  %2144 = vst [vmem:[%s3689_s17 + $0x8] sm:$0xff] %v2573_v7  ;;  %v1986_v27 = vmax.f32 %v3647_v48, %v1939_v6  ;;  %v1943_v28 = vsel %vm1364_vm1, %v1933_v13, %v1942_v8  ;;  %v2020_v31 = vsel %vm2002_vm2, %v2010_v51, %v2019_v9  ;;  %v1944_v32 = vrot.slane %v3707_v10, 3 }
 0x1ad   : > { %v1988_v33 = vmax.f32 %v3649_v2, %v1943_v28  ;;  %v1941_v12 = vsel %vm1364_vm1, %v1930_v15, %v1940_v21  ;;  %v2018_v46 = vsel %vm2002_vm2, %v2007_v16, %v2017_v24  ;;  %v2021_v34 = vrot.slane %v3707_v10, 6 }
 0x1ae   : > { %v2063_v39 = vmax.f32 %v1986_v27, %v2016_v14  ;;  %v1987_v40 = vmax.f32 %v3651_v4, %v1941_v12  ;;  %v1945_v48 = vsel %vm1364_vm1, %v1936_v17, %v1944_v32  ;;  %v3727_v13 = vmax.f32 %v1877_v56, 0.0 }
 0x1af   : > { %v2065_v51 = vmax.f32 %v1988_v33, %v2020_v31  ;;  %v1989_v41 = vmax.f32 %v3653_v5, %v1945_v48  ;;  %v2022_v2 = vsel %vm2002_vm2, %v2013_v20, %v2021_v34  ;;  %v3733_v15 = vmax.f32 %v1879_v57, 0.0 }
 0x1b0   : > { %v2064_v16 = vmax.f32 %v1987_v40, %v2018_v46  ;;  %v1946_v42 = vrot.slane %v3727_v13, 3  ;;  %v2023_v4 = vrot.slane %v3727_v13, 6  ;;  %v1878_v17 = vadd.f32 %v3635_v37, %v3667_v29 }
 0x1b1   : > { %v2066_v43 = vmax.f32 %v1989_v41, %v2022_v2  ;;  %v1950_v44 = vrot.slane %v3733_v15, 3  ;;  %v2027_v45 = vrot.slane %v3733_v15, 6  ;;  %v1880_v5 = vadd.f32 %v3637_v38, %v3669_v30 }
 0x1b2   : > { %v2574_v20 = vpack.c.bf16 %v2064_v16, %v2063_v39  ;;  %v1947_v47 = vsel %vm1364_vm1, %v1938_v62, %v1946_v42  ;;  %v2024_v49 = vsel %vm2002_vm2, %v2015_v63, %v2023_v4  ;;  %v3745_v52 = vmax.f32 %v1878_v17, 0.0 }
 0x1b3   : > { %v2575_v53 = vpack.c.bf16 %v2066_v43, %v2065_v51  ;;  %v1990_v54 = vmax.f32 %v3682_v50, %v1947_v47  ;;  %v1951_v29 = vsel %vm1364_vm1, %v1942_v8, %v1950_v44  ;;  %v2028_v56 = vsel %vm2002_vm2, %v2019_v9, %v2027_v45 }
 0x1b4   : > { %2145 = vst [vmem:[%s3689_s17 + $0x10] sm:$0xff] %v2574_v20  ;;  %v1992_v30 = vmax.f32 %v3691_v55, %v1951_v29  ;;  %v1948_v57 = vrot.slane %v3745_v52, 3  ;;  %v2025_v60 = vrot.slane %v3745_v52, 6  ;;  %v3754_v62 = vmax.f32 %v1880_v5, 0.0  ;;  %v2158_v5 = vld [vmem:[%s3689_s17 + $0x40] sm:$0x11] }
 0x1b5   : > { %2146 = vst [vmem:[%s3689_s17 + $0x18] sm:$0xff] %v2575_v53  ;;  %v2067_v63 = vmax.f32 %v1990_v54, %v2024_v49  ;;  %v1839_v50 = vadd.f32 %v3695_v58, %v3620_v18  ;;  %v1841_v7 = vadd.f32 %v3697_v59, %v3622_v19  ;;  %v1840_v8 = vadd.f32 %v1757_v1, %v3624_v22 }
 0x1b6   : > { %v2069_v9 = vmax.f32 %v1992_v30, %v2028_v56  ;;  %v1949_v61 = vsel %vm1364_vm1, %v1940_v21, %v1948_v57  ;;  %v2026_v55 = vsel %vm2002_vm2, %v2017_v24, %v2025_v60  ;;  %v1952_v11 = vrot.slane %v3754_v62, 3 }
 0x1b7   : > { %v1991_v6 = vmax.f32 %v3701_v0, %v1949_v61  ;;  %v2029_v14 = vrot.slane %v3754_v62, 6  ;;  %v1881_v25 = vadd.f32 %v3631_v35, %v1839_v50  ;;  %v1883_v18 = vadd.f32 %v3633_v36, %v1841_v7  ;;  %v2161_v50 = vld [vmem:[%s3689_s17 + $0x48] sm:$0x11] }
 0x1b8   : > { %v1953_v58 = vsel %vm1364_vm1, %v1944_v32, %v1952_v11  ;;  %v1882_v19 = vadd.f32 %v3635_v37, %v1840_v8  ;;  %v1842_v22 = vadd.f32 %v3703_v3, %v3626_v23 }
 0x1b9   : > { %v2068_v59 = vmax.f32 %v1991_v6, %v2026_v55  ;;  %v1993_v1 = vmax.f32 %v3707_v10, %v1953_v58  ;;  %v2030_v0 = vsel %vm2002_vm2, %v2021_v34, %v2029_v14  ;;  %v1901_v21 = vmax.f32 %v1881_v25, 0.0 }
 0x1ba   : > { %v1903_v24 = vmax.f32 %v1883_v18, 0.0  ;;  %v1902_v26 = vmax.f32 %v1882_v19, 0.0  ;;  %v1884_v35 = vadd.f32 %v3637_v38, %v1842_v22 }
 0x1bb   : > { %v2576_v36 = vpack.c.bf16 %v2068_v59, %v2067_v63  ;;  %v2070_v27 = vmax.f32 %v1993_v1, %v2030_v0  ;;  %v1954_v37 = vrot.slane %v1901_v21, 3  ;;  %v2031_v28 = vrot.slane %v1901_v21, 6 }
 0x1bc   : > { %v1958_v31 = vrot.slane %v1903_v24, 3  ;;  %v2035_v32 = vrot.slane %v1903_v24, 6  ;;  %v1956_v23 = vrot.slane %v1902_v26, 3  ;;  %v2033_v3 = vrot.slane %v1902_v26, 6 }
 0x1bd   : > { %2147 = vst [vmem:[%s3689_s17 + $0x20] sm:$0xff] %v2576_v36  ;;  %v2577_v33 = vpack.c.bf16 %v2070_v27, %v2069_v9  ;;  %v1955_v10 = vsel %vm1364_vm1, %v1946_v42, %v1954_v37  ;;  %v1998_v12 = vmax.f32 %v1901_v21, %v1954_v37  ;;  %v2032_v46 = vsel %vm2002_vm2, %v2023_v4, %v2031_v28 }
 0x1be   : > { %v1994_v34 = vmax.f32 %v3727_v13, %v1955_v10  ;;  %v1959_v38 = vsel %vm1364_vm1, %v1950_v44, %v1958_v31  ;;  %v2036_v39 = vsel %vm2002_vm2, %v2027_v45, %v2035_v32  ;;  %v1957_v41 = vsel %vm1364_vm1, %v1948_v57, %v1956_v23 }
 0x1bf   : > { %2148 = vst [vmem:[%s3689_s17 + $0x28] sm:$0xff] %v2577_v33  ;;  %v2075_v48 = vmax.f32 %v1998_v12, %v2031_v28  ;;  %v1996_v51 = vmax.f32 %v3733_v15, %v1959_v38  ;;  %v1999_v2 = vmax.f32 %v1902_v26, %v1956_v23  ;;  %v2000_v42 = vmax.f32 %v1903_v24, %v1958_v31 }
 0x1c0   : > { %v2071_v16 = vmax.f32 %v1994_v34, %v2032_v46  ;;  %v1995_v4 = vmax.f32 %v3745_v52, %v1957_v41  ;;  %v2034_v17 = vsel %vm2002_vm2, %v2025_v60, %v2033_v3  ;;  %v1904_v15 = vmax.f32 %v1884_v35, 0.0 }
 0x1c1   : > { %v2073_v43 = vmax.f32 %v1996_v51, %v2036_v39  ;;  %v2076_v44 = vmax.f32 %v1999_v2, %v2033_v3  ;;  %v2077_v52 = vmax.f32 %v2000_v42, %v2035_v32 }
 0x1c2   : > { %v2072_v45 = vmax.f32 %v1995_v4, %v2034_v17  ;;  %v1960_v47 = vrot.slane %v1904_v15, 3  ;;  %v2037_v49 = vrot.slane %v1904_v15, 6 }
 0x1c3   : > { %v2580_v20 = vpack.c.bf16 %v2076_v44, %v2075_v48 }
 0x1c4   : > { %v2578_v53 = vpack.c.bf16 %v2072_v45, %v2071_v16  ;;  %v1961_v29 = vsel %vm1364_vm1, %v1952_v11, %v1960_v47  ;;  %v2001_v56 = vmax.f32 %v1904_v15, %v1960_v47  ;;  %v2038_v30 = vsel %vm2002_vm2, %v2029_v14, %v2037_v49 }
 0x1c5   : > { %v2159_v54 = vsel %vm2157_vm9, %v2580_v20, %v2158_v5  ;;  %v1997_v57 = vmax.f32 %v3754_v62, %v1961_v29 }
 0x1c6   : > { %2149 = vst [vmem:[%s3689_s17 + $0x30] sm:$0xff] %v2578_v53  ;;  %2160 = vst [vmem:[%s3689_s17 + $0x40] sm:$0x11] %v2159_v54  ;;  %v2078_v60 = vmax.f32 %v2001_v56, %v2037_v49 }
 0x1c7   : > { %v2074_v63 = vmax.f32 %v1997_v57, %v2038_v30 }
 0x1c8   : > { %v2581_v7 = vpack.c.bf16 %v2078_v60, %v2077_v52 }
 0x1c9   : > { %v2579_v8 = vpack.c.bf16 %v2074_v63, %v2073_v43 }
 0x1ca   : > { %v2162_v9 = vsel %vm2157_vm9, %v2581_v7, %v2161_v50 }
 0x1cb   : > { %2150 = vst [vmem:[%s3689_s17 + $0x38] sm:$0xff] %v2579_v8  ;;  %2163 = vst [vmem:[%s3689_s17 + $0x48] sm:$0x11] %v2162_v9 }
 0x1cc PF: > { %s13_s12 = sadd.s32 1, %s2933_s12  }
 0x1cd   : > { %p10_p4 = scmp.ge.s32.totalorder %s13_s12, 4  }
 0x1cf   :  { %12 = sbr.rel (!%p10_p4) target bundleno = 1 (0x1), region = 64 }

// kernel: tomato_forward.5
= control target key start
LH: loop header
LB: loop body
LE: loop exit
PB: predicated region body
PF: predicated region fallthrough
CT: control target
= control target key end

     0   :  { %18 = vsyncpa [#allocation3], 0  ;;  %vm1825_vm0 = vmmov 0   ;;  %s2243_s0 = inlined_call_operand.vmem [shape: bf16[6,1152], index: 0, kind: input, shape index: {}]   ;;  %s2244_s1 = inlined_call_operand.vmem [shape: bf16[6,8], index: 1, kind: input, shape index: {}]   ;;  %s2245_s2 = inlined_call_operand.vmem [shape: f32[3,2,1], index: 2, kind: input, shape index: {}]   ;;  %s2246_s3 = inlined_call_operand.vmem [shape: bf16[1152,16], index: 3, kind: input, shape index: {}]   ;;  %s2247_s4 = inlined_call_operand.vmem [shape: f32[1,16], index: 4, kind: input, shape index: {}]   ;;  %s2248_s5 = inlined_call_operand.vmem [shape: bf16[16,128], index: 5, kind: input, shape index: {}]   ;;  %s2249_s6 = inlined_call_operand.vmem [shape: bf16[8,128], index: 6, kind: input, shape index: {}]   ;;  %s2250_s7 = inlined_call_operand.vmem [shape: bf16[32,128], index: 7, kind: input, shape index: {}]   ;;  %s2251_s8 = inlined_call_operand.vmem [shape: f32[1,128], index: 8, kind: input, shape index: {}]   ;;  %s2252_s9 = inlined_call_operand.vmem [shape: bf16[32,4], index: 9, kind: input, shape index: {}]   ;;  %s2253_s10 = inlined_call_operand.vmem [shape: f32[1,4], index: 10, kind: input, shape index: {}]   ;;  %s2254_s11 = inlined_call_operand.hbm [shape: f32[2,4], index: 11, kind: output, shape index: {0}]   ;;  %s2255_s12 = inlined_call_operand.hbm [shape: f32[2,32], index: 12, kind: output, shape index: {1}]  }
   0x1   :  { %v1666_v0 = vld [vmem:[%s2246_s3 + $0x40] sm:$0xff]   ;;  %v1670_v4 = vld [vmem:[%s2246_s3 + $0x48] sm:$0xff]   ;;  %v1674_v8 = vld [vmem:[%s2246_s3 + $0x50] sm:$0xff]  }
   0x2   :  { %v1667_v1 = vld [vmem:[%s2246_s3] sm:$0xff]   ;;  %1480 = vmatprep.subr.bf16.mxu0 %v1666_v0  ;;  %v1671_v5 = vld [vmem:[%s2246_s3 + $0x8] sm:$0xff]   ;;  %v1675_v9 = vld [vmem:[%s2246_s3 + $0x10] sm:$0xff]  }
   0x3   :  { %v1668_v2 = vld [vmem:[%s2246_s3 + $0xc0] sm:$0xff]   ;;  %1481 = vmatpush3.bf16.msra.mxu0 %v1667_v1  ;;  %v1672_v6 = vld [vmem:[%s2246_s3 + $0xc8] sm:$0xff]   ;;  %v1676_v10 = vld [vmem:[%s2246_s3 + $0xd0] sm:$0xff]  }
   0x4   :  { %v1669_v3 = vld [vmem:[%s2246_s3 + $0x80] sm:$0xff]   ;;  %1502 = vmatprep.subr.bf16.mxu1 %v1668_v2  ;;  %1482 = vmatprep.subr.bf16.mxu0 %v1670_v4  ;;  %v1673_v7 = vld [vmem:[%s2246_s3 + $0x88] sm:$0xff]   ;;  %v1677_v11 = vld [vmem:[%s2246_s3 + $0x90] sm:$0xff]  }
   0x5   :  { %1503 = vmatpush3.bf16.msra.mxu1 %v1669_v3  ;;  %v1678_v12 = vld [vmem:[%s2246_s3 + $0x58] sm:$0xff]   ;;  %v1682_v16 = vld [vmem:[%s2246_s3 + $0x60] sm:$0xff]   ;;  %v1686_v20 = vld [vmem:[%s2246_s3 + $0x68] sm:$0xff]  }
   0x6   :  { %1504 = vmatprep.subr.bf16.mxu1 %v1672_v6  ;;  %v1679_v13 = vld [vmem:[%s2246_s3 + $0x18] sm:$0xff]   ;;  %v1683_v17 = vld [vmem:[%s2246_s3 + $0x20] sm:$0xff]   ;;  %v1687_v21 = vld [vmem:[%s2246_s3 + $0x28] sm:$0xff]  }
   0x7   :  { %1483 = vmatpush3.bf16.msra.mxu0 %v1671_v5  ;;  %v1680_v14 = vld [vmem:[%s2246_s3 + $0xd8] sm:$0xff]   ;;  %v1684_v18 = vld [vmem:[%s2246_s3 + $0xe0] sm:$0xff]   ;;  %v1688_v22 = vld [vmem:[%s2246_s3 + $0xe8] sm:$0xff]  }
   0x8   :  { %1484 = vmatprep.subr.bf16.mxu0 %v1674_v8  ;;  %v1681_v15 = vld [vmem:[%s2246_s3 + $0x98] sm:$0xff]   ;;  %v1685_v19 = vld [vmem:[%s2246_s3 + $0xa0] sm:$0xff]   ;;  %v1689_v23 = vld [vmem:[%s2246_s3 + $0xa8] sm:$0xff]  }
   0x9   :  { %1505 = vmatpush3.bf16.msra.mxu1 %v1673_v7  ;;  %v1690_v24 = vld [vmem:[%s2246_s3 + $0x70] sm:$0xff]   ;;  %v1694_v28 = vld [vmem:[%s2246_s3 + $0x78] sm:$0xff]   ;;  %v43_v31 = vld [vmem:[%s2243_s0] sm:$0x77] }
   0xa   :  { %1506 = vmatprep.subr.bf16.mxu1 %v1676_v10  ;;  %v1691_v25 = vld [vmem:[%s2246_s3 + $0x30] sm:$0xff]   ;;  %v1695_v29 = vld [vmem:[%s2246_s3 + $0x38] sm:$0xff]   ;;  %v1382_v32 = vcombine.low %v43_v31, %v43_v31  ;;  %v1383_v33 = vcombine.high %v43_v31, %v43_v31  ;;  %v1700_v35 = vld [vmem:[%s2246_s3 + $0x140] sm:$0xff]  }
   0xb   :  { %1485 = vmatpush3.bf16.msra.mxu0 %v1675_v9  ;;  %v1692_v26 = vld [vmem:[%s2246_s3 + $0xf0] sm:$0xff]   ;;  %v1696_v30 = vld [vmem:[%s2246_s3 + $0xf8] sm:$0xff]   ;;  %v44_v36 = vld [vmem:[%s2243_s0 + $0x8] sm:$0x77]  ;;  %v1824_v9 = vmov 0.0  }
   0xc   :  { %1486 = vmatprep.subr.bf16.mxu0 %v1678_v12  ;;  %v1693_v27 = vld [vmem:[%s2246_s3 + $0xb0] sm:$0xff]   ;;  %v1699_v34 = vld [vmem:[%s2246_s3 + $0xb8] sm:$0xff]   ;;  %695 = vmatprep.mubr.bf16.mxu0 %v1383_v33  ;;  %v1384_v37 = vcombine.low %v44_v36, %v44_v36  ;;  %v1385_v38 = vcombine.high %v44_v36, %v44_v36  ;;  %v1703_v39 = vld [vmem:[%s2246_s3 + $0x100] sm:$0xff]  }
   0xd   :  { %1507 = vmatpush3.bf16.msra.mxu1 %v1677_v11  ;;  %v1704_v40 = vld [vmem:[%s2246_s3 + $0x1c0] sm:$0xff]   ;;  %v1706_v42 = vld [vmem:[%s2246_s3 + $0x148] sm:$0xff]   ;;  %v1710_v46 = vld [vmem:[%s2246_s3 + $0x150] sm:$0xff]  }
   0xe   :  { %1508 = vmatprep.subr.bf16.mxu1 %v1680_v14  ;;  %735 = vmatprep.mubr.bf16.mxu1 %v1385_v38  ;;  %v1705_v41 = vld [vmem:[%s2246_s3 + $0x180] sm:$0xff]   ;;  %v1707_v43 = vld [vmem:[%s2246_s3 + $0x108] sm:$0xff]   ;;  %v1711_v47 = vld [vmem:[%s2246_s3 + $0x110] sm:$0xff]  }
   0xf   :  { %1487 = vmatpush3.bf16.msra.mxu0 %v1679_v13  ;;  %v1708_v44 = vld [vmem:[%s2246_s3 + $0x1c8] sm:$0xff]   ;;  %v1712_v48 = vld [vmem:[%s2246_s3 + $0x1d0] sm:$0xff]   ;;  %v1714_v50 = vld [vmem:[%s2246_s3 + $0x158] sm:$0xff]  }
  0x10   :  { %1488 = vmatprep.subr.bf16.mxu0 %v1682_v16  ;;  %v1709_v45 = vld [vmem:[%s2246_s3 + $0x188] sm:$0xff]   ;;  %v1713_v49 = vld [vmem:[%s2246_s3 + $0x190] sm:$0xff]   ;;  %v1715_v51 = vld [vmem:[%s2246_s3 + $0x118] sm:$0xff]  }
  0x11   :  { %1509 = vmatpush3.bf16.msra.mxu1 %v1681_v15  ;;  %v1716_v52 = vld [vmem:[%s2246_s3 + $0x1d8] sm:$0xff]   ;;  %v1718_v54 = vld [vmem:[%s2246_s3 + $0x160] sm:$0xff]   ;;  %v1722_v58 = vld [vmem:[%s2246_s3 + $0x168] sm:$0xff]  }
  0x12   :  { %1510 = vmatprep.subr.bf16.mxu1 %v1684_v18  ;;  %v1717_v53 = vld [vmem:[%s2246_s3 + $0x198] sm:$0xff]   ;;  %v1719_v55 = vld [vmem:[%s2246_s3 + $0x120] sm:$0xff]   ;;  %v1723_v59 = vld [vmem:[%s2246_s3 + $0x128] sm:$0xff]  }
  0x13   :  { %1489 = vmatpush3.bf16.msra.mxu0 %v1683_v17  ;;  %v1720_v56 = vld [vmem:[%s2246_s3 + $0x1e0] sm:$0xff]   ;;  %v1724_v60 = vld [vmem:[%s2246_s3 + $0x1e8] sm:$0xff]   ;;  %v1726_v62 = vld [vmem:[%s2246_s3 + $0x170] sm:$0xff]  }
  0x14   :  { %1490 = vmatprep.subr.bf16.mxu0 %v1686_v20  ;;  %v1721_v57 = vld [vmem:[%s2246_s3 + $0x1a0] sm:$0xff]   ;;  %v1725_v61 = vld [vmem:[%s2246_s3 + $0x1a8] sm:$0xff]   ;;  %v1727_v63 = vld [vmem:[%s2246_s3 + $0x130] sm:$0xff]  }
  0x15   :  { %1511 = vmatpush3.bf16.msra.mxu1 %v1685_v19  ;;  %v1728_v0 = vld [vmem:[%s2246_s3 + $0x1f0] sm:$0xff]   ;;  %v1730_v2 = vld [vmem:[%s2246_s3 + $0x178] sm:$0xff]   ;;  %v1738_v13 = vld [vmem:[%s2246_s3 + $0x200] sm:$0xff]  }
  0x16   :  { %1512 = vmatprep.subr.bf16.mxu1 %v1688_v22  ;;  %v1729_v1 = vld [vmem:[%s2246_s3 + $0x1b0] sm:$0xff]   ;;  %v1731_v3 = vld [vmem:[%s2246_s3 + $0x138] sm:$0xff]   ;;  %v1739_v14 = vld [vmem:[%s2246_s3 + $0x208] sm:$0xff]  }
  0x17   :  { %1491 = vmatpush3.bf16.msra.mxu0 %v1687_v21  ;;  %v1732_v4 = vld [vmem:[%s2246_s3 + $0x1f8] sm:$0xff]   ;;  %v45_v5 = vld [vmem:[%s2243_s0 + $0x10] sm:$0x77] }
  0x18   :  { %1492 = vmatprep.subr.bf16.mxu0 %v1690_v24  ;;  %v1386_v6 = vcombine.low %v45_v5, %v45_v5  ;;  %v1387_v7 = vcombine.high %v45_v5, %v45_v5  ;;  %v1735_v8 = vld [vmem:[%s2246_s3 + $0x1b8] sm:$0xff]   ;;  %v1740_v15 = vld [vmem:[%s2246_s3 + $0x210] sm:$0xff]  }
  0x19   :  { %1513 = vmatpush3.bf16.msra.mxu1 %v1689_v23  ;;  %v46_v10 = vld [vmem:[%s2243_s0 + $0x18] sm:$0x77] }
  0x1a   :  { %1514 = vmatprep.subr.bf16.mxu1 %v1692_v26  ;;  %v1388_v11 = vcombine.low %v46_v10, %v46_v10  ;;  %v1389_v12 = vcombine.high %v46_v10, %v46_v10  ;;  %v1741_v16 = vld [vmem:[%s2246_s3 + $0x218] sm:$0xff]  }
  0x1b   :  { %1493 = vmatpush3.bf16.msra.mxu0 %v1691_v25 }
  0x1c   :  { %1494 = vmatprep.subr.bf16.mxu0 %v1694_v28 }
  0x1d   :  { %1515 = vmatpush3.bf16.msra.mxu1 %v1693_v27 }
  0x1e   :  { %1516 = vmatprep.subr.bf16.mxu1 %v1696_v30 }
  0x1f   :  { %1495 = vmatpush3.bf16.msra.mxu0 %v1695_v29 }
  0x20   :  { %1524 = vmatprep.subr.bf16.mxu0 %v1700_v35 }
  0x21   :  { %1517 = vmatpush3.bf16.msra.mxu1 %v1699_v34 }
  0x22   :  { %696 = vmatmul.mubr.bf16.vlgmr.msra.gmra.mrb[0].mxu0 %v1382_v32  ;;  %1546 = vmatprep.subr.bf16.mxu1 %v1704_v40 }
  0x23   :  { %1525 = vmatpush3.bf16.msra.mxu0 %v1703_v39  ;;  %775 = vmatprep.mubr.bf16.mxu0 %v1387_v7 }
  0x24   :  { %736 = vmatmul.mubr.bf16.vlgmr.msra.gmra.mrb[0].mxu1 %v1384_v37  ;;  %1526 = vmatprep.subr.bf16.mxu0 %v1706_v42 }
  0x25   :  { %1547 = vmatpush3.bf16.msra.mxu1 %v1705_v41  ;;  %815 = vmatprep.mubr.bf16.mxu1 %v1389_v12 }
  0x26   :  { %1548 = vmatprep.subr.bf16.mxu1 %v1708_v44 }
  0x27   :  { %1527 = vmatpush3.bf16.msra.mxu0 %v1707_v43 }
  0x28   :  { %1528 = vmatprep.subr.bf16.mxu0 %v1710_v46 }
  0x29   :  { %1549 = vmatpush3.bf16.msra.mxu1 %v1709_v45 }
  0x2a   :  { %1550 = vmatprep.subr.bf16.mxu1 %v1712_v48 }
  0x2b   :  { %1529 = vmatpush3.bf16.msra.mxu0 %v1711_v47 }
  0x2c   :  { %1530 = vmatprep.subr.bf16.mxu0 %v1714_v50 }
  0x2d   :  { %1551 = vmatpush3.bf16.msra.mxu1 %v1713_v49 }
  0x2e   :  { %1552 = vmatprep.subr.bf16.mxu1 %v1716_v52 }
  0x2f   :  { %1531 = vmatpush3.bf16.msra.mxu0 %v1715_v51 }
  0x30   :  { %1532 = vmatprep.subr.bf16.mxu0 %v1718_v54 }
  0x31   :  { %1553 = vmatpush3.bf16.msra.mxu1 %v1717_v53 }
  0x32   :  { %1554 = vmatprep.subr.bf16.mxu1 %v1720_v56 }
  0x33   :  { %1533 = vmatpush3.bf16.msra.mxu0 %v1719_v55 }
  0x34   :  { %1534 = vmatprep.subr.bf16.mxu0 %v1722_v58 }
  0x35   :  { %1555 = vmatpush3.bf16.msra.mxu1 %v1721_v57 }
  0x36   :  { %1556 = vmatprep.subr.bf16.mxu1 %v1724_v60 }
  0x37   :  { %1535 = vmatpush3.bf16.msra.mxu0 %v1723_v59 }
  0x38   :  { %1536 = vmatprep.subr.bf16.mxu0 %v1726_v62 }
  0x39   :  { %1557 = vmatpush3.bf16.msra.mxu1 %v1725_v61 }
  0x3a   :  { %1558 = vmatprep.subr.bf16.mxu1 %v1728_v0 }
  0x3b   :  { %1537 = vmatpush3.bf16.msra.mxu0 %v1727_v63 }
  0x3c   :  { %1538 = vmatprep.subr.bf16.mxu0 %v1730_v2 }
  0x3d   :  { %1559 = vmatpush3.bf16.msra.mxu1 %v1729_v1 }
  0x3e   :  { %1560 = vmatprep.subr.bf16.mxu1 %v1732_v4 }
  0x3f   :  { %1539 = vmatpush3.bf16.msra.mxu0 %v1731_v3 }
  0x40   :  { %1593 = vmatprep.subr.bf16.mxu0 %v1824_v9 }
  0x41   :  { %1561 = vmatpush3.bf16.msra.mxu1 %v1735_v8 }
  0x42   :  { %776 = vmatmul.mubr.bf16.vlgmr.msra.gmra.mrb[4].mxu0 %v1386_v6  ;;  %1613 = vmatprep.subr.bf16.mxu1 %v1824_v9 }
  0x43   :  { %1594 = vmatpush3.bf16.msra.mxu0 %v1738_v13  ;;  %1609 = vmatprep.mubr.msk.bf16.mxu0 %vm1825_vm0, %v1824_v9 }
  0x44   :  { %816 = vmatmul.mubr.bf16.vlgmr.msra.gmra.mrb[4].mxu1 %v1388_v11  ;;  %1595 = vmatprep.subr.bf16.mxu0 %v1824_v9 }
  0x45   :  { %1615 = vmatprep.mubr.msk.bf16.mxu1 %vm1825_vm0, %v1824_v9 }
  0x47   :  { %1596 = vmatpush3.bf16.msra.mxu0 %v1739_v14 }
  0x48   :  { %1597 = vmatprep.subr.bf16.mxu0 %v1824_v9 }
  0x4b   :  { %1598 = vmatpush3.bf16.msra.mxu0 %v1740_v15 }
  0x4c   :  { %1599 = vmatprep.subr.bf16.mxu0 %v1824_v9 }
  0x4d   :  { %19 = vsyncpa [#allocation5], 0  ;;  %v1742_v17 = vld [vmem:[%s2246_s3 + $0x220] sm:$0xff]   ;;  %v1743_v18 = vld [vmem:[%s2246_s3 + $0x228] sm:$0xff]   ;;  %vm873_vm1 = vcmask 1043456   ;;  %vm869_vm2 = vcmask 64512  }
  0x4e   :  { %v1744_v19 = vld [vmem:[%s2246_s3 + $0x230] sm:$0xff]   ;;  %v1745_v20 = vld [vmem:[%s2246_s3 + $0x238] sm:$0xff]   ;;  %v1746_v21 = vld [vmem:[%s2243_s0 + $0x20] ss:$0 sps:$4 sm:$0x77]   ;;  %v1826_v28 = vmov 0  }
  0x4f   :  { %1600 = vmatpush3.bf16.msra.mxu0 %v1741_v16  ;;  %v868_v22 = vld [vmem:[%s2249_s6] sm:$0xf]  ;;  %v1749_v27 = vld [vmem:[%s2250_s7 + $0x8] sm:$0xff]   ;;  %1664 = vset.pattern.permute.xlu1 %v1826_v28  ;;  %vm923_vm3 = vcmask 130048   ;;  %s1827_s22 = smov 96   ;;  %vm991_vm4 = vcmask 261120  }
  0x50   :  { %1601 = vmatprep.subr.bf16.mxu0 %v1824_v9  ;;  %v875_v23 = vsel %vm873_vm1, %v868_v22, 0  ;;  %v865_v24 = vld [vmem:[%s2244_s1] sm:$0x7]  ;;  %1665 = vset.pattern.permute.xlu0 %v1826_v28  ;;  %vm1351_vm5 = vcmask 254976   ;;  %s1829_s30 = smov [#allocation4]  }
  0x51   :  { %1614 = vmatpush3.bf16.msra.mxu1 %v875_v23  ;;  %v1747_v25 = vld [vmem:[%s2248_s5] sm:$0xff]   ;;  %s1369_s13 = sshll.u32 %s1829_s30, 4  ;;  %s1370_s13 = int_to_ptr.vmem [resolvable:$true] %s1369_s13 }
  0x52   :  { %1619 = vmatprep.subr.bf16.mxu1 %v1824_v9  ;;  %v1748_v26 = vld [vmem:[%s2250_s7] sm:$0xff]   ;;  %p1781_p1 = scmp.lt.s32.totalorder %s1370_s13, %s1370_s13 }
  0x53   :  { %1602 = vmatpush3.bf16.msra.mxu0 %v1742_v17  ;;  %v1381_v30 = vld [vmem:[%s2247_s4] ss:$0 sm:$0xff] }
  0x54   :  { %1603 = vmatprep.subr.bf16.mxu0 %v1824_v9  ;;  %1616 = vmatmul.mubr.msk.bf16.vlgmr.msra.gmra.mrb[8].mxu1 %vm869_vm2, %v865_v24  ;;  %v1060_v1 = vld [vmem:[%s2245_s2] sm:$0x3] }
  0x55   :  { %1620 = vmatpush3.bf16.msra.mxu1 %v1747_v25  ;;  %1621 = vmatprep.mubr.msk.bf16.mxu1 %vm1825_vm0, %v1824_v9  ;;  %v1067_v2 = vsub.f32 1.0, %v1060_v1  ;;  %v1466_v8 = vld [vmem:[%s2251_s8] ss:$0 sm:$0xff]  ;;  %s1828_s8 = smov 32  }
  0x56   :  { %1625 = vmatprep.subr.bf16.mxu1 %v1824_v9  ;;  %1063 = vperm.xlu1 %1664, %v1060_v1  }
  0x57   :  { %1604 = vmatpush3.bf16.msra.mxu0 %v1743_v18 }
  0x58   :  { %1605 = vmatprep.subr.bf16.mxu0 %v1824_v9 }
  0x5a   :  { %1070 = vperm.xlu1 %1664, %v1067_v2  }
  0x5b   :  { %1606 = vmatpush3.bf16.msra.mxu0 %v1744_v19 }
  0x5c   :  { %1607 = vmatprep.subr.bf16.mxu0 %v1824_v9 }
  0x5f   :  { %1608 = vmatpush3.bf16.msra.mxu0 %v1745_v20 }
  0x60   :  { %1641 = vmatprep.subr.bf16.mxu0 %v1824_v9 }
  0x62   :  { %1610 = vmatmul.mubr.bf16.vlgmr.msra.gmra.mrb[8].mxu0 %v1746_v21 }
  0x63   :  { %1645 = vmatprep.mubr.msk.bf16.mxu0 %vm1825_vm0, %v1824_v9  ;;  %1642 = vmatpush3.bf16.msra.mxu0 %v1748_v26 }
  0x64   :  { %1643 = vmatprep.subr.bf16.mxu0 %v1824_v9 }
  0x67   :  { %1644 = vmatpush3.bf16.msra.mxu0 %v1749_v27 }
  0xf5   :  { %v1496_v29 = vpop.f32.mrb[0].mxu0 }
  0xf6   :  { %v1497_v31 = vpop.f32.mrb[1].mxu0 }
  0xf7   :  { %v1498_v32 = vadd.f32 %v1497_v31, %v1496_v29  ;;  %v1499_v33 = vpop.f32.mrb[2].mxu0  ;;  %v1518_v34 = vpop.f32.mrb[0].mxu1 }
  0xf8   :  { %v1500_v35 = vpop.f32.mrb[3].mxu0  ;;  %v1519_v36 = vpop.f32.mrb[1].mxu1 }
  0xf9   :  { %v698_v37 = vadd.f32 %v1498_v32, %v1381_v30  ;;  %v1520_v38 = vadd.f32 %v1519_v36, %v1518_v34  ;;  %v1521_v39 = vpop.f32.mrb[2].mxu1 }
  0xfa   :  { %v1522_v40 = vpop.f32.mrb[3].mxu1 }
  0xfb   :  { %v738_v41 = vadd.f32 %v1520_v38, %v698_v37 }
 0x115   :  { %v1540_v42 = vpop.f32.mrb[4].mxu0 }
 0x116   :  { %v1541_v43 = vpop.f32.mrb[5].mxu0 }
 0x117   :  { %v1542_v44 = vadd.f32 %v1541_v43, %v1540_v42  ;;  %v1543_v45 = vpop.f32.mrb[6].mxu0  ;;  %v1562_v46 = vpop.f32.mrb[4].mxu1  ;;  %v1472_v42 = vld [vmem:[%s2245_s2 + $0x2] sm:$0x3] }
 0x118   :  { %v1544_v47 = vpop.f32.mrb[7].mxu0  ;;  %v1563_v48 = vpop.f32.mrb[5].mxu1 }
 0x119   :  { %v778_v49 = vadd.f32 %v1542_v44, %v738_v41  ;;  %v1564_v50 = vadd.f32 %v1563_v48, %v1562_v46  ;;  %v1565_v51 = vpop.f32.mrb[6].mxu1  ;;  %v1166_v44 = vsub.f32 1.0, %v1472_v42 }
 0x11a   :  { %v1566_v52 = vpop.f32.mrb[7].mxu1 }
 0x11b   :  { %v818_v53 = vadd.f32 %v1564_v50, %v778_v49 }
 0x127   :  { %v911_v61 = vpop.f32.mrb[8].mxu1 }
 0x128   :  { %v1617_v62 = vpop.f32.mrb[9].mxu1 }
 0x129   :  { %v914_v63 = vpop.f32.mrb[10].mxu1 }
 0x12a   :  { %v1618_v0 = vpop.f32.mrb[11].mxu1 }
 0x135   :  { %v857_v54 = vpop.f32.mrb[8].mxu0 }
 0x136   :  { %v858_v55 = vadd.f32 %v857_v54, %v818_v53  ;;  %v1611_v56 = vpop.f32.mrb[9].mxu0 }
 0x137   :  { %v860_v57 = vpop.f32.mrb[10].mxu0 }
 0x138   :  { %v863_v58 = vmax.f32 %v858_v55, 0.0  ;;  %v1612_v59 = vpop.f32.mrb[11].mxu0 }
 0x13a   :  { %v864_v60 = vpack.c.bf16 %v863_v58, %v863_v58 }
 0x13c   :  { %1622 = vmatmul.mubr.msk.bf16.vlgmr.msra.gmra.mrb[12].mxu1 %vm923_vm3, %v864_v60 }
 0x13d   :  { %1626 = vmatpush3.bf16.msra.mxu1 %v1748_v26  ;;  %1629 = vmatprep.mubr.msk.bf16.mxu1 %vm1825_vm0, %v1824_v9 }
 0x13e   :  { %1627 = vmatprep.subr.bf16.mxu1 %v1824_v9 }
 0x141   :  { %1628 = vmatpush3.bf16.msra.mxu1 %v1749_v27 }
 0x142   :  { %1633 = vmatprep.subr.bf16.mxu1 %v1824_v9 }
 0x144   :  { %1630 = vmatmul.mubr.bf16.vlgmr.msra.gmra.mrb[16].mxu1 %v1826_v28 }
 0x145   :  { %1634 = vmatpush3.bf16.msra.mxu1 %v1748_v26  ;;  %1637 = vmatprep.mubr.msk.bf16.mxu1 %vm1825_vm0, %v1824_v9 }
 0x146   :  { %1635 = vmatprep.subr.bf16.mxu1 %v1824_v9 }
 0x149   :  { %1636 = vmatpush3.bf16.msra.mxu1 %v1749_v27  ;;  %v1064_v27 = vpop.permute.xlu1 %1063 }
 0x14a   :  { %1649 = vmatprep.subr.bf16.mxu1 %v1824_v9 }
 0x14d   :  { %v1071_v28 = vpop.permute.xlu1 %1070 }
 0x14e   :  { %v1073_v31 = vmul.f32 0.0, %v1071_v28 }
 0x20f   :  { %v961_v3 = vpop.f32.mrb[12].mxu1 }
 0x210   :  { %v962_v4 = vadd.f32 %v961_v3, %v911_v61  ;;  %v1623_v5 = vpop.f32.mrb[13].mxu1 }
 0x211   :  { %v964_v6 = vpop.f32.mrb[14].mxu1 }
 0x212   :  { %v1624_v7 = vpop.f32.mrb[15].mxu1  ;;  %v2180_v10 = vadd.f32 %v1466_v8, %v962_v4 }
 0x217   :  { %v1029_v11 = vpop.f32.mrb[16].mxu1 }
 0x218   :  { %v1035_v12 = vadd.f32 %v1029_v11, %v2180_v10  ;;  %v1631_v13 = vpop.f32.mrb[17].mxu1 }
 0x219   :  { %v1032_v14 = vpop.f32.mrb[18].mxu1 }
 0x21a   :  { %1752 = vtanh.f32 %v1035_v12  ;;  %v1632_v15 = vpop.f32.mrb[19].mxu1  ;;  %v1469_v17 = vmul.f32 -1.442695, %v1035_v12 }
 0x21c   :  { %1754 = vpow2.f32 %v1469_v17 }
 0x224   :  { %v1753_v16 = vpop.eup %1752 }
 0x225   :  { %1045 = vrot.lane.b32.xlu0 %v1753_v16, %s1827_s22 }
 0x226   :  { %v1755_v18 = vpop.eup %1754 }
 0x227   :  { %v1039_v19 = vadd.f32 1.0, %v1755_v18 }
 0x229   :  { %1756 = vrcp.f32 %v1039_v19 }
 0x233   :  { %v1757_v20 = vpop.eup %1756 }
 0x234   :  { %v1043_v23 = vmul.f32 0.0, %v1757_v20 }
 0x297   :  { %v1046_v21 = vpop.permute.xlu0 %1045 }
 0x298   :  { %v1048_v22 = vmul.f32 %v1757_v20, %v1046_v21 }
 0x29a   :  { %1050 = vrot.lane.b32.xlu0 %v1048_v22, %s1827_s22 }
 0x30c   :  { %v1051_v24 = vpop.permute.xlu0 %1050 }
 0x30d   :  { %v1053_v25 = vadd.f32 %v1051_v24, %v1043_v23 }
 0x30f   :  { %1758 = vtanh.f32 %v1053_v25  ;;  %v1066_v51 = vmul.f32 %v1064_v27, %v1053_v25 }
 0x311   :  { %v1074_v52 = vadd.f32 %v1073_v31, %v1066_v51 }
 0x313   :  { %v1136_v53 = vrot.slane %v1074_v52, 6 }
 0x319   :  { %v1759_v26 = vpop.eup %1758 }
 0x31a   :  { %1056 = vrot.lane.b32.xlu0 %v1759_v26, %s1827_s22 }
 0x38c   :  { %v1057_v29 = vpop.permute.xlu0 %1056 }
 0x38d   :  { %v1059_v30 = vmul.f32 %v1757_v20, %v1057_v29  ;;  %v1475_v20 = vld [vmem:[%s2245_s2 + $0x4] sm:$0x3] }
 0x38e   :  { %v1274_v29 = vsub.f32 1.0, %v1475_v20 }
 0x38f   :  { %v1075_v32 = vmul.f32 %v1064_v27, %v1059_v30  ;;  %v1750_v30 = vld [vmem:[%s2252_s9] sm:$0xff]  }
 0x391   :  { %v1076_v33 = vadd.f32 %v1075_v32, %v1073_v31  ;;  %v1751_v31 = vld [vmem:[%s2252_s9 + $0x8] sm:$0xff]   ;;  %s1776_s9 = scalar_lea.vmem %s1370_s13, 32 }
 0x392   :  { %p1777_p0 = scmp.ne.s32.totalorder %s1370_s13, %s1776_s9  ;;  %p1782_p2 = scmp.lt.s32.totalorder %s1776_s9, %s1776_s9 }
 0x393   :  { %v1077_v34 = vpack.c.bf16 %v1076_v33, %v1076_v33 }
 0x394   :  { %p1783_p3 = por %p1782_p2, %p1781_p1 }
 0x395   :  { %1079 = vrot.lane.b32.xlu1 %v1077_v34, %s1828_s8 }
 0x396   :  { %p1784_p4 = pnand %p1783_p3, %p1777_p0 }
 0x407   :  { %v1080_v35 = vpop.permute.xlu1 %1079 }
 0x408   :  { %1638 = vmatmul.mubr.msk.bf16.vlgmr.msra.gmra.mrb[20].mxu1 %vm991_vm4, %v1080_v35 }
 0x409   :  { %1653 = vmatprep.mubr.msk.bf16.mxu1 %vm1825_vm0, %v1824_v9  ;;  %1650 = vmatpush3.bf16.msra.mxu1 %v1750_v30 }
 0x40a   :  { %1651 = vmatprep.subr.bf16.mxu1 %v1824_v9 }
 0x40d   :  { %1652 = vmatpush3.bf16.msra.mxu1 %v1751_v31 }
 0x4db   :  { %v1118_v36 = vpop.f32.mrb[20].mxu1 }
 0x4dc   :  { %v1125_v37 = vrot.slane %v1118_v36, 6  ;;  %v1639_v38 = vpop.f32.mrb[21].mxu1 }
 0x4dd   :  { %v1121_v39 = vpop.f32.mrb[22].mxu1 }
 0x4de   :  { %v1127_v40 = vadd.f32 %v1125_v37, %v2180_v10  ;;  %v1640_v41 = vpop.f32.mrb[23].mxu1 }
 0x4e0   :  { %1760 = vtanh.f32 %v1127_v40  ;;  %v1471_v45 = vmul.f32 -1.442695, %v1127_v40 }
 0x4e2   :  { %1762 = vpow2.f32 %v1471_v45 }
 0x4ea   :  { %v1761_v43 = vpop.eup %1760 }
 0x4eb   :  { %1140 = vrot.lane.b32.xlu0 %v1761_v43, %s1827_s22 }
 0x4ec   :  { %v1763_v46 = vpop.eup %1762 }
 0x4ed   :  { %v1131_v47 = vadd.f32 1.0, %v1763_v46 }
 0x4ef   :  { %1169 = vperm.xlu0 %1665, %v1166_v44   ;;  %1764 = vrcp.f32 %v1131_v47 }
 0x4f9   :  { %v1765_v48 = vpop.eup %1764 }
 0x4fa   :  { %v1138_v54 = vmul.f32 %v1765_v48, %v1136_v53 }
 0x55d   :  { %v1141_v49 = vpop.permute.xlu0 %1140 }
 0x55e   :  { %v1143_v50 = vmul.f32 %v1765_v48, %v1141_v49 }
 0x560   :  { %1145 = vrot.lane.b32.xlu1 %v1143_v50, %s1827_s22 }
 0x56e   :  { %v1170_v58 = vpop.permute.xlu0 %1169 }
 0x56f   :  { %v1180_v59 = vmul.f32 %v1170_v58, %v1076_v33  ;;  %v1172_v22 = vmul.f32 %v1170_v58, %v1074_v52 }
 0x5d2   :  { %v1146_v55 = vpop.permute.xlu1 %1145 }
 0x5d3   :  { %v1148_v56 = vadd.f32 %v1146_v55, %v1138_v54 }
 0x5d5   :  { %1766 = vtanh.f32 %v1148_v56 }
 0x5df   :  { %v1767_v57 = vpop.eup %1766 }
 0x5e0   :  { %1151 = vrot.lane.b32.xlu1 %v1767_v57, %s1827_s22 }
 0x5e4   :  { %1159 = vperm.xlu1 %1664, %v1472_v42  }
 0x5e8   :  { %1182 = vrot.lane.b32.xlu1 %v1180_v59, %s1828_s8 }
 0x652   :  { %v1152_v60 = vpop.permute.xlu1 %1151 }
 0x653   :  { %v1154_v61 = vmul.f32 %v1765_v48, %v1152_v60 }
 0x655   :  { %v1175_v62 = vrot.slane %v1154_v61, 2 }
 0x657   :  { %1176 = vrot.lane.b32.xlu0 %v1175_v62, %s1828_s8 }
 0x663   :  { %v1160_v63 = vpop.permute.xlu1 %1159 }
 0x667   :  { %v1183_v2 = vpop.permute.xlu1 %1182 }
 0x6c9   :  { %v1177_v0 = vpop.permute.xlu0 %1176 }
 0x6ca   :  { %v1179_v1 = vmul.f32 %v1177_v0, %v1160_v63 }
 0x6cc   :  { %v1185_v3 = vadd.f32 %v1183_v2, %v1179_v1 }
 0x6ce   :  { %v1186_v4 = vpack.c.bf16 %v1185_v3, %v1185_v3 }
 0x6d0   :  { %1646 = vmatmul.mubr.msk.bf16.vlgmr.msra.gmra.mrb[12].mxu0 %vm991_vm4, %v1186_v4 }
 0x7a3   :  { %v1224_v5 = vpop.f32.mrb[12].mxu0 }
 0x7a4   :  { %v1231_v6 = vrot.slane %v1224_v5, 4  ;;  %v1647_v7 = vpop.f32.mrb[13].mxu0 }
 0x7a5   :  { %v1227_v8 = vpop.f32.mrb[14].mxu0 }
 0x7a6   :  { %v1233_v11 = vadd.f32 %v1231_v6, %v2180_v10  ;;  %v1648_v12 = vpop.f32.mrb[15].mxu0  ;;  %v1163_v10 = vrot.slane %v1148_v56, 2 }
 0x7a8   :  { %1768 = vtanh.f32 %v1233_v11  ;;  %v1474_v14 = vmul.f32 -1.442695, %v1233_v11  ;;  %v1165_v21 = vmul.f32 %v1163_v10, %v1160_v63 }
 0x7aa   :  { %1770 = vpow2.f32 %v1474_v14  ;;  %v1173_v23 = vadd.f32 %v1172_v22, %v1165_v21 }
 0x7ac   :  { %v1242_v24 = vrot.slane %v1173_v23, 4 }
 0x7b2   :  { %v1769_v13 = vpop.eup %1768 }
 0x7b3   :  { %1246 = vrot.lane.b32.xlu0 %v1769_v13, %s1827_s22 }
 0x7b4   :  { %v1771_v15 = vpop.eup %1770 }
 0x7b5   :  { %v1237_v16 = vadd.f32 1.0, %v1771_v15 }
 0x7b7   :  { %1772 = vrcp.f32 %v1237_v16 }
 0x7c1   :  { %v1773_v17 = vpop.eup %1772 }
 0x7c2   :  { %v1244_v25 = vmul.f32 %v1773_v17, %v1242_v24 }
 0x825   :  { %v1247_v18 = vpop.permute.xlu0 %1246 }
 0x826   :  { %v1249_v19 = vmul.f32 %v1773_v17, %v1247_v18 }
 0x828   :  { %1251 = vrot.lane.b32.xlu1 %v1249_v19, %s1827_s22 }
 0x82c   :  { %1265 = vperm.xlu1 %1664, %v1475_v20  }
 0x89a   :  { %v1252_v26 = vpop.permute.xlu1 %1251 }
 0x89b   :  { %v1254_v27 = vadd.f32 %v1252_v26, %v1244_v25 }
 0x89d   :  { %1774 = vtanh.f32 %v1254_v27 }
 0x8a7   :  { %v1775_v28 = vpop.eup %1774 }
 0x8a8   :  { %1257 = vrot.lane.b32.xlu0 %v1775_v28, %s1827_s22 }
 0x8ab   :  { %v1266_v35 = vpop.permute.xlu1 %1265 }
 0x8ac   :  { %1277 = vperm.xlu0 %1665, %v1274_v29  }
 0x91a   :  { %v1258_v32 = vpop.permute.xlu0 %1257 }
 0x91b   :  { %v1260_v33 = vmul.f32 %v1773_v17, %v1258_v32 }
 0x91d   :  { %v1269_v34 = vrot.slane %v1260_v33, 4 }
 0x91f   :  { %1270 = vrot.lane.b32.xlu1 %v1269_v34, %s1828_s8 }
 0x92b   :  { %v1278_v36 = vpop.permute.xlu0 %1277 }
 0x92c   :  { %v1280_v38 = vmul.f32 %v1278_v36, %v1185_v3 }
 0x991   :  { %v1271_v37 = vpop.permute.xlu1 %1270 }
 0x992   :  { %v1273_v39 = vmul.f32 %v1271_v37, %v1266_v35 }
 0x994   :  { %v1281_v40 = vadd.f32 %v1280_v38, %v1273_v39 }
 0x996   :  { %v1282_v41 = vpack.c.bf16 %v1281_v40, %v1281_v40  ;;  %1352 = vst.msk [vmem:[#allocation4] sm:$0x3] %vm1351_vm5, %v1281_v40 }
 0x998   :  { %1654 = vmatmul.mubr.msk.bf16.vlgmr.msra.gmra.mrb[24].mxu1 %vm991_vm4, %v1282_v41 }
 0x999   :  { %1787 = shalt.err (!%p1784_p4)
}
 0x99a   :  { %s1788_s15 = scalar_lea.hbm %s2255_s12, 32 }
 0x99b   :  { %p1789_p5 = scmp.ne.s32.totalorder %s2255_s12, %s1788_s15  ;;  %p1792_p6 = scmp.lt.u32.totalorder %s1788_s15, %s2255_s12 }
 0x99d   :  { %p1794_p7 = pnand %p1792_p6, %p1789_p5 }
 0x99f   :  { %1797 = shalt.err (!%p1794_p7)
}
 0x9a0   :  { %1372 = dma.vmem_to_hbm [thread:$0]  %s1370_s13, 32, %s2255_s12, [#allocation5]   ;;  %v1476_v9 = vld [vmem:[%s2253_s10] ss:$0 sm:$0xff]  ;;  %vm1349_vm6 = vcmask 25600  }
 0x9a1   :  { %s1830_s4 = smov [#allocation2]  }
 0x9a2   :  { %s1359_s7 = sshll.u32 %s1830_s4, 4  ;;  %s1360_s7 = int_to_ptr.vmem [resolvable:$true] %s1359_s7 }
 0x9a3   :  { %s1798_s20 = scalar_lea.vmem %s1360_s7, 32  ;;  %p1803_p9 = scmp.lt.s32.totalorder %s1360_s7, %s1360_s7 }
 0x9a4   :  { %p1799_p8 = scmp.ne.s32.totalorder %s1360_s7, %s1798_s20  ;;  %p1804_p10 = scmp.lt.s32.totalorder %s1798_s20, %s1798_s20 }
 0x9a6   :  { %p1805_p11 = por %p1804_p10, %p1803_p9 }
 0x9a8   :  { %p1806_p12 = pnand %p1805_p11, %p1799_p8 }
 0xa6b   :  { %v1343_v42 = vpop.f32.mrb[24].mxu1 }
 0xa6c   :  { %v1344_v43 = vadd.f32 %v1476_v9, %v1343_v42  ;;  %v1655_v44 = vpop.f32.mrb[25].mxu1 }
 0xa6d   :  { %v1346_v45 = vpop.f32.mrb[26].mxu1 }
 0xa6e   :  { %v1656_v46 = vpop.f32.mrb[27].mxu1  ;;  %1350 = vst.msk [vmem:[#allocation2] sm:$0x3] %vm1349_vm6, %v1344_v43 }
 0xa6f   :  { %1809 = shalt.err (!%p1806_p12)
}
 0xa70   :  { %s1810_s10 = scalar_lea.hbm %s2254_s11, 32 }
 0xa71   :  { %p1811_p13 = scmp.ne.s32.totalorder %s2254_s11, %s1810_s10  ;;  %p1814_p0 = scmp.lt.u32.totalorder %s1810_s10, %s2254_s11 }
 0xa73   :  { %p1816_p1 = pnand %p1814_p0, %p1811_p13 }
 0xa75   :  { %1819 = shalt.err (!%p1816_p1)
}
 0xa76   :  { %1362 = dma.vmem_to_hbm [thread:$0]  %s1360_s7, 32, %s2254_s11, [#allocation3]  }
 0xa77   :  { %1820 = dma.done.wait [#allocation3], 32  }
 0xa78   :  { %1821 = vsyncadd [#allocation3], 4294967264 }
 0xa79   :  { %1822 = dma.done.wait [#allocation5], 32  }
 0xa7a   :  { %1823 = vsyncadd [#allocation5], 4294967264 }
 0xa7b   :  { %1379 = vsyncpa [#allocation3], 1 }
 0xa7c   :  { %1380 = vsyncpa [#allocation5], 1 }

</bundles_post_ra>
